<compile_context>
chip_gen: v7x
topology: tpu7x:2x2x1
jax: 0.10.0
libtpu: 0.0.40
codegen_flags: <defaults>
</compile_context>

<pallas_src>
import numpy as np

import jax
import jax.numpy as jnp
from jax.experimental import pallas as pl
from jax.experimental.pallas import tpu as pltpu


def _round_up(x, m):
    return (x + m - 1) // m * m


def _row_tiling(m, tm_max):
    """Row tile size: >=2 grid steps when possible (v7x has 2 TensorCores),
    multiple of 16 (bf16 sublane packing), capped at tm_max."""
    steps = max(2, -(-m // tm_max))
    tm = max(16, _round_up(-(-m // steps), 16))
    return tm, _round_up(m, tm)


_COMPILER_PARAMS = pltpu.CompilerParams(
    dimension_semantics=("parallel",),
    vmem_limit_bytes=48 * 1024 * 1024,   # < v7x 64 MiB physical, > v5e 16 MiB default
)


# ----------------------------- Pallas kernels ------------------------------

def _conv_pool_kernel(x_ref, w_ref, bias_ref, o_ref):
    """Fused 3x3 conv (Toeplitz-along-W) + MaxPool2x2 + bias + ReLU.

    x_ref   : (4, TM, K1)        bf16  row slabs; slab r = padded input row
                                       2*oh + r for each pooled output row oh.
    w_ref   : (6, K1, OW*Cout)   bf16  banded weights, index = dw*3 + kh.
    bias_ref: (1, OW*Cout)       f32   per-channel bias tiled over ow.
    o_ref   : (TM, OW*Cout)      bf16  pooled + activated output rows.
    """
    a = x_ref[0]
    b = x_ref[1]
    c = x_ref[2]
    d = x_ref[3]

    def pre(r0, r1, r2, dw):
        # conv pre-activation of one pool row-position at column-parity dw
        return (jnp.dot(r0, w_ref[3 * dw + 0], preferred_element_type=jnp.float32)
                + jnp.dot(r1, w_ref[3 * dw + 1], preferred_element_type=jnp.float32)
                + jnp.dot(r2, w_ref[3 * dw + 2], preferred_element_type=jnp.float32))

    # 2x2 pool window = rows (a,b,c) / (b,c,d) x column parities 0/1.
    pooled = jnp.maximum(jnp.maximum(pre(a, b, c, 0), pre(a, b, c, 1)),
                         jnp.maximum(pre(b, c, d, 0), pre(b, c, d, 1)))
    o_ref[...] = jnp.maximum(pooled + bias_ref[...], 0.0).astype(o_ref.dtype)


def _mlp_kernel(x_ref, w1_ref, b1_ref, w2_ref, b2_ref, o_ref):
    """Fused fc1(+ReLU) and fc2: o = relu(x @ W1 + b1) @ W2 + b2."""
    h = jnp.dot(x_ref[...], w1_ref[...], preferred_element_type=jnp.float32)
    h = jnp.maximum(h + b1_ref[...], 0.0)
    o = jnp.dot(h.astype(jnp.bfloat16), w2_ref[...],
                preferred_element_type=jnp.float32)
    o_ref[...] = (o + b2_ref[...]).astype(o_ref.dtype)


# ------------------------------ layer wrappers ------------------------------

def conv3x3_relu_pool(x_nhwc, w_t, bias_row, *, tm_max):
    """nn.Conv2d(Cin,Cout,3,padding=1) + ReLU + MaxPool2d(2,2). NHWC -> NHWC bf16."""
    N, H, W, Cin = x_nhwc.shape
    assert H % 2 == 0 and W % 2 == 0, "MaxPool2d(2,2) striding assumes even H, W"
    OH, OW = H // 2, W // 2
    K1 = (W + 2) * Cin
    nout = w_t.shape[-1]
    assert w_t.shape == (6, K1, nout) and nout % OW == 0

    # Pad H and W by 1 (zeros); flatten each padded row to (W+2)*Cin lanes.
    xp = jnp.pad(x_nhwc.astype(jnp.bfloat16), ((0, 0), (1, 1), (1, 1), (0, 0)))
    xp = xp.reshape(N, H + 2, K1)
    # Four row-parity slabs (1x-sized strided slices, no im2col expansion).
    slabs = jnp.stack(
        [xp[:, r:r + 2 * OH:2, :].reshape(N * OH, K1) for r in range(4)], axis=0)

    M = N * OH
    tm, Mp = _row_tiling(M, tm_max)
    if Mp != M:
        slabs = jnp.pad(slabs, ((0, 0), (0, Mp - M), (0, 0)))

    out = pl.pallas_call(
        _conv_pool_kernel,
        out_shape=jax.ShapeDtypeStruct((Mp, nout), jnp.bfloat16),
        grid=(Mp // tm,),
        in_specs=[pl.BlockSpec((4, tm, K1), lambda i: (0, i, 0)),
                  pl.BlockSpec((6, K1, nout), lambda i: (0, 0, 0)),
                  pl.BlockSpec((1, nout), lambda i: (0, 0))],
        out_specs=pl.BlockSpec((tm, nout), lambda i: (i, 0)),
        compiler_params=_COMPILER_PARAMS,
        cost_estimate=pl.CostEstimate(
            flops=2 * 12 * Mp * K1 * nout,
            transcendentals=0,
            bytes_accessed=(4 * Mp * K1 + 6 * K1 * nout + Mp * nout) * 2 + nout * 4),
    )(slabs, w_t, bias_row)
    return out[:M].reshape(N, OH, OW, -1)


def mlp_head(x, w1, b1, w2, b2, *, tm_max=512):
    """relu(x @ W1 + b1) @ W2 + b2 as one row-tiled, parallel-grid kernel."""
    M, K1 = x.shape
    N1 = w1.shape[1]
    N2 = w2.shape[1]            # 128 (fc2 zero-padded to a lane-dense width)
    tm, Mp = _row_tiling(M, tm_max)
    xb = x.astype(jnp.bfloat16)
    if Mp != M:
        xb = jnp.pad(xb, ((0, Mp - M), (0, 0)))
    out = pl.pallas_call(
        _mlp_kernel,
        out_shape=jax.ShapeDtypeStruct((Mp, N2), jnp.float32),
        grid=(Mp // tm,),
        in_specs=[pl.BlockSpec((tm, K1), lambda i: (i, 0)),
                  pl.BlockSpec((K1, N1), lambda i: (0, 0)),
                  pl.BlockSpec((1, N1), lambda i: (0, 0)),
                  pl.BlockSpec((N1, N2), lambda i: (0, 0)),
                  pl.BlockSpec((1, N2), lambda i: (0, 0))],
        out_specs=pl.BlockSpec((tm, N2), lambda i: (i, 0)),
        compiler_params=_COMPILER_PARAMS,
        cost_estimate=pl.CostEstimate(
            flops=2 * Mp * (K1 * N1 + N1 * N2),
            transcendentals=0,
            bytes_accessed=(Mp * K1 + K1 * N1 + N1 * N2) * 2 + Mp * N2 * 4),
    )(xb, w1, b1, w2, b2)
    return out[:M, :10]


# ------------------------------- parameters --------------------------------

def init_params(key):
    """Deterministic init with shapes matching the torch CNN.__init__."""
    ks = jax.random.split(key, 8)

    def u(k, shape, fan_in):
        bound = 1.0 / jnp.sqrt(jnp.float32(fan_in))
        return jax.random.uniform(k, shape, jnp.float32, -bound, bound)

    return {
        "conv1_w": u(ks[0], (32, 1, 3, 3), 1 * 9),
        "conv1_b": u(ks[1], (32,), 1 * 9),
        "conv2_w": u(ks[2], (64, 32, 3, 3), 32 * 9),
        "conv2_b": u(ks[3], (64,), 32 * 9),
        "fc1_w":   u(ks[4], (128, 64 * 7 * 7), 64 * 7 * 7),
        "fc1_b":   u(ks[5], (128,), 64 * 7 * 7),
        "fc2_w":   u(ks[6], (10, 128), 128),
        "fc2_b":   u(ks[7], (10,), 128),
    }


def _conv_toeplitz(w_oihw, b, W):
    """torch Conv2d weight (Cout,Cin,3,3) -> Toeplitz-along-W matrices.

    Returns T of shape (6, (W+2)*Cin, (W//2)*Cout), bf16, where T[dw*3 + kh]
    maps one flattened W-padded input row (pixel-major, channel-minor) to the
    conv pre-activations of all output pixels at columns 2*ow + dw for kernel
    row kh; plus the bias tiled over ow as a (1, (W//2)*Cout) f32 row.
    """
    w = np.asarray(w_oihw, np.float32)
    cout, cin = w.shape[0], w.shape[1]
    ow_n = W // 2
    t = np.zeros((2, 3, W + 2, cin, ow_n, cout), np.float32)
    for dw in range(2):
        for kh in range(3):
            for kw in range(3):
                tap = w[:, :, kh, kw].T                       # (Cin, Cout)
                for ow in range(ow_n):
                    t[dw, kh, 2 * ow + dw + kw, :, ow, :] = tap
    t = t.reshape(6, (W + 2) * cin, ow_n * cout)
    bias_row = np.tile(np.asarray(b, np.float32), ow_n).reshape(1, ow_n * cout)
    return jnp.asarray(t, jnp.bfloat16), jnp.asarray(bias_row, jnp.float32)


def prepare_params(p):
    """One-time host-side repack of torch-layout params into kernel layouts."""
    c1_w, c1_b = _conv_toeplitz(p["conv1_w"], p["conv1_b"], W=28)
    c2_w, c2_b = _conv_toeplitz(p["conv2_w"], p["conv2_b"], W=14)

    # torch flattens NCHW (c*49 + h*7 + w); our conv2 output is NHWC-flat
    # ((h*7 + w)*64 + c).  Permute fc1 columns once so numerics match exactly.
    w1 = np.asarray(p["fc1_w"], np.float32).reshape(128, 64, 7, 7)
    w1 = w1.transpose(0, 2, 3, 1).reshape(128, 64 * 7 * 7).T      # (3136, 128)

    # fc2 zero-padded to 128 output columns -> lane-dense final store.
    w2 = np.zeros((128, 128), np.float32)
    w2[:, :10] = np.asarray(p["fc2_w"], np.float32).T
    b2 = np.zeros((1, 128), np.float32)
    b2[0, :10] = np.asarray(p["fc2_b"], np.float32)

    return {
        "c1_w": c1_w, "c1_b": c1_b,
        "c2_w": c2_w, "c2_b": c2_b,
        "fc1_w": jnp.asarray(w1, jnp.bfloat16),
        "fc1_b": jnp.asarray(np.asarray(p["fc1_b"], np.float32).reshape(1, -1)),
        "fc2_w": jnp.asarray(w2, jnp.bfloat16),
        "fc2_b": jnp.asarray(b2),
    }


# ------------------------------- CNN forward -------------------------------

@jax.jit
def cnn_forward(kp, x_nchw):
    """x: (N, 1, 28, 28) f32 NCHW -> logits (N, 10) f32."""
    x = jnp.transpose(x_nchw, (0, 2, 3, 1))                  # NHWC (C=1: free)
    x = conv3x3_relu_pool(x, kp["c1_w"], kp["c1_b"], tm_max=1024)   # (N,14,14,32)
    x = conv3x3_relu_pool(x, kp["c2_w"], kp["c2_b"], tm_max=512)    # (N, 7, 7,64)
    x = x.reshape(x.shape[0], -1)                            # NHWC-flat (N, 3136)
    return mlp_head(x, kp["fc1_w"], kp["fc1_b"], kp["fc2_w"], kp["fc2_b"])


# ------------------------- pure-XLA reference check -------------------------

@jax.jit
def reference_forward(params, x):
    """Independent XLA reference; conv/matmul operands rounded to bf16 to match
    the kernels' bf16 MXU inputs with f32 accumulation."""
    hi = jax.lax.Precision.HIGHEST

    def rnd(a):
        return a.astype(jnp.bfloat16).astype(jnp.float32)

    def conv(h, w, b):
        y = jax.lax.conv_general_dilated(
            rnd(h), rnd(w), window_strides=(1, 1), padding=((1, 1), (1, 1)),
            dimension_numbers=("NCHW", "OIHW", "NCHW"), precision=hi)
        return jax.nn.relu(y + b[None, :, None, None])

    def pool(h):
        return jax.lax.reduce_window(h, -jnp.inf, jax.lax.max,
                                     (1, 1, 2, 2), (1, 1, 2, 2), "VALID")

    h = pool(conv(x, params["conv1_w"], params["conv1_b"]))
    h = pool(conv(h, params["conv2_w"], params["conv2_b"]))
    h = h.reshape(h.shape[0], -1)                            # NCHW flatten
    h = jax.nn.relu(jnp.dot(rnd(h), rnd(params["fc1_w"]).T, precision=hi)
                    + params["fc1_b"])
    return (jnp.dot(rnd(h), rnd(params["fc2_w"]).T, precision=hi)
            + params["fc2_b"])


if __name__ == "__main__":
    key = jax.random.PRNGKey(0)
    pkey, xkey = jax.random.split(key)
    params = init_params(pkey)
    kparams = prepare_params(params)

    # MNIST-shaped input (fc1 = 64*7*7 forces 28x28 spatial); small batch = 2.
    x = jax.random.normal(xkey, (2, 1, 28, 28), dtype=jnp.float32)

    logits = cnn_forward(kparams, x)
    jax.block_until_ready(logits)
    assert logits.shape == (2, 10) and logits.dtype == jnp.float32

    ref = reference_forward(params, x)
    jax.block_until_ready(ref)
    err = float(jnp.max(jnp.abs(logits - ref)))
    tol = 2e-3 + 2e-2 * float(jnp.max(jnp.abs(ref)))
    assert err <= tol, f"kernel vs reference mismatch: {err} > {tol}"

    print("KERNEL_OK")
</pallas_src>

<mosaic_0001>
module attributes {stable_mosaic.version = 11 : i64} {
  func.func @_conv_pool_kernel(%arg0: i32, %arg1: memref<4x16x30xbf16, #tpu.memory_space<vmem>>, %arg2: memref<6x30x448xbf16, #tpu.memory_space<vmem>>, %arg3: memref<1x448xf32, #tpu.memory_space<vmem>>, %arg4: memref<16x448xbf16, #tpu.memory_space<vmem>>) attributes {dimension_semantics = [#tpu.dimension_semantics<parallel>], iteration_bounds = array<i64: 2>, scalar_prefetch = 0 : i64, scratch_operands = 0 : i64, tpu.core_type = #tpu.core_type<tc>, window_params = [{transform_indices = @transform_0, window_bounds = array<i64: 4, 16, 30>}, {pipeline_mode = #tpu.pipeline_mode<synchronous>, transform_indices = @transform_1, window_bounds = array<i64: 6, 30, 448>}, {pipeline_mode = #tpu.pipeline_mode<synchronous>, transform_indices = @transform_2, window_bounds = array<i64: 1, 448>}, {transform_indices = @transform_3, window_bounds = array<i64: 16, 448>}]} {
    %c0 = arith.constant 0 : index
    %c0_0 = arith.constant 0 : index
    %c0_1 = arith.constant 0 : index
    %0 = vector.load %arg1[%c0, %c0_0, %c0_1] : memref<4x16x30xbf16, #tpu.memory_space<vmem>>, vector<1x16x30xbf16>
    %1 = vector.shape_cast %0 : vector<1x16x30xbf16> to vector<16x30xbf16>
    %c1 = arith.constant 1 : index
    %c0_2 = arith.constant 0 : index
    %c0_3 = arith.constant 0 : index
    %2 = vector.load %arg1[%c1, %c0_2, %c0_3] : memref<4x16x30xbf16, #tpu.memory_space<vmem>>, vector<1x16x30xbf16>
    %3 = vector.shape_cast %2 : vector<1x16x30xbf16> to vector<16x30xbf16>
    %c2 = arith.constant 2 : index
    %c0_4 = arith.constant 0 : index
    %c0_5 = arith.constant 0 : index
    %4 = vector.load %arg1[%c2, %c0_4, %c0_5] : memref<4x16x30xbf16, #tpu.memory_space<vmem>>, vector<1x16x30xbf16>
    %5 = vector.shape_cast %4 : vector<1x16x30xbf16> to vector<16x30xbf16>
    %c3 = arith.constant 3 : index
    %c0_6 = arith.constant 0 : index
    %c0_7 = arith.constant 0 : index
    %6 = vector.load %arg1[%c3, %c0_6, %c0_7] : memref<4x16x30xbf16, #tpu.memory_space<vmem>>, vector<1x16x30xbf16>
    %7 = vector.shape_cast %6 : vector<1x16x30xbf16> to vector<16x30xbf16>
    %c0_8 = arith.constant 0 : index
    %c0_9 = arith.constant 0 : index
    %c0_10 = arith.constant 0 : index
    %8 = vector.load %arg2[%c0_8, %c0_9, %c0_10] : memref<6x30x448xbf16, #tpu.memory_space<vmem>>, vector<1x30x448xbf16>
    %9 = vector.shape_cast %8 : vector<1x30x448xbf16> to vector<30x448xbf16>
    %cst = arith.constant dense<0.000000e+00> : vector<16x448xf32>
    %10 = tpu.matmul %1, %9, %cst {dimension_numbers = #tpu.dot_dimension_numbers<[1], [0], [0], [1], [0, 0, 1, 1], [], []>} : vector<16x30xbf16>, vector<30x448xbf16>, vector<16x448xf32> -> vector<16x448xf32>
    %c1_11 = arith.constant 1 : index
    %c0_12 = arith.constant 0 : index
    %c0_13 = arith.constant 0 : index
    %11 = vector.load %arg2[%c1_11, %c0_12, %c0_13] : memref<6x30x448xbf16, #tpu.memory_space<vmem>>, vector<1x30x448xbf16>
    %12 = vector.shape_cast %11 : vector<1x30x448xbf16> to vector<30x448xbf16>
    %cst_14 = arith.constant dense<0.000000e+00> : vector<16x448xf32>
    %13 = tpu.matmul %3, %12, %cst_14 {dimension_numbers = #tpu.dot_dimension_numbers<[1], [0], [0], [1], [0, 0, 1, 1], [], []>} : vector<16x30xbf16>, vector<30x448xbf16>, vector<16x448xf32> -> vector<16x448xf32>
    %14 = arith.addf %10, %13 : vector<16x448xf32>
    %c2_15 = arith.constant 2 : index
    %c0_16 = arith.constant 0 : index
    %c0_17 = arith.constant 0 : index
    %15 = vector.load %arg2[%c2_15, %c0_16, %c0_17] : memref<6x30x448xbf16, #tpu.memory_space<vmem>>, vector<1x30x448xbf16>
    %16 = vector.shape_cast %15 : vector<1x30x448xbf16> to vector<30x448xbf16>
    %cst_18 = arith.constant dense<0.000000e+00> : vector<16x448xf32>
    %17 = tpu.matmul %5, %16, %cst_18 {dimension_numbers = #tpu.dot_dimension_numbers<[1], [0], [0], [1], [0, 0, 1, 1], [], []>} : vector<16x30xbf16>, vector<30x448xbf16>, vector<16x448xf32> -> vector<16x448xf32>
    %18 = arith.addf %14, %17 : vector<16x448xf32>
    %c3_19 = arith.constant 3 : index
    %c0_20 = arith.constant 0 : index
    %c0_21 = arith.constant 0 : index
    %19 = vector.load %arg2[%c3_19, %c0_20, %c0_21] : memref<6x30x448xbf16, #tpu.memory_space<vmem>>, vector<1x30x448xbf16>
    %20 = vector.shape_cast %19 : vector<1x30x448xbf16> to vector<30x448xbf16>
    %cst_22 = arith.constant dense<0.000000e+00> : vector<16x448xf32>
    %21 = tpu.matmul %1, %20, %cst_22 {dimension_numbers = #tpu.dot_dimension_numbers<[1], [0], [0], [1], [0, 0, 1, 1], [], []>} : vector<16x30xbf16>, vector<30x448xbf16>, vector<16x448xf32> -> vector<16x448xf32>
    %c4 = arith.constant 4 : index
    %c0_23 = arith.constant 0 : index
    %c0_24 = arith.constant 0 : index
    %22 = vector.load %arg2[%c4, %c0_23, %c0_24] : memref<6x30x448xbf16, #tpu.memory_space<vmem>>, vector<1x30x448xbf16>
    %23 = vector.shape_cast %22 : vector<1x30x448xbf16> to vector<30x448xbf16>
    %cst_25 = arith.constant dense<0.000000e+00> : vector<16x448xf32>
    %24 = tpu.matmul %3, %23, %cst_25 {dimension_numbers = #tpu.dot_dimension_numbers<[1], [0], [0], [1], [0, 0, 1, 1], [], []>} : vector<16x30xbf16>, vector<30x448xbf16>, vector<16x448xf32> -> vector<16x448xf32>
    %25 = arith.addf %21, %24 : vector<16x448xf32>
    %c5 = arith.constant 5 : index
    %c0_26 = arith.constant 0 : index
    %c0_27 = arith.constant 0 : index
    %26 = vector.load %arg2[%c5, %c0_26, %c0_27] : memref<6x30x448xbf16, #tpu.memory_space<vmem>>, vector<1x30x448xbf16>
    %27 = vector.shape_cast %26 : vector<1x30x448xbf16> to vector<30x448xbf16>
    %cst_28 = arith.constant dense<0.000000e+00> : vector<16x448xf32>
    %28 = tpu.matmul %5, %27, %cst_28 {dimension_numbers = #tpu.dot_dimension_numbers<[1], [0], [0], [1], [0, 0, 1, 1], [], []>} : vector<16x30xbf16>, vector<30x448xbf16>, vector<16x448xf32> -> vector<16x448xf32>
    %29 = arith.addf %25, %28 : vector<16x448xf32>
    %30 = arith.maximumf %18, %29 : vector<16x448xf32>
    %c0_29 = arith.constant 0 : index
    %c0_30 = arith.constant 0 : index
    %c0_31 = arith.constant 0 : index
    %31 = vector.load %arg2[%c0_29, %c0_30, %c0_31] : memref<6x30x448xbf16, #tpu.memory_space<vmem>>, vector<1x30x448xbf16>
    %32 = vector.shape_cast %31 : vector<1x30x448xbf16> to vector<30x448xbf16>
    %cst_32 = arith.constant dense<0.000000e+00> : vector<16x448xf32>
    %33 = tpu.matmul %3, %32, %cst_32 {dimension_numbers = #tpu.dot_dimension_numbers<[1], [0], [0], [1], [0, 0, 1, 1], [], []>} : vector<16x30xbf16>, vector<30x448xbf16>, vector<16x448xf32> -> vector<16x448xf32>
    %c1_33 = arith.constant 1 : index
    %c0_34 = arith.constant 0 : index
    %c0_35 = arith.constant 0 : index
    %34 = vector.load %arg2[%c1_33, %c0_34, %c0_35] : memref<6x30x448xbf16, #tpu.memory_space<vmem>>, vector<1x30x448xbf16>
    %35 = vector.shape_cast %34 : vector<1x30x448xbf16> to vector<30x448xbf16>
    %cst_36 = arith.constant dense<0.000000e+00> : vector<16x448xf32>
    %36 = tpu.matmul %5, %35, %cst_36 {dimension_numbers = #tpu.dot_dimension_numbers<[1], [0], [0], [1], [0, 0, 1, 1], [], []>} : vector<16x30xbf16>, vector<30x448xbf16>, vector<16x448xf32> -> vector<16x448xf32>
    %37 = arith.addf %33, %36 : vector<16x448xf32>
    %c2_37 = arith.constant 2 : index
    %c0_38 = arith.constant 0 : index
    %c0_39 = arith.constant 0 : index
    %38 = vector.load %arg2[%c2_37, %c0_38, %c0_39] : memref<6x30x448xbf16, #tpu.memory_space<vmem>>, vector<1x30x448xbf16>
    %39 = vector.shape_cast %38 : vector<1x30x448xbf16> to vector<30x448xbf16>
    %cst_40 = arith.constant dense<0.000000e+00> : vector<16x448xf32>
    %40 = tpu.matmul %7, %39, %cst_40 {dimension_numbers = #tpu.dot_dimension_numbers<[1], [0], [0], [1], [0, 0, 1, 1], [], []>} : vector<16x30xbf16>, vector<30x448xbf16>, vector<16x448xf32> -> vector<16x448xf32>
    %41 = arith.addf %37, %40 : vector<16x448xf32>
    %c3_41 = arith.constant 3 : index
    %c0_42 = arith.constant 0 : index
    %c0_43 = arith.constant 0 : index
    %42 = vector.load %arg2[%c3_41, %c0_42, %c0_43] : memref<6x30x448xbf16, #tpu.memory_space<vmem>>, vector<1x30x448xbf16>
    %43 = vector.shape_cast %42 : vector<1x30x448xbf16> to vector<30x448xbf16>
    %cst_44 = arith.constant dense<0.000000e+00> : vector<16x448xf32>
    %44 = tpu.matmul %3, %43, %cst_44 {dimension_numbers = #tpu.dot_dimension_numbers<[1], [0], [0], [1], [0, 0, 1, 1], [], []>} : vector<16x30xbf16>, vector<30x448xbf16>, vector<16x448xf32> -> vector<16x448xf32>
    %c4_45 = arith.constant 4 : index
    %c0_46 = arith.constant 0 : index
    %c0_47 = arith.constant 0 : index
    %45 = vector.load %arg2[%c4_45, %c0_46, %c0_47] : memref<6x30x448xbf16, #tpu.memory_space<vmem>>, vector<1x30x448xbf16>
    %46 = vector.shape_cast %45 : vector<1x30x448xbf16> to vector<30x448xbf16>
    %cst_48 = arith.constant dense<0.000000e+00> : vector<16x448xf32>
    %47 = tpu.matmul %5, %46, %cst_48 {dimension_numbers = #tpu.dot_dimension_numbers<[1], [0], [0], [1], [0, 0, 1, 1], [], []>} : vector<16x30xbf16>, vector<30x448xbf16>, vector<16x448xf32> -> vector<16x448xf32>
    %48 = arith.addf %44, %47 : vector<16x448xf32>
    %c5_49 = arith.constant 5 : index
    %c0_50 = arith.constant 0 : index
    %c0_51 = arith.constant 0 : index
    %49 = vector.load %arg2[%c5_49, %c0_50, %c0_51] : memref<6x30x448xbf16, #tpu.memory_space<vmem>>, vector<1x30x448xbf16>
    %50 = vector.shape_cast %49 : vector<1x30x448xbf16> to vector<30x448xbf16>
    %cst_52 = arith.constant dense<0.000000e+00> : vector<16x448xf32>
    %51 = tpu.matmul %7, %50, %cst_52 {dimension_numbers = #tpu.dot_dimension_numbers<[1], [0], [0], [1], [0, 0, 1, 1], [], []>} : vector<16x30xbf16>, vector<30x448xbf16>, vector<16x448xf32> -> vector<16x448xf32>
    %52 = arith.addf %48, %51 : vector<16x448xf32>
    %53 = arith.maximumf %41, %52 : vector<16x448xf32>
    %54 = arith.maximumf %30, %53 : vector<16x448xf32>
    %c0_53 = arith.constant 0 : index
    %c0_54 = arith.constant 0 : index
    %55 = vector.load %arg3[%c0_53, %c0_54] : memref<1x448xf32, #tpu.memory_space<vmem>>, vector<1x448xf32>
    %56 = vector.broadcast %55 : vector<1x448xf32> to vector<16x448xf32>
    %57 = arith.addf %54, %56 : vector<16x448xf32>
    %cst_55 = arith.constant 0.000000e+00 : f32
    %58 = vector.broadcast %cst_55 : f32 to vector<16x448xf32>
    %59 = arith.maximumf %57, %58 : vector<16x448xf32>
    %60 = arith.truncf %59 : vector<16x448xf32> to vector<16x448xbf16>
    %c0_56 = arith.constant 0 : index
    %c0_57 = arith.constant 0 : index
    %61 = vector.load %arg4[%c0_56, %c0_57] : memref<16x448xbf16, #tpu.memory_space<vmem>>, vector<16x448xbf16>
    tpu.vector_store %arg4[%c0_56, %c0_57], %60 {strides = array<i32>} : memref<16x448xbf16, #tpu.memory_space<vmem>>, vector<16x448xbf16>,
    return
  }
  func.func @transform_0(%arg0: i32) -> (i32, i32, i32) {
    %c0_i32 = arith.constant 0 : i32
    %c0_i32_0 = arith.constant 0 : i32
    %c0_i32_1 = arith.constant 0 : i32
    return %c0_i32, %arg0, %c0_i32_0 : i32, i32, i32
  }
  func.func @transform_1(%arg0: i32) -> (i32, i32, i32) {
    %c0_i32 = arith.constant 0 : i32
    %c0_i32_0 = arith.constant 0 : i32
    %c0_i32_1 = arith.constant 0 : i32
    %c0_i32_2 = arith.constant 0 : i32
    return %c0_i32, %c0_i32_0, %c0_i32_1 : i32, i32, i32
  }
  func.func @transform_2(%arg0: i32) -> (i32, i32) {
    %c0_i32 = arith.constant 0 : i32
    %c0_i32_0 = arith.constant 0 : i32
    %c0_i32_1 = arith.constant 0 : i32
    return %c0_i32, %c0_i32_0 : i32, i32
  }
  func.func @transform_3(%arg0: i32) -> (i32, i32) {
    %c0_i32 = arith.constant 0 : i32
    %c0_i32_0 = arith.constant 0 : i32
    return %arg0, %c0_i32 : i32, i32
  }
}

module attributes {stable_mosaic.version = 11 : i64} {
  func.func @_conv_pool_kernel(%arg0: i32, %arg1: memref<4x16x512xbf16, #tpu.memory_space<vmem>>, %arg2: memref<6x512x448xbf16, #tpu.memory_space<vmem>>, %arg3: memref<1x448xf32, #tpu.memory_space<vmem>>, %arg4: memref<16x448xbf16, #tpu.memory_space<vmem>>) attributes {dimension_semantics = [#tpu.dimension_semantics<parallel>], iteration_bounds = array<i64: 1>, scalar_prefetch = 0 : i64, scratch_operands = 0 : i64, tpu.core_type = #tpu.core_type<tc>, window_params = [{transform_indices = @transform_0, window_bounds = array<i64: 4, 16, 512>}, {pipeline_mode = #tpu.pipeline_mode<synchronous>, transform_indices = @transform_1, window_bounds = array<i64: 6, 512, 448>}, {pipeline_mode = #tpu.pipeline_mode<synchronous>, transform_indices = @transform_2, window_bounds = array<i64: 1, 448>}, {transform_indices = @transform_3, window_bounds = array<i64: 16, 448>}]} {
    %c0 = arith.constant 0 : index
    %c0_0 = arith.constant 0 : index
    %c0_1 = arith.constant 0 : index
    %0 = vector.load %arg1[%c0, %c0_0, %c0_1] : memref<4x16x512xbf16, #tpu.memory_space<vmem>>, vector<1x16x512xbf16>
    %1 = vector.shape_cast %0 : vector<1x16x512xbf16> to vector<16x512xbf16>
    %c1 = arith.constant 1 : index
    %c0_2 = arith.constant 0 : index
    %c0_3 = arith.constant 0 : index
    %2 = vector.load %arg1[%c1, %c0_2, %c0_3] : memref<4x16x512xbf16, #tpu.memory_space<vmem>>, vector<1x16x512xbf16>
    %3 = vector.shape_cast %2 : vector<1x16x512xbf16> to vector<16x512xbf16>
    %c2 = arith.constant 2 : index
    %c0_4 = arith.constant 0 : index
    %c0_5 = arith.constant 0 : index
    %4 = vector.load %arg1[%c2, %c0_4, %c0_5] : memref<4x16x512xbf16, #tpu.memory_space<vmem>>, vector<1x16x512xbf16>
    %5 = vector.shape_cast %4 : vector<1x16x512xbf16> to vector<16x512xbf16>
    %c3 = arith.constant 3 : index
    %c0_6 = arith.constant 0 : index
    %c0_7 = arith.constant 0 : index
    %6 = vector.load %arg1[%c3, %c0_6, %c0_7] : memref<4x16x512xbf16, #tpu.memory_space<vmem>>, vector<1x16x512xbf16>
    %7 = vector.shape_cast %6 : vector<1x16x512xbf16> to vector<16x512xbf16>
    %c0_8 = arith.constant 0 : index
    %c0_9 = arith.constant 0 : index
    %c0_10 = arith.constant 0 : index
    %8 = vector.load %arg2[%c0_8, %c0_9, %c0_10] : memref<6x512x448xbf16, #tpu.memory_space<vmem>>, vector<1x512x448xbf16>
    %9 = vector.shape_cast %8 : vector<1x512x448xbf16> to vector<512x448xbf16>
    %cst = arith.constant dense<0.000000e+00> : vector<16x448xf32>
    %10 = tpu.matmul %1, %9, %cst {dimension_numbers = #tpu.dot_dimension_numbers<[1], [0], [0], [1], [0, 0, 1, 1], [], []>} : vector<16x512xbf16>, vector<512x448xbf16>, vector<16x448xf32> -> vector<16x448xf32>
    %c1_11 = arith.constant 1 : index
    %c0_12 = arith.constant 0 : index
    %c0_13 = arith.constant 0 : index
    %11 = vector.load %arg2[%c1_11, %c0_12, %c0_13] : memref<6x512x448xbf16, #tpu.memory_space<vmem>>, vector<1x512x448xbf16>
    %12 = vector.shape_cast %11 : vector<1x512x448xbf16> to vector<512x448xbf16>
    %cst_14 = arith.constant dense<0.000000e+00> : vector<16x448xf32>
    %13 = tpu.matmul %3, %12, %cst_14 {dimension_numbers = #tpu.dot_dimension_numbers<[1], [0], [0], [1], [0, 0, 1, 1], [], []>} : vector<16x512xbf16>, vector<512x448xbf16>, vector<16x448xf32> -> vector<16x448xf32>
    %14 = arith.addf %10, %13 : vector<16x448xf32>
    %c2_15 = arith.constant 2 : index
    %c0_16 = arith.constant 0 : index
    %c0_17 = arith.constant 0 : index
    %15 = vector.load %arg2[%c2_15, %c0_16, %c0_17] : memref<6x512x448xbf16, #tpu.memory_space<vmem>>, vector<1x512x448xbf16>
    %16 = vector.shape_cast %15 : vector<1x512x448xbf16> to vector<512x448xbf16>
    %cst_18 = arith.constant dense<0.000000e+00> : vector<16x448xf32>
    %17 = tpu.matmul %5, %16, %cst_18 {dimension_numbers = #tpu.dot_dimension_numbers<[1], [0], [0], [1], [0, 0, 1, 1], [], []>} : vector<16x512xbf16>, vector<512x448xbf16>, vector<16x448xf32> -> vector<16x448xf32>
    %18 = arith.addf %14, %17 : vector<16x448xf32>
    %c3_19 = arith.constant 3 : index
    %c0_20 = arith.constant 0 : index
    %c0_21 = arith.constant 0 : index
    %19 = vector.load %arg2[%c3_19, %c0_20, %c0_21] : memref<6x512x448xbf16, #tpu.memory_space<vmem>>, vector<1x512x448xbf16>
    %20 = vector.shape_cast %19 : vector<1x512x448xbf16> to vector<512x448xbf16>
    %cst_22 = arith.constant dense<0.000000e+00> : vector<16x448xf32>
    %21 = tpu.matmul %1, %20, %cst_22 {dimension_numbers = #tpu.dot_dimension_numbers<[1], [0], [0], [1], [0, 0, 1, 1], [], []>} : vector<16x512xbf16>, vector<512x448xbf16>, vector<16x448xf32> -> vector<16x448xf32>
    %c4 = arith.constant 4 : index
    %c0_23 = arith.constant 0 : index
    %c0_24 = arith.constant 0 : index
    %22 = vector.load %arg2[%c4, %c0_23, %c0_24] : memref<6x512x448xbf16, #tpu.memory_space<vmem>>, vector<1x512x448xbf16>
    %23 = vector.shape_cast %22 : vector<1x512x448xbf16> to vector<512x448xbf16>
    %cst_25 = arith.constant dense<0.000000e+00> : vector<16x448xf32>
    %24 = tpu.matmul %3, %23, %cst_25 {dimension_numbers = #tpu.dot_dimension_numbers<[1], [0], [0], [1], [0, 0, 1, 1], [], []>} : vector<16x512xbf16>, vector<512x448xbf16>, vector<16x448xf32> -> vector<16x448xf32>
    %25 = arith.addf %21, %24 : vector<16x448xf32>
    %c5 = arith.constant 5 : index
    %c0_26 = arith.constant 0 : index
    %c0_27 = arith.constant 0 : index
    %26 = vector.load %arg2[%c5, %c0_26, %c0_27] : memref<6x512x448xbf16, #tpu.memory_space<vmem>>, vector<1x512x448xbf16>
    %27 = vector.shape_cast %26 : vector<1x512x448xbf16> to vector<512x448xbf16>
    %cst_28 = arith.constant dense<0.000000e+00> : vector<16x448xf32>
    %28 = tpu.matmul %5, %27, %cst_28 {dimension_numbers = #tpu.dot_dimension_numbers<[1], [0], [0], [1], [0, 0, 1, 1], [], []>} : vector<16x512xbf16>, vector<512x448xbf16>, vector<16x448xf32> -> vector<16x448xf32>
    %29 = arith.addf %25, %28 : vector<16x448xf32>
    %30 = arith.maximumf %18, %29 : vector<16x448xf32>
    %c0_29 = arith.constant 0 : index
    %c0_30 = arith.constant 0 : index
    %c0_31 = arith.constant 0 : index
    %31 = vector.load %arg2[%c0_29, %c0_30, %c0_31] : memref<6x512x448xbf16, #tpu.memory_space<vmem>>, vector<1x512x448xbf16>
    %32 = vector.shape_cast %31 : vector<1x512x448xbf16> to vector<512x448xbf16>
    %cst_32 = arith.constant dense<0.000000e+00> : vector<16x448xf32>
    %33 = tpu.matmul %3, %32, %cst_32 {dimension_numbers = #tpu.dot_dimension_numbers<[1], [0], [0], [1], [0, 0, 1, 1], [], []>} : vector<16x512xbf16>, vector<512x448xbf16>, vector<16x448xf32> -> vector<16x448xf32>
    %c1_33 = arith.constant 1 : index
    %c0_34 = arith.constant 0 : index
    %c0_35 = arith.constant 0 : index
    %34 = vector.load %arg2[%c1_33, %c0_34, %c0_35] : memref<6x512x448xbf16, #tpu.memory_space<vmem>>, vector<1x512x448xbf16>
    %35 = vector.shape_cast %34 : vector<1x512x448xbf16> to vector<512x448xbf16>
    %cst_36 = arith.constant dense<0.000000e+00> : vector<16x448xf32>
    %36 = tpu.matmul %5, %35, %cst_36 {dimension_numbers = #tpu.dot_dimension_numbers<[1], [0], [0], [1], [0, 0, 1, 1], [], []>} : vector<16x512xbf16>, vector<512x448xbf16>, vector<16x448xf32> -> vector<16x448xf32>
    %37 = arith.addf %33, %36 : vector<16x448xf32>
    %c2_37 = arith.constant 2 : index
    %c0_38 = arith.constant 0 : index
    %c0_39 = arith.constant 0 : index
    %38 = vector.load %arg2[%c2_37, %c0_38, %c0_39] : memref<6x512x448xbf16, #tpu.memory_space<vmem>>, vector<1x512x448xbf16>
    %39 = vector.shape_cast %38 : vector<1x512x448xbf16> to vector<512x448xbf16>
    %cst_40 = arith.constant dense<0.000000e+00> : vector<16x448xf32>
    %40 = tpu.matmul %7, %39, %cst_40 {dimension_numbers = #tpu.dot_dimension_numbers<[1], [0], [0], [1], [0, 0, 1, 1], [], []>} : vector<16x512xbf16>, vector<512x448xbf16>, vector<16x448xf32> -> vector<16x448xf32>
    %41 = arith.addf %37, %40 : vector<16x448xf32>
    %c3_41 = arith.constant 3 : index
    %c0_42 = arith.constant 0 : index
    %c0_43 = arith.constant 0 : index
    %42 = vector.load %arg2[%c3_41, %c0_42, %c0_43] : memref<6x512x448xbf16, #tpu.memory_space<vmem>>, vector<1x512x448xbf16>
    %43 = vector.shape_cast %42 : vector<1x512x448xbf16> to vector<512x448xbf16>
    %cst_44 = arith.constant dense<0.000000e+00> : vector<16x448xf32>
    %44 = tpu.matmul %3, %43, %cst_44 {dimension_numbers = #tpu.dot_dimension_numbers<[1], [0], [0], [1], [0, 0, 1, 1], [], []>} : vector<16x512xbf16>, vector<512x448xbf16>, vector<16x448xf32> -> vector<16x448xf32>
    %c4_45 = arith.constant 4 : index
    %c0_46 = arith.constant 0 : index
    %c0_47 = arith.constant 0 : index
    %45 = vector.load %arg2[%c4_45, %c0_46, %c0_47] : memref<6x512x448xbf16, #tpu.memory_space<vmem>>, vector<1x512x448xbf16>
    %46 = vector.shape_cast %45 : vector<1x512x448xbf16> to vector<512x448xbf16>
    %cst_48 = arith.constant dense<0.000000e+00> : vector<16x448xf32>
    %47 = tpu.matmul %5, %46, %cst_48 {dimension_numbers = #tpu.dot_dimension_numbers<[1], [0], [0], [1], [0, 0, 1, 1], [], []>} : vector<16x512xbf16>, vector<512x448xbf16>, vector<16x448xf32> -> vector<16x448xf32>
    %48 = arith.addf %44, %47 : vector<16x448xf32>
    %c5_49 = arith.constant 5 : index
    %c0_50 = arith.constant 0 : index
    %c0_51 = arith.constant 0 : index
    %49 = vector.load %arg2[%c5_49, %c0_50, %c0_51] : memref<6x512x448xbf16, #tpu.memory_space<vmem>>, vector<1x512x448xbf16>
    %50 = vector.shape_cast %49 : vector<1x512x448xbf16> to vector<512x448xbf16>
    %cst_52 = arith.constant dense<0.000000e+00> : vector<16x448xf32>
    %51 = tpu.matmul %7, %50, %cst_52 {dimension_numbers = #tpu.dot_dimension_numbers<[1], [0], [0], [1], [0, 0, 1, 1], [], []>} : vector<16x512xbf16>, vector<512x448xbf16>, vector<16x448xf32> -> vector<16x448xf32>
    %52 = arith.addf %48, %51 : vector<16x448xf32>
    %53 = arith.maximumf %41, %52 : vector<16x448xf32>
    %54 = arith.maximumf %30, %53 : vector<16x448xf32>
    %c0_53 = arith.constant 0 : index
    %c0_54 = arith.constant 0 : index
    %55 = vector.load %arg3[%c0_53, %c0_54] : memref<1x448xf32, #tpu.memory_space<vmem>>, vector<1x448xf32>
    %56 = vector.broadcast %55 : vector<1x448xf32> to vector<16x448xf32>
    %57 = arith.addf %54, %56 : vector<16x448xf32>
    %cst_55 = arith.constant 0.000000e+00 : f32
    %58 = vector.broadcast %cst_55 : f32 to vector<16x448xf32>
    %59 = arith.maximumf %57, %58 : vector<16x448xf32>
    %60 = arith.truncf %59 : vector<16x448xf32> to vector<16x448xbf16>
    %c0_56 = arith.constant 0 : index
    %c0_57 = arith.constant 0 : index
    %61 = vector.load %arg4[%c0_56, %c0_57] : memref<16x448xbf16, #tpu.memory_space<vmem>>, vector<16x448xbf16>
    tpu.vector_store %arg4[%c0_56, %c0_57], %60 {strides = array<i32>} : memref<16x448xbf16, #tpu.memory_space<vmem>>, vector<16x448xbf16>,
    return
  }
  func.func @transform_0(%arg0: i32) -> (i32, i32, i32) {
    %c0_i32 = arith.constant 0 : i32
    %c0_i32_0 = arith.constant 0 : i32
    %c0_i32_1 = arith.constant 0 : i32
    return %c0_i32, %arg0, %c0_i32_0 : i32, i32, i32
  }
  func.func @transform_1(%arg0: i32) -> (i32, i32, i32) {
    %c0_i32 = arith.constant 0 : i32
    %c0_i32_0 = arith.constant 0 : i32
    %c0_i32_1 = arith.constant 0 : i32
    %c0_i32_2 = arith.constant 0 : i32
    return %c0_i32, %c0_i32_0, %c0_i32_1 : i32, i32, i32
  }
  func.func @transform_2(%arg0: i32) -> (i32, i32) {
    %c0_i32 = arith.constant 0 : i32
    %c0_i32_0 = arith.constant 0 : i32
    %c0_i32_1 = arith.constant 0 : i32
    return %c0_i32, %c0_i32_0 : i32, i32
  }
  func.func @transform_3(%arg0: i32) -> (i32, i32) {
    %c0_i32 = arith.constant 0 : i32
    %c0_i32_0 = arith.constant 0 : i32
    return %arg0, %c0_i32 : i32, i32
  }
}

module attributes {stable_mosaic.version = 11 : i64} {
  func.func @_mlp_kernel(%arg0: i32, %arg1: memref<16x3136xbf16, #tpu.memory_space<vmem>>, %arg2: memref<3136x128xbf16, #tpu.memory_space<vmem>>, %arg3: memref<1x128xf32, #tpu.memory_space<vmem>>, %arg4: memref<128x128xbf16, #tpu.memory_space<vmem>>, %arg5: memref<1x128xf32, #tpu.memory_space<vmem>>, %arg6: memref<16x128xf32, #tpu.memory_space<vmem>>) attributes {dimension_semantics = [#tpu.dimension_semantics<parallel>], iteration_bounds = array<i64: 1>, scalar_prefetch = 0 : i64, scratch_operands = 0 : i64, tpu.core_type = #tpu.core_type<tc>, window_params = [{transform_indices = @transform_0, window_bounds = array<i64: 16, 3136>}, {pipeline_mode = #tpu.pipeline_mode<synchronous>, transform_indices = @transform_1, window_bounds = array<i64: 3136, 128>}, {pipeline_mode = #tpu.pipeline_mode<synchronous>, transform_indices = @transform_2, window_bounds = array<i64: 1, 128>}, {pipeline_mode = #tpu.pipeline_mode<synchronous>, transform_indices = @transform_3, window_bounds = array<i64: 128, 128>}, {pipeline_mode = #tpu.pipeline_mode<synchronous>, transform_indices = @transform_4, window_bounds = array<i64: 1, 128>}, {transform_indices = @transform_5, window_bounds = array<i64: 16, 128>}]} {
    %c0 = arith.constant 0 : index
    %c0_0 = arith.constant 0 : index
    %0 = vector.load %arg1[%c0, %c0_0] : memref<16x3136xbf16, #tpu.memory_space<vmem>>, vector<16x3136xbf16>
    %c0_1 = arith.constant 0 : index
    %c0_2 = arith.constant 0 : index
    %1 = vector.load %arg2[%c0_1, %c0_2] : memref<3136x128xbf16, #tpu.memory_space<vmem>>, vector<3136x128xbf16>
    %cst = arith.constant dense<0.000000e+00> : vector<16x128xf32>
    %2 = tpu.matmul %0, %1, %cst {dimension_numbers = #tpu.dot_dimension_numbers<[1], [0], [0], [1], [0, 0, 1, 1], [], []>} : vector<16x3136xbf16>, vector<3136x128xbf16>, vector<16x128xf32> -> vector<16x128xf32>
    %c0_3 = arith.constant 0 : index
    %c0_4 = arith.constant 0 : index
    %3 = vector.load %arg3[%c0_3, %c0_4] : memref<1x128xf32, #tpu.memory_space<vmem>>, vector<1x128xf32>
    %4 = vector.broadcast %3 : vector<1x128xf32> to vector<16x128xf32>
    %5 = arith.addf %2, %4 : vector<16x128xf32>
    %cst_5 = arith.constant 0.000000e+00 : f32
    %6 = vector.broadcast %cst_5 : f32 to vector<16x128xf32>
    %7 = arith.maximumf %5, %6 : vector<16x128xf32>
    %8 = arith.truncf %7 : vector<16x128xf32> to vector<16x128xbf16>
    %c0_6 = arith.constant 0 : index
    %c0_7 = arith.constant 0 : index
    %9 = vector.load %arg4[%c0_6, %c0_7] : memref<128x128xbf16, #tpu.memory_space<vmem>>, vector<128x128xbf16>
    %cst_8 = arith.constant dense<0.000000e+00> : vector<16x128xf32>
    %10 = tpu.matmul %8, %9, %cst_8 {dimension_numbers = #tpu.dot_dimension_numbers<[1], [0], [0], [1], [0, 0, 1, 1], [], []>} : vector<16x128xbf16>, vector<128x128xbf16>, vector<16x128xf32> -> vector<16x128xf32>
    %c0_9 = arith.constant 0 : index
    %c0_10 = arith.constant 0 : index
    %11 = vector.load %arg5[%c0_9, %c0_10] : memref<1x128xf32, #tpu.memory_space<vmem>>, vector<1x128xf32>
    %12 = vector.broadcast %11 : vector<1x128xf32> to vector<16x128xf32>
    %13 = arith.addf %10, %12 : vector<16x128xf32>
    %c0_11 = arith.constant 0 : index
    %c0_12 = arith.constant 0 : index
    %14 = vector.load %arg6[%c0_11, %c0_12] : memref<16x128xf32, #tpu.memory_space<vmem>>, vector<16x128xf32>
    tpu.vector_store %arg6[%c0_11, %c0_12], %13 {strides = array<i32>} : memref<16x128xf32, #tpu.memory_space<vmem>>, vector<16x128xf32>,
    return
  }
  func.func @transform_0(%arg0: i32) -> (i32, i32) {
    %c0_i32 = arith.constant 0 : i32
    %c0_i32_0 = arith.constant 0 : i32
    return %arg0, %c0_i32 : i32, i32
  }
  func.func @transform_1(%arg0: i32) -> (i32, i32) {
    %c0_i32 = arith.constant 0 : i32
    %c0_i32_0 = arith.constant 0 : i32
    %c0_i32_1 = arith.constant 0 : i32
    return %c0_i32, %c0_i32_0 : i32, i32
  }
  func.func @transform_2(%arg0: i32) -> (i32, i32) {
    %c0_i32 = arith.constant 0 : i32
    %c0_i32_0 = arith.constant 0 : i32
    %c0_i32_1 = arith.constant 0 : i32
    return %c0_i32, %c0_i32_0 : i32, i32
  }
  func.func @transform_3(%arg0: i32) -> (i32, i32) {
    %c0_i32 = arith.constant 0 : i32
    %c0_i32_0 = arith.constant 0 : i32
    %c0_i32_1 = arith.constant 0 : i32
    return %c0_i32, %c0_i32_0 : i32, i32
  }
  func.func @transform_4(%arg0: i32) -> (i32, i32) {
    %c0_i32 = arith.constant 0 : i32
    %c0_i32_0 = arith.constant 0 : i32
    %c0_i32_1 = arith.constant 0 : i32
    return %c0_i32, %c0_i32_0 : i32, i32
  }
  func.func @transform_5(%arg0: i32) -> (i32, i32) {
    %c0_i32 = arith.constant 0 : i32
    %c0_i32_0 = arith.constant 0 : i32
    return %arg0, %c0_i32 : i32, i32
  }
}

</mosaic_0001>

<bundles_post_ra>
// kernel: cnn_forward.3
= control target key start
LH: loop header
LB: loop body
LE: loop exit
PB: predicated region body
PF: predicated region fallthrough
CT: control target
= control target key end

     0   :  { %8 = vsyncpa [#allocation4], 0  ;;  %s2804_s0 = inlined_call_operand.vmem [shape: bf16[4,32,30], index: 0, kind: input, shape index: {}]   ;;  %s2805_s1 = inlined_call_operand.hbm [shape: bf16[6,30,448], index: 1, kind: input, shape index: {}]   ;;  %s2806_s2 = inlined_call_operand.hbm [shape: f32[1,448], index: 2, kind: input, shape index: {}]   ;;  %s2807_s3 = inlined_call_operand.vmem [shape: bf16[32,448], index: 3, kind: output, shape index: {}]  }
   0x1   :  { %9 = vsyncpa [#allocation6], 0  ;;  %s2338_s12 = smov 0   ;;  %s2340_s13 = smov 0  }
   0x2   :  { %s2342_s14 = smov 0  }
   0x3 LB: > { %s1903_s15 = sadd.s32 4294967295, %s2311_s14   ;;  %s2355_s16 = sadd.s32 1, %s2311_s14   ;;  %s2311_s14 = sphi %s2342_s14, %s2820_s14   ;;  %s2307_s13 = sphi %s2340_s13, %s2819_s13   ;;  %s2303_s12 = sphi %s2338_s12, %s2818_s12  }
   0x4   : > { %s19_s17 = ssub.s32 %s2311_s14, %s2355_s16  ;;  %s22_s18 = sadd.s32 1, %s2307_s13 }
   0x5   : > { %p20_p0 = scmp.eq.s32.totalorder %s19_s17, 0  ;;  %p29_p1 = scmp.ne.s32.totalorder %s2307_s13, %s2303_s12 }
   0x6   : > { %p30_p2 = scmp.eq.s32.totalorder %s2311_s14, 0  ;;  %p1905_p3 = scmp.ge.s32.totalorder %s2311_s14, 1 }
   0x7   : > { %s2365_s19 = scalar_select %p20_p0, %s2307_s13, %s22_s18  }
   0x8   : > { %p2367_p4 = por %p30_p2, %p29_p1  ;;  %p114_p5 = scmp.lt.s32.totalorder %s2311_s14, 3 }
   0x9   : > { %p2374_p6 = scmp.eq.s32.totalorder %s1903_s15, 0  ;;  %s2313_s23 = smov [#allocation3]  }
   0xa   : > { %s2811_s20 = scalar_select %p2367_p4, 1, 0 }
   0xb   : > { %s2812_s21 = scalar_select %p2374_p6, 1, 0 }
   0xc   : > { %p2378_p7 = pnand %p1905_p3, %p114_p5  ;;  %s126_s24 = sshll.u32 %s2313_s23, 4  ;;  %s127_s24 = int_to_ptr.vmem [resolvable:$true] %s126_s24 }
   0xd   : > { %s2314_s26 = smov [#allocation5]   ;;  %s2225_s30 = scalar_lea.hbm %s2805_s1, 6144 }
   0xe   : > { %s2813_s22 = scalar_select %p2378_p7, 1, 0 }
   0xf   : > { %p2109_p8 = pneg %p2378_p7  ;;  %s140_s27 = sshll.u32 %s2314_s26, 4  ;;  %s2390_s27 = int_to_ptr.vmem [resolvable:$true] %s140_s27 }
  0x10   : > { %p2226_p10 = scmp.ne.s32.totalorder %s2805_s1, %s2225_s30  ;;  %p2232_p0 = scmp.lt.u32.totalorder %s2225_s30, %s2805_s1 }
  0x11   : > { %p2386_p9 = pnand %p2374_p6, %p2109_p8 }
  0x13   : > { %p2227_p11 = pneg %p2386_p9 }
  0x15   : > { %p2228_p12 = pnand %p2227_p11, %p2226_p10 }
  0x17   : > { %p2229_p13 = pneg %p2228_p12 }
  0x19   : > { %p2234_p1 = pnand %p2232_p0, %p2229_p13 }
  0x1b   : > { %2237 = shalt.err (!%p2234_p1)
}
  0x1c   : > { %s2238_s8 = scalar_lea.vmem %s127_s24, 6144  ;;  %p2246_p8 = scmp.lt.s32.totalorder %s127_s24, %s127_s24 }
  0x1d   : > { %p2239_p2 = scmp.ne.s32.totalorder %s127_s24, %s2238_s8  ;;  %p2247_p6 = scmp.lt.s32.totalorder %s2238_s8, %s2238_s8 }
  0x1f   : > { %p2241_p3 = pnand %p2239_p2, %p2227_p11  ;;  %p2248_p7 = por %p2247_p6, %p2246_p8 }
  0x21   : > { %p2242_p5 = pneg %p2241_p3 }
  0x23   : > { %p2249_p4 = pnand %p2248_p7, %p2242_p5 }
  0x25   : > { %2252 = shalt.err (!%p2249_p4)
}
  0x26   : > { %s2315_s9 = smov 256   ;;  %s2316_s10 = smov 16  }
  0x27   : > { %2112 = dma.hbm_to_vmem [thread:$0]  (!%p2386_p9), %s2805_s1, 6144, %s127_s24, [#allocation4], %s2315_s9, %s2315_s9, %s2316_s10  }
  0x28   : > { %s2253_s26 = scalar_lea.hbm %s2806_s2, 64 }
  0x29   : > { %p2254_p10 = scmp.ne.s32.totalorder %s2806_s2, %s2253_s26  ;;  %p2260_p7 = scmp.lt.u32.totalorder %s2253_s26, %s2806_s2 }
  0x2b   : > { %p2256_p4 = pnand %p2254_p10, %p2227_p11 }
  0x2d   : > { %p2257_p6 = pneg %p2256_p4 }
  0x2f   : > { %p2262_p12 = pnand %p2260_p7, %p2257_p6 }
  0x31   : > { %2265 = shalt.err (!%p2262_p12)
}
  0x32   : > { %s2266_s24 = scalar_lea.vmem %s2390_s27, 64  ;;  %p2274_p2 = scmp.lt.s32.totalorder %s2390_s27, %s2390_s27 }
  0x33   : > { %p2267_p13 = scmp.ne.s32.totalorder %s2390_s27, %s2266_s24  ;;  %p2275_p3 = scmp.lt.s32.totalorder %s2266_s24, %s2266_s24 }
  0x35   : > { %p2269_p0 = pnand %p2267_p13, %p2227_p11  ;;  %p2276_p5 = por %p2275_p3, %p2274_p2 }
  0x37   : > { %p2270_p1 = pneg %p2269_p0 }
  0x39   : > { %p2277_p8 = pnand %p2276_p5, %p2270_p1 }
  0x3b   : > { %2280 = shalt.err (!%p2277_p8)
}
  0x3c   : > { %2115 = dma.hbm_to_vmem [thread:$0]  (!%p2386_p9), %s2806_s2, 64, %s2390_s27, [#allocation6]  }
  0x3d   : > { %p1908_p10 = scmp.ge.s32.totalorder %s2311_s14, 2 }
  0x3e   : > { %p2815_p4 = scmp.ne.s32.totalorder (!%p1908_p10), %s2811_s20, 0 }
  0x3f   : > { %147 = sbr.rel (%p1908_p10) target bundleno = 77 (0x4d), region = 24 }
  0x46   : > { %150 = sbr.rel (!%p2815_p4) target bundleno = 77 (0x4d), region = 28  ;;  %s152_s7 = sand.u32 (%p2815_p4), 1, %s2307_s13  }
  0x47   : > { %s2031_s8 = sshll.u32 (%p2815_p4), %s2311_s14, 3  ;;  %s1909_s9 = sshll.u32 (%p2815_p4), %s152_s7, 5 }
  0x48   : > { %s157_s25 = scalar_lea.vmem (%p2815_p4), %s2804_s0, %s2031_s8  ;;  %s154_s17 = scalar_lea.vmem (%p2815_p4), [#allocation2], %s1909_s9 }
  0x49   : > { %v173_v0 = vld [vmem:[%s157_s25] sm:$0xff] (%p2815_p4)   ;;  %v177_v1 = vld [vmem:[%s157_s25 + $0x10] sm:$0xff] (%p2815_p4)  }
  0x4a   : > { %v181_v2 = vld [vmem:[%s157_s25 + $0x20] sm:$0xff] (%p2815_p4)   ;;  %174 = vst [vmem:[%s154_s17] sm:$0xff] (%p2815_p4), %v173_v0   ;;  %178 = vst [vmem:[%s154_s17 + $0x8] sm:$0xff] (%p2815_p4), %v177_v1   ;;  %v185_v3 = vld [vmem:[%s157_s25 + $0x30] sm:$0xff] (%p2815_p4)  }
  0x4b   : > { %182 = vst [vmem:[%s154_s17 + $0x10] sm:$0xff] (%p2815_p4), %v181_v2   ;;  %186 = vst [vmem:[%s154_s17 + $0x18] sm:$0xff] (%p2815_p4), %v185_v3  }
  0x4d PF: > { %p2816_p9 = scmp.ne.s32.totalorder %s2813_s22, 0 }
  0x4e   : > { %s233_s20 = sand.u32 (!%p2816_p9), 1, %s2303_s12   ;;  %p2817_p11 = scmp.ne.s32.totalorder (!%p2816_p9), %s2812_s21, 0 }
  0x4f   : > { %230 = sbr.rel (%p2816_p9) target bundleno = 445 (0x1bd), region = 69  ;;  %s1913_s27 = sshll.u32 (!%p2816_p9), %s233_s20, 5 }
  0x50   : > { %s2450_s18 = scalar_lea.vmem (!%p2816_p9), [#allocation2], %s1913_s27 }
  0x56   : > { %2294 = dma.done.wait (%p2817_p11), [#allocation4], 6144  }
  0x57   : > { %2296 = vsyncadd (%p2817_p11), [#allocation4], 4294961152 }
  0x58   : > { %2298 = dma.done.wait (%p2817_p11), [#allocation6], 64  }
  0x59   : > { %2300 = vsyncadd (%p2817_p11), [#allocation6], 4294967232  ;;  %v2317_v4 = vmov 0   ;;  %v2462_v5 = vld [vmem:[#allocation3 + $0x44] ss:$16 sps:$4 sm:$0xff]   ;;  %vm347_vm0 = vcmask 1046528  }
  0x5a   : > { %392 = vmatprep.mubr.bf16.mxu0 %v2317_v4  ;;  %435 = vmatprep.mubr.bf16.mxu1 %v2317_v4  ;;  %v2464_v6 = vld [vmem:[#allocation3 + $0x4c] ss:$16 sps:$4 sm:$0xff]   ;;  %v2467_v7 = vld [vmem:[#allocation3 + $0x40] ss:$16 sps:$4 sm:$0xff]   ;;  %v2469_v8 = vld [vmem:[#allocation3 + $0x48] ss:$16 sps:$4 sm:$0xff]  }
  0x5b   : > { %360 = vmatprep.subr.bf16.mxu0 %v2462_v5  ;;  %403 = vmatprep.subr.bf16.mxu1 %v2464_v6  ;;  %v2472_v9 = vld [vmem:[#allocation3 + $0x64] ss:$16 sps:$4 sm:$0x7f]   ;;  %v2476_v10 = vld [vmem:[#allocation3 + $0x6c] ss:$16 sps:$4 sm:$0x7f]  }
  0x5c   : > { %361 = vmatpush1.bf16.msra.mxu0 %v2467_v7  ;;  %404 = vmatpush1.bf16.msra.mxu1 %v2469_v8  ;;  %v2159_v11 = vld [vmem:[#allocation3 + $0x60] ss:$16 sps:$4 sm:$0x7f]   ;;  %v2160_v12 = vld [vmem:[#allocation3 + $0x68] ss:$16 sps:$4 sm:$0x7f]  }
  0x5d   : > { %1934 = vmatprep.subr.msk.bf16.mxu0 %vm347_vm0, %v2472_v9  ;;  %v2481_v13 = vld [vmem:[%s2450_s18 + $0x8] sm:$0xff]   ;;  %1936 = vmatprep.subr.msk.bf16.mxu1 %vm347_vm0, %v2476_v10  ;;  %v2486_v14 = vsel %vm347_vm0, %v2159_v11, 0  ;;  %v2489_v15 = vsel %vm347_vm0, %v2160_v12, 0  ;;  %v2491_v16 = vld [vmem:[#allocation3] ss:$16 sps:$4 sm:$0xff]   ;;  %vm343_vm1 = vcmask 244736  }
  0x5e   : > { %v2495_v17 = vld [vmem:[#allocation3 + $0x4] ss:$16 sps:$4 sm:$0xff]   ;;  %v2497_v18 = vld [vmem:[#allocation3 + $0x8] ss:$16 sps:$4 sm:$0xff]   ;;  %v2499_v19 = vld [vmem:[#allocation3 + $0xc] ss:$16 sps:$4 sm:$0xff]  }
  0x5f   : > { %v2502_v20 = vld [vmem:[#allocation3 + $0x24] ss:$16 sps:$4 sm:$0x7f]   ;;  %v2508_v21 = vld [vmem:[#allocation3 + $0x2c] ss:$16 sps:$4 sm:$0x7f]  }
  0x60   : > { %363 = vmatpush1.bf16.msra.mxu0 %v2486_v14  ;;  %406 = vmatpush1.bf16.msra.mxu1 %v2489_v15  ;;  %v2172_v22 = vld [vmem:[#allocation3 + $0x20] ss:$16 sps:$4 sm:$0x7f]   ;;  %v2173_v23 = vld [vmem:[#allocation3 + $0x28] ss:$16 sps:$4 sm:$0x7f]  }
  0x61   : > { %502 = vmatprep.subr.bf16.mxu0 %v2495_v17  ;;  %545 = vmatprep.subr.bf16.mxu1 %v2499_v19  ;;  %v2516_v24 = vsel %vm347_vm0, %v2172_v22, 0  ;;  %v2521_v25 = vsel %vm347_vm0, %v2173_v23, 0  ;;  %v2524_v26 = vld [vmem:[#allocation3 + $0x84] ss:$16 sps:$4 sm:$0xff]   ;;  %v2527_v27 = vld [vmem:[#allocation3 + $0x8c] ss:$16 sps:$4 sm:$0xff]  }
  0x62   : > { %v2533_v28 = vld [vmem:[%s2450_s18] sm:$0xff]   ;;  %v2538_v30 = vld [vmem:[#allocation3 + $0x88] ss:$16 sps:$4 sm:$0xff]   ;;  %v2542_v32 = vld [vmem:[#allocation3 + $0xac] ss:$16 sps:$4 sm:$0x7f]  }
  0x63   : > { %1935 = vmatmul.mubr.msk.bf16.vlgmr.msra.gmra.mrb[0].mxu0 %vm343_vm1, %v2481_v13  ;;  %1937 = vmatmul.mubr.msk.bf16.vlgmr.msra.gmra.mrb[0].mxu1 %vm343_vm1, %v2481_v13  ;;  %v2535_v29 = vld [vmem:[#allocation3 + $0x80] ss:$16 sps:$4 sm:$0xff]   ;;  %v2540_v31 = vld [vmem:[#allocation3 + $0xa4] ss:$16 sps:$4 sm:$0x7f]   ;;  %s1916_s12 = sshll.u32 %s1903_s15, 1 }
  0x64   : > { %503 = vmatpush1.bf16.msra.mxu0 %v2491_v16  ;;  %546 = vmatpush1.bf16.msra.mxu1 %v2497_v18  ;;  %v2185_v33 = vld [vmem:[#allocation3 + $0xa0] ss:$16 sps:$4 sm:$0x7f]   ;;  %v2186_v34 = vld [vmem:[#allocation3 + $0xa8] ss:$16 sps:$4 sm:$0x7f]  }
  0x65   : > { %1947 = vmatprep.subr.msk.bf16.mxu0 %vm347_vm0, %v2502_v20  ;;  %1949 = vmatprep.subr.msk.bf16.mxu1 %vm347_vm0, %v2508_v21  ;;  %v2555_v35 = vsel %vm347_vm0, %v2185_v33, 0  ;;  %v2558_v36 = vsel %vm347_vm0, %v2186_v34, 0  ;;  %v2560_v37 = vld [vmem:[#allocation3 + $0x104] ss:$16 sps:$4 sm:$0xff]   ;;  %v2562_v38 = vld [vmem:[#allocation3 + $0x10c] ss:$16 sps:$4 sm:$0xff]  }
  0x66   : > { %534 = vmatprep.mubr.bf16.mxu0 %v2317_v4  ;;  %577 = vmatprep.mubr.bf16.mxu1 %v2317_v4  ;;  %v2571_v39 = vld [vmem:[%s2450_s18 + $0x10] sm:$0xff]   ;;  %v2577_v43 = vld [vmem:[#allocation3 + $0x108] ss:$16 sps:$4 sm:$0xff]   ;;  %v2579_v45 = vld [vmem:[#allocation3 + $0x12c] ss:$16 sps:$4 sm:$0x7f]  }
  0x67   : > { %v2573_v40 = vld [vmem:[#allocation3 + $0x100] ss:$16 sps:$4 sm:$0xff]   ;;  %v2575_v41 = vld [vmem:[#allocation3 + $0x124] ss:$16 sps:$4 sm:$0x7f]   ;;  %p267_p6 = scmp.lt.s32.totalorder %s1916_s12, 3 }
  0x68   : > { %505 = vmatpush1.bf16.msra.mxu0 %v2516_v24  ;;  %548 = vmatpush1.bf16.msra.mxu1 %v2521_v25  ;;  %v2198_v42 = vld [vmem:[#allocation3 + $0x120] ss:$16 sps:$4 sm:$0x7f]   ;;  %v2199_v44 = vld [vmem:[#allocation3 + $0x128] ss:$16 sps:$4 sm:$0x7f]  }
  0x69   : > { %653 = vmatprep.subr.bf16.mxu0 %v2524_v26  ;;  %696 = vmatprep.subr.bf16.mxu1 %v2527_v27  ;;  %v2588_v46 = vsel %vm347_vm0, %v2198_v42, 0  ;;  %v2591_v47 = vsel %vm347_vm0, %v2199_v44, 0  ;;  %v2593_v48 = vld [vmem:[#allocation3 + $0xc4] ss:$16 sps:$4 sm:$0xff]   ;;  %v2599_v49 = vld [vmem:[#allocation3 + $0xcc] ss:$16 sps:$4 sm:$0xff]  }
  0x6a   : > { %v2603_v50 = vld [vmem:[#allocation3 + $0xc0] ss:$16 sps:$4 sm:$0xff]   ;;  %v2605_v51 = vld [vmem:[#allocation3 + $0xc8] ss:$16 sps:$4 sm:$0xff]   ;;  %v2631_v58 = vld [vmem:[#allocation3 + $0x144] ss:$16 sps:$4 sm:$0xff]  }
  0x6b   : > { %v2609_v52 = vld [vmem:[#allocation3 + $0xe4] ss:$16 sps:$4 sm:$0x7f]   ;;  %v2611_v53 = vld [vmem:[#allocation3 + $0xec] ss:$16 sps:$4 sm:$0x7f]  }
  0x6c   : > { %v2210_v54 = vld [vmem:[#allocation3 + $0xe0] ss:$16 sps:$4 sm:$0x7f]   ;;  %v2211_v55 = vld [vmem:[#allocation3 + $0xe8] ss:$16 sps:$4 sm:$0x7f]  }
  0x6d   : > { %v2626_v56 = vsel %vm347_vm0, %v2210_v54, 0  ;;  %v2629_v57 = vsel %vm347_vm0, %v2211_v55, 0  ;;  %v2633_v59 = vld [vmem:[#allocation3 + $0x14c] ss:$16 sps:$4 sm:$0xff]   ;;  %v2641_v60 = vld [vmem:[#allocation3 + $0x140] ss:$16 sps:$4 sm:$0xff]  }
  0x6e   : > { %v2643_v61 = vld [vmem:[#allocation3 + $0x148] ss:$16 sps:$4 sm:$0xff]   ;;  %v2645_v62 = vld [vmem:[#allocation3 + $0x164] ss:$16 sps:$4 sm:$0x7f]   ;;  %s2822_s12 = smov (!%p267_p6, %s1916_s12), 3 }
  0x6f   : > { %1948 = vmatmul.mubr.msk.bf16.vlgmr.msra.gmra.mrb[0].mxu0 %vm343_vm1, %v2533_v28  ;;  %1950 = vmatmul.mubr.msk.bf16.vlgmr.msra.gmra.mrb[0].mxu1 %vm343_vm1, %v2533_v28  ;;  %v2647_v63 = vld [vmem:[#allocation3 + $0x16c] ss:$16 sps:$4 sm:$0x7f]   ;;  %v2222_v0 = vld [vmem:[#allocation3 + $0x160] ss:$16 sps:$4 sm:$0x7f]  }
  0x70   : > { %654 = vmatpush1.bf16.msra.mxu0 %v2535_v29  ;;  %697 = vmatpush1.bf16.msra.mxu1 %v2538_v30  ;;  %v2223_v1 = vld [vmem:[#allocation3 + $0x168] ss:$16 sps:$4 sm:$0x7f]   ;;  %v2660_v2 = vsel %vm347_vm0, %v2222_v0, 0  ;;  %vm1811_vm2 = vcmask 1043456   ;;  %vm1812_vm3 = vcmask 523268  }
  0x71   : > { %1960 = vmatprep.subr.msk.bf16.mxu0 %vm347_vm0, %v2540_v31  ;;  %1962 = vmatprep.subr.msk.bf16.mxu1 %vm347_vm0, %v2542_v32  ;;  %v2663_v3 = vsel %vm347_vm0, %v2223_v1, 0  ;;  %s2032_s14 = sshll.u32 %s2822_s12, 4  ;;  %vm1813_vm4 = vmor %vm1812_vm3, %vm1811_vm2 }
  0x72   : > { %685 = vmatprep.mubr.bf16.mxu0 %v2317_v4  ;;  %728 = vmatprep.mubr.bf16.mxu1 %v2317_v4  ;;  %s271_s22 = scalar_lea.vmem %s2807_s3, %s2032_s14 }
  0x74   : > { %656 = vmatpush1.bf16.msra.mxu0 %v2555_v35  ;;  %699 = vmatpush1.bf16.msra.mxu1 %v2558_v36 }
  0x75   : > { %813 = vmatprep.subr.bf16.mxu0 %v2560_v37  ;;  %856 = vmatprep.subr.bf16.mxu1 %v2562_v38 }
  0x7b   : > { %1961 = vmatmul.mubr.msk.bf16.vlgmr.msra.gmra.mrb[0].mxu0 %vm343_vm1, %v2571_v39  ;;  %1963 = vmatmul.mubr.msk.bf16.vlgmr.msra.gmra.mrb[0].mxu1 %vm343_vm1, %v2571_v39 }
  0x7c   : > { %814 = vmatpush1.bf16.msra.mxu0 %v2573_v40  ;;  %857 = vmatpush1.bf16.msra.mxu1 %v2577_v43 }
  0x7d   : > { %1972 = vmatprep.subr.msk.bf16.mxu0 %vm347_vm0, %v2575_v41  ;;  %1974 = vmatprep.subr.msk.bf16.mxu1 %vm347_vm0, %v2579_v45 }
  0x7e   : > { %845 = vmatprep.mubr.bf16.mxu0 %v2317_v4  ;;  %888 = vmatprep.mubr.bf16.mxu1 %v2317_v4 }
  0x80   : > { %816 = vmatpush1.bf16.msra.mxu0 %v2588_v46  ;;  %859 = vmatpush1.bf16.msra.mxu1 %v2591_v47 }
  0x81   : > { %947 = vmatprep.subr.bf16.mxu0 %v2593_v48  ;;  %990 = vmatprep.subr.bf16.mxu1 %v2599_v49 }
  0x83   : > { %1973 = vmatmul.mubr.msk.bf16.vlgmr.msra.gmra.mrb[4].mxu0 %vm343_vm1, %v2481_v13  ;;  %1975 = vmatmul.mubr.msk.bf16.vlgmr.msra.gmra.mrb[4].mxu1 %vm343_vm1, %v2481_v13 }
  0x84   : > { %948 = vmatpush1.bf16.msra.mxu0 %v2603_v50  ;;  %991 = vmatpush1.bf16.msra.mxu1 %v2605_v51 }
  0x85   : > { %1984 = vmatprep.subr.msk.bf16.mxu0 %vm347_vm0, %v2609_v52  ;;  %1986 = vmatprep.subr.msk.bf16.mxu1 %vm347_vm0, %v2611_v53 }
  0x86   : > { %979 = vmatprep.mubr.bf16.mxu0 %v2317_v4  ;;  %1022 = vmatprep.mubr.bf16.mxu1 %v2317_v4 }
  0x88   : > { %950 = vmatpush1.bf16.msra.mxu0 %v2626_v56  ;;  %993 = vmatpush1.bf16.msra.mxu1 %v2629_v57 }
  0x89   : > { %1090 = vmatprep.subr.bf16.mxu0 %v2631_v58  ;;  %1133 = vmatprep.subr.bf16.mxu1 %v2633_v59 }
  0x8f   : > { %1985 = vmatmul.mubr.msk.bf16.vlgmr.msra.gmra.mrb[4].mxu0 %vm343_vm1, %v2533_v28  ;;  %1987 = vmatmul.mubr.msk.bf16.vlgmr.msra.gmra.mrb[4].mxu1 %vm343_vm1, %v2533_v28 }
  0x90   : > { %1091 = vmatpush1.bf16.msra.mxu0 %v2641_v60  ;;  %1134 = vmatpush1.bf16.msra.mxu1 %v2643_v61 }
  0x91   : > { %1996 = vmatprep.subr.msk.bf16.mxu0 %vm347_vm0, %v2645_v62  ;;  %1998 = vmatprep.subr.msk.bf16.mxu1 %vm347_vm0, %v2647_v63 }
  0x92   : > { %1122 = vmatprep.mubr.bf16.mxu0 %v2317_v4  ;;  %1165 = vmatprep.mubr.bf16.mxu1 %v2317_v4 }
  0x94   : > { %1093 = vmatpush1.bf16.msra.mxu0 %v2660_v2  ;;  %1136 = vmatpush1.bf16.msra.mxu1 %v2663_v3 }
  0x95   : > { %1192 = vmatprep.subr.bf16.mxu0 %v2462_v5  ;;  %1235 = vmatprep.subr.bf16.mxu1 %v2464_v6  ;;  %v2224_v5 = vld [vmem:[%s2450_s18 + $0x18] sm:$0xff]  }
  0x9b   : > { %1997 = vmatmul.mubr.msk.bf16.vlgmr.msra.gmra.mrb[4].mxu0 %vm343_vm1, %v2571_v39  ;;  %1999 = vmatmul.mubr.msk.bf16.vlgmr.msra.gmra.mrb[4].mxu1 %vm343_vm1, %v2571_v39 }
  0x9c   : > { %1193 = vmatpush1.bf16.msra.mxu0 %v2467_v7  ;;  %1236 = vmatpush1.bf16.msra.mxu1 %v2469_v8 }
  0x9d   : > { %2000 = vmatprep.subr.msk.bf16.mxu0 %vm347_vm0, %v2472_v9  ;;  %2002 = vmatprep.subr.msk.bf16.mxu1 %vm347_vm0, %v2476_v10 }
  0x9e   : > { %1224 = vmatprep.mubr.bf16.mxu0 %v2317_v4  ;;  %1267 = vmatprep.mubr.bf16.mxu1 %v2317_v4 }
  0xa0   : > { %1195 = vmatpush1.bf16.msra.mxu0 %v2486_v14  ;;  %1238 = vmatpush1.bf16.msra.mxu1 %v2489_v15 }
  0xa1   : > { %1278 = vmatprep.subr.bf16.mxu0 %v2495_v17  ;;  %1321 = vmatprep.subr.bf16.mxu1 %v2499_v19 }
  0xa3   : > { %2001 = vmatmul.mubr.msk.bf16.vlgmr.msra.gmra.mrb[8].mxu0 %vm343_vm1, %v2571_v39  ;;  %2003 = vmatmul.mubr.msk.bf16.vlgmr.msra.gmra.mrb[8].mxu1 %vm343_vm1, %v2571_v39 }
  0xa4   : > { %1279 = vmatpush1.bf16.msra.mxu0 %v2491_v16  ;;  %1322 = vmatpush1.bf16.msra.mxu1 %v2497_v18 }
  0xa5   : > { %2004 = vmatprep.subr.msk.bf16.mxu0 %vm347_vm0, %v2502_v20  ;;  %2006 = vmatprep.subr.msk.bf16.mxu1 %vm347_vm0, %v2508_v21 }
  0xa6   : > { %1310 = vmatprep.mubr.bf16.mxu0 %v2317_v4  ;;  %1353 = vmatprep.mubr.bf16.mxu1 %v2317_v4 }
  0xa8   : > { %1281 = vmatpush1.bf16.msra.mxu0 %v2516_v24  ;;  %1324 = vmatpush1.bf16.msra.mxu1 %v2521_v25 }
  0xa9   : > { %1372 = vmatprep.subr.bf16.mxu0 %v2524_v26  ;;  %1415 = vmatprep.subr.bf16.mxu1 %v2527_v27 }
  0xaf   : > { %2005 = vmatmul.mubr.msk.bf16.vlgmr.msra.gmra.mrb[8].mxu0 %vm343_vm1, %v2481_v13  ;;  %2007 = vmatmul.mubr.msk.bf16.vlgmr.msra.gmra.mrb[8].mxu1 %vm343_vm1, %v2481_v13 }
  0xb0   : > { %1373 = vmatpush1.bf16.msra.mxu0 %v2535_v29  ;;  %1416 = vmatpush1.bf16.msra.mxu1 %v2538_v30 }
  0xb1   : > { %2009 = vmatprep.subr.msk.bf16.mxu0 %vm347_vm0, %v2540_v31  ;;  %2011 = vmatprep.subr.msk.bf16.mxu1 %vm347_vm0, %v2542_v32 }
  0xb2   : > { %1404 = vmatprep.mubr.bf16.mxu0 %v2317_v4  ;;  %1447 = vmatprep.mubr.bf16.mxu1 %v2317_v4 }
  0xb4   : > { %1375 = vmatpush1.bf16.msra.mxu0 %v2555_v35  ;;  %1418 = vmatpush1.bf16.msra.mxu1 %v2558_v36 }
  0xb5   : > { %1466 = vmatprep.subr.bf16.mxu0 %v2560_v37  ;;  %1509 = vmatprep.subr.bf16.mxu1 %v2562_v38  ;;  %v1750_v37 = vlaneseq }
  0xb7   : > { %v1751_v38 = vshrl.u32 %v1750_v37, 7 }
  0xb9   : > { %v1756_v42 = vsub.s32 1, %v1751_v38 }
  0xbb   : > { %2010 = vmatmul.mubr.msk.bf16.vlgmr.msra.gmra.mrb[8].mxu0 %vm343_vm1, %v2224_v5  ;;  %2012 = vmatmul.mubr.msk.bf16.vlgmr.msra.gmra.mrb[8].mxu1 %vm343_vm1, %v2224_v5 }
  0xbc   : > { %1467 = vmatpush1.bf16.msra.mxu0 %v2573_v40  ;;  %1510 = vmatpush1.bf16.msra.mxu1 %v2577_v43  ;;  %v1760_v40 = vsub.s32 2, %v1751_v38  ;;  %v1764_v43 = vsub.s32 3, %v1751_v38 }
  0xbd   : > { %2013 = vmatprep.subr.msk.bf16.mxu0 %vm347_vm0, %v2575_v41  ;;  %2015 = vmatprep.subr.msk.bf16.mxu1 %vm347_vm0, %v2579_v45  ;;  %v1748_v41 = vld [vmem:[#allocation5] sm:$0xf] }
  0xbe   : > { %1498 = vmatprep.mubr.bf16.mxu0 %v2317_v4  ;;  %1541 = vmatprep.mubr.bf16.mxu1 %v2317_v4 }
  0xc0   : > { %1469 = vmatpush1.bf16.msra.mxu0 %v2588_v46  ;;  %1512 = vmatpush1.bf16.msra.mxu1 %v2591_v47  ;;  %v1761_v47 = vrot.slane %v1748_v41, %v1760_v40 }
  0xc1   : > { %1552 = vmatprep.subr.bf16.mxu0 %v2593_v48  ;;  %1595 = vmatprep.subr.bf16.mxu1 %v2599_v49 }
  0xc3   : > { %2014 = vmatmul.mubr.msk.bf16.vlgmr.msra.gmra.mrb[12].mxu0 %vm343_vm1, %v2571_v39  ;;  %2016 = vmatmul.mubr.msk.bf16.vlgmr.msra.gmra.mrb[12].mxu1 %vm343_vm1, %v2571_v39  ;;  %v1752_v39 = vsub.s32 0, %v1751_v38 }
  0xc4   : > { %1553 = vmatpush1.bf16.msra.mxu0 %v2603_v50  ;;  %1596 = vmatpush1.bf16.msra.mxu1 %v2605_v51  ;;  %v1757_v51 = vrot.slane %v1748_v41, %v1756_v42 }
  0xc5   : > { %2017 = vmatprep.subr.msk.bf16.mxu0 %vm347_vm0, %v2609_v52  ;;  %2019 = vmatprep.subr.msk.bf16.mxu1 %vm347_vm0, %v2611_v53  ;;  %v1753_v45 = vrot.slane %v1748_v41, %v1752_v39  ;;  %v1765_v53 = vrot.slane %v1748_v41, %v1764_v43 }
  0xc6   : > { %1584 = vmatprep.mubr.bf16.mxu0 %v2317_v4  ;;  %1627 = vmatprep.mubr.bf16.mxu1 %v2317_v4 }
  0xc8   : > { %1555 = vmatpush1.bf16.msra.mxu0 %v2626_v56  ;;  %1598 = vmatpush1.bf16.msra.mxu1 %v2629_v57 }
  0xc9   : > { %1638 = vmatprep.subr.bf16.mxu0 %v2631_v58  ;;  %1681 = vmatprep.subr.bf16.mxu1 %v2633_v59 }
  0xcf   : > { %2018 = vmatmul.mubr.msk.bf16.vlgmr.msra.gmra.mrb[12].mxu0 %vm343_vm1, %v2481_v13  ;;  %2020 = vmatmul.mubr.msk.bf16.vlgmr.msra.gmra.mrb[12].mxu1 %vm343_vm1, %v2481_v13 }
  0xd0   : > { %1639 = vmatpush1.bf16.msra.mxu0 %v2641_v60  ;;  %1682 = vmatpush1.bf16.msra.mxu1 %v2643_v61 }
  0xd1   : > { %2021 = vmatprep.subr.msk.bf16.mxu0 %vm347_vm0, %v2645_v62  ;;  %2023 = vmatprep.subr.msk.bf16.mxu1 %vm347_vm0, %v2647_v63 }
  0xd2   : > { %1670 = vmatprep.mubr.bf16.mxu0 %v2317_v4  ;;  %1713 = vmatprep.mubr.bf16.mxu1 %v2317_v4 }
  0xd4   : > { %1641 = vmatpush1.bf16.msra.mxu0 %v2660_v2  ;;  %1684 = vmatpush1.bf16.msra.mxu1 %v2663_v3 }
  0xdb   : > { %2022 = vmatmul.mubr.msk.bf16.vlgmr.msra.gmra.mrb[12].mxu0 %vm343_vm1, %v2224_v5  ;;  %2024 = vmatmul.mubr.msk.bf16.vlgmr.msra.gmra.mrb[12].mxu1 %vm343_vm1, %v2224_v5 }
 0x14e   : > { %v687_v6 = vpop.f32.mrb[0].mxu0  ;;  %v730_v7 = vpop.f32.mrb[0].mxu1 }
 0x14f   : > { %v2766_v8 = vpop.f32.mrb[1].mxu0  ;;  %v2768_v9 = vpop.f32.mrb[1].mxu1 }
 0x150   : > { %v2770_v10 = vpop.f32.mrb[2].mxu0  ;;  %v2772_v11 = vpop.f32.mrb[2].mxu1 }
 0x151   : > { %v2774_v12 = vpop.f32.mrb[3].mxu0  ;;  %v2776_v4 = vpop.f32.mrb[3].mxu1 }
 0x16e   : > { %v1124_v13 = vpop.f32.mrb[4].mxu0  ;;  %v1167_v14 = vpop.f32.mrb[4].mxu1 }
 0x16f   : > { %v1184_v15 = vmax.f32 %v687_v6, %v1124_v13  ;;  %v1186_v16 = vmax.f32 %v730_v7, %v1167_v14  ;;  %v1126_v17 = vpop.f32.mrb[5].mxu0  ;;  %v1169_v18 = vpop.f32.mrb[5].mxu1 }
 0x170   : > { %v1185_v19 = vmax.f32 %v2766_v8, %v1126_v17  ;;  %v1187_v20 = vmax.f32 %v2768_v9, %v1169_v18  ;;  %v1128_v21 = vpop.f32.mrb[6].mxu0  ;;  %v1171_v22 = vpop.f32.mrb[6].mxu1 }
 0x171   : > { %v1188_v23 = vmax.f32 %v2770_v10, %v1128_v21  ;;  %v1190_v24 = vmax.f32 %v2772_v11, %v1171_v22  ;;  %v1130_v25 = vpop.f32.mrb[7].mxu0  ;;  %v1173_v26 = vpop.f32.mrb[7].mxu1 }
 0x172   : > { %v1189_v27 = vmax.f32 %v2774_v12, %v1130_v25  ;;  %v1191_v28 = vmax.f32 %v2776_v4, %v1173_v26 }
 0x18e   : > { %v1406_v29 = vpop.f32.mrb[8].mxu0  ;;  %v1449_v30 = vpop.f32.mrb[8].mxu1 }
 0x18f   : > { %v1408_v31 = vpop.f32.mrb[9].mxu0  ;;  %v1451_v32 = vpop.f32.mrb[9].mxu1 }
 0x190   : > { %v1410_v33 = vpop.f32.mrb[10].mxu0  ;;  %v1453_v34 = vpop.f32.mrb[10].mxu1 }
 0x191   : > { %v1412_v35 = vpop.f32.mrb[11].mxu0  ;;  %v1455_v36 = vpop.f32.mrb[11].mxu1 }
 0x1ae   : > { %v1672_v44 = vpop.f32.mrb[12].mxu0  ;;  %v1715_v46 = vpop.f32.mrb[12].mxu1 }
 0x1af   : > { %v1732_v48 = vmax.f32 %v1406_v29, %v1672_v44  ;;  %v1734_v49 = vmax.f32 %v1449_v30, %v1715_v46  ;;  %v1674_v50 = vpop.f32.mrb[13].mxu0  ;;  %v1717_v52 = vpop.f32.mrb[13].mxu1 }
 0x1b0   : > { %v1733_v54 = vmax.f32 %v1408_v31, %v1674_v50  ;;  %v1735_v55 = vmax.f32 %v1451_v32, %v1717_v52  ;;  %v1676_v56 = vpop.f32.mrb[14].mxu0  ;;  %v1719_v57 = vpop.f32.mrb[14].mxu1 }
 0x1b1   : > { %v1740_v58 = vmax.f32 %v1184_v15, %v1732_v48  ;;  %v1742_v59 = vmax.f32 %v1186_v16, %v1734_v49  ;;  %v1736_v60 = vmax.f32 %v1410_v33, %v1676_v56  ;;  %v1738_v61 = vmax.f32 %v1453_v34, %v1719_v57  ;;  %v1678_v62 = vpop.f32.mrb[15].mxu0  ;;  %v1721_v63 = vpop.f32.mrb[15].mxu1 }
 0x1b2   : > { %v1741_v0 = vmax.f32 %v1185_v19, %v1733_v54  ;;  %v1743_v1 = vmax.f32 %v1187_v20, %v1735_v55  ;;  %v1737_v2 = vmax.f32 %v1412_v35, %v1678_v62  ;;  %v1739_v3 = vmax.f32 %v1455_v36, %v1721_v63 }
 0x1b3   : > { %v1770_v5 = vadd.f32 %v1753_v45, %v1740_v58  ;;  %v1772_v6 = vadd.f32 %v1761_v47, %v1742_v59  ;;  %v1744_v7 = vmax.f32 %v1188_v23, %v1736_v60  ;;  %v1746_v8 = vmax.f32 %v1190_v24, %v1738_v61 }
 0x1b4   : > { %v1771_v9 = vadd.f32 %v1757_v51, %v1741_v0  ;;  %v1773_v10 = vadd.f32 %v1765_v53, %v1743_v1  ;;  %v1745_v11 = vmax.f32 %v1189_v27, %v1737_v2  ;;  %v1747_v12 = vmax.f32 %v1191_v28, %v1739_v3 }
 0x1b5   : > { %v1778_v4 = vmax.f32 %v1770_v5, 0.0  ;;  %v1780_v13 = vmax.f32 %v1772_v6, 0.0  ;;  %v1774_v14 = vadd.f32 %v1753_v45, %v1744_v7  ;;  %v1776_v15 = vadd.f32 %v1761_v47, %v1746_v8 }
 0x1b6   : > { %v1779_v16 = vmax.f32 %v1771_v9, 0.0  ;;  %v1781_v17 = vmax.f32 %v1773_v10, 0.0  ;;  %v1775_v18 = vadd.f32 %v1757_v51, %v1745_v11  ;;  %v1777_v19 = vadd.f32 %v1765_v53, %v1747_v12 }
 0x1b7   : > { %v1782_v20 = vmax.f32 %v1774_v14, 0.0  ;;  %v1784_v21 = vmax.f32 %v1776_v15, 0.0 }
 0x1b8   : > { %v2033_v22 = vpack.c.bf16 %v1779_v16, %v1778_v4  ;;  %v2034_v23 = vpack.c.bf16 %v1781_v17, %v1780_v13  ;;  %v1783_v24 = vmax.f32 %v1775_v18, 0.0  ;;  %v1785_v25 = vmax.f32 %v1777_v19, 0.0 }
 0x1ba   : > { %1810 = vst [vmem:[%s271_s22] sm:$0xff] %v2033_v22  ;;  %1814 = vst.msk [vmem:[%s271_s22 + $0x8] sm:$0xff] %vm1813_vm4, %v2034_v23  ;;  %v2035_v26 = vpack.c.bf16 %v1783_v24, %v1782_v20  ;;  %v2036_v27 = vpack.c.bf16 %v1785_v25, %v1784_v21 }
 0x1bc   : > { %1815 = vst [vmem:[%s271_s22 + $0x10] sm:$0xff] %v2035_v26  ;;  %1816 = vst.msk [vmem:[%s271_s22 + $0x18] sm:$0xff] %vm1813_vm4, %v2036_v27 }
 0x1bd PF: > { %p12_p7 = scmp.ge.s32.totalorder %s2355_s16, 4   ;;  %s2818_s12 = smov %s2307_s13 }
 0x1be   : > { %s2819_s13 = smov %s2365_s19  ;;  %s2820_s14 = smov %s2355_s16 }
 0x1bf   :  { %14 = sbr.rel (!%p12_p7) target bundleno = 3 (0x3), region = 125 }
 0x1c6   :  { %1841 = vsyncpa [#allocation4], 1 }
 0x1c7   :  { %1843 = vsyncpa [#allocation4 + $0x1], 1 }
 0x1c8   :  { %1844 = vsyncpa [#allocation6], 1 }

// kernel: cnn_forward.5
= control target key start
LH: loop header
LB: loop body
LE: loop exit
PB: predicated region body
PF: predicated region fallthrough
CT: control target
= control target key end

     0   :  { %vm3191_vm0 = vmmov 0   ;;  %vm1747_vm1 = vcmask 523264   ;;  %s3935_s1 = inlined_call_operand.vmem [shape: bf16[3136,128], index: 1, kind: input, shape index: {}]   ;;  %s3936_s0 = inlined_call_operand.vmem [shape: bf16[16,3136], index: 0, kind: input, shape index: {}]   ;;  %s3937_s2 = inlined_call_operand.vmem [shape: f32[1,128], index: 2, kind: input, shape index: {}]   ;;  %s3938_s3 = inlined_call_operand.vmem [shape: bf16[128,128], index: 3, kind: input, shape index: {}]   ;;  %s3939_s4 = inlined_call_operand.vmem [shape: f32[1,128], index: 4, kind: input, shape index: {}]   ;;  %s3940_s5 = inlined_call_operand.vmem [shape: f32[16,128], index: 5, kind: output, shape index: {}]  }
   0x1   :  { %v2949_v0 = vld [vmem:[%s3935_s1 + $0x40] sm:$0xff]   ;;  %v2953_v4 = vld [vmem:[%s3935_s1 + $0x48] sm:$0xff]   ;;  %v2957_v8 = vld [vmem:[%s3935_s1 + $0x50] sm:$0xff]  }
   0x2   :  { %v2950_v1 = vld [vmem:[%s3935_s1] sm:$0xff]   ;;  %2637 = vmatprep.subr.bf16.mxu0 %v2949_v0  ;;  %v2954_v5 = vld [vmem:[%s3935_s1 + $0x8] sm:$0xff]   ;;  %v2958_v9 = vld [vmem:[%s3935_s1 + $0x10] sm:$0xff]  }
   0x3   :  { %v2951_v2 = vld [vmem:[%s3935_s1 + $0xc0] sm:$0xff]   ;;  %2638 = vmatpush3.bf16.msra.mxu0 %v2950_v1  ;;  %v2955_v6 = vld [vmem:[%s3935_s1 + $0xc8] sm:$0xff]   ;;  %v2959_v10 = vld [vmem:[%s3935_s1 + $0xd0] sm:$0xff]  }
   0x4   :  { %v2952_v3 = vld [vmem:[%s3935_s1 + $0x80] sm:$0xff]   ;;  %2659 = vmatprep.subr.bf16.mxu1 %v2951_v2  ;;  %2639 = vmatprep.subr.bf16.mxu0 %v2953_v4  ;;  %v2956_v7 = vld [vmem:[%s3935_s1 + $0x88] sm:$0xff]   ;;  %v2960_v11 = vld [vmem:[%s3935_s1 + $0x90] sm:$0xff]  }
   0x5   :  { %2660 = vmatpush3.bf16.msra.mxu1 %v2952_v3  ;;  %v2961_v12 = vld [vmem:[%s3935_s1 + $0x58] sm:$0xff]   ;;  %v2965_v16 = vld [vmem:[%s3935_s1 + $0x60] sm:$0xff]   ;;  %v2969_v20 = vld [vmem:[%s3935_s1 + $0x68] sm:$0xff]  }
   0x6   :  { %2661 = vmatprep.subr.bf16.mxu1 %v2955_v6  ;;  %v2962_v13 = vld [vmem:[%s3935_s1 + $0x18] sm:$0xff]   ;;  %v2966_v17 = vld [vmem:[%s3935_s1 + $0x20] sm:$0xff]   ;;  %v2970_v21 = vld [vmem:[%s3935_s1 + $0x28] sm:$0xff]  }
   0x7   :  { %2640 = vmatpush3.bf16.msra.mxu0 %v2954_v5  ;;  %v2963_v14 = vld [vmem:[%s3935_s1 + $0xd8] sm:$0xff]   ;;  %v2967_v18 = vld [vmem:[%s3935_s1 + $0xe0] sm:$0xff]   ;;  %v2971_v22 = vld [vmem:[%s3935_s1 + $0xe8] sm:$0xff]  }
   0x8   :  { %2641 = vmatprep.subr.bf16.mxu0 %v2957_v8  ;;  %v2964_v15 = vld [vmem:[%s3935_s1 + $0x98] sm:$0xff]   ;;  %v2968_v19 = vld [vmem:[%s3935_s1 + $0xa0] sm:$0xff]   ;;  %v2972_v23 = vld [vmem:[%s3935_s1 + $0xa8] sm:$0xff]  }
   0x9   :  { %2662 = vmatpush3.bf16.msra.mxu1 %v2956_v7  ;;  %v2973_v24 = vld [vmem:[%s3935_s1 + $0x70] sm:$0xff]   ;;  %v2977_v28 = vld [vmem:[%s3935_s1 + $0x78] sm:$0xff]   ;;  %v2980_v31 = vld [vmem:[%s3936_s0] ss:$100 sps:$4 sm:$0xff]  }
   0xa   :  { %2663 = vmatprep.subr.bf16.mxu1 %v2959_v10  ;;  %v2974_v25 = vld [vmem:[%s3935_s1 + $0x30] sm:$0xff]   ;;  %v2978_v29 = vld [vmem:[%s3935_s1 + $0x38] sm:$0xff]   ;;  %v2982_v32 = vld [vmem:[%s3936_s0 + $0x4] ss:$100 sps:$4 sm:$0xff]  }
   0xb   :  { %2642 = vmatpush3.bf16.msra.mxu0 %v2958_v9  ;;  %v2975_v26 = vld [vmem:[%s3935_s1 + $0xf0] sm:$0xff]   ;;  %v2979_v30 = vld [vmem:[%s3935_s1 + $0xf8] sm:$0xff]   ;;  %1783 = vmatprep.mubr.bf16.mxu0 %v2982_v32  ;;  %v2984_v34 = vld [vmem:[%s3935_s1 + $0x140] sm:$0xff]  }
   0xc   :  { %2643 = vmatprep.subr.bf16.mxu0 %v2961_v12  ;;  %v2976_v27 = vld [vmem:[%s3935_s1 + $0xb0] sm:$0xff]   ;;  %v2983_v33 = vld [vmem:[%s3935_s1 + $0xb8] sm:$0xff]   ;;  %v2985_v35 = vld [vmem:[%s3936_s0 + $0x8] ss:$100 sps:$4 sm:$0xff]  }
   0xd   :  { %2664 = vmatpush3.bf16.msra.mxu1 %v2960_v11  ;;  %v2987_v36 = vld [vmem:[%s3936_s0 + $0xc] ss:$100 sps:$4 sm:$0xff]   ;;  %v2988_v37 = vld [vmem:[%s3935_s1 + $0x100] sm:$0xff]   ;;  %v2999_v48 = vld [vmem:[%s3935_s1 + $0x158] sm:$0xff]  }
   0xe   :  { %2665 = vmatprep.subr.bf16.mxu1 %v2963_v14  ;;  %1824 = vmatprep.mubr.bf16.mxu1 %v2987_v36  ;;  %v2989_v38 = vld [vmem:[%s3935_s1 + $0x1c0] sm:$0xff]   ;;  %v2991_v40 = vld [vmem:[%s3935_s1 + $0x148] sm:$0xff]   ;;  %v2995_v44 = vld [vmem:[%s3935_s1 + $0x150] sm:$0xff]  }
   0xf   :  { %2644 = vmatpush3.bf16.msra.mxu0 %v2962_v13  ;;  %v2990_v39 = vld [vmem:[%s3935_s1 + $0x180] sm:$0xff]   ;;  %v2992_v41 = vld [vmem:[%s3935_s1 + $0x108] sm:$0xff]   ;;  %v2996_v45 = vld [vmem:[%s3935_s1 + $0x110] sm:$0xff]  }
  0x10   :  { %2645 = vmatprep.subr.bf16.mxu0 %v2965_v16  ;;  %v2993_v42 = vld [vmem:[%s3935_s1 + $0x1c8] sm:$0xff]   ;;  %v2997_v46 = vld [vmem:[%s3935_s1 + $0x1d0] sm:$0xff]   ;;  %v3000_v49 = vld [vmem:[%s3935_s1 + $0x118] sm:$0xff]  }
  0x11   :  { %2666 = vmatpush3.bf16.msra.mxu1 %v2964_v15  ;;  %v2994_v43 = vld [vmem:[%s3935_s1 + $0x188] sm:$0xff]   ;;  %v2998_v47 = vld [vmem:[%s3935_s1 + $0x190] sm:$0xff]   ;;  %v3001_v50 = vld [vmem:[%s3935_s1 + $0x1d8] sm:$0xff]  }
  0x12   :  { %2667 = vmatprep.subr.bf16.mxu1 %v2967_v18  ;;  %v3002_v51 = vld [vmem:[%s3935_s1 + $0x198] sm:$0xff]   ;;  %v3003_v52 = vld [vmem:[%s3935_s1 + $0x160] sm:$0xff]   ;;  %v3007_v56 = vld [vmem:[%s3935_s1 + $0x168] sm:$0xff]  }
  0x13   :  { %2646 = vmatpush3.bf16.msra.mxu0 %v2966_v17  ;;  %v3004_v53 = vld [vmem:[%s3935_s1 + $0x120] sm:$0xff]   ;;  %v3008_v57 = vld [vmem:[%s3935_s1 + $0x128] sm:$0xff]   ;;  %v3011_v60 = vld [vmem:[%s3935_s1 + $0x170] sm:$0xff]  }
  0x14   :  { %2647 = vmatprep.subr.bf16.mxu0 %v2969_v20  ;;  %v3005_v54 = vld [vmem:[%s3935_s1 + $0x1e0] sm:$0xff]   ;;  %v3009_v58 = vld [vmem:[%s3935_s1 + $0x1e8] sm:$0xff]   ;;  %v3012_v61 = vld [vmem:[%s3935_s1 + $0x130] sm:$0xff]  }
  0x15   :  { %2668 = vmatpush3.bf16.msra.mxu1 %v2968_v19  ;;  %v3006_v55 = vld [vmem:[%s3935_s1 + $0x1a0] sm:$0xff]   ;;  %v3010_v59 = vld [vmem:[%s3935_s1 + $0x1a8] sm:$0xff]   ;;  %v3013_v62 = vld [vmem:[%s3935_s1 + $0x1f0] sm:$0xff]  }
  0x16   :  { %2669 = vmatprep.subr.bf16.mxu1 %v2971_v22  ;;  %v3014_v63 = vld [vmem:[%s3935_s1 + $0x1b0] sm:$0xff]   ;;  %v3015_v0 = vld [vmem:[%s3935_s1 + $0x178] sm:$0xff]   ;;  %v3022_v6 = vld [vmem:[%s3935_s1 + $0x240] sm:$0xff]  }
  0x17   :  { %2648 = vmatpush3.bf16.msra.mxu0 %v2970_v21  ;;  %v3016_v1 = vld [vmem:[%s3935_s1 + $0x138] sm:$0xff]   ;;  %v3018_v3 = vld [vmem:[%s3936_s0 + $0x10] ss:$100 sps:$4 sm:$0xff]   ;;  %v3026_v9 = vld [vmem:[%s3935_s1 + $0x200] sm:$0xff]  }
  0x18   :  { %2649 = vmatprep.subr.bf16.mxu0 %v2973_v24  ;;  %v3017_v2 = vld [vmem:[%s3935_s1 + $0x1f8] sm:$0xff]   ;;  %v3027_v10 = vld [vmem:[%s3935_s1 + $0x2c0] sm:$0xff]   ;;  %v3029_v12 = vld [vmem:[%s3935_s1 + $0x248] sm:$0xff]  }
  0x19   :  { %2670 = vmatpush3.bf16.msra.mxu1 %v2972_v23  ;;  %v3020_v4 = vld [vmem:[%s3936_s0 + $0x14] ss:$100 sps:$4 sm:$0xff]   ;;  %v3025_v8 = vld [vmem:[%s3936_s0 + $0x1c] ss:$100 sps:$4 sm:$0xff]   ;;  %v3030_v13 = vld [vmem:[%s3935_s1 + $0x208] sm:$0xff]  }
  0x1a   :  { %2671 = vmatprep.subr.bf16.mxu1 %v2975_v26  ;;  %v3021_v5 = vld [vmem:[%s3935_s1 + $0x1b8] sm:$0xff]   ;;  %v3028_v11 = vld [vmem:[%s3935_s1 + $0x280] sm:$0xff]   ;;  %v3031_v14 = vld [vmem:[%s3935_s1 + $0x2c8] sm:$0xff]  }
  0x1b   :  { %2650 = vmatpush3.bf16.msra.mxu0 %v2974_v25  ;;  %v3023_v7 = vld [vmem:[%s3936_s0 + $0x18] ss:$100 sps:$4 sm:$0xff]   ;;  %v3032_v15 = vld [vmem:[%s3935_s1 + $0x288] sm:$0xff]   ;;  %v3033_v16 = vld [vmem:[%s3935_s1 + $0x250] sm:$0xff]  }
  0x1c   :  { %2651 = vmatprep.subr.bf16.mxu0 %v2977_v28  ;;  %v3034_v17 = vld [vmem:[%s3935_s1 + $0x210] sm:$0xff]   ;;  %v3037_v20 = vld [vmem:[%s3935_s1 + $0x258] sm:$0xff]   ;;  %v3041_v24 = vld [vmem:[%s3935_s1 + $0x260] sm:$0xff]  }
  0x1d   :  { %2672 = vmatpush3.bf16.msra.mxu1 %v2976_v27  ;;  %v3035_v18 = vld [vmem:[%s3935_s1 + $0x2d0] sm:$0xff]   ;;  %v3038_v21 = vld [vmem:[%s3935_s1 + $0x218] sm:$0xff]   ;;  %v3042_v25 = vld [vmem:[%s3935_s1 + $0x220] sm:$0xff]  }
  0x1e   :  { %2673 = vmatprep.subr.bf16.mxu1 %v2979_v30  ;;  %v3036_v19 = vld [vmem:[%s3935_s1 + $0x290] sm:$0xff]   ;;  %v3039_v22 = vld [vmem:[%s3935_s1 + $0x2d8] sm:$0xff]   ;;  %v3043_v26 = vld [vmem:[%s3935_s1 + $0x2e0] sm:$0xff]  }
  0x1f   :  { %2652 = vmatpush3.bf16.msra.mxu0 %v2978_v29  ;;  %v3040_v23 = vld [vmem:[%s3935_s1 + $0x298] sm:$0xff]   ;;  %v3044_v27 = vld [vmem:[%s3935_s1 + $0x2a0] sm:$0xff]   ;;  %v3045_v28 = vld [vmem:[%s3935_s1 + $0x268] sm:$0xff]  }
  0x20   :  { %2681 = vmatprep.subr.bf16.mxu0 %v2984_v34  ;;  %v3046_v29 = vld [vmem:[%s3935_s1 + $0x228] sm:$0xff]   ;;  %v3049_v32 = vld [vmem:[%s3935_s1 + $0x270] sm:$0xff]   ;;  %v3053_v36 = vld [vmem:[%s3935_s1 + $0x278] sm:$0xff]  }
  0x21   :  { %2674 = vmatpush3.bf16.msra.mxu1 %v2983_v33  ;;  %v3047_v30 = vld [vmem:[%s3935_s1 + $0x2e8] sm:$0xff]   ;;  %v3050_v33 = vld [vmem:[%s3935_s1 + $0x230] sm:$0xff]  }
  0x22   :  { %1784 = vmatmul.mubr.bf16.vlgmr.msra.gmra.mrb[0].mxu0 %v2980_v31  ;;  %2703 = vmatprep.subr.bf16.mxu1 %v2989_v38  ;;  %v3048_v31 = vld [vmem:[%s3935_s1 + $0x2a8] sm:$0xff]   ;;  %v3051_v34 = vld [vmem:[%s3935_s1 + $0x2f0] sm:$0xff]   ;;  %v3055_v38 = vld [vmem:[%s3935_s1 + $0x2f8] sm:$0xff]  }
  0x23   :  { %2682 = vmatpush3.bf16.msra.mxu0 %v2988_v37  ;;  %1865 = vmatprep.mubr.bf16.mxu0 %v3020_v4  ;;  %v3054_v37 = vld [vmem:[%s3935_s1 + $0x238] sm:$0xff]   ;;  %v3087_v4 = vld [vmem:[%s3935_s1 + $0x370] sm:$0xff]  }
  0x24   :  { %1825 = vmatmul.mubr.bf16.vlgmr.msra.gmra.mrb[0].mxu1 %v2985_v35  ;;  %2683 = vmatprep.subr.bf16.mxu0 %v2991_v40  ;;  %v3052_v35 = vld [vmem:[%s3935_s1 + $0x2b0] sm:$0xff]   ;;  %v3058_v40 = vld [vmem:[%s3936_s0 + $0x24] ss:$100 sps:$4 sm:$0xff]  }
  0x25   :  { %2704 = vmatpush3.bf16.msra.mxu1 %v2990_v39  ;;  %1906 = vmatprep.mubr.bf16.mxu1 %v3025_v8  ;;  %v3056_v39 = vld [vmem:[%s3936_s0 + $0x20] ss:$100 sps:$4 sm:$0xff]   ;;  %v3091_v8 = vld [vmem:[%s3935_s1 + $0x378] sm:$0xff]  }
  0x26   :  { %2705 = vmatprep.subr.bf16.mxu1 %v2993_v42  ;;  %v3060_v42 = vld [vmem:[%s3935_s1 + $0x340] sm:$0xff]  }
  0x27   :  { %2684 = vmatpush3.bf16.msra.mxu0 %v2992_v41  ;;  %v3059_v41 = vld [vmem:[%s3935_s1 + $0x2b8] sm:$0xff]  }
  0x28   :  { %2685 = vmatprep.subr.bf16.mxu0 %v2995_v44  ;;  %v3063_v44 = vld [vmem:[%s3936_s0 + $0x2c] ss:$100 sps:$4 sm:$0xff]  }
  0x29   :  { %2706 = vmatpush3.bf16.msra.mxu1 %v2994_v43  ;;  %v3061_v43 = vld [vmem:[%s3936_s0 + $0x28] ss:$100 sps:$4 sm:$0xff]  }
  0x2a   :  { %2707 = vmatprep.subr.bf16.mxu1 %v2997_v46  ;;  %v3065_v46 = vld [vmem:[%s3935_s1 + $0x3c0] sm:$0xff]  }
  0x2b   :  { %2686 = vmatpush3.bf16.msra.mxu0 %v2996_v45  ;;  %v3064_v45 = vld [vmem:[%s3935_s1 + $0x300] sm:$0xff]  }
  0x2c   :  { %2687 = vmatprep.subr.bf16.mxu0 %v2999_v48  ;;  %v3067_v48 = vld [vmem:[%s3935_s1 + $0x348] sm:$0xff]  }
  0x2d   :  { %2708 = vmatpush3.bf16.msra.mxu1 %v2998_v47  ;;  %v3066_v47 = vld [vmem:[%s3935_s1 + $0x380] sm:$0xff]  }
  0x2e   :  { %2709 = vmatprep.subr.bf16.mxu1 %v3001_v50  ;;  %v3069_v50 = vld [vmem:[%s3935_s1 + $0x3c8] sm:$0xff]  }
  0x2f   :  { %2688 = vmatpush3.bf16.msra.mxu0 %v3000_v49  ;;  %v3068_v49 = vld [vmem:[%s3935_s1 + $0x308] sm:$0xff]  }
  0x30   :  { %2689 = vmatprep.subr.bf16.mxu0 %v3003_v52  ;;  %v3071_v52 = vld [vmem:[%s3935_s1 + $0x350] sm:$0xff]  }
  0x31   :  { %2710 = vmatpush3.bf16.msra.mxu1 %v3002_v51  ;;  %v3070_v51 = vld [vmem:[%s3935_s1 + $0x388] sm:$0xff]  }
  0x32   :  { %2711 = vmatprep.subr.bf16.mxu1 %v3005_v54  ;;  %v3073_v54 = vld [vmem:[%s3935_s1 + $0x3d0] sm:$0xff]  }
  0x33   :  { %2690 = vmatpush3.bf16.msra.mxu0 %v3004_v53  ;;  %v3072_v53 = vld [vmem:[%s3935_s1 + $0x310] sm:$0xff]  }
  0x34   :  { %2691 = vmatprep.subr.bf16.mxu0 %v3007_v56  ;;  %v3075_v56 = vld [vmem:[%s3935_s1 + $0x358] sm:$0xff]  }
  0x35   :  { %2712 = vmatpush3.bf16.msra.mxu1 %v3006_v55  ;;  %v3074_v55 = vld [vmem:[%s3935_s1 + $0x390] sm:$0xff]  }
  0x36   :  { %2713 = vmatprep.subr.bf16.mxu1 %v3009_v58  ;;  %v3077_v58 = vld [vmem:[%s3935_s1 + $0x3d8] sm:$0xff]  }
  0x37   :  { %2692 = vmatpush3.bf16.msra.mxu0 %v3008_v57  ;;  %v3076_v57 = vld [vmem:[%s3935_s1 + $0x318] sm:$0xff]  }
  0x38   :  { %2693 = vmatprep.subr.bf16.mxu0 %v3011_v60  ;;  %v3079_v60 = vld [vmem:[%s3935_s1 + $0x360] sm:$0xff]  }
  0x39   :  { %2714 = vmatpush3.bf16.msra.mxu1 %v3010_v59  ;;  %v3078_v59 = vld [vmem:[%s3935_s1 + $0x398] sm:$0xff]  }
  0x3a   :  { %2715 = vmatprep.subr.bf16.mxu1 %v3013_v62  ;;  %v3081_v62 = vld [vmem:[%s3935_s1 + $0x3e0] sm:$0xff]  }
  0x3b   :  { %2694 = vmatpush3.bf16.msra.mxu0 %v3012_v61  ;;  %v3080_v61 = vld [vmem:[%s3935_s1 + $0x320] sm:$0xff]  }
  0x3c   :  { %2695 = vmatprep.subr.bf16.mxu0 %v3015_v0  ;;  %v3083_v0 = vld [vmem:[%s3935_s1 + $0x368] sm:$0xff]  }
  0x3d   :  { %2716 = vmatpush3.bf16.msra.mxu1 %v3014_v63  ;;  %v3082_v63 = vld [vmem:[%s3935_s1 + $0x3a0] sm:$0xff]  }
  0x3e   :  { %2717 = vmatprep.subr.bf16.mxu1 %v3017_v2  ;;  %v3085_v2 = vld [vmem:[%s3935_s1 + $0x3e8] sm:$0xff]  }
  0x3f   :  { %2696 = vmatpush3.bf16.msra.mxu0 %v3016_v1  ;;  %v3084_v1 = vld [vmem:[%s3935_s1 + $0x328] sm:$0xff]  }
  0x40   :  { %2725 = vmatprep.subr.bf16.mxu0 %v3022_v6  ;;  %v3089_v6 = vld [vmem:[%s3935_s1 + $0x3f0] sm:$0xff]  }
  0x41   :  { %2718 = vmatpush3.bf16.msra.mxu1 %v3021_v5  ;;  %v3088_v5 = vld [vmem:[%s3935_s1 + $0x330] sm:$0xff]  }
  0x42   :  { %1866 = vmatmul.mubr.bf16.vlgmr.msra.gmra.mrb[4].mxu0 %v3018_v3  ;;  %2747 = vmatprep.subr.bf16.mxu1 %v3027_v10  ;;  %v3086_v3 = vld [vmem:[%s3935_s1 + $0x3a8] sm:$0xff]   ;;  %v3093_v10 = vld [vmem:[%s3935_s1 + $0x3f8] sm:$0xff]  }
  0x43   :  { %2726 = vmatpush3.bf16.msra.mxu0 %v3026_v9  ;;  %1947 = vmatprep.mubr.bf16.mxu0 %v3058_v40  ;;  %v3092_v9 = vld [vmem:[%s3935_s1 + $0x338] sm:$0xff]   ;;  %v3125_v40 = vld [vmem:[%s3935_s1 + $0x470] sm:$0xff]  }
  0x44   :  { %1907 = vmatmul.mubr.bf16.vlgmr.msra.gmra.mrb[4].mxu1 %v3023_v7  ;;  %2727 = vmatprep.subr.bf16.mxu0 %v3029_v12  ;;  %v3090_v7 = vld [vmem:[%s3935_s1 + $0x3b0] sm:$0xff]  }
  0x45   :  { %2748 = vmatpush3.bf16.msra.mxu1 %v3028_v11  ;;  %1988 = vmatprep.mubr.bf16.mxu1 %v3063_v44  ;;  %v3094_v11 = vld [vmem:[%s3936_s0 + $0x30] ss:$100 sps:$4 sm:$0xff]   ;;  %v3129_v44 = vld [vmem:[%s3935_s1 + $0x478] sm:$0xff]  }
  0x46   :  { %2749 = vmatprep.subr.bf16.mxu1 %v3031_v14  ;;  %v3096_v12 = vld [vmem:[%s3936_s0 + $0x34] ss:$100 sps:$4 sm:$0xff]   ;;  %v3098_v14 = vld [vmem:[%s3935_s1 + $0x440] sm:$0xff]  }
  0x47   :  { %2728 = vmatpush3.bf16.msra.mxu0 %v3030_v13  ;;  %v3097_v13 = vld [vmem:[%s3935_s1 + $0x3b8] sm:$0xff]  }
  0x48   :  { %2729 = vmatprep.subr.bf16.mxu0 %v3033_v16  ;;  %v3101_v16 = vld [vmem:[%s3936_s0 + $0x3c] ss:$100 sps:$4 sm:$0xff]  }
  0x49   :  { %2750 = vmatpush3.bf16.msra.mxu1 %v3032_v15  ;;  %v3099_v15 = vld [vmem:[%s3936_s0 + $0x38] ss:$100 sps:$4 sm:$0xff]  }
  0x4a   :  { %2751 = vmatprep.subr.bf16.mxu1 %v3035_v18  ;;  %v3103_v18 = vld [vmem:[%s3935_s1 + $0x4c0] sm:$0xff]  }
  0x4b   :  { %2730 = vmatpush3.bf16.msra.mxu0 %v3034_v17  ;;  %v3102_v17 = vld [vmem:[%s3935_s1 + $0x400] sm:$0xff]  }
  0x4c   :  { %2731 = vmatprep.subr.bf16.mxu0 %v3037_v20  ;;  %v3105_v20 = vld [vmem:[%s3935_s1 + $0x448] sm:$0xff]  }
  0x4d   :  { %2752 = vmatpush3.bf16.msra.mxu1 %v3036_v19  ;;  %v3104_v19 = vld [vmem:[%s3935_s1 + $0x480] sm:$0xff]  }
  0x4e   :  { %2753 = vmatprep.subr.bf16.mxu1 %v3039_v22  ;;  %v3107_v22 = vld [vmem:[%s3935_s1 + $0x4c8] sm:$0xff]  }
  0x4f   :  { %2732 = vmatpush3.bf16.msra.mxu0 %v3038_v21  ;;  %v3106_v21 = vld [vmem:[%s3935_s1 + $0x408] sm:$0xff]  }
  0x50   :  { %2733 = vmatprep.subr.bf16.mxu0 %v3041_v24  ;;  %v3109_v24 = vld [vmem:[%s3935_s1 + $0x450] sm:$0xff]  }
  0x51   :  { %2754 = vmatpush3.bf16.msra.mxu1 %v3040_v23  ;;  %v3108_v23 = vld [vmem:[%s3935_s1 + $0x488] sm:$0xff]  }
  0x52   :  { %2755 = vmatprep.subr.bf16.mxu1 %v3043_v26  ;;  %v3111_v26 = vld [vmem:[%s3935_s1 + $0x4d0] sm:$0xff]  }
  0x53   :  { %2734 = vmatpush3.bf16.msra.mxu0 %v3042_v25  ;;  %v3110_v25 = vld [vmem:[%s3935_s1 + $0x410] sm:$0xff]  }
  0x54   :  { %2735 = vmatprep.subr.bf16.mxu0 %v3045_v28  ;;  %v3113_v28 = vld [vmem:[%s3935_s1 + $0x458] sm:$0xff]  }
  0x55   :  { %2756 = vmatpush3.bf16.msra.mxu1 %v3044_v27  ;;  %v3112_v27 = vld [vmem:[%s3935_s1 + $0x490] sm:$0xff]  }
  0x56   :  { %2757 = vmatprep.subr.bf16.mxu1 %v3047_v30  ;;  %v3115_v30 = vld [vmem:[%s3935_s1 + $0x4d8] sm:$0xff]  }
  0x57   :  { %2736 = vmatpush3.bf16.msra.mxu0 %v3046_v29  ;;  %v3114_v29 = vld [vmem:[%s3935_s1 + $0x418] sm:$0xff]  }
  0x58   :  { %2737 = vmatprep.subr.bf16.mxu0 %v3049_v32  ;;  %v3117_v32 = vld [vmem:[%s3935_s1 + $0x460] sm:$0xff]  }
  0x59   :  { %2758 = vmatpush3.bf16.msra.mxu1 %v3048_v31  ;;  %v3116_v31 = vld [vmem:[%s3935_s1 + $0x498] sm:$0xff]  }
  0x5a   :  { %2759 = vmatprep.subr.bf16.mxu1 %v3051_v34  ;;  %v3119_v34 = vld [vmem:[%s3935_s1 + $0x4e0] sm:$0xff]  }
  0x5b   :  { %2738 = vmatpush3.bf16.msra.mxu0 %v3050_v33  ;;  %v3118_v33 = vld [vmem:[%s3935_s1 + $0x420] sm:$0xff]  }
  0x5c   :  { %2739 = vmatprep.subr.bf16.mxu0 %v3053_v36  ;;  %v3121_v36 = vld [vmem:[%s3935_s1 + $0x468] sm:$0xff]  }
  0x5d   :  { %2760 = vmatpush3.bf16.msra.mxu1 %v3052_v35  ;;  %v3120_v35 = vld [vmem:[%s3935_s1 + $0x4a0] sm:$0xff]  }
  0x5e   :  { %2761 = vmatprep.subr.bf16.mxu1 %v3055_v38  ;;  %v3123_v38 = vld [vmem:[%s3935_s1 + $0x4e8] sm:$0xff]  }
  0x5f   :  { %2740 = vmatpush3.bf16.msra.mxu0 %v3054_v37  ;;  %v3122_v37 = vld [vmem:[%s3935_s1 + $0x428] sm:$0xff]  }
  0x60   :  { %2769 = vmatprep.subr.bf16.mxu0 %v3060_v42  ;;  %v3127_v42 = vld [vmem:[%s3935_s1 + $0x4f0] sm:$0xff]  }
  0x61   :  { %2762 = vmatpush3.bf16.msra.mxu1 %v3059_v41  ;;  %v3126_v41 = vld [vmem:[%s3935_s1 + $0x430] sm:$0xff]  }
  0x62   :  { %1948 = vmatmul.mubr.bf16.vlgmr.msra.gmra.mrb[8].mxu0 %v3056_v39  ;;  %2791 = vmatprep.subr.bf16.mxu1 %v3065_v46  ;;  %v3124_v39 = vld [vmem:[%s3935_s1 + $0x4a8] sm:$0xff]   ;;  %v3131_v46 = vld [vmem:[%s3935_s1 + $0x4f8] sm:$0xff]  }
  0x63   :  { %2770 = vmatpush3.bf16.msra.mxu0 %v3064_v45  ;;  %2029 = vmatprep.mubr.bf16.mxu0 %v3096_v12  ;;  %v3130_v45 = vld [vmem:[%s3935_s1 + $0x438] sm:$0xff]   ;;  %v3163_v12 = vld [vmem:[%s3935_s1 + $0x570] sm:$0xff]  }
  0x64   :  { %1989 = vmatmul.mubr.bf16.vlgmr.msra.gmra.mrb[8].mxu1 %v3061_v43  ;;  %2771 = vmatprep.subr.bf16.mxu0 %v3067_v48  ;;  %v3128_v43 = vld [vmem:[%s3935_s1 + $0x4b0] sm:$0xff]   ;;  %v3134_v48 = vld [vmem:[%s3936_s0 + $0x44] ss:$100 sps:$4 sm:$0xff]  }
  0x65   :  { %2792 = vmatpush3.bf16.msra.mxu1 %v3066_v47  ;;  %2070 = vmatprep.mubr.bf16.mxu1 %v3101_v16  ;;  %v3132_v47 = vld [vmem:[%s3936_s0 + $0x40] ss:$100 sps:$4 sm:$0xff]   ;;  %v3167_v16 = vld [vmem:[%s3935_s1 + $0x578] sm:$0xff]  }
  0x66   :  { %2793 = vmatprep.subr.bf16.mxu1 %v3069_v50  ;;  %v3136_v50 = vld [vmem:[%s3935_s1 + $0x540] sm:$0xff]  }
  0x67   :  { %2772 = vmatpush3.bf16.msra.mxu0 %v3068_v49  ;;  %v3135_v49 = vld [vmem:[%s3935_s1 + $0x4b8] sm:$0xff]  }
  0x68   :  { %2773 = vmatprep.subr.bf16.mxu0 %v3071_v52  ;;  %v3139_v52 = vld [vmem:[%s3936_s0 + $0x4c] ss:$100 sps:$4 sm:$0xff]  }
  0x69   :  { %2794 = vmatpush3.bf16.msra.mxu1 %v3070_v51  ;;  %v3137_v51 = vld [vmem:[%s3936_s0 + $0x48] ss:$100 sps:$4 sm:$0xff]  }
  0x6a   :  { %2795 = vmatprep.subr.bf16.mxu1 %v3073_v54  ;;  %v3141_v54 = vld [vmem:[%s3935_s1 + $0x5c0] sm:$0xff]  }
  0x6b   :  { %2774 = vmatpush3.bf16.msra.mxu0 %v3072_v53  ;;  %v3140_v53 = vld [vmem:[%s3935_s1 + $0x500] sm:$0xff]  }
  0x6c   :  { %2775 = vmatprep.subr.bf16.mxu0 %v3075_v56  ;;  %v3143_v56 = vld [vmem:[%s3935_s1 + $0x548] sm:$0xff]  }
  0x6d   :  { %2796 = vmatpush3.bf16.msra.mxu1 %v3074_v55  ;;  %v3142_v55 = vld [vmem:[%s3935_s1 + $0x580] sm:$0xff]  }
  0x6e   :  { %2797 = vmatprep.subr.bf16.mxu1 %v3077_v58  ;;  %v3145_v58 = vld [vmem:[%s3935_s1 + $0x5c8] sm:$0xff]  }
  0x6f   :  { %2776 = vmatpush3.bf16.msra.mxu0 %v3076_v57  ;;  %v3144_v57 = vld [vmem:[%s3935_s1 + $0x508] sm:$0xff]  }
  0x70   :  { %2777 = vmatprep.subr.bf16.mxu0 %v3079_v60  ;;  %v3147_v60 = vld [vmem:[%s3935_s1 + $0x550] sm:$0xff]  }
  0x71   :  { %2798 = vmatpush3.bf16.msra.mxu1 %v3078_v59  ;;  %v3146_v59 = vld [vmem:[%s3935_s1 + $0x588] sm:$0xff]  }
  0x72   :  { %2799 = vmatprep.subr.bf16.mxu1 %v3081_v62  ;;  %v3149_v62 = vld [vmem:[%s3935_s1 + $0x5d0] sm:$0xff]  }
  0x73   :  { %2778 = vmatpush3.bf16.msra.mxu0 %v3080_v61  ;;  %v3148_v61 = vld [vmem:[%s3935_s1 + $0x510] sm:$0xff]  }
  0x74   :  { %2779 = vmatprep.subr.bf16.mxu0 %v3083_v0  ;;  %v3151_v0 = vld [vmem:[%s3935_s1 + $0x558] sm:$0xff]  }
  0x75   :  { %2800 = vmatpush3.bf16.msra.mxu1 %v3082_v63  ;;  %v3150_v63 = vld [vmem:[%s3935_s1 + $0x590] sm:$0xff]  }
  0x76   :  { %2801 = vmatprep.subr.bf16.mxu1 %v3085_v2  ;;  %v3153_v2 = vld [vmem:[%s3935_s1 + $0x5d8] sm:$0xff]  }
  0x77   :  { %2780 = vmatpush3.bf16.msra.mxu0 %v3084_v1  ;;  %v3152_v1 = vld [vmem:[%s3935_s1 + $0x518] sm:$0xff]  }
  0x78   :  { %2781 = vmatprep.subr.bf16.mxu0 %v3087_v4  ;;  %v3155_v4 = vld [vmem:[%s3935_s1 + $0x560] sm:$0xff]  }
  0x79   :  { %2802 = vmatpush3.bf16.msra.mxu1 %v3086_v3  ;;  %v3154_v3 = vld [vmem:[%s3935_s1 + $0x598] sm:$0xff]  }
  0x7a   :  { %2803 = vmatprep.subr.bf16.mxu1 %v3089_v6  ;;  %v3157_v6 = vld [vmem:[%s3935_s1 + $0x5e0] sm:$0xff]  }
  0x7b   :  { %2782 = vmatpush3.bf16.msra.mxu0 %v3088_v5  ;;  %v3156_v5 = vld [vmem:[%s3935_s1 + $0x520] sm:$0xff]  }
  0x7c   :  { %2783 = vmatprep.subr.bf16.mxu0 %v3091_v8  ;;  %v3159_v8 = vld [vmem:[%s3935_s1 + $0x568] sm:$0xff]  }
  0x7d   :  { %2804 = vmatpush3.bf16.msra.mxu1 %v3090_v7  ;;  %v3158_v7 = vld [vmem:[%s3935_s1 + $0x5a0] sm:$0xff]  }
  0x7e   :  { %2805 = vmatprep.subr.bf16.mxu1 %v3093_v10  ;;  %v3161_v10 = vld [vmem:[%s3935_s1 + $0x5e8] sm:$0xff]  }
  0x7f   :  { %2784 = vmatpush3.bf16.msra.mxu0 %v3092_v9  ;;  %v3160_v9 = vld [vmem:[%s3935_s1 + $0x528] sm:$0xff]  }
  0x80   :  { %2813 = vmatprep.subr.bf16.mxu0 %v3098_v14  ;;  %v3165_v14 = vld [vmem:[%s3935_s1 + $0x5f0] sm:$0xff]  }
  0x81   :  { %2806 = vmatpush3.bf16.msra.mxu1 %v3097_v13  ;;  %v3164_v13 = vld [vmem:[%s3935_s1 + $0x530] sm:$0xff]  }
  0x82   :  { %2030 = vmatmul.mubr.bf16.vlgmr.msra.gmra.mrb[12].mxu0 %v3094_v11  ;;  %2835 = vmatprep.subr.bf16.mxu1 %v3103_v18  ;;  %v3162_v11 = vld [vmem:[%s3935_s1 + $0x5a8] sm:$0xff]   ;;  %v3169_v18 = vld [vmem:[%s3935_s1 + $0x5f8] sm:$0xff]  }
  0x83   :  { %2814 = vmatpush3.bf16.msra.mxu0 %v3102_v17  ;;  %2111 = vmatprep.mubr.bf16.mxu0 %v3134_v48  ;;  %v3168_v17 = vld [vmem:[%s3935_s1 + $0x538] sm:$0xff]   ;;  %v3183_v48 = vld [vmem:[%s3938_s3 + $0x8] sm:$0xff]  }
  0x84   :  { %2071 = vmatmul.mubr.bf16.vlgmr.msra.gmra.mrb[12].mxu1 %v3099_v15  ;;  %2815 = vmatprep.subr.bf16.mxu0 %v3105_v20  ;;  %v3166_v15 = vld [vmem:[%s3935_s1 + $0x5b0] sm:$0xff]  }
  0x85   :  { %2836 = vmatpush3.bf16.msra.mxu1 %v3104_v19  ;;  %2152 = vmatprep.mubr.bf16.mxu1 %v3139_v52  ;;  %v3170_v19 = vld [vmem:[%s3936_s0 + $0x50] ss:$100 sps:$4 sm:$0xff]  }
  0x86   :  { %2837 = vmatprep.subr.bf16.mxu1 %v3107_v22  ;;  %v3172_v20 = vld [vmem:[%s3936_s0 + $0x54] ss:$100 sps:$4 sm:$0xff]   ;;  %v3190_v22 = vmov 0.0  }
  0x87   :  { %2816 = vmatpush3.bf16.msra.mxu0 %v3106_v21  ;;  %v3173_v21 = vld [vmem:[%s3935_s1 + $0x5b8] sm:$0xff]  }
  0x88   :  { %2817 = vmatprep.subr.bf16.mxu0 %v3109_v24  ;;  %v3176_v24 = vld [vmem:[%s3936_s0 + $0x5c] ss:$100 sps:$4 sm:$0xff]  }
  0x89   :  { %2838 = vmatpush3.bf16.msra.mxu1 %v3108_v23  ;;  %v3174_v23 = vld [vmem:[%s3936_s0 + $0x58] ss:$100 sps:$4 sm:$0xff]  }
  0x8a   :  { %2839 = vmatprep.subr.bf16.mxu1 %v3111_v26  ;;  %v3178_v26 = vld [vmem:[%s3935_s1 + $0x608] sm:$0xff]  }
  0x8b   :  { %2818 = vmatpush3.bf16.msra.mxu0 %v3110_v25  ;;  %v3177_v25 = vld [vmem:[%s3935_s1 + $0x600] sm:$0xff]  }
  0x8c   :  { %2819 = vmatprep.subr.bf16.mxu0 %v3113_v28  ;;  %v3180_v28 = vld [vmem:[%s3935_s1 + $0x618] sm:$0xff]  }
  0x8d   :  { %2840 = vmatpush3.bf16.msra.mxu1 %v3112_v27  ;;  %v3179_v27 = vld [vmem:[%s3935_s1 + $0x610] sm:$0xff]  }
  0x8e   :  { %2841 = vmatprep.subr.bf16.mxu1 %v3115_v30 }
  0x8f   :  { %2820 = vmatpush3.bf16.msra.mxu0 %v3114_v29  ;;  %v3181_v29 = vld [vmem:[%s3936_s0 + $0x60] ss:$100 sps:$4 sm:$0xff]  }
  0x90   :  { %2821 = vmatprep.subr.bf16.mxu0 %v3117_v32 }
  0x91   :  { %2842 = vmatpush3.bf16.msra.mxu1 %v3116_v31  ;;  %v2405_v31 = vld [vmem:[%s3937_s2] ss:$0 sm:$0xff] }
  0x92   :  { %2843 = vmatprep.subr.bf16.mxu1 %v3119_v34 }
  0x93   :  { %2822 = vmatpush3.bf16.msra.mxu0 %v3118_v33 }
  0x94   :  { %2823 = vmatprep.subr.bf16.mxu0 %v3121_v36 }
  0x95   :  { %2844 = vmatpush3.bf16.msra.mxu1 %v3120_v35 }
  0x96   :  { %2845 = vmatprep.subr.bf16.mxu1 %v3123_v38 }
  0x97   :  { %2824 = vmatpush3.bf16.msra.mxu0 %v3122_v37 }
  0x98   :  { %2825 = vmatprep.subr.bf16.mxu0 %v3125_v40 }
  0x99   :  { %2846 = vmatpush3.bf16.msra.mxu1 %v3124_v39 }
  0x9a   :  { %2847 = vmatprep.subr.bf16.mxu1 %v3127_v42 }
  0x9b   :  { %2826 = vmatpush3.bf16.msra.mxu0 %v3126_v41 }
  0x9c   :  { %2827 = vmatprep.subr.bf16.mxu0 %v3129_v44 }
  0x9d   :  { %2848 = vmatpush3.bf16.msra.mxu1 %v3128_v43 }
  0x9e   :  { %2849 = vmatprep.subr.bf16.mxu1 %v3131_v46 }
  0x9f   :  { %2828 = vmatpush3.bf16.msra.mxu0 %v3130_v45 }
  0xa0   :  { %2857 = vmatprep.subr.bf16.mxu0 %v3136_v50 }
  0xa1   :  { %2850 = vmatpush3.bf16.msra.mxu1 %v3135_v49 }
  0xa2   :  { %2112 = vmatmul.mubr.bf16.vlgmr.msra.gmra.mrb[16].mxu0 %v3132_v47  ;;  %2879 = vmatprep.subr.bf16.mxu1 %v3141_v54  ;;  %v3182_v47 = vld [vmem:[%s3938_s3] sm:$0xff]  }
  0xa3   :  { %2858 = vmatpush3.bf16.msra.mxu0 %v3140_v53  ;;  %2193 = vmatprep.mubr.bf16.mxu0 %v3172_v20 }
  0xa4   :  { %2153 = vmatmul.mubr.bf16.vlgmr.msra.gmra.mrb[16].mxu1 %v3137_v51  ;;  %2859 = vmatprep.subr.bf16.mxu0 %v3143_v56 }
  0xa5   :  { %2880 = vmatpush3.bf16.msra.mxu1 %v3142_v55  ;;  %2234 = vmatprep.mubr.bf16.mxu1 %v3176_v24 }
  0xa6   :  { %2881 = vmatprep.subr.bf16.mxu1 %v3145_v58 }
  0xa7   :  { %2860 = vmatpush3.bf16.msra.mxu0 %v3144_v57 }
  0xa8   :  { %2861 = vmatprep.subr.bf16.mxu0 %v3147_v60 }
  0xa9   :  { %2882 = vmatpush3.bf16.msra.mxu1 %v3146_v59 }
  0xaa   :  { %2883 = vmatprep.subr.bf16.mxu1 %v3149_v62 }
  0xab   :  { %2862 = vmatpush3.bf16.msra.mxu0 %v3148_v61 }
  0xac   :  { %2863 = vmatprep.subr.bf16.mxu0 %v3151_v0 }
  0xad   :  { %2884 = vmatpush3.bf16.msra.mxu1 %v3150_v63 }
  0xae   :  { %2885 = vmatprep.subr.bf16.mxu1 %v3153_v2  ;;  %v3185_v2 = vld [vmem:[%s3938_s3 + $0x18] sm:$0xff]  }
  0xaf   :  { %2864 = vmatpush3.bf16.msra.mxu0 %v3152_v1  ;;  %v3184_v1 = vld [vmem:[%s3938_s3 + $0x10] sm:$0xff]  }
  0xb0   :  { %2865 = vmatprep.subr.bf16.mxu0 %v3155_v4  ;;  %v3187_v4 = vld [vmem:[%s3938_s3 + $0x28] sm:$0xff]  }
  0xb1   :  { %2886 = vmatpush3.bf16.msra.mxu1 %v3154_v3  ;;  %v3186_v3 = vld [vmem:[%s3938_s3 + $0x20] sm:$0xff]  }
  0xb2   :  { %2887 = vmatprep.subr.bf16.mxu1 %v3157_v6  ;;  %v3189_v6 = vld [vmem:[%s3938_s3 + $0x38] sm:$0xff]  }
  0xb3   :  { %2866 = vmatpush3.bf16.msra.mxu0 %v3156_v5  ;;  %v3188_v5 = vld [vmem:[%s3938_s3 + $0x30] sm:$0xff]  }
  0xb4   :  { %2867 = vmatprep.subr.bf16.mxu0 %v3159_v8 }
  0xb5   :  { %2888 = vmatpush3.bf16.msra.mxu1 %v3158_v7 }
  0xb6   :  { %2889 = vmatprep.subr.bf16.mxu1 %v3161_v10 }
  0xb7   :  { %2868 = vmatpush3.bf16.msra.mxu0 %v3160_v9 }
  0xb8   :  { %2869 = vmatprep.subr.bf16.mxu0 %v3163_v12 }
  0xb9   :  { %2890 = vmatpush3.bf16.msra.mxu1 %v3162_v11 }
  0xba   :  { %2891 = vmatprep.subr.bf16.mxu1 %v3165_v14 }
  0xbb   :  { %2870 = vmatpush3.bf16.msra.mxu0 %v3164_v13 }
  0xbc   :  { %2871 = vmatprep.subr.bf16.mxu0 %v3167_v16 }
  0xbd   :  { %2892 = vmatpush3.bf16.msra.mxu1 %v3166_v15 }
  0xbe   :  { %2893 = vmatprep.subr.bf16.mxu1 %v3169_v18 }
  0xbf   :  { %2872 = vmatpush3.bf16.msra.mxu0 %v3168_v17 }
  0xc0   :  { %2915 = vmatprep.subr.bf16.mxu0 %v3190_v22 }
  0xc1   :  { %2894 = vmatpush3.bf16.msra.mxu1 %v3173_v21 }
  0xc2   :  { %2194 = vmatmul.mubr.bf16.vlgmr.msra.gmra.mrb[20].mxu0 %v3170_v19  ;;  %2927 = vmatprep.subr.bf16.mxu1 %v3190_v22 }
  0xc3   :  { %2923 = vmatprep.mubr.msk.bf16.mxu0 %vm3191_vm0, %v3190_v22  ;;  %2916 = vmatpush3.bf16.msra.mxu0 %v3177_v25 }
  0xc4   :  { %2235 = vmatmul.mubr.bf16.vlgmr.msra.gmra.mrb[20].mxu1 %v3174_v23  ;;  %2917 = vmatprep.subr.bf16.mxu0 %v3190_v22 }
  0xc5   :  { %2943 = vmatprep.mubr.msk.bf16.mxu1 %vm3191_vm0, %v3190_v22  ;;  %2928 = vmatpush3.bf16.msra.mxu1 %v3182_v47 }
  0xc6   :  { %2929 = vmatprep.subr.bf16.mxu1 %v3190_v22 }
  0xc7   :  { %2918 = vmatpush3.bf16.msra.mxu0 %v3178_v26 }
  0xc8   :  { %2919 = vmatprep.subr.bf16.mxu0 %v3190_v22 }
  0xc9   :  { %2930 = vmatpush3.bf16.msra.mxu1 %v3183_v48 }
  0xca   :  { %2931 = vmatprep.subr.bf16.mxu1 %v3190_v22 }
  0xcb   :  { %2920 = vmatpush3.bf16.msra.mxu0 %v3179_v27 }
  0xcc   :  { %2921 = vmatprep.subr.bf16.mxu0 %v3190_v22 }
  0xcd   :  { %2932 = vmatpush3.bf16.msra.mxu1 %v3184_v1 }
  0xce   :  { %2933 = vmatprep.subr.bf16.mxu1 %v3190_v22 }
  0xcf   :  { %2922 = vmatpush3.bf16.msra.mxu0 %v3180_v28 }
  0xd1   :  { %2934 = vmatpush3.bf16.msra.mxu1 %v3185_v2 }
  0xd2   :  { %2924 = vmatmul.mubr.msk.bf16.vlgmr.msra.gmra.mrb[24].mxu0 %vm1747_vm1, %v3181_v29  ;;  %2935 = vmatprep.subr.bf16.mxu1 %v3190_v22 }
  0xd5   :  { %2936 = vmatpush3.bf16.msra.mxu1 %v3186_v3 }
  0xd6   :  { %2937 = vmatprep.subr.bf16.mxu1 %v3190_v22 }
  0xd9   :  { %2938 = vmatpush3.bf16.msra.mxu1 %v3187_v4 }
  0xda   :  { %2939 = vmatprep.subr.bf16.mxu1 %v3190_v22 }
  0xdd   :  { %2940 = vmatpush3.bf16.msra.mxu1 %v3188_v5 }
  0xde   :  { %2941 = vmatprep.subr.bf16.mxu1 %v3190_v22 }
  0xe1   :  { %2942 = vmatpush3.bf16.msra.mxu1 %v3189_v6 }
  0xf5   :  { %v2653_v30 = vpop.f32.mrb[0].mxu0 }
  0xf6   :  { %v2654_v32 = vpop.f32.mrb[1].mxu0 }
  0xf7   :  { %v2655_v33 = vadd.f32 %v2654_v32, %v2653_v30  ;;  %v2656_v34 = vpop.f32.mrb[2].mxu0  ;;  %v2675_v35 = vpop.f32.mrb[0].mxu1 }
  0xf8   :  { %v2657_v36 = vpop.f32.mrb[3].mxu0  ;;  %v2676_v39 = vpop.f32.mrb[1].mxu1 }
  0xf9   :  { %v1786_v37 = vadd.f32 %v2655_v33, %v2405_v31  ;;  %v2658_v38 = vadd.f32 %v2657_v36, %v2656_v34  ;;  %v2677_v40 = vadd.f32 %v2676_v39, %v2675_v35  ;;  %v2678_v41 = vpop.f32.mrb[2].mxu1 }
  0xfa   :  { %v2679_v43 = vpop.f32.mrb[3].mxu1 }
  0xfb   :  { %v1789_v42 = vadd.f32 %v2658_v38, %v2405_v31  ;;  %v1827_v44 = vadd.f32 %v2677_v40, %v1786_v37  ;;  %v2680_v45 = vadd.f32 %v2679_v43, %v2678_v41 }
  0xfd   :  { %v1830_v46 = vadd.f32 %v2680_v45, %v1789_v42 }
 0x115   :  { %v2697_v49 = vpop.f32.mrb[4].mxu0 }
 0x116   :  { %v2698_v50 = vpop.f32.mrb[5].mxu0 }
 0x117   :  { %v2699_v51 = vadd.f32 %v2698_v50, %v2697_v49  ;;  %v2700_v52 = vpop.f32.mrb[6].mxu0  ;;  %v2719_v55 = vpop.f32.mrb[4].mxu1 }
 0x118   :  { %v2701_v53 = vpop.f32.mrb[7].mxu0  ;;  %v2720_v57 = vpop.f32.mrb[5].mxu1 }
 0x119   :  { %v1868_v54 = vadd.f32 %v2699_v51, %v1827_v44  ;;  %v2702_v56 = vadd.f32 %v2701_v53, %v2700_v52  ;;  %v2721_v59 = vadd.f32 %v2720_v57, %v2719_v55  ;;  %v2722_v60 = vpop.f32.mrb[6].mxu1 }
 0x11a   :  { %v2723_v61 = vpop.f32.mrb[7].mxu1 }
 0x11b   :  { %v1871_v58 = vadd.f32 %v2702_v56, %v1830_v46  ;;  %v1909_v62 = vadd.f32 %v2721_v59, %v1868_v54  ;;  %v2724_v63 = vadd.f32 %v2723_v61, %v2722_v60 }
 0x11d   :  { %v1912_v0 = vadd.f32 %v2724_v63, %v1871_v58 }
 0x135   :  { %v2741_v7 = vpop.f32.mrb[8].mxu0 }
 0x136   :  { %v2742_v8 = vpop.f32.mrb[9].mxu0 }
 0x137   :  { %v2743_v9 = vadd.f32 %v2742_v8, %v2741_v7  ;;  %v2744_v10 = vpop.f32.mrb[10].mxu0  ;;  %v2763_v11 = vpop.f32.mrb[8].mxu1 }
 0x138   :  { %v2745_v12 = vpop.f32.mrb[11].mxu0  ;;  %v2764_v15 = vpop.f32.mrb[9].mxu1 }
 0x139   :  { %v1950_v13 = vadd.f32 %v2743_v9, %v1909_v62  ;;  %v2746_v14 = vadd.f32 %v2745_v12, %v2744_v10  ;;  %v2765_v16 = vadd.f32 %v2764_v15, %v2763_v11  ;;  %v2766_v17 = vpop.f32.mrb[10].mxu1 }
 0x13a   :  { %v2767_v19 = vpop.f32.mrb[11].mxu1 }
 0x13b   :  { %v1953_v18 = vadd.f32 %v2746_v14, %v1912_v0  ;;  %v1991_v20 = vadd.f32 %v2765_v16, %v1950_v13  ;;  %v2768_v21 = vadd.f32 %v2767_v19, %v2766_v17  ;;  %v2628_v16 = vld [vmem:[%s3939_s4] ss:$0 sm:$0xff] }
 0x13d   :  { %v1994_v22 = vadd.f32 %v2768_v21, %v1953_v18 }
 0x155   :  { %v2785_v23 = vpop.f32.mrb[12].mxu0 }
 0x156   :  { %v2786_v24 = vpop.f32.mrb[13].mxu0 }
 0x157   :  { %v2787_v25 = vadd.f32 %v2786_v24, %v2785_v23  ;;  %v2788_v26 = vpop.f32.mrb[14].mxu0  ;;  %v2807_v27 = vpop.f32.mrb[12].mxu1 }
 0x158   :  { %v2789_v28 = vpop.f32.mrb[15].mxu0  ;;  %v2808_v31 = vpop.f32.mrb[13].mxu1 }
 0x159   :  { %v2032_v29 = vadd.f32 %v2787_v25, %v1991_v20  ;;  %v2790_v30 = vadd.f32 %v2789_v28, %v2788_v26  ;;  %v2809_v32 = vadd.f32 %v2808_v31, %v2807_v27  ;;  %v2810_v33 = vpop.f32.mrb[14].mxu1 }
 0x15a   :  { %v2811_v35 = vpop.f32.mrb[15].mxu1 }
 0x15b   :  { %v2035_v34 = vadd.f32 %v2790_v30, %v1994_v22  ;;  %v2073_v36 = vadd.f32 %v2809_v32, %v2032_v29  ;;  %v2812_v37 = vadd.f32 %v2811_v35, %v2810_v33 }
 0x15d   :  { %v2076_v38 = vadd.f32 %v2812_v37, %v2035_v34 }
 0x175   :  { %v2829_v39 = vpop.f32.mrb[16].mxu0 }
 0x176   :  { %v2830_v40 = vpop.f32.mrb[17].mxu0 }
 0x177   :  { %v2831_v41 = vadd.f32 %v2830_v40, %v2829_v39  ;;  %v2832_v42 = vpop.f32.mrb[18].mxu0  ;;  %v2851_v45 = vpop.f32.mrb[16].mxu1 }
 0x178   :  { %v2833_v43 = vpop.f32.mrb[19].mxu0  ;;  %v2852_v47 = vpop.f32.mrb[17].mxu1 }
 0x179   :  { %v2114_v44 = vadd.f32 %v2831_v41, %v2073_v36  ;;  %v2834_v46 = vadd.f32 %v2833_v43, %v2832_v42  ;;  %v2853_v49 = vadd.f32 %v2852_v47, %v2851_v45  ;;  %v2854_v50 = vpop.f32.mrb[18].mxu1 }
 0x17a   :  { %v2855_v51 = vpop.f32.mrb[19].mxu1 }
 0x17b   :  { %v2117_v48 = vadd.f32 %v2834_v46, %v2076_v38  ;;  %v2155_v52 = vadd.f32 %v2853_v49, %v2114_v44  ;;  %v2856_v53 = vadd.f32 %v2855_v51, %v2854_v50 }
 0x17d   :  { %v2158_v54 = vadd.f32 %v2856_v53, %v2117_v48 }
 0x195   :  { %v2873_v55 = vpop.f32.mrb[20].mxu0 }
 0x196   :  { %v2874_v56 = vpop.f32.mrb[21].mxu0 }
 0x197   :  { %v2875_v57 = vadd.f32 %v2874_v56, %v2873_v55  ;;  %v2876_v58 = vpop.f32.mrb[22].mxu0  ;;  %v2895_v59 = vpop.f32.mrb[20].mxu1 }
 0x198   :  { %v2877_v60 = vpop.f32.mrb[23].mxu0  ;;  %v2896_v63 = vpop.f32.mrb[21].mxu1 }
 0x199   :  { %v2196_v61 = vadd.f32 %v2875_v57, %v2155_v52  ;;  %v2878_v62 = vadd.f32 %v2877_v60, %v2876_v58  ;;  %v2897_v0 = vadd.f32 %v2896_v63, %v2895_v59  ;;  %v2898_v1 = vpop.f32.mrb[22].mxu1 }
 0x19a   :  { %v2899_v3 = vpop.f32.mrb[23].mxu1 }
 0x19b   :  { %v2199_v2 = vadd.f32 %v2878_v62, %v2158_v54  ;;  %v2900_v4 = vadd.f32 %v2899_v3, %v2898_v1  ;;  %v2237_v5 = vadd.f32 %v2897_v0, %v2196_v61 }
 0x19d   :  { %v2240_v6 = vadd.f32 %v2900_v4, %v2199_v2 }
 0x1a5   :  { %v2277_v7 = vpop.f32.mrb[24].mxu0 }
 0x1a6   :  { %v2278_v8 = vadd.f32 %v2277_v7, %v2237_v5  ;;  %v2925_v9 = vpop.f32.mrb[25].mxu0 }
 0x1a7   :  { %v2280_v10 = vpop.f32.mrb[26].mxu0 }
 0x1a8   :  { %v2281_v11 = vadd.f32 %v2280_v10, %v2240_v6  ;;  %v2926_v12 = vpop.f32.mrb[27].mxu0  ;;  %v2284_v13 = vmax.f32 %v2278_v8, 0.0 }
 0x1aa   :  { %v2285_v14 = vmax.f32 %v2281_v11, 0.0 }
 0x1ac   :  { %v2286_v15 = vpack.c.bf16 %v2285_v14, %v2284_v13 }
 0x1ae   :  { %2944 = vmatmul.mubr.bf16.vlgmr.msra.gmra.mrb[24].mxu1 %v2286_v15 }
 0x281   :  { %v2392_v17 = vpop.f32.mrb[24].mxu1 }
 0x282   :  { %v2393_v18 = vadd.f32 %v2628_v16, %v2392_v17  ;;  %v2945_v19 = vpop.f32.mrb[25].mxu1 }
 0x283   :  { %v2395_v20 = vpop.f32.mrb[26].mxu1 }
 0x284   :  { %2399 = vst [vmem:[%s3940_s5] sm:$0xff] %v2393_v18  ;;  %v2396_v21 = vadd.f32 %v2628_v16, %v2395_v20  ;;  %v2946_v22 = vpop.f32.mrb[27].mxu1 }
 0x286   :  { %2400 = vst [vmem:[%s3940_s5 + $0x8] sm:$0xff] %v2396_v21 }

// kernel: cnn_forward.4
= control target key start
LH: loop header
LB: loop body
LE: loop exit
PB: predicated region body
PF: predicated region fallthrough
CT: control target
= control target key end

     0   :  { %vm6909_vm0 = vcmask 1043456   ;;  %vm6910_vm1 = vcmask 523268   ;;  %s15408_s1 = inlined_call_operand.vmem [shape: bf16[6,512,448], index: 1, kind: input, shape index: {}]   ;;  %s15409_s0 = inlined_call_operand.vmem [shape: bf16[4,16,512], index: 0, kind: input, shape index: {}]   ;;  %s15410_s2 = inlined_call_operand.vmem [shape: f32[1,448], index: 2, kind: input, shape index: {}]   ;;  %s15411_s3 = inlined_call_operand.vmem [shape: bf16[16,448], index: 3, kind: output, shape index: {}]  }
   0x1   :  { %v8523_v0 = vld [vmem:[%s15408_s1 + $0x404] ss:$16 sps:$4 sm:$0xff]   ;;  %v8525_v1 = vld [vmem:[%s15408_s1 + $0x40c] ss:$16 sps:$4 sm:$0xff]   ;;  %v8527_v2 = vld [vmem:[%s15408_s1 + $0x400] ss:$16 sps:$4 sm:$0xff]  }
   0x2   :  { %950 = vmatprep.subr.bf16.mxu0 %v8523_v0  ;;  %v8528_v3 = vld [vmem:[%s15408_s1 + $0x408] ss:$16 sps:$4 sm:$0xff]   ;;  %1036 = vmatprep.subr.bf16.mxu1 %v8525_v1  ;;  %v8529_v4 = vld [vmem:[%s15408_s1 + $0x424] ss:$16 sps:$4 sm:$0xff]   ;;  %v8531_v5 = vld [vmem:[%s15408_s1 + $0x42c] ss:$16 sps:$4 sm:$0xff]  }
   0x3   :  { %951 = vmatpush1.bf16.msra.mxu0 %v8527_v2  ;;  %1037 = vmatpush1.bf16.msra.mxu1 %v8528_v3  ;;  %v8533_v6 = vld [vmem:[%s15408_s1 + $0x420] ss:$16 sps:$4 sm:$0xff]   ;;  %v8534_v7 = vld [vmem:[%s15408_s1 + $0x428] ss:$16 sps:$4 sm:$0xff]   ;;  %v8535_v8 = vld [vmem:[%s15408_s1 + $0x444] ss:$16 sps:$4 sm:$0xff]  }
   0x4   :  { %952 = vmatprep.subr.bf16.mxu0 %v8529_v4  ;;  %1038 = vmatprep.subr.bf16.mxu1 %v8531_v5  ;;  %v8537_v9 = vld [vmem:[%s15408_s1 + $0x44c] ss:$16 sps:$4 sm:$0xff]   ;;  %v8539_v10 = vld [vmem:[%s15408_s1 + $0x440] ss:$16 sps:$4 sm:$0xff]   ;;  %v8540_v11 = vld [vmem:[%s15408_s1 + $0x448] ss:$16 sps:$4 sm:$0xff]  }
   0x5   :  { %v8541_v12 = vld [vmem:[%s15408_s1 + $0x464] ss:$16 sps:$4 sm:$0xff]   ;;  %v8543_v13 = vld [vmem:[%s15408_s1 + $0x46c] ss:$16 sps:$4 sm:$0xff]   ;;  %v8545_v14 = vld [vmem:[%s15408_s1 + $0x460] ss:$16 sps:$4 sm:$0xff]  }
   0x6   :  { %v8546_v15 = vld [vmem:[%s15408_s1 + $0x468] ss:$16 sps:$4 sm:$0xff]   ;;  %v8547_v16 = vld [vmem:[%s15408_s1 + $0x484] ss:$16 sps:$4 sm:$0xff]   ;;  %v8549_v17 = vld [vmem:[%s15408_s1 + $0x48c] ss:$16 sps:$4 sm:$0xff]  }
   0x7   :  { %953 = vmatpush1.bf16.msra.mxu0 %v8533_v6  ;;  %1039 = vmatpush1.bf16.msra.mxu1 %v8534_v7  ;;  %v8551_v18 = vld [vmem:[%s15408_s1 + $0x480] ss:$16 sps:$4 sm:$0xff]   ;;  %v8552_v19 = vld [vmem:[%s15408_s1 + $0x488] ss:$16 sps:$4 sm:$0xff]   ;;  %v8553_v20 = vld [vmem:[%s15408_s1 + $0x4a4] ss:$16 sps:$4 sm:$0xff]  }
   0x8   :  { %954 = vmatprep.subr.bf16.mxu0 %v8535_v8  ;;  %1040 = vmatprep.subr.bf16.mxu1 %v8537_v9  ;;  %v8555_v21 = vld [vmem:[%s15408_s1 + $0x4ac] ss:$16 sps:$4 sm:$0xff]   ;;  %v8557_v22 = vld [vmem:[%s15408_s1 + $0x4a0] ss:$16 sps:$4 sm:$0xff]   ;;  %v8558_v23 = vld [vmem:[%s15408_s1 + $0x4a8] ss:$16 sps:$4 sm:$0xff]  }
   0x9   :  { %v8559_v24 = vld [vmem:[%s15408_s1 + $0x4c4] ss:$16 sps:$4 sm:$0xff]   ;;  %v8561_v25 = vld [vmem:[%s15408_s1 + $0x4cc] ss:$16 sps:$4 sm:$0xff]   ;;  %v8563_v26 = vld [vmem:[%s15408_s1 + $0x4c0] ss:$16 sps:$4 sm:$0xff]  }
   0xa   :  { %v8564_v27 = vld [vmem:[%s15408_s1 + $0x4c8] ss:$16 sps:$4 sm:$0xff]   ;;  %v8565_v28 = vld [vmem:[%s15408_s1 + $0x4e4] ss:$16 sps:$4 sm:$0xff]   ;;  %v8567_v29 = vld [vmem:[%s15408_s1 + $0x4ec] ss:$16 sps:$4 sm:$0xff]  }
   0xb   :  { %955 = vmatpush1.bf16.msra.mxu0 %v8539_v10  ;;  %1041 = vmatpush1.bf16.msra.mxu1 %v8540_v11  ;;  %v8569_v30 = vld [vmem:[%s15408_s1 + $0x4e0] ss:$16 sps:$4 sm:$0xff]   ;;  %v8570_v31 = vld [vmem:[%s15408_s1 + $0x4e8] ss:$16 sps:$4 sm:$0xff]   ;;  %v8571_v32 = vld [vmem:[%s15408_s1 + $0x504] ss:$16 sps:$4 sm:$0xff]  }
   0xc   :  { %956 = vmatprep.subr.bf16.mxu0 %v8541_v12  ;;  %1042 = vmatprep.subr.bf16.mxu1 %v8543_v13  ;;  %v8573_v33 = vld [vmem:[%s15408_s1 + $0x50c] ss:$16 sps:$4 sm:$0xff]   ;;  %v8575_v34 = vld [vmem:[%s15408_s1 + $0x500] ss:$16 sps:$4 sm:$0xff]   ;;  %v8576_v35 = vld [vmem:[%s15408_s1 + $0x508] ss:$16 sps:$4 sm:$0xff]  }
   0xd   :  { %v8577_v36 = vld [vmem:[%s15408_s1 + $0x524] ss:$16 sps:$4 sm:$0xff]   ;;  %v8579_v37 = vld [vmem:[%s15408_s1 + $0x52c] ss:$16 sps:$4 sm:$0xff]   ;;  %v8581_v38 = vld [vmem:[%s15408_s1 + $0x520] ss:$16 sps:$4 sm:$0xff]  }
   0xe   :  { %v8582_v39 = vld [vmem:[%s15408_s1 + $0x528] ss:$16 sps:$4 sm:$0xff]   ;;  %v8583_v40 = vld [vmem:[%s15408_s1 + $0x544] ss:$16 sps:$4 sm:$0xff]   ;;  %v8585_v41 = vld [vmem:[%s15408_s1 + $0x54c] ss:$16 sps:$4 sm:$0xff]  }
   0xf   :  { %957 = vmatpush1.bf16.msra.mxu0 %v8545_v14  ;;  %1043 = vmatpush1.bf16.msra.mxu1 %v8546_v15  ;;  %v8587_v42 = vld [vmem:[%s15408_s1 + $0x540] ss:$16 sps:$4 sm:$0xff]   ;;  %v8588_v43 = vld [vmem:[%s15408_s1 + $0x548] ss:$16 sps:$4 sm:$0xff]   ;;  %v8589_v44 = vld [vmem:[%s15408_s1 + $0x564] ss:$16 sps:$4 sm:$0xff]  }
  0x10   :  { %958 = vmatprep.subr.bf16.mxu0 %v8547_v16  ;;  %1044 = vmatprep.subr.bf16.mxu1 %v8549_v17  ;;  %v8591_v45 = vld [vmem:[%s15408_s1 + $0x56c] ss:$16 sps:$4 sm:$0xff]   ;;  %v8593_v46 = vld [vmem:[%s15408_s1 + $0x560] ss:$16 sps:$4 sm:$0xff]   ;;  %v8619_v47 = vld [vmem:[%s15409_s0 + $0x24] ss:$16 sps:$4 sm:$0xff]  }
  0x11   :  { %v8594_v48 = vld [vmem:[%s15408_s1 + $0x568] ss:$16 sps:$4 sm:$0xff]   ;;  %v8595_v49 = vld [vmem:[%s15408_s1 + $0x584] ss:$16 sps:$4 sm:$0xff]   ;;  %v8597_v50 = vld [vmem:[%s15408_s1 + $0x58c] ss:$16 sps:$4 sm:$0xff]   ;;  %982 = vmatprep.mubr.bf16.mxu0 %v8619_v47  ;;  %1068 = vmatprep.mubr.bf16.mxu1 %v8619_v47 }
  0x12   :  { %v8599_v51 = vld [vmem:[%s15408_s1 + $0x580] ss:$16 sps:$4 sm:$0xff]   ;;  %v8600_v52 = vld [vmem:[%s15408_s1 + $0x588] ss:$16 sps:$4 sm:$0xff]   ;;  %v8601_v53 = vld [vmem:[%s15408_s1 + $0x5a4] ss:$16 sps:$4 sm:$0xff]  }
  0x13   :  { %959 = vmatpush1.bf16.msra.mxu0 %v8551_v18  ;;  %1045 = vmatpush1.bf16.msra.mxu1 %v8552_v19  ;;  %v8603_v54 = vld [vmem:[%s15408_s1 + $0x5ac] ss:$16 sps:$4 sm:$0xff]   ;;  %v8605_v55 = vld [vmem:[%s15408_s1 + $0x5a0] ss:$16 sps:$4 sm:$0xff]   ;;  %v8606_v56 = vld [vmem:[%s15408_s1 + $0x5a8] ss:$16 sps:$4 sm:$0xff]  }
  0x14   :  { %960 = vmatprep.subr.bf16.mxu0 %v8553_v20  ;;  %1046 = vmatprep.subr.bf16.mxu1 %v8555_v21  ;;  %v8607_v57 = vld [vmem:[%s15408_s1 + $0x5c4] ss:$16 sps:$4 sm:$0xff]   ;;  %v8609_v58 = vld [vmem:[%s15408_s1 + $0x5cc] ss:$16 sps:$4 sm:$0xff]   ;;  %v8611_v59 = vld [vmem:[%s15408_s1 + $0x5c0] ss:$16 sps:$4 sm:$0xff]  }
  0x15   :  { %v8612_v60 = vld [vmem:[%s15408_s1 + $0x5c8] ss:$16 sps:$4 sm:$0xff]   ;;  %v8613_v61 = vld [vmem:[%s15408_s1 + $0x5e4] ss:$16 sps:$4 sm:$0xff]   ;;  %v8615_v62 = vld [vmem:[%s15408_s1 + $0x5ec] ss:$16 sps:$4 sm:$0xff]  }
  0x16   :  { %v8617_v63 = vld [vmem:[%s15408_s1 + $0x5e0] ss:$16 sps:$4 sm:$0xff]   ;;  %v8618_v0 = vld [vmem:[%s15408_s1 + $0x5e8] ss:$16 sps:$4 sm:$0xff]   ;;  %v8623_v1 = vld [vmem:[%s15408_s1 + $0x604] ss:$16 sps:$4 sm:$0xff]  }
  0x17   :  { %961 = vmatpush1.bf16.msra.mxu0 %v8557_v22  ;;  %1047 = vmatpush1.bf16.msra.mxu1 %v8558_v23  ;;  %v8626_v2 = vld [vmem:[%s15408_s1 + $0x60c] ss:$16 sps:$4 sm:$0xff]   ;;  %v8621_v3 = vld [vmem:[%s15408_s1 + $0x600] ss:$16 sps:$4 sm:$0xff]   ;;  %v8624_v4 = vld [vmem:[%s15408_s1 + $0x608] ss:$16 sps:$4 sm:$0xff]  }
  0x18   :  { %962 = vmatprep.subr.bf16.mxu0 %v8559_v24  ;;  %1048 = vmatprep.subr.bf16.mxu1 %v8561_v25  ;;  %v8627_v5 = vld [vmem:[%s15409_s0 + $0x20] ss:$16 sps:$4 sm:$0xff]   ;;  %v8630_v6 = vld [vmem:[%s15408_s1 + $0x624] ss:$16 sps:$4 sm:$0xff]   ;;  %v8633_v7 = vld [vmem:[%s15408_s1 + $0x62c] ss:$16 sps:$4 sm:$0xff]  }
  0x19   :  { %v8628_v8 = vld [vmem:[%s15408_s1 + $0x620] ss:$16 sps:$4 sm:$0xff]   ;;  %v8631_v9 = vld [vmem:[%s15408_s1 + $0x628] ss:$16 sps:$4 sm:$0xff]   ;;  %v8636_v10 = vld [vmem:[%s15408_s1 + $0x644] ss:$16 sps:$4 sm:$0xff]  }
  0x1a   :  { %v8639_v11 = vld [vmem:[%s15408_s1 + $0x64c] ss:$16 sps:$4 sm:$0xff]   ;;  %v8634_v12 = vld [vmem:[%s15408_s1 + $0x640] ss:$16 sps:$4 sm:$0xff]   ;;  %v8637_v13 = vld [vmem:[%s15408_s1 + $0x648] ss:$16 sps:$4 sm:$0xff]  }
  0x1b   :  { %963 = vmatpush1.bf16.msra.mxu0 %v8563_v26  ;;  %1049 = vmatpush1.bf16.msra.mxu1 %v8564_v27  ;;  %v8642_v14 = vld [vmem:[%s15408_s1 + $0x664] ss:$16 sps:$4 sm:$0xff]   ;;  %v8645_v15 = vld [vmem:[%s15408_s1 + $0x66c] ss:$16 sps:$4 sm:$0xff]   ;;  %v8640_v16 = vld [vmem:[%s15408_s1 + $0x660] ss:$16 sps:$4 sm:$0xff]  }
  0x1c   :  { %964 = vmatprep.subr.bf16.mxu0 %v8565_v28  ;;  %1050 = vmatprep.subr.bf16.mxu1 %v8567_v29  ;;  %v8643_v17 = vld [vmem:[%s15408_s1 + $0x668] ss:$16 sps:$4 sm:$0xff]   ;;  %v8648_v18 = vld [vmem:[%s15408_s1 + $0x684] ss:$16 sps:$4 sm:$0xff]   ;;  %v8651_v19 = vld [vmem:[%s15408_s1 + $0x68c] ss:$16 sps:$4 sm:$0xff]  }
  0x1d   :  { %v8646_v20 = vld [vmem:[%s15408_s1 + $0x680] ss:$16 sps:$4 sm:$0xff]   ;;  %v8649_v21 = vld [vmem:[%s15408_s1 + $0x688] ss:$16 sps:$4 sm:$0xff]   ;;  %v8654_v22 = vld [vmem:[%s15408_s1 + $0x6a4] ss:$16 sps:$4 sm:$0xff]  }
  0x1e   :  { %v8657_v23 = vld [vmem:[%s15408_s1 + $0x6ac] ss:$16 sps:$4 sm:$0xff]   ;;  %v8652_v24 = vld [vmem:[%s15408_s1 + $0x6a0] ss:$16 sps:$4 sm:$0xff]   ;;  %v8655_v25 = vld [vmem:[%s15408_s1 + $0x6a8] ss:$16 sps:$4 sm:$0xff]  }
  0x1f   :  { %965 = vmatpush1.bf16.msra.mxu0 %v8569_v30  ;;  %1051 = vmatpush1.bf16.msra.mxu1 %v8570_v31  ;;  %v8660_v26 = vld [vmem:[%s15408_s1 + $0x6c4] ss:$16 sps:$4 sm:$0xff]   ;;  %v8663_v27 = vld [vmem:[%s15408_s1 + $0x6cc] ss:$16 sps:$4 sm:$0xff]   ;;  %v8658_v28 = vld [vmem:[%s15408_s1 + $0x6c0] ss:$16 sps:$4 sm:$0xff]  }
  0x20   :  { %966 = vmatprep.subr.bf16.mxu0 %v8571_v32  ;;  %1052 = vmatprep.subr.bf16.mxu1 %v8573_v33  ;;  %v8718_v29 = vld [vmem:[%s15409_s0 + $0x2c] ss:$16 sps:$4 sm:$0xff]   ;;  %v8661_v30 = vld [vmem:[%s15408_s1 + $0x6c8] ss:$16 sps:$4 sm:$0xff]   ;;  %v8666_v31 = vld [vmem:[%s15408_s1 + $0x6e4] ss:$16 sps:$4 sm:$0xff]  }
  0x21   :  { %v8669_v32 = vld [vmem:[%s15408_s1 + $0x6ec] ss:$16 sps:$4 sm:$0xff]   ;;  %v8664_v33 = vld [vmem:[%s15408_s1 + $0x6e0] ss:$16 sps:$4 sm:$0xff]   ;;  %v8690_v47 = vld [vmem:[%s15408_s1 + $0x764] ss:$16 sps:$4 sm:$0xff]  }
  0x22   :  { %vm6911_vm2 = vmor %vm6910_vm1, %vm6909_vm0 }
  0x23   :  { %967 = vmatpush1.bf16.msra.mxu0 %v8575_v34  ;;  %1053 = vmatpush1.bf16.msra.mxu1 %v8576_v35  ;;  %v8667_v34 = vld [vmem:[%s15408_s1 + $0x6e8] ss:$16 sps:$4 sm:$0xff]   ;;  %v8672_v35 = vld [vmem:[%s15408_s1 + $0x704] ss:$16 sps:$4 sm:$0xff]  }
  0x24   :  { %968 = vmatprep.subr.bf16.mxu0 %v8577_v36  ;;  %1054 = vmatprep.subr.bf16.mxu1 %v8579_v37  ;;  %v8675_v36 = vld [vmem:[%s15408_s1 + $0x70c] ss:$16 sps:$4 sm:$0xff]   ;;  %v8670_v37 = vld [vmem:[%s15408_s1 + $0x700] ss:$16 sps:$4 sm:$0xff]  }
  0x27   :  { %969 = vmatpush1.bf16.msra.mxu0 %v8581_v38  ;;  %1055 = vmatpush1.bf16.msra.mxu1 %v8582_v39  ;;  %v8673_v38 = vld [vmem:[%s15408_s1 + $0x708] ss:$16 sps:$4 sm:$0xff]   ;;  %v8678_v39 = vld [vmem:[%s15408_s1 + $0x724] ss:$16 sps:$4 sm:$0xff]  }
  0x28   :  { %970 = vmatprep.subr.bf16.mxu0 %v8583_v40  ;;  %1056 = vmatprep.subr.bf16.mxu1 %v8585_v41  ;;  %v8681_v40 = vld [vmem:[%s15408_s1 + $0x72c] ss:$16 sps:$4 sm:$0xff]   ;;  %v8676_v41 = vld [vmem:[%s15408_s1 + $0x720] ss:$16 sps:$4 sm:$0xff]  }
  0x2b   :  { %971 = vmatpush1.bf16.msra.mxu0 %v8587_v42  ;;  %1057 = vmatpush1.bf16.msra.mxu1 %v8588_v43  ;;  %v8679_v42 = vld [vmem:[%s15408_s1 + $0x728] ss:$16 sps:$4 sm:$0xff]   ;;  %v8684_v43 = vld [vmem:[%s15408_s1 + $0x744] ss:$16 sps:$4 sm:$0xff]  }
  0x2c   :  { %972 = vmatprep.subr.bf16.mxu0 %v8589_v44  ;;  %1058 = vmatprep.subr.bf16.mxu1 %v8591_v45  ;;  %v8687_v44 = vld [vmem:[%s15408_s1 + $0x74c] ss:$16 sps:$4 sm:$0xff]   ;;  %v8682_v45 = vld [vmem:[%s15408_s1 + $0x740] ss:$16 sps:$4 sm:$0xff]  }
  0x2f   :  { %973 = vmatpush1.bf16.msra.mxu0 %v8593_v46  ;;  %1059 = vmatpush1.bf16.msra.mxu1 %v8594_v48  ;;  %v8685_v46 = vld [vmem:[%s15408_s1 + $0x748] ss:$16 sps:$4 sm:$0xff]   ;;  %v8693_v48 = vld [vmem:[%s15408_s1 + $0x76c] ss:$16 sps:$4 sm:$0xff]  }
  0x30   :  { %974 = vmatprep.subr.bf16.mxu0 %v8595_v49  ;;  %1060 = vmatprep.subr.bf16.mxu1 %v8597_v50  ;;  %v8688_v49 = vld [vmem:[%s15408_s1 + $0x760] ss:$16 sps:$4 sm:$0xff]   ;;  %v8691_v50 = vld [vmem:[%s15408_s1 + $0x768] ss:$16 sps:$4 sm:$0xff]  }
  0x33   :  { %975 = vmatpush1.bf16.msra.mxu0 %v8599_v51  ;;  %1061 = vmatpush1.bf16.msra.mxu1 %v8600_v52  ;;  %v8696_v51 = vld [vmem:[%s15408_s1 + $0x784] ss:$16 sps:$4 sm:$0xff]   ;;  %v8699_v52 = vld [vmem:[%s15408_s1 + $0x78c] ss:$16 sps:$4 sm:$0xff]  }
  0x34   :  { %976 = vmatprep.subr.bf16.mxu0 %v8601_v53  ;;  %1062 = vmatprep.subr.bf16.mxu1 %v8603_v54  ;;  %v8694_v53 = vld [vmem:[%s15408_s1 + $0x780] ss:$16 sps:$4 sm:$0xff]   ;;  %v8697_v54 = vld [vmem:[%s15408_s1 + $0x788] ss:$16 sps:$4 sm:$0xff]  }
  0x37   :  { %977 = vmatpush1.bf16.msra.mxu0 %v8605_v55  ;;  %1063 = vmatpush1.bf16.msra.mxu1 %v8606_v56  ;;  %v8702_v55 = vld [vmem:[%s15408_s1 + $0x7a4] ss:$16 sps:$4 sm:$0xff]   ;;  %v8705_v56 = vld [vmem:[%s15408_s1 + $0x7ac] ss:$16 sps:$4 sm:$0xff]  }
  0x38   :  { %978 = vmatprep.subr.bf16.mxu0 %v8607_v57  ;;  %1064 = vmatprep.subr.bf16.mxu1 %v8609_v58  ;;  %v8700_v57 = vld [vmem:[%s15408_s1 + $0x7a0] ss:$16 sps:$4 sm:$0xff]   ;;  %v8703_v58 = vld [vmem:[%s15408_s1 + $0x7a8] ss:$16 sps:$4 sm:$0xff]  }
  0x3b   :  { %979 = vmatpush1.bf16.msra.mxu0 %v8611_v59  ;;  %1065 = vmatpush1.bf16.msra.mxu1 %v8612_v60  ;;  %v8708_v59 = vld [vmem:[%s15408_s1 + $0x7c4] ss:$16 sps:$4 sm:$0xff]   ;;  %v8711_v60 = vld [vmem:[%s15408_s1 + $0x7cc] ss:$16 sps:$4 sm:$0xff]  }
  0x3c   :  { %980 = vmatprep.subr.bf16.mxu0 %v8613_v61  ;;  %1066 = vmatprep.subr.bf16.mxu1 %v8615_v62  ;;  %v8706_v61 = vld [vmem:[%s15408_s1 + $0x7c0] ss:$16 sps:$4 sm:$0xff]   ;;  %v8709_v62 = vld [vmem:[%s15408_s1 + $0x7c8] ss:$16 sps:$4 sm:$0xff]  }
  0x3f   :  { %981 = vmatpush1.bf16.msra.mxu0 %v8617_v63  ;;  %1067 = vmatpush1.bf16.msra.mxu1 %v8618_v0  ;;  %v8714_v63 = vld [vmem:[%s15408_s1 + $0x7e4] ss:$16 sps:$4 sm:$0xff]   ;;  %v8717_v0 = vld [vmem:[%s15408_s1 + $0x7ec] ss:$16 sps:$4 sm:$0xff]  }
  0x40   :  { %993 = vmatprep.subr.bf16.mxu0 %v8623_v1  ;;  %1079 = vmatprep.subr.bf16.mxu1 %v8626_v2  ;;  %v8712_v1 = vld [vmem:[%s15408_s1 + $0x7e0] ss:$16 sps:$4 sm:$0xff]   ;;  %v8715_v2 = vld [vmem:[%s15408_s1 + $0x7e8] ss:$16 sps:$4 sm:$0xff]  }
  0x42   :  { %983 = vmatmul.mubr.bf16.vlgmr.msra.gmra.mrb[0].mxu0 %v8627_v5  ;;  %1069 = vmatmul.mubr.bf16.vlgmr.msra.gmra.mrb[0].mxu1 %v8627_v5  ;;  %v8720_v5 = vld [vmem:[%s15408_s1] ss:$16 sps:$4 sm:$0xff]  }
  0x43   :  { %994 = vmatpush1.bf16.msra.mxu0 %v8621_v3  ;;  %1080 = vmatpush1.bf16.msra.mxu1 %v8624_v4  ;;  %v8722_v3 = vld [vmem:[%s15408_s1 + $0x4] ss:$16 sps:$4 sm:$0xff]   ;;  %v8725_v4 = vld [vmem:[%s15408_s1 + $0xc] ss:$16 sps:$4 sm:$0xff]  }
  0x44   :  { %995 = vmatprep.subr.bf16.mxu0 %v8630_v6  ;;  %1081 = vmatprep.subr.bf16.mxu1 %v8633_v7  ;;  %v8723_v6 = vld [vmem:[%s15408_s1 + $0x8] ss:$16 sps:$4 sm:$0xff]  }
  0x45   :  { %1025 = vmatprep.mubr.bf16.mxu0 %v8718_v29  ;;  %1111 = vmatprep.mubr.bf16.mxu1 %v8718_v29  ;;  %v8726_v7 = vld [vmem:[%s15409_s0 + $0x28] ss:$16 sps:$4 sm:$0xff]   ;;  %v8759_v29 = vld [vmem:[%s15408_s1 + $0xc4] ss:$16 sps:$4 sm:$0xff]  }
  0x47   :  { %996 = vmatpush1.bf16.msra.mxu0 %v8628_v8  ;;  %1082 = vmatpush1.bf16.msra.mxu1 %v8631_v9  ;;  %v8729_v8 = vld [vmem:[%s15408_s1 + $0x24] ss:$16 sps:$4 sm:$0xff]   ;;  %v8732_v9 = vld [vmem:[%s15408_s1 + $0x2c] ss:$16 sps:$4 sm:$0xff]  }
  0x48   :  { %997 = vmatprep.subr.bf16.mxu0 %v8636_v10  ;;  %1083 = vmatprep.subr.bf16.mxu1 %v8639_v11  ;;  %v8727_v10 = vld [vmem:[%s15408_s1 + $0x20] ss:$16 sps:$4 sm:$0xff]   ;;  %v8817_v11 = vld [vmem:[%s15409_s0 + $0x4] ss:$16 sps:$4 sm:$0xff]  }
  0x4b   :  { %998 = vmatpush1.bf16.msra.mxu0 %v8634_v12  ;;  %1084 = vmatpush1.bf16.msra.mxu1 %v8637_v13  ;;  %v8730_v12 = vld [vmem:[%s15408_s1 + $0x28] ss:$16 sps:$4 sm:$0xff]   ;;  %v8735_v13 = vld [vmem:[%s15408_s1 + $0x44] ss:$16 sps:$4 sm:$0xff]  }
  0x4c   :  { %999 = vmatprep.subr.bf16.mxu0 %v8642_v14  ;;  %1085 = vmatprep.subr.bf16.mxu1 %v8645_v15  ;;  %v8738_v14 = vld [vmem:[%s15408_s1 + $0x4c] ss:$16 sps:$4 sm:$0xff]   ;;  %v8733_v15 = vld [vmem:[%s15408_s1 + $0x40] ss:$16 sps:$4 sm:$0xff]  }
  0x4f   :  { %1000 = vmatpush1.bf16.msra.mxu0 %v8640_v16  ;;  %1086 = vmatpush1.bf16.msra.mxu1 %v8643_v17  ;;  %v8736_v16 = vld [vmem:[%s15408_s1 + $0x48] ss:$16 sps:$4 sm:$0xff]   ;;  %v8741_v17 = vld [vmem:[%s15408_s1 + $0x64] ss:$16 sps:$4 sm:$0xff]  }
  0x50   :  { %1001 = vmatprep.subr.bf16.mxu0 %v8648_v18  ;;  %1087 = vmatprep.subr.bf16.mxu1 %v8651_v19  ;;  %v8744_v18 = vld [vmem:[%s15408_s1 + $0x6c] ss:$16 sps:$4 sm:$0xff]   ;;  %v8739_v19 = vld [vmem:[%s15408_s1 + $0x60] ss:$16 sps:$4 sm:$0xff]  }
  0x53   :  { %1002 = vmatpush1.bf16.msra.mxu0 %v8646_v20  ;;  %1088 = vmatpush1.bf16.msra.mxu1 %v8649_v21  ;;  %v8742_v20 = vld [vmem:[%s15408_s1 + $0x68] ss:$16 sps:$4 sm:$0xff]   ;;  %v8747_v21 = vld [vmem:[%s15408_s1 + $0x84] ss:$16 sps:$4 sm:$0xff]  }
  0x54   :  { %1003 = vmatprep.subr.bf16.mxu0 %v8654_v22  ;;  %1089 = vmatprep.subr.bf16.mxu1 %v8657_v23  ;;  %v8750_v22 = vld [vmem:[%s15408_s1 + $0x8c] ss:$16 sps:$4 sm:$0xff]   ;;  %v8745_v23 = vld [vmem:[%s15408_s1 + $0x80] ss:$16 sps:$4 sm:$0xff]  }
  0x57   :  { %1004 = vmatpush1.bf16.msra.mxu0 %v8652_v24  ;;  %1090 = vmatpush1.bf16.msra.mxu1 %v8655_v25  ;;  %v8748_v24 = vld [vmem:[%s15408_s1 + $0x88] ss:$16 sps:$4 sm:$0xff]   ;;  %v8753_v25 = vld [vmem:[%s15408_s1 + $0xa4] ss:$16 sps:$4 sm:$0xff]  }
  0x58   :  { %1005 = vmatprep.subr.bf16.mxu0 %v8660_v26  ;;  %1091 = vmatprep.subr.bf16.mxu1 %v8663_v27  ;;  %v8756_v26 = vld [vmem:[%s15408_s1 + $0xac] ss:$16 sps:$4 sm:$0xff]   ;;  %v8751_v27 = vld [vmem:[%s15408_s1 + $0xa0] ss:$16 sps:$4 sm:$0xff]  }
  0x5b   :  { %1006 = vmatpush1.bf16.msra.mxu0 %v8658_v28  ;;  %1092 = vmatpush1.bf16.msra.mxu1 %v8661_v30  ;;  %v8754_v28 = vld [vmem:[%s15408_s1 + $0xa8] ss:$16 sps:$4 sm:$0xff]   ;;  %v8762_v30 = vld [vmem:[%s15408_s1 + $0xcc] ss:$16 sps:$4 sm:$0xff]  }
  0x5c   :  { %1007 = vmatprep.subr.bf16.mxu0 %v8666_v31  ;;  %1093 = vmatprep.subr.bf16.mxu1 %v8669_v32  ;;  %v8757_v31 = vld [vmem:[%s15408_s1 + $0xc0] ss:$16 sps:$4 sm:$0xff]   ;;  %v8760_v32 = vld [vmem:[%s15408_s1 + $0xc8] ss:$16 sps:$4 sm:$0xff]  }
  0x5f   :  { %1008 = vmatpush1.bf16.msra.mxu0 %v8664_v33  ;;  %1094 = vmatpush1.bf16.msra.mxu1 %v8667_v34  ;;  %v8765_v33 = vld [vmem:[%s15408_s1 + $0xe4] ss:$16 sps:$4 sm:$0xff]   ;;  %v8768_v34 = vld [vmem:[%s15408_s1 + $0xec] ss:$16 sps:$4 sm:$0xff]  }
  0x60   :  { %1009 = vmatprep.subr.bf16.mxu0 %v8672_v35  ;;  %1095 = vmatprep.subr.bf16.mxu1 %v8675_v36  ;;  %v8763_v35 = vld [vmem:[%s15408_s1 + $0xe0] ss:$16 sps:$4 sm:$0xff]   ;;  %v8766_v36 = vld [vmem:[%s15408_s1 + $0xe8] ss:$16 sps:$4 sm:$0xff]  }
  0x63   :  { %1010 = vmatpush1.bf16.msra.mxu0 %v8670_v37  ;;  %1096 = vmatpush1.bf16.msra.mxu1 %v8673_v38  ;;  %v8771_v37 = vld [vmem:[%s15408_s1 + $0x104] ss:$16 sps:$4 sm:$0xff]   ;;  %v8774_v38 = vld [vmem:[%s15408_s1 + $0x10c] ss:$16 sps:$4 sm:$0xff]  }
  0x64   :  { %1011 = vmatprep.subr.bf16.mxu0 %v8678_v39  ;;  %1097 = vmatprep.subr.bf16.mxu1 %v8681_v40  ;;  %v8769_v39 = vld [vmem:[%s15408_s1 + $0x100] ss:$16 sps:$4 sm:$0xff]   ;;  %v8772_v40 = vld [vmem:[%s15408_s1 + $0x108] ss:$16 sps:$4 sm:$0xff]  }
  0x67   :  { %1012 = vmatpush1.bf16.msra.mxu0 %v8676_v41  ;;  %1098 = vmatpush1.bf16.msra.mxu1 %v8679_v42  ;;  %v8777_v41 = vld [vmem:[%s15408_s1 + $0x124] ss:$16 sps:$4 sm:$0xff]   ;;  %v8780_v42 = vld [vmem:[%s15408_s1 + $0x12c] ss:$16 sps:$4 sm:$0xff]  }
  0x68   :  { %1013 = vmatprep.subr.bf16.mxu0 %v8684_v43  ;;  %1099 = vmatprep.subr.bf16.mxu1 %v8687_v44  ;;  %v8775_v43 = vld [vmem:[%s15408_s1 + $0x120] ss:$16 sps:$4 sm:$0xff]   ;;  %v8778_v44 = vld [vmem:[%s15408_s1 + $0x128] ss:$16 sps:$4 sm:$0xff]  }
  0x6b   :  { %1014 = vmatpush1.bf16.msra.mxu0 %v8682_v45  ;;  %1100 = vmatpush1.bf16.msra.mxu1 %v8685_v46  ;;  %v8783_v45 = vld [vmem:[%s15408_s1 + $0x144] ss:$16 sps:$4 sm:$0xff]   ;;  %v8786_v46 = vld [vmem:[%s15408_s1 + $0x14c] ss:$16 sps:$4 sm:$0xff]  }
  0x6c   :  { %1015 = vmatprep.subr.bf16.mxu0 %v8690_v47  ;;  %1101 = vmatprep.subr.bf16.mxu1 %v8693_v48  ;;  %v8781_v47 = vld [vmem:[%s15408_s1 + $0x140] ss:$16 sps:$4 sm:$0xff]   ;;  %v8784_v48 = vld [vmem:[%s15408_s1 + $0x148] ss:$16 sps:$4 sm:$0xff]  }
  0x6f   :  { %1016 = vmatpush1.bf16.msra.mxu0 %v8688_v49  ;;  %1102 = vmatpush1.bf16.msra.mxu1 %v8691_v50  ;;  %v8789_v49 = vld [vmem:[%s15408_s1 + $0x164] ss:$16 sps:$4 sm:$0xff]   ;;  %v8792_v50 = vld [vmem:[%s15408_s1 + $0x16c] ss:$16 sps:$4 sm:$0xff]  }
  0x70   :  { %1017 = vmatprep.subr.bf16.mxu0 %v8696_v51  ;;  %1103 = vmatprep.subr.bf16.mxu1 %v8699_v52  ;;  %v8787_v51 = vld [vmem:[%s15408_s1 + $0x160] ss:$16 sps:$4 sm:$0xff]   ;;  %v8790_v52 = vld [vmem:[%s15408_s1 + $0x168] ss:$16 sps:$4 sm:$0xff]  }
  0x73   :  { %1018 = vmatpush1.bf16.msra.mxu0 %v8694_v53  ;;  %1104 = vmatpush1.bf16.msra.mxu1 %v8697_v54  ;;  %v8795_v53 = vld [vmem:[%s15408_s1 + $0x184] ss:$16 sps:$4 sm:$0xff]   ;;  %v8798_v54 = vld [vmem:[%s15408_s1 + $0x18c] ss:$16 sps:$4 sm:$0xff]  }
  0x74   :  { %1019 = vmatprep.subr.bf16.mxu0 %v8702_v55  ;;  %1105 = vmatprep.subr.bf16.mxu1 %v8705_v56  ;;  %v8793_v55 = vld [vmem:[%s15408_s1 + $0x180] ss:$16 sps:$4 sm:$0xff]   ;;  %v8796_v56 = vld [vmem:[%s15408_s1 + $0x188] ss:$16 sps:$4 sm:$0xff]  }
  0x77   :  { %1020 = vmatpush1.bf16.msra.mxu0 %v8700_v57  ;;  %1106 = vmatpush1.bf16.msra.mxu1 %v8703_v58  ;;  %v8801_v57 = vld [vmem:[%s15408_s1 + $0x1a4] ss:$16 sps:$4 sm:$0xff]   ;;  %v8804_v58 = vld [vmem:[%s15408_s1 + $0x1ac] ss:$16 sps:$4 sm:$0xff]  }
  0x78   :  { %1021 = vmatprep.subr.bf16.mxu0 %v8708_v59  ;;  %1107 = vmatprep.subr.bf16.mxu1 %v8711_v60  ;;  %v8799_v59 = vld [vmem:[%s15408_s1 + $0x1a0] ss:$16 sps:$4 sm:$0xff]   ;;  %v8802_v60 = vld [vmem:[%s15408_s1 + $0x1a8] ss:$16 sps:$4 sm:$0xff]  }
  0x7b   :  { %1022 = vmatpush1.bf16.msra.mxu0 %v8706_v61  ;;  %1108 = vmatpush1.bf16.msra.mxu1 %v8709_v62  ;;  %v8807_v61 = vld [vmem:[%s15408_s1 + $0x1c4] ss:$16 sps:$4 sm:$0xff]   ;;  %v8810_v62 = vld [vmem:[%s15408_s1 + $0x1cc] ss:$16 sps:$4 sm:$0xff]  }
  0x7c   :  { %1023 = vmatprep.subr.bf16.mxu0 %v8714_v63  ;;  %1109 = vmatprep.subr.bf16.mxu1 %v8717_v0  ;;  %v8805_v63 = vld [vmem:[%s15408_s1 + $0x1c0] ss:$16 sps:$4 sm:$0xff]   ;;  %v8808_v0 = vld [vmem:[%s15408_s1 + $0x1c8] ss:$16 sps:$4 sm:$0xff]  }
  0x7f   :  { %1024 = vmatpush1.bf16.msra.mxu0 %v8712_v1  ;;  %1110 = vmatpush1.bf16.msra.mxu1 %v8715_v2  ;;  %v8813_v1 = vld [vmem:[%s15408_s1 + $0x1e4] ss:$16 sps:$4 sm:$0xff]   ;;  %v8816_v2 = vld [vmem:[%s15408_s1 + $0x1ec] ss:$16 sps:$4 sm:$0xff]  }
  0x80   :  { %1782 = vmatprep.subr.bf16.mxu0 %v8722_v3  ;;  %1868 = vmatprep.subr.bf16.mxu1 %v8725_v4  ;;  %v8811_v3 = vld [vmem:[%s15408_s1 + $0x1e0] ss:$16 sps:$4 sm:$0xff]   ;;  %v8814_v4 = vld [vmem:[%s15408_s1 + $0x1e8] ss:$16 sps:$4 sm:$0xff]  }
  0x82   :  { %1026 = vmatmul.mubr.bf16.vlgmr.msra.gmra.mrb[0].mxu0 %v8726_v7  ;;  %1112 = vmatmul.mubr.bf16.vlgmr.msra.gmra.mrb[0].mxu1 %v8726_v7  ;;  %v8819_v7 = vld [vmem:[%s15408_s1 + $0x200] ss:$16 sps:$4 sm:$0xff]  }
  0x83   :  { %1783 = vmatpush1.bf16.msra.mxu0 %v8720_v5  ;;  %1869 = vmatpush1.bf16.msra.mxu1 %v8723_v6  ;;  %v8821_v5 = vld [vmem:[%s15408_s1 + $0x204] ss:$16 sps:$4 sm:$0xff]   ;;  %v8824_v6 = vld [vmem:[%s15408_s1 + $0x20c] ss:$16 sps:$4 sm:$0xff]  }
  0x84   :  { %1784 = vmatprep.subr.bf16.mxu0 %v8729_v8  ;;  %1870 = vmatprep.subr.bf16.mxu1 %v8732_v9  ;;  %v8822_v8 = vld [vmem:[%s15408_s1 + $0x208] ss:$16 sps:$4 sm:$0xff]   ;;  %v8825_v9 = vld [vmem:[%s15409_s0] ss:$16 sps:$4 sm:$0xff]  }
  0x85   :  { %1814 = vmatprep.mubr.bf16.mxu0 %v8817_v11  ;;  %1900 = vmatprep.mubr.bf16.mxu1 %v8817_v11  ;;  %v8831_v11 = vld [vmem:[%s15408_s1 + $0x22c] ss:$16 sps:$4 sm:$0xff]  }
  0x87   :  { %1785 = vmatpush1.bf16.msra.mxu0 %v8727_v10  ;;  %1871 = vmatpush1.bf16.msra.mxu1 %v8730_v12  ;;  %v8828_v10 = vld [vmem:[%s15408_s1 + $0x224] ss:$16 sps:$4 sm:$0xff]   ;;  %v8916_v12 = vld [vmem:[%s15409_s0 + $0xc] ss:$16 sps:$4 sm:$0xff]  }
  0x88   :  { %1786 = vmatprep.subr.bf16.mxu0 %v8735_v13  ;;  %1872 = vmatprep.subr.bf16.mxu1 %v8738_v14  ;;  %v8826_v13 = vld [vmem:[%s15408_s1 + $0x220] ss:$16 sps:$4 sm:$0xff]   ;;  %v8829_v14 = vld [vmem:[%s15408_s1 + $0x228] ss:$16 sps:$4 sm:$0xff]  }
  0x8b   :  { %1787 = vmatpush1.bf16.msra.mxu0 %v8733_v15  ;;  %1873 = vmatpush1.bf16.msra.mxu1 %v8736_v16  ;;  %v8834_v15 = vld [vmem:[%s15408_s1 + $0x244] ss:$16 sps:$4 sm:$0xff]   ;;  %v8837_v16 = vld [vmem:[%s15408_s1 + $0x24c] ss:$16 sps:$4 sm:$0xff]  }
  0x8c   :  { %1788 = vmatprep.subr.bf16.mxu0 %v8741_v17  ;;  %1874 = vmatprep.subr.bf16.mxu1 %v8744_v18  ;;  %v8832_v17 = vld [vmem:[%s15408_s1 + $0x240] ss:$16 sps:$4 sm:$0xff]   ;;  %v8835_v18 = vld [vmem:[%s15408_s1 + $0x248] ss:$16 sps:$4 sm:$0xff]  }
  0x8f   :  { %1789 = vmatpush1.bf16.msra.mxu0 %v8739_v19  ;;  %1875 = vmatpush1.bf16.msra.mxu1 %v8742_v20  ;;  %v8840_v19 = vld [vmem:[%s15408_s1 + $0x264] ss:$16 sps:$4 sm:$0xff]   ;;  %v8843_v20 = vld [vmem:[%s15408_s1 + $0x26c] ss:$16 sps:$4 sm:$0xff]  }
  0x90   :  { %1790 = vmatprep.subr.bf16.mxu0 %v8747_v21  ;;  %1876 = vmatprep.subr.bf16.mxu1 %v8750_v22  ;;  %v8838_v21 = vld [vmem:[%s15408_s1 + $0x260] ss:$16 sps:$4 sm:$0xff]   ;;  %v8841_v22 = vld [vmem:[%s15408_s1 + $0x268] ss:$16 sps:$4 sm:$0xff]  }
  0x93   :  { %1791 = vmatpush1.bf16.msra.mxu0 %v8745_v23  ;;  %1877 = vmatpush1.bf16.msra.mxu1 %v8748_v24  ;;  %v8846_v23 = vld [vmem:[%s15408_s1 + $0x284] ss:$16 sps:$4 sm:$0xff]   ;;  %v8849_v24 = vld [vmem:[%s15408_s1 + $0x28c] ss:$16 sps:$4 sm:$0xff]  }
  0x94   :  { %1792 = vmatprep.subr.bf16.mxu0 %v8753_v25  ;;  %1878 = vmatprep.subr.bf16.mxu1 %v8756_v26  ;;  %v8844_v25 = vld [vmem:[%s15408_s1 + $0x280] ss:$16 sps:$4 sm:$0xff]   ;;  %v8847_v26 = vld [vmem:[%s15408_s1 + $0x288] ss:$16 sps:$4 sm:$0xff]  }
  0x97   :  { %1793 = vmatpush1.bf16.msra.mxu0 %v8751_v27  ;;  %1879 = vmatpush1.bf16.msra.mxu1 %v8754_v28  ;;  %v8852_v27 = vld [vmem:[%s15408_s1 + $0x2a4] ss:$16 sps:$4 sm:$0xff]   ;;  %v8855_v28 = vld [vmem:[%s15408_s1 + $0x2ac] ss:$16 sps:$4 sm:$0xff]  }
  0x98   :  { %1794 = vmatprep.subr.bf16.mxu0 %v8759_v29  ;;  %1880 = vmatprep.subr.bf16.mxu1 %v8762_v30  ;;  %v8850_v29 = vld [vmem:[%s15408_s1 + $0x2a0] ss:$16 sps:$4 sm:$0xff]   ;;  %v8853_v30 = vld [vmem:[%s15408_s1 + $0x2a8] ss:$16 sps:$4 sm:$0xff]  }
  0x9b   :  { %1795 = vmatpush1.bf16.msra.mxu0 %v8757_v31  ;;  %1881 = vmatpush1.bf16.msra.mxu1 %v8760_v32  ;;  %v8858_v31 = vld [vmem:[%s15408_s1 + $0x2c4] ss:$16 sps:$4 sm:$0xff]   ;;  %v8861_v32 = vld [vmem:[%s15408_s1 + $0x2cc] ss:$16 sps:$4 sm:$0xff]  }
  0x9c   :  { %1796 = vmatprep.subr.bf16.mxu0 %v8765_v33  ;;  %1882 = vmatprep.subr.bf16.mxu1 %v8768_v34  ;;  %v8856_v33 = vld [vmem:[%s15408_s1 + $0x2c0] ss:$16 sps:$4 sm:$0xff]   ;;  %v8859_v34 = vld [vmem:[%s15408_s1 + $0x2c8] ss:$16 sps:$4 sm:$0xff]  }
  0x9f   :  { %1797 = vmatpush1.bf16.msra.mxu0 %v8763_v35  ;;  %1883 = vmatpush1.bf16.msra.mxu1 %v8766_v36  ;;  %v8864_v35 = vld [vmem:[%s15408_s1 + $0x2e4] ss:$16 sps:$4 sm:$0xff]   ;;  %v8867_v36 = vld [vmem:[%s15408_s1 + $0x2ec] ss:$16 sps:$4 sm:$0xff]  }
  0xa0   :  { %1798 = vmatprep.subr.bf16.mxu0 %v8771_v37  ;;  %1884 = vmatprep.subr.bf16.mxu1 %v8774_v38  ;;  %v8862_v37 = vld [vmem:[%s15408_s1 + $0x2e0] ss:$16 sps:$4 sm:$0xff]   ;;  %v8865_v38 = vld [vmem:[%s15408_s1 + $0x2e8] ss:$16 sps:$4 sm:$0xff]  }
  0xa3   :  { %1799 = vmatpush1.bf16.msra.mxu0 %v8769_v39  ;;  %1885 = vmatpush1.bf16.msra.mxu1 %v8772_v40  ;;  %v8870_v39 = vld [vmem:[%s15408_s1 + $0x304] ss:$16 sps:$4 sm:$0xff]   ;;  %v8873_v40 = vld [vmem:[%s15408_s1 + $0x30c] ss:$16 sps:$4 sm:$0xff]  }
  0xa4   :  { %1800 = vmatprep.subr.bf16.mxu0 %v8777_v41  ;;  %1886 = vmatprep.subr.bf16.mxu1 %v8780_v42  ;;  %v8868_v41 = vld [vmem:[%s15408_s1 + $0x300] ss:$16 sps:$4 sm:$0xff]   ;;  %v8871_v42 = vld [vmem:[%s15408_s1 + $0x308] ss:$16 sps:$4 sm:$0xff]  }
  0xa7   :  { %1801 = vmatpush1.bf16.msra.mxu0 %v8775_v43  ;;  %1887 = vmatpush1.bf16.msra.mxu1 %v8778_v44  ;;  %v8876_v43 = vld [vmem:[%s15408_s1 + $0x324] ss:$16 sps:$4 sm:$0xff]   ;;  %v8879_v44 = vld [vmem:[%s15408_s1 + $0x32c] ss:$16 sps:$4 sm:$0xff]  }
  0xa8   :  { %1802 = vmatprep.subr.bf16.mxu0 %v8783_v45  ;;  %1888 = vmatprep.subr.bf16.mxu1 %v8786_v46  ;;  %v8874_v45 = vld [vmem:[%s15408_s1 + $0x320] ss:$16 sps:$4 sm:$0xff]   ;;  %v8877_v46 = vld [vmem:[%s15408_s1 + $0x328] ss:$16 sps:$4 sm:$0xff]  }
  0xab   :  { %1803 = vmatpush1.bf16.msra.mxu0 %v8781_v47  ;;  %1889 = vmatpush1.bf16.msra.mxu1 %v8784_v48  ;;  %v8882_v47 = vld [vmem:[%s15408_s1 + $0x344] ss:$16 sps:$4 sm:$0xff]   ;;  %v8885_v48 = vld [vmem:[%s15408_s1 + $0x34c] ss:$16 sps:$4 sm:$0xff]  }
  0xac   :  { %1804 = vmatprep.subr.bf16.mxu0 %v8789_v49  ;;  %1890 = vmatprep.subr.bf16.mxu1 %v8792_v50  ;;  %v8880_v49 = vld [vmem:[%s15408_s1 + $0x340] ss:$16 sps:$4 sm:$0xff]   ;;  %v8883_v50 = vld [vmem:[%s15408_s1 + $0x348] ss:$16 sps:$4 sm:$0xff]  }
  0xaf   :  { %1805 = vmatpush1.bf16.msra.mxu0 %v8787_v51  ;;  %1891 = vmatpush1.bf16.msra.mxu1 %v8790_v52  ;;  %v8888_v51 = vld [vmem:[%s15408_s1 + $0x364] ss:$16 sps:$4 sm:$0xff]   ;;  %v8891_v52 = vld [vmem:[%s15408_s1 + $0x36c] ss:$16 sps:$4 sm:$0xff]  }
  0xb0   :  { %1806 = vmatprep.subr.bf16.mxu0 %v8795_v53  ;;  %1892 = vmatprep.subr.bf16.mxu1 %v8798_v54  ;;  %v8886_v53 = vld [vmem:[%s15408_s1 + $0x360] ss:$16 sps:$4 sm:$0xff]   ;;  %v8889_v54 = vld [vmem:[%s15408_s1 + $0x368] ss:$16 sps:$4 sm:$0xff]  }
  0xb3   :  { %1807 = vmatpush1.bf16.msra.mxu0 %v8793_v55  ;;  %1893 = vmatpush1.bf16.msra.mxu1 %v8796_v56  ;;  %v8894_v55 = vld [vmem:[%s15408_s1 + $0x384] ss:$16 sps:$4 sm:$0xff]   ;;  %v8897_v56 = vld [vmem:[%s15408_s1 + $0x38c] ss:$16 sps:$4 sm:$0xff]  }
  0xb4   :  { %1808 = vmatprep.subr.bf16.mxu0 %v8801_v57  ;;  %1894 = vmatprep.subr.bf16.mxu1 %v8804_v58  ;;  %v8892_v57 = vld [vmem:[%s15408_s1 + $0x380] ss:$16 sps:$4 sm:$0xff]   ;;  %v8895_v58 = vld [vmem:[%s15408_s1 + $0x388] ss:$16 sps:$4 sm:$0xff]  }
  0xb7   :  { %1809 = vmatpush1.bf16.msra.mxu0 %v8799_v59  ;;  %1895 = vmatpush1.bf16.msra.mxu1 %v8802_v60  ;;  %v8900_v59 = vld [vmem:[%s15408_s1 + $0x3a4] ss:$16 sps:$4 sm:$0xff]   ;;  %v8903_v60 = vld [vmem:[%s15408_s1 + $0x3ac] ss:$16 sps:$4 sm:$0xff]  }
  0xb8   :  { %1810 = vmatprep.subr.bf16.mxu0 %v8807_v61  ;;  %1896 = vmatprep.subr.bf16.mxu1 %v8810_v62  ;;  %v8898_v61 = vld [vmem:[%s15408_s1 + $0x3a0] ss:$16 sps:$4 sm:$0xff]   ;;  %v8901_v62 = vld [vmem:[%s15408_s1 + $0x3a8] ss:$16 sps:$4 sm:$0xff]  }
  0xbb   :  { %1811 = vmatpush1.bf16.msra.mxu0 %v8805_v63  ;;  %1897 = vmatpush1.bf16.msra.mxu1 %v8808_v0  ;;  %v8906_v63 = vld [vmem:[%s15408_s1 + $0x3c4] ss:$16 sps:$4 sm:$0xff]   ;;  %v8909_v0 = vld [vmem:[%s15408_s1 + $0x3cc] ss:$16 sps:$4 sm:$0xff]  }
  0xbc   :  { %1812 = vmatprep.subr.bf16.mxu0 %v8813_v1  ;;  %1898 = vmatprep.subr.bf16.mxu1 %v8816_v2  ;;  %v8904_v1 = vld [vmem:[%s15408_s1 + $0x3c0] ss:$16 sps:$4 sm:$0xff]   ;;  %v8907_v2 = vld [vmem:[%s15408_s1 + $0x3c8] ss:$16 sps:$4 sm:$0xff]  }
  0xbf   :  { %1813 = vmatpush1.bf16.msra.mxu0 %v8811_v3  ;;  %1899 = vmatpush1.bf16.msra.mxu1 %v8814_v4  ;;  %v8912_v3 = vld [vmem:[%s15408_s1 + $0x3e4] ss:$16 sps:$4 sm:$0xff]   ;;  %v8915_v4 = vld [vmem:[%s15408_s1 + $0x3ec] ss:$16 sps:$4 sm:$0xff]  }
  0xc0   :  { %1825 = vmatprep.subr.bf16.mxu0 %v8821_v5  ;;  %1911 = vmatprep.subr.bf16.mxu1 %v8824_v6  ;;  %v8910_v5 = vld [vmem:[%s15408_s1 + $0x3e0] ss:$16 sps:$4 sm:$0xff]   ;;  %v8913_v6 = vld [vmem:[%s15408_s1 + $0x3e8] ss:$16 sps:$4 sm:$0xff]  }
  0xc2   :  { %1815 = vmatmul.mubr.bf16.vlgmr.msra.gmra.mrb[0].mxu0 %v8825_v9  ;;  %1901 = vmatmul.mubr.bf16.vlgmr.msra.gmra.mrb[0].mxu1 %v8825_v9  ;;  %v8918_v9 = vld [vmem:[%s15408_s1 + $0x800] ss:$16 sps:$4 sm:$0xff]  }
  0xc3   :  { %1826 = vmatpush1.bf16.msra.mxu0 %v8819_v7  ;;  %1912 = vmatpush1.bf16.msra.mxu1 %v8822_v8  ;;  %v8920_v7 = vld [vmem:[%s15408_s1 + $0x804] ss:$16 sps:$4 sm:$0xff]   ;;  %v8923_v8 = vld [vmem:[%s15408_s1 + $0x80c] ss:$16 sps:$4 sm:$0xff]  }
  0xc4   :  { %1827 = vmatprep.subr.bf16.mxu0 %v8828_v10  ;;  %1913 = vmatprep.subr.bf16.mxu1 %v8831_v11  ;;  %v8921_v10 = vld [vmem:[%s15408_s1 + $0x808] ss:$16 sps:$4 sm:$0xff]  }
  0xc5   :  { %1857 = vmatprep.mubr.bf16.mxu0 %v8916_v12  ;;  %1943 = vmatprep.mubr.bf16.mxu1 %v8916_v12  ;;  %v8924_v11 = vld [vmem:[%s15409_s0 + $0x8] ss:$16 sps:$4 sm:$0xff]   ;;  %v8927_v12 = vld [vmem:[%s15408_s1 + $0x824] ss:$16 sps:$4 sm:$0xff]  }
  0xc7   :  { %1828 = vmatpush1.bf16.msra.mxu0 %v8826_v13  ;;  %1914 = vmatpush1.bf16.msra.mxu1 %v8829_v14  ;;  %v8930_v13 = vld [vmem:[%s15408_s1 + $0x82c] ss:$16 sps:$4 sm:$0xff]   ;;  %v9015_v14 = vld [vmem:[%s15409_s0 + $0x44] ss:$16 sps:$4 sm:$0xff]  }
  0xc8   :  { %1829 = vmatprep.subr.bf16.mxu0 %v8834_v15  ;;  %1915 = vmatprep.subr.bf16.mxu1 %v8837_v16  ;;  %v8925_v15 = vld [vmem:[%s15408_s1 + $0x820] ss:$16 sps:$4 sm:$0xff]   ;;  %v8928_v16 = vld [vmem:[%s15408_s1 + $0x828] ss:$16 sps:$4 sm:$0xff]  }
  0xcb   :  { %1830 = vmatpush1.bf16.msra.mxu0 %v8832_v17  ;;  %1916 = vmatpush1.bf16.msra.mxu1 %v8835_v18  ;;  %v8933_v17 = vld [vmem:[%s15408_s1 + $0x844] ss:$16 sps:$4 sm:$0xff]   ;;  %v8936_v18 = vld [vmem:[%s15408_s1 + $0x84c] ss:$16 sps:$4 sm:$0xff]  }
  0xcc   :  { %1831 = vmatprep.subr.bf16.mxu0 %v8840_v19  ;;  %1917 = vmatprep.subr.bf16.mxu1 %v8843_v20  ;;  %v8931_v19 = vld [vmem:[%s15408_s1 + $0x840] ss:$16 sps:$4 sm:$0xff]   ;;  %v8934_v20 = vld [vmem:[%s15408_s1 + $0x848] ss:$16 sps:$4 sm:$0xff]  }
  0xcf   :  { %1832 = vmatpush1.bf16.msra.mxu0 %v8838_v21  ;;  %1918 = vmatpush1.bf16.msra.mxu1 %v8841_v22  ;;  %v8939_v21 = vld [vmem:[%s15408_s1 + $0x864] ss:$16 sps:$4 sm:$0xff]   ;;  %v8942_v22 = vld [vmem:[%s15408_s1 + $0x86c] ss:$16 sps:$4 sm:$0xff]  }
  0xd0   :  { %1833 = vmatprep.subr.bf16.mxu0 %v8846_v23  ;;  %1919 = vmatprep.subr.bf16.mxu1 %v8849_v24  ;;  %v8937_v23 = vld [vmem:[%s15408_s1 + $0x860] ss:$16 sps:$4 sm:$0xff]   ;;  %v8940_v24 = vld [vmem:[%s15408_s1 + $0x868] ss:$16 sps:$4 sm:$0xff]  }
  0xd3   :  { %1834 = vmatpush1.bf16.msra.mxu0 %v8844_v25  ;;  %1920 = vmatpush1.bf16.msra.mxu1 %v8847_v26  ;;  %v8945_v25 = vld [vmem:[%s15408_s1 + $0x884] ss:$16 sps:$4 sm:$0xff]   ;;  %v8948_v26 = vld [vmem:[%s15408_s1 + $0x88c] ss:$16 sps:$4 sm:$0xff]  }
  0xd4   :  { %1835 = vmatprep.subr.bf16.mxu0 %v8852_v27  ;;  %1921 = vmatprep.subr.bf16.mxu1 %v8855_v28  ;;  %v8943_v27 = vld [vmem:[%s15408_s1 + $0x880] ss:$16 sps:$4 sm:$0xff]   ;;  %v8946_v28 = vld [vmem:[%s15408_s1 + $0x888] ss:$16 sps:$4 sm:$0xff]  }
  0xd7   :  { %1836 = vmatpush1.bf16.msra.mxu0 %v8850_v29  ;;  %1922 = vmatpush1.bf16.msra.mxu1 %v8853_v30  ;;  %v8951_v29 = vld [vmem:[%s15408_s1 + $0x8a4] ss:$16 sps:$4 sm:$0xff]   ;;  %v8954_v30 = vld [vmem:[%s15408_s1 + $0x8ac] ss:$16 sps:$4 sm:$0xff]  }
  0xd8   :  { %1837 = vmatprep.subr.bf16.mxu0 %v8858_v31  ;;  %1923 = vmatprep.subr.bf16.mxu1 %v8861_v32  ;;  %v8949_v31 = vld [vmem:[%s15408_s1 + $0x8a0] ss:$16 sps:$4 sm:$0xff]   ;;  %v8952_v32 = vld [vmem:[%s15408_s1 + $0x8a8] ss:$16 sps:$4 sm:$0xff]  }
  0xdb   :  { %1838 = vmatpush1.bf16.msra.mxu0 %v8856_v33  ;;  %1924 = vmatpush1.bf16.msra.mxu1 %v8859_v34  ;;  %v8957_v33 = vld [vmem:[%s15408_s1 + $0x8c4] ss:$16 sps:$4 sm:$0xff]   ;;  %v8960_v34 = vld [vmem:[%s15408_s1 + $0x8cc] ss:$16 sps:$4 sm:$0xff]  }
  0xdc   :  { %1839 = vmatprep.subr.bf16.mxu0 %v8864_v35  ;;  %1925 = vmatprep.subr.bf16.mxu1 %v8867_v36  ;;  %v8955_v35 = vld [vmem:[%s15408_s1 + $0x8c0] ss:$16 sps:$4 sm:$0xff]   ;;  %v8958_v36 = vld [vmem:[%s15408_s1 + $0x8c8] ss:$16 sps:$4 sm:$0xff]  }
  0xdf   :  { %1840 = vmatpush1.bf16.msra.mxu0 %v8862_v37  ;;  %1926 = vmatpush1.bf16.msra.mxu1 %v8865_v38  ;;  %v8963_v37 = vld [vmem:[%s15408_s1 + $0x8e4] ss:$16 sps:$4 sm:$0xff]   ;;  %v8966_v38 = vld [vmem:[%s15408_s1 + $0x8ec] ss:$16 sps:$4 sm:$0xff]  }
  0xe0   :  { %1841 = vmatprep.subr.bf16.mxu0 %v8870_v39  ;;  %1927 = vmatprep.subr.bf16.mxu1 %v8873_v40  ;;  %v8961_v39 = vld [vmem:[%s15408_s1 + $0x8e0] ss:$16 sps:$4 sm:$0xff]   ;;  %v8964_v40 = vld [vmem:[%s15408_s1 + $0x8e8] ss:$16 sps:$4 sm:$0xff]  }
  0xe3   :  { %1842 = vmatpush1.bf16.msra.mxu0 %v8868_v41  ;;  %1928 = vmatpush1.bf16.msra.mxu1 %v8871_v42  ;;  %v8969_v41 = vld [vmem:[%s15408_s1 + $0x904] ss:$16 sps:$4 sm:$0xff]   ;;  %v8972_v42 = vld [vmem:[%s15408_s1 + $0x90c] ss:$16 sps:$4 sm:$0xff]  }
  0xe4   :  { %1843 = vmatprep.subr.bf16.mxu0 %v8876_v43  ;;  %1929 = vmatprep.subr.bf16.mxu1 %v8879_v44  ;;  %v8967_v43 = vld [vmem:[%s15408_s1 + $0x900] ss:$16 sps:$4 sm:$0xff]   ;;  %v8970_v44 = vld [vmem:[%s15408_s1 + $0x908] ss:$16 sps:$4 sm:$0xff]  }
  0xe7   :  { %1844 = vmatpush1.bf16.msra.mxu0 %v8874_v45  ;;  %1930 = vmatpush1.bf16.msra.mxu1 %v8877_v46  ;;  %v8975_v45 = vld [vmem:[%s15408_s1 + $0x924] ss:$16 sps:$4 sm:$0xff]   ;;  %v8978_v46 = vld [vmem:[%s15408_s1 + $0x92c] ss:$16 sps:$4 sm:$0xff]  }
  0xe8   :  { %1845 = vmatprep.subr.bf16.mxu0 %v8882_v47  ;;  %1931 = vmatprep.subr.bf16.mxu1 %v8885_v48  ;;  %v8973_v47 = vld [vmem:[%s15408_s1 + $0x920] ss:$16 sps:$4 sm:$0xff]   ;;  %v8976_v48 = vld [vmem:[%s15408_s1 + $0x928] ss:$16 sps:$4 sm:$0xff]  }
  0xeb   :  { %1846 = vmatpush1.bf16.msra.mxu0 %v8880_v49  ;;  %1932 = vmatpush1.bf16.msra.mxu1 %v8883_v50  ;;  %v8981_v49 = vld [vmem:[%s15408_s1 + $0x944] ss:$16 sps:$4 sm:$0xff]   ;;  %v8984_v50 = vld [vmem:[%s15408_s1 + $0x94c] ss:$16 sps:$4 sm:$0xff]  }
  0xec   :  { %1847 = vmatprep.subr.bf16.mxu0 %v8888_v51  ;;  %1933 = vmatprep.subr.bf16.mxu1 %v8891_v52  ;;  %v8979_v51 = vld [vmem:[%s15408_s1 + $0x940] ss:$16 sps:$4 sm:$0xff]   ;;  %v8982_v52 = vld [vmem:[%s15408_s1 + $0x948] ss:$16 sps:$4 sm:$0xff]  }
  0xef   :  { %1848 = vmatpush1.bf16.msra.mxu0 %v8886_v53  ;;  %1934 = vmatpush1.bf16.msra.mxu1 %v8889_v54  ;;  %v8987_v53 = vld [vmem:[%s15408_s1 + $0x964] ss:$16 sps:$4 sm:$0xff]   ;;  %v8990_v54 = vld [vmem:[%s15408_s1 + $0x96c] ss:$16 sps:$4 sm:$0xff]  }
  0xf0   :  { %1849 = vmatprep.subr.bf16.mxu0 %v8894_v55  ;;  %1935 = vmatprep.subr.bf16.mxu1 %v8897_v56  ;;  %v8985_v55 = vld [vmem:[%s15408_s1 + $0x960] ss:$16 sps:$4 sm:$0xff]   ;;  %v8988_v56 = vld [vmem:[%s15408_s1 + $0x968] ss:$16 sps:$4 sm:$0xff]  }
  0xf3   :  { %1850 = vmatpush1.bf16.msra.mxu0 %v8892_v57  ;;  %1936 = vmatpush1.bf16.msra.mxu1 %v8895_v58  ;;  %v8993_v57 = vld [vmem:[%s15408_s1 + $0x984] ss:$16 sps:$4 sm:$0xff]   ;;  %v8996_v58 = vld [vmem:[%s15408_s1 + $0x98c] ss:$16 sps:$4 sm:$0xff]  }
  0xf4   :  { %1851 = vmatprep.subr.bf16.mxu0 %v8900_v59  ;;  %1937 = vmatprep.subr.bf16.mxu1 %v8903_v60  ;;  %v8991_v59 = vld [vmem:[%s15408_s1 + $0x980] ss:$16 sps:$4 sm:$0xff]   ;;  %v8994_v60 = vld [vmem:[%s15408_s1 + $0x988] ss:$16 sps:$4 sm:$0xff]  }
  0xf7   :  { %1852 = vmatpush1.bf16.msra.mxu0 %v8898_v61  ;;  %1938 = vmatpush1.bf16.msra.mxu1 %v8901_v62  ;;  %v8999_v61 = vld [vmem:[%s15408_s1 + $0x9a4] ss:$16 sps:$4 sm:$0xff]   ;;  %v9002_v62 = vld [vmem:[%s15408_s1 + $0x9ac] ss:$16 sps:$4 sm:$0xff]  }
  0xf8   :  { %1853 = vmatprep.subr.bf16.mxu0 %v8906_v63  ;;  %1939 = vmatprep.subr.bf16.mxu1 %v8909_v0  ;;  %v8997_v63 = vld [vmem:[%s15408_s1 + $0x9a0] ss:$16 sps:$4 sm:$0xff]   ;;  %v9000_v0 = vld [vmem:[%s15408_s1 + $0x9a8] ss:$16 sps:$4 sm:$0xff]  }
  0xfb   :  { %1854 = vmatpush1.bf16.msra.mxu0 %v8904_v1  ;;  %1940 = vmatpush1.bf16.msra.mxu1 %v8907_v2  ;;  %v9005_v1 = vld [vmem:[%s15408_s1 + $0x9c4] ss:$16 sps:$4 sm:$0xff]   ;;  %v9008_v2 = vld [vmem:[%s15408_s1 + $0x9cc] ss:$16 sps:$4 sm:$0xff]  }
  0xfc   :  { %1855 = vmatprep.subr.bf16.mxu0 %v8912_v3  ;;  %1941 = vmatprep.subr.bf16.mxu1 %v8915_v4  ;;  %v9003_v3 = vld [vmem:[%s15408_s1 + $0x9c0] ss:$16 sps:$4 sm:$0xff]   ;;  %v9006_v4 = vld [vmem:[%s15408_s1 + $0x9c8] ss:$16 sps:$4 sm:$0xff]  }
  0xff   :  { %1856 = vmatpush1.bf16.msra.mxu0 %v8910_v5  ;;  %1942 = vmatpush1.bf16.msra.mxu1 %v8913_v6  ;;  %v9011_v5 = vld [vmem:[%s15408_s1 + $0x9e4] ss:$16 sps:$4 sm:$0xff]   ;;  %v9014_v6 = vld [vmem:[%s15408_s1 + $0x9ec] ss:$16 sps:$4 sm:$0xff]  }
 0x100   :  { %2743 = vmatprep.subr.bf16.mxu0 %v8920_v7  ;;  %2829 = vmatprep.subr.bf16.mxu1 %v8923_v8  ;;  %v9009_v7 = vld [vmem:[%s15408_s1 + $0x9e0] ss:$16 sps:$4 sm:$0xff]   ;;  %v9012_v8 = vld [vmem:[%s15408_s1 + $0x9e8] ss:$16 sps:$4 sm:$0xff]  }
 0x102   :  { %1858 = vmatmul.mubr.bf16.vlgmr.msra.gmra.mrb[0].mxu0 %v8924_v11  ;;  %1944 = vmatmul.mubr.bf16.vlgmr.msra.gmra.mrb[0].mxu1 %v8924_v11  ;;  %v9023_v11 = vld [vmem:[%s15409_s0 + $0x40] ss:$16 sps:$4 sm:$0xff]  }
 0x103   :  { %2744 = vmatpush1.bf16.msra.mxu0 %v8918_v9  ;;  %2830 = vmatpush1.bf16.msra.mxu1 %v8921_v10  ;;  %v9019_v9 = vld [vmem:[%s15408_s1 + $0xa04] ss:$16 sps:$4 sm:$0xff]   ;;  %v9022_v10 = vld [vmem:[%s15408_s1 + $0xa0c] ss:$16 sps:$4 sm:$0xff]  }
 0x104   :  { %2745 = vmatprep.subr.bf16.mxu0 %v8927_v12  ;;  %2831 = vmatprep.subr.bf16.mxu1 %v8930_v13  ;;  %v9017_v12 = vld [vmem:[%s15408_s1 + $0xa00] ss:$16 sps:$4 sm:$0xff]   ;;  %v9020_v13 = vld [vmem:[%s15408_s1 + $0xa08] ss:$16 sps:$4 sm:$0xff]  }
 0x105   :  { %2775 = vmatprep.mubr.bf16.mxu0 %v9015_v14  ;;  %2861 = vmatprep.mubr.bf16.mxu1 %v9015_v14  ;;  %v9026_v14 = vld [vmem:[%s15408_s1 + $0xa24] ss:$16 sps:$4 sm:$0xff]  }
 0x107   :  { %2746 = vmatpush1.bf16.msra.mxu0 %v8925_v15  ;;  %2832 = vmatpush1.bf16.msra.mxu1 %v8928_v16  ;;  %v9029_v15 = vld [vmem:[%s15408_s1 + $0xa2c] ss:$16 sps:$4 sm:$0xff]  }
 0x108   :  { %2747 = vmatprep.subr.bf16.mxu0 %v8933_v17  ;;  %2833 = vmatprep.subr.bf16.mxu1 %v8936_v18  ;;  %v9114_v16 = vld [vmem:[%s15409_s0 + $0x4c] ss:$16 sps:$4 sm:$0xff]   ;;  %v9024_v17 = vld [vmem:[%s15408_s1 + $0xa20] ss:$16 sps:$4 sm:$0xff]   ;;  %v9027_v18 = vld [vmem:[%s15408_s1 + $0xa28] ss:$16 sps:$4 sm:$0xff]  }
 0x10b   :  { %2748 = vmatpush1.bf16.msra.mxu0 %v8931_v19  ;;  %2834 = vmatpush1.bf16.msra.mxu1 %v8934_v20  ;;  %v9032_v19 = vld [vmem:[%s15408_s1 + $0xa44] ss:$16 sps:$4 sm:$0xff]   ;;  %v9035_v20 = vld [vmem:[%s15408_s1 + $0xa4c] ss:$16 sps:$4 sm:$0xff]  }
 0x10c   :  { %2749 = vmatprep.subr.bf16.mxu0 %v8939_v21  ;;  %2835 = vmatprep.subr.bf16.mxu1 %v8942_v22  ;;  %v9030_v21 = vld [vmem:[%s15408_s1 + $0xa40] ss:$16 sps:$4 sm:$0xff]   ;;  %v9033_v22 = vld [vmem:[%s15408_s1 + $0xa48] ss:$16 sps:$4 sm:$0xff]  }
 0x10f   :  { %2750 = vmatpush1.bf16.msra.mxu0 %v8937_v23  ;;  %2836 = vmatpush1.bf16.msra.mxu1 %v8940_v24  ;;  %v9038_v23 = vld [vmem:[%s15408_s1 + $0xa64] ss:$16 sps:$4 sm:$0xff]   ;;  %v9041_v24 = vld [vmem:[%s15408_s1 + $0xa6c] ss:$16 sps:$4 sm:$0xff]  }
 0x110   :  { %2751 = vmatprep.subr.bf16.mxu0 %v8945_v25  ;;  %2837 = vmatprep.subr.bf16.mxu1 %v8948_v26  ;;  %v9036_v25 = vld [vmem:[%s15408_s1 + $0xa60] ss:$16 sps:$4 sm:$0xff]   ;;  %v9039_v26 = vld [vmem:[%s15408_s1 + $0xa68] ss:$16 sps:$4 sm:$0xff]  }
 0x113   :  { %2752 = vmatpush1.bf16.msra.mxu0 %v8943_v27  ;;  %2838 = vmatpush1.bf16.msra.mxu1 %v8946_v28  ;;  %v9044_v27 = vld [vmem:[%s15408_s1 + $0xa84] ss:$16 sps:$4 sm:$0xff]   ;;  %v9047_v28 = vld [vmem:[%s15408_s1 + $0xa8c] ss:$16 sps:$4 sm:$0xff]  }
 0x114   :  { %2753 = vmatprep.subr.bf16.mxu0 %v8951_v29  ;;  %2839 = vmatprep.subr.bf16.mxu1 %v8954_v30  ;;  %v9042_v29 = vld [vmem:[%s15408_s1 + $0xa80] ss:$16 sps:$4 sm:$0xff]   ;;  %v9045_v30 = vld [vmem:[%s15408_s1 + $0xa88] ss:$16 sps:$4 sm:$0xff]  }
 0x117   :  { %2754 = vmatpush1.bf16.msra.mxu0 %v8949_v31  ;;  %2840 = vmatpush1.bf16.msra.mxu1 %v8952_v32  ;;  %v9050_v31 = vld [vmem:[%s15408_s1 + $0xaa4] ss:$16 sps:$4 sm:$0xff]   ;;  %v9053_v32 = vld [vmem:[%s15408_s1 + $0xaac] ss:$16 sps:$4 sm:$0xff]  }
 0x118   :  { %2755 = vmatprep.subr.bf16.mxu0 %v8957_v33  ;;  %2841 = vmatprep.subr.bf16.mxu1 %v8960_v34  ;;  %v9048_v33 = vld [vmem:[%s15408_s1 + $0xaa0] ss:$16 sps:$4 sm:$0xff]   ;;  %v9051_v34 = vld [vmem:[%s15408_s1 + $0xaa8] ss:$16 sps:$4 sm:$0xff]  }
 0x11b   :  { %2756 = vmatpush1.bf16.msra.mxu0 %v8955_v35  ;;  %2842 = vmatpush1.bf16.msra.mxu1 %v8958_v36  ;;  %v9056_v35 = vld [vmem:[%s15408_s1 + $0xac4] ss:$16 sps:$4 sm:$0xff]   ;;  %v9059_v36 = vld [vmem:[%s15408_s1 + $0xacc] ss:$16 sps:$4 sm:$0xff]  }
 0x11c   :  { %2757 = vmatprep.subr.bf16.mxu0 %v8963_v37  ;;  %2843 = vmatprep.subr.bf16.mxu1 %v8966_v38  ;;  %v9054_v37 = vld [vmem:[%s15408_s1 + $0xac0] ss:$16 sps:$4 sm:$0xff]   ;;  %v9057_v38 = vld [vmem:[%s15408_s1 + $0xac8] ss:$16 sps:$4 sm:$0xff]  }
 0x11f   :  { %2758 = vmatpush1.bf16.msra.mxu0 %v8961_v39  ;;  %2844 = vmatpush1.bf16.msra.mxu1 %v8964_v40  ;;  %v9062_v39 = vld [vmem:[%s15408_s1 + $0xae4] ss:$16 sps:$4 sm:$0xff]   ;;  %v9065_v40 = vld [vmem:[%s15408_s1 + $0xaec] ss:$16 sps:$4 sm:$0xff]  }
 0x120   :  { %2759 = vmatprep.subr.bf16.mxu0 %v8969_v41  ;;  %2845 = vmatprep.subr.bf16.mxu1 %v8972_v42  ;;  %v9060_v41 = vld [vmem:[%s15408_s1 + $0xae0] ss:$16 sps:$4 sm:$0xff]   ;;  %v9063_v42 = vld [vmem:[%s15408_s1 + $0xae8] ss:$16 sps:$4 sm:$0xff]  }
 0x123   :  { %2760 = vmatpush1.bf16.msra.mxu0 %v8967_v43  ;;  %2846 = vmatpush1.bf16.msra.mxu1 %v8970_v44  ;;  %v9068_v43 = vld [vmem:[%s15408_s1 + $0xb04] ss:$16 sps:$4 sm:$0xff]   ;;  %v9071_v44 = vld [vmem:[%s15408_s1 + $0xb0c] ss:$16 sps:$4 sm:$0xff]  }
 0x124   :  { %2761 = vmatprep.subr.bf16.mxu0 %v8975_v45  ;;  %2847 = vmatprep.subr.bf16.mxu1 %v8978_v46  ;;  %v9066_v45 = vld [vmem:[%s15408_s1 + $0xb00] ss:$16 sps:$4 sm:$0xff]   ;;  %v9069_v46 = vld [vmem:[%s15408_s1 + $0xb08] ss:$16 sps:$4 sm:$0xff]  }
 0x127   :  { %2762 = vmatpush1.bf16.msra.mxu0 %v8973_v47  ;;  %2848 = vmatpush1.bf16.msra.mxu1 %v8976_v48  ;;  %v9074_v47 = vld [vmem:[%s15408_s1 + $0xb24] ss:$16 sps:$4 sm:$0xff]   ;;  %v9077_v48 = vld [vmem:[%s15408_s1 + $0xb2c] ss:$16 sps:$4 sm:$0xff]  }
 0x128   :  { %2763 = vmatprep.subr.bf16.mxu0 %v8981_v49  ;;  %2849 = vmatprep.subr.bf16.mxu1 %v8984_v50  ;;  %v9072_v49 = vld [vmem:[%s15408_s1 + $0xb20] ss:$16 sps:$4 sm:$0xff]   ;;  %v9075_v50 = vld [vmem:[%s15408_s1 + $0xb28] ss:$16 sps:$4 sm:$0xff]  }
 0x12b   :  { %2764 = vmatpush1.bf16.msra.mxu0 %v8979_v51  ;;  %2850 = vmatpush1.bf16.msra.mxu1 %v8982_v52  ;;  %v9080_v51 = vld [vmem:[%s15408_s1 + $0xb44] ss:$16 sps:$4 sm:$0xff]   ;;  %v9083_v52 = vld [vmem:[%s15408_s1 + $0xb4c] ss:$16 sps:$4 sm:$0xff]  }
 0x12c   :  { %2765 = vmatprep.subr.bf16.mxu0 %v8987_v53  ;;  %2851 = vmatprep.subr.bf16.mxu1 %v8990_v54  ;;  %v9078_v53 = vld [vmem:[%s15408_s1 + $0xb40] ss:$16 sps:$4 sm:$0xff]   ;;  %v9081_v54 = vld [vmem:[%s15408_s1 + $0xb48] ss:$16 sps:$4 sm:$0xff]  }
 0x12f   :  { %2766 = vmatpush1.bf16.msra.mxu0 %v8985_v55  ;;  %2852 = vmatpush1.bf16.msra.mxu1 %v8988_v56  ;;  %v9086_v55 = vld [vmem:[%s15408_s1 + $0xb64] ss:$16 sps:$4 sm:$0xff]   ;;  %v9089_v56 = vld [vmem:[%s15408_s1 + $0xb6c] ss:$16 sps:$4 sm:$0xff]  }
 0x130   :  { %2767 = vmatprep.subr.bf16.mxu0 %v8993_v57  ;;  %2853 = vmatprep.subr.bf16.mxu1 %v8996_v58  ;;  %v9084_v57 = vld [vmem:[%s15408_s1 + $0xb60] ss:$16 sps:$4 sm:$0xff]   ;;  %v9087_v58 = vld [vmem:[%s15408_s1 + $0xb68] ss:$16 sps:$4 sm:$0xff]  }
 0x133   :  { %2768 = vmatpush1.bf16.msra.mxu0 %v8991_v59  ;;  %2854 = vmatpush1.bf16.msra.mxu1 %v8994_v60  ;;  %v9092_v59 = vld [vmem:[%s15408_s1 + $0xb84] ss:$16 sps:$4 sm:$0xff]   ;;  %v9095_v60 = vld [vmem:[%s15408_s1 + $0xb8c] ss:$16 sps:$4 sm:$0xff]  }
 0x134   :  { %2769 = vmatprep.subr.bf16.mxu0 %v8999_v61  ;;  %2855 = vmatprep.subr.bf16.mxu1 %v9002_v62  ;;  %v9090_v61 = vld [vmem:[%s15408_s1 + $0xb80] ss:$16 sps:$4 sm:$0xff]   ;;  %v9093_v62 = vld [vmem:[%s15408_s1 + $0xb88] ss:$16 sps:$4 sm:$0xff]  }
 0x137   :  { %2770 = vmatpush1.bf16.msra.mxu0 %v8997_v63  ;;  %2856 = vmatpush1.bf16.msra.mxu1 %v9000_v0  ;;  %v9098_v63 = vld [vmem:[%s15408_s1 + $0xba4] ss:$16 sps:$4 sm:$0xff]   ;;  %v9101_v0 = vld [vmem:[%s15408_s1 + $0xbac] ss:$16 sps:$4 sm:$0xff]  }
 0x138   :  { %2771 = vmatprep.subr.bf16.mxu0 %v9005_v1  ;;  %2857 = vmatprep.subr.bf16.mxu1 %v9008_v2  ;;  %v9096_v1 = vld [vmem:[%s15408_s1 + $0xba0] ss:$16 sps:$4 sm:$0xff]   ;;  %v9099_v2 = vld [vmem:[%s15408_s1 + $0xba8] ss:$16 sps:$4 sm:$0xff]  }
 0x13b   :  { %2772 = vmatpush1.bf16.msra.mxu0 %v9003_v3  ;;  %2858 = vmatpush1.bf16.msra.mxu1 %v9006_v4  ;;  %v9104_v3 = vld [vmem:[%s15408_s1 + $0xbc4] ss:$16 sps:$4 sm:$0xff]   ;;  %v9107_v4 = vld [vmem:[%s15408_s1 + $0xbcc] ss:$16 sps:$4 sm:$0xff]  }
 0x13c   :  { %2773 = vmatprep.subr.bf16.mxu0 %v9011_v5  ;;  %2859 = vmatprep.subr.bf16.mxu1 %v9014_v6  ;;  %v9102_v5 = vld [vmem:[%s15408_s1 + $0xbc0] ss:$16 sps:$4 sm:$0xff]   ;;  %v9105_v6 = vld [vmem:[%s15408_s1 + $0xbc8] ss:$16 sps:$4 sm:$0xff]  }
 0x13f   :  { %2774 = vmatpush1.bf16.msra.mxu0 %v9009_v7  ;;  %2860 = vmatpush1.bf16.msra.mxu1 %v9012_v8  ;;  %v9110_v7 = vld [vmem:[%s15408_s1 + $0xbe4] ss:$16 sps:$4 sm:$0xff]   ;;  %v9113_v8 = vld [vmem:[%s15408_s1 + $0xbec] ss:$16 sps:$4 sm:$0xff]  }
 0x140   :  { %2786 = vmatprep.subr.bf16.mxu0 %v9019_v9  ;;  %2872 = vmatprep.subr.bf16.mxu1 %v9022_v10  ;;  %v9108_v9 = vld [vmem:[%s15408_s1 + $0xbe0] ss:$16 sps:$4 sm:$0xff]   ;;  %v9111_v10 = vld [vmem:[%s15408_s1 + $0xbe8] ss:$16 sps:$4 sm:$0xff]  }
 0x142   :  { %2776 = vmatmul.mubr.bf16.vlgmr.msra.gmra.mrb[0].mxu0 %v9023_v11  ;;  %2862 = vmatmul.mubr.bf16.vlgmr.msra.gmra.mrb[0].mxu1 %v9023_v11  ;;  %v9116_v11 = vld [vmem:[%s15409_s0 + $0x48] ss:$16 sps:$4 sm:$0xff]  }
 0x143   :  { %2787 = vmatpush1.bf16.msra.mxu0 %v9017_v12  ;;  %2873 = vmatpush1.bf16.msra.mxu1 %v9020_v13  ;;  %v9119_v12 = vld [vmem:[%s15408_s1 + $0x1004] ss:$16 sps:$4 sm:$0xff]   ;;  %v9122_v13 = vld [vmem:[%s15408_s1 + $0x100c] ss:$16 sps:$4 sm:$0xff]  }
 0x144   :  { %2788 = vmatprep.subr.bf16.mxu0 %v9026_v14  ;;  %2874 = vmatprep.subr.bf16.mxu1 %v9029_v15  ;;  %v9117_v14 = vld [vmem:[%s15408_s1 + $0x1000] ss:$16 sps:$4 sm:$0xff]   ;;  %v9120_v15 = vld [vmem:[%s15408_s1 + $0x1008] ss:$16 sps:$4 sm:$0xff]  }
 0x145   :  { %2818 = vmatprep.mubr.bf16.mxu0 %v9114_v16  ;;  %2904 = vmatprep.mubr.bf16.mxu1 %v9114_v16  ;;  %v9125_v16 = vld [vmem:[%s15408_s1 + $0x1024] ss:$16 sps:$4 sm:$0xff]  }
 0x147   :  { %2789 = vmatpush1.bf16.msra.mxu0 %v9024_v17  ;;  %2875 = vmatpush1.bf16.msra.mxu1 %v9027_v18  ;;  %v9128_v17 = vld [vmem:[%s15408_s1 + $0x102c] ss:$16 sps:$4 sm:$0xff]   ;;  %v9123_v18 = vld [vmem:[%s15408_s1 + $0x1020] ss:$16 sps:$4 sm:$0xff]  }
 0x148   :  { %2790 = vmatprep.subr.bf16.mxu0 %v9032_v19  ;;  %2876 = vmatprep.subr.bf16.mxu1 %v9035_v20  ;;  %v9126_v19 = vld [vmem:[%s15408_s1 + $0x1028] ss:$16 sps:$4 sm:$0xff]   ;;  %v9131_v20 = vld [vmem:[%s15408_s1 + $0x1044] ss:$16 sps:$4 sm:$0xff]  }
 0x14b   :  { %2791 = vmatpush1.bf16.msra.mxu0 %v9030_v21  ;;  %2877 = vmatpush1.bf16.msra.mxu1 %v9033_v22  ;;  %v9134_v21 = vld [vmem:[%s15408_s1 + $0x104c] ss:$16 sps:$4 sm:$0xff]   ;;  %v9699_v22 = vld [vmem:[%s15409_s0 + $0x24] ss:$16 sps:$4 sm:$0xff]  }
 0x14c   :  { %2792 = vmatprep.subr.bf16.mxu0 %v9038_v23  ;;  %2878 = vmatprep.subr.bf16.mxu1 %v9041_v24  ;;  %v9129_v23 = vld [vmem:[%s15408_s1 + $0x1040] ss:$16 sps:$4 sm:$0xff]   ;;  %v9132_v24 = vld [vmem:[%s15408_s1 + $0x1048] ss:$16 sps:$4 sm:$0xff]  }
 0x14f   :  { %2793 = vmatpush1.bf16.msra.mxu0 %v9036_v25  ;;  %2879 = vmatpush1.bf16.msra.mxu1 %v9039_v26  ;;  %v9137_v25 = vld [vmem:[%s15408_s1 + $0x1064] ss:$16 sps:$4 sm:$0xff]   ;;  %v9140_v26 = vld [vmem:[%s15408_s1 + $0x106c] ss:$16 sps:$4 sm:$0xff]  }
 0x150   :  { %2794 = vmatprep.subr.bf16.mxu0 %v9044_v27  ;;  %2880 = vmatprep.subr.bf16.mxu1 %v9047_v28  ;;  %v9135_v27 = vld [vmem:[%s15408_s1 + $0x1060] ss:$16 sps:$4 sm:$0xff]   ;;  %v9138_v28 = vld [vmem:[%s15408_s1 + $0x1068] ss:$16 sps:$4 sm:$0xff]  }
 0x153   :  { %2795 = vmatpush1.bf16.msra.mxu0 %v9042_v29  ;;  %2881 = vmatpush1.bf16.msra.mxu1 %v9045_v30  ;;  %v9143_v29 = vld [vmem:[%s15408_s1 + $0x1084] ss:$16 sps:$4 sm:$0xff]   ;;  %v9146_v30 = vld [vmem:[%s15408_s1 + $0x108c] ss:$16 sps:$4 sm:$0xff]  }
 0x154   :  { %2796 = vmatprep.subr.bf16.mxu0 %v9050_v31  ;;  %2882 = vmatprep.subr.bf16.mxu1 %v9053_v32  ;;  %v9141_v31 = vld [vmem:[%s15408_s1 + $0x1080] ss:$16 sps:$4 sm:$0xff]   ;;  %v9144_v32 = vld [vmem:[%s15408_s1 + $0x1088] ss:$16 sps:$4 sm:$0xff]  }
 0x157   :  { %2797 = vmatpush1.bf16.msra.mxu0 %v9048_v33  ;;  %2883 = vmatpush1.bf16.msra.mxu1 %v9051_v34  ;;  %v9149_v33 = vld [vmem:[%s15408_s1 + $0x10a4] ss:$16 sps:$4 sm:$0xff]   ;;  %v9152_v34 = vld [vmem:[%s15408_s1 + $0x10ac] ss:$16 sps:$4 sm:$0xff]  }
 0x158   :  { %2798 = vmatprep.subr.bf16.mxu0 %v9056_v35  ;;  %2884 = vmatprep.subr.bf16.mxu1 %v9059_v36  ;;  %v9147_v35 = vld [vmem:[%s15408_s1 + $0x10a0] ss:$16 sps:$4 sm:$0xff]   ;;  %v9150_v36 = vld [vmem:[%s15408_s1 + $0x10a8] ss:$16 sps:$4 sm:$0xff]  }
 0x15b   :  { %2799 = vmatpush1.bf16.msra.mxu0 %v9054_v37  ;;  %2885 = vmatpush1.bf16.msra.mxu1 %v9057_v38  ;;  %v9155_v37 = vld [vmem:[%s15408_s1 + $0x10c4] ss:$16 sps:$4 sm:$0xff]   ;;  %v9158_v38 = vld [vmem:[%s15408_s1 + $0x10cc] ss:$16 sps:$4 sm:$0xff]  }
 0x15c   :  { %2800 = vmatprep.subr.bf16.mxu0 %v9062_v39  ;;  %2886 = vmatprep.subr.bf16.mxu1 %v9065_v40  ;;  %v9153_v39 = vld [vmem:[%s15408_s1 + $0x10c0] ss:$16 sps:$4 sm:$0xff]   ;;  %v9156_v40 = vld [vmem:[%s15408_s1 + $0x10c8] ss:$16 sps:$4 sm:$0xff]  }
 0x15f   :  { %2801 = vmatpush1.bf16.msra.mxu0 %v9060_v41  ;;  %2887 = vmatpush1.bf16.msra.mxu1 %v9063_v42  ;;  %v9161_v41 = vld [vmem:[%s15408_s1 + $0x10e4] ss:$16 sps:$4 sm:$0xff]   ;;  %v9164_v42 = vld [vmem:[%s15408_s1 + $0x10ec] ss:$16 sps:$4 sm:$0xff]  }
 0x160   :  { %2802 = vmatprep.subr.bf16.mxu0 %v9068_v43  ;;  %2888 = vmatprep.subr.bf16.mxu1 %v9071_v44  ;;  %v9159_v43 = vld [vmem:[%s15408_s1 + $0x10e0] ss:$16 sps:$4 sm:$0xff]   ;;  %v9162_v44 = vld [vmem:[%s15408_s1 + $0x10e8] ss:$16 sps:$4 sm:$0xff]  }
 0x163   :  { %2803 = vmatpush1.bf16.msra.mxu0 %v9066_v45  ;;  %2889 = vmatpush1.bf16.msra.mxu1 %v9069_v46  ;;  %v9167_v45 = vld [vmem:[%s15408_s1 + $0x1104] ss:$16 sps:$4 sm:$0xff]   ;;  %v9170_v46 = vld [vmem:[%s15408_s1 + $0x110c] ss:$16 sps:$4 sm:$0xff]  }
 0x164   :  { %2804 = vmatprep.subr.bf16.mxu0 %v9074_v47  ;;  %2890 = vmatprep.subr.bf16.mxu1 %v9077_v48  ;;  %v9165_v47 = vld [vmem:[%s15408_s1 + $0x1100] ss:$16 sps:$4 sm:$0xff]   ;;  %v9168_v48 = vld [vmem:[%s15408_s1 + $0x1108] ss:$16 sps:$4 sm:$0xff]  }
 0x167   :  { %2805 = vmatpush1.bf16.msra.mxu0 %v9072_v49  ;;  %2891 = vmatpush1.bf16.msra.mxu1 %v9075_v50  ;;  %v9173_v49 = vld [vmem:[%s15408_s1 + $0x1124] ss:$16 sps:$4 sm:$0xff]   ;;  %v9176_v50 = vld [vmem:[%s15408_s1 + $0x112c] ss:$16 sps:$4 sm:$0xff]  }
 0x168   :  { %2806 = vmatprep.subr.bf16.mxu0 %v9080_v51  ;;  %2892 = vmatprep.subr.bf16.mxu1 %v9083_v52  ;;  %v9171_v51 = vld [vmem:[%s15408_s1 + $0x1120] ss:$16 sps:$4 sm:$0xff]   ;;  %v9174_v52 = vld [vmem:[%s15408_s1 + $0x1128] ss:$16 sps:$4 sm:$0xff]  }
 0x16b   :  { %2807 = vmatpush1.bf16.msra.mxu0 %v9078_v53  ;;  %2893 = vmatpush1.bf16.msra.mxu1 %v9081_v54  ;;  %v9179_v53 = vld [vmem:[%s15408_s1 + $0x1144] ss:$16 sps:$4 sm:$0xff]   ;;  %v9182_v54 = vld [vmem:[%s15408_s1 + $0x114c] ss:$16 sps:$4 sm:$0xff]  }
 0x16c   :  { %2808 = vmatprep.subr.bf16.mxu0 %v9086_v55  ;;  %2894 = vmatprep.subr.bf16.mxu1 %v9089_v56  ;;  %v9177_v55 = vld [vmem:[%s15408_s1 + $0x1140] ss:$16 sps:$4 sm:$0xff]   ;;  %v9180_v56 = vld [vmem:[%s15408_s1 + $0x1148] ss:$16 sps:$4 sm:$0xff]  }
 0x16f   :  { %2809 = vmatpush1.bf16.msra.mxu0 %v9084_v57  ;;  %2895 = vmatpush1.bf16.msra.mxu1 %v9087_v58  ;;  %v9185_v57 = vld [vmem:[%s15408_s1 + $0x1164] ss:$16 sps:$4 sm:$0xff]   ;;  %v9188_v58 = vld [vmem:[%s15408_s1 + $0x116c] ss:$16 sps:$4 sm:$0xff]  }
 0x170   :  { %2810 = vmatprep.subr.bf16.mxu0 %v9092_v59  ;;  %2896 = vmatprep.subr.bf16.mxu1 %v9095_v60  ;;  %v9183_v59 = vld [vmem:[%s15408_s1 + $0x1160] ss:$16 sps:$4 sm:$0xff]   ;;  %v9186_v60 = vld [vmem:[%s15408_s1 + $0x1168] ss:$16 sps:$4 sm:$0xff]  }
 0x173   :  { %2811 = vmatpush1.bf16.msra.mxu0 %v9090_v61  ;;  %2897 = vmatpush1.bf16.msra.mxu1 %v9093_v62  ;;  %v9191_v61 = vld [vmem:[%s15408_s1 + $0x1184] ss:$16 sps:$4 sm:$0xff]   ;;  %v9194_v62 = vld [vmem:[%s15408_s1 + $0x118c] ss:$16 sps:$4 sm:$0xff]  }
 0x174   :  { %2812 = vmatprep.subr.bf16.mxu0 %v9098_v63  ;;  %2898 = vmatprep.subr.bf16.mxu1 %v9101_v0  ;;  %v9189_v63 = vld [vmem:[%s15408_s1 + $0x1180] ss:$16 sps:$4 sm:$0xff]   ;;  %v9192_v0 = vld [vmem:[%s15408_s1 + $0x1188] ss:$16 sps:$4 sm:$0xff]  }
 0x177   :  { %2813 = vmatpush1.bf16.msra.mxu0 %v9096_v1  ;;  %2899 = vmatpush1.bf16.msra.mxu1 %v9099_v2  ;;  %v9197_v1 = vld [vmem:[%s15408_s1 + $0x11a4] ss:$16 sps:$4 sm:$0xff]   ;;  %v9200_v2 = vld [vmem:[%s15408_s1 + $0x11ac] ss:$16 sps:$4 sm:$0xff]  }
 0x178   :  { %2814 = vmatprep.subr.bf16.mxu0 %v9104_v3  ;;  %2900 = vmatprep.subr.bf16.mxu1 %v9107_v4  ;;  %v9195_v3 = vld [vmem:[%s15408_s1 + $0x11a0] ss:$16 sps:$4 sm:$0xff]   ;;  %v9198_v4 = vld [vmem:[%s15408_s1 + $0x11a8] ss:$16 sps:$4 sm:$0xff]  }
 0x17b   :  { %2815 = vmatpush1.bf16.msra.mxu0 %v9102_v5  ;;  %2901 = vmatpush1.bf16.msra.mxu1 %v9105_v6  ;;  %v9203_v5 = vld [vmem:[%s15408_s1 + $0x11c4] ss:$16 sps:$4 sm:$0xff]   ;;  %v9206_v6 = vld [vmem:[%s15408_s1 + $0x11cc] ss:$16 sps:$4 sm:$0xff]  }
 0x17c   :  { %2816 = vmatprep.subr.bf16.mxu0 %v9110_v7  ;;  %2902 = vmatprep.subr.bf16.mxu1 %v9113_v8  ;;  %v9201_v7 = vld [vmem:[%s15408_s1 + $0x11c0] ss:$16 sps:$4 sm:$0xff]   ;;  %v9204_v8 = vld [vmem:[%s15408_s1 + $0x11c8] ss:$16 sps:$4 sm:$0xff]  }
 0x17f   :  { %2817 = vmatpush1.bf16.msra.mxu0 %v9108_v9  ;;  %2903 = vmatpush1.bf16.msra.mxu1 %v9111_v10  ;;  %v9209_v9 = vld [vmem:[%s15408_s1 + $0x11e4] ss:$16 sps:$4 sm:$0xff]   ;;  %v9212_v10 = vld [vmem:[%s15408_s1 + $0x11ec] ss:$16 sps:$4 sm:$0xff]  }
 0x180   :  { %3821 = vmatprep.subr.bf16.mxu0 %v9119_v12  ;;  %3907 = vmatprep.subr.bf16.mxu1 %v9122_v13  ;;  %v9210_v12 = vld [vmem:[%s15408_s1 + $0x11e8] ss:$16 sps:$4 sm:$0xff]   ;;  %v9215_v13 = vld [vmem:[%s15408_s1 + $0x1204] ss:$16 sps:$4 sm:$0xff]  }
 0x182   :  { %2819 = vmatmul.mubr.bf16.vlgmr.msra.gmra.mrb[0].mxu0 %v9116_v11  ;;  %2905 = vmatmul.mubr.bf16.vlgmr.msra.gmra.mrb[0].mxu1 %v9116_v11  ;;  %v9207_v11 = vld [vmem:[%s15408_s1 + $0x11e0] ss:$16 sps:$4 sm:$0xff]  }
 0x183   :  { %3822 = vmatpush1.bf16.msra.mxu0 %v9117_v14  ;;  %3908 = vmatpush1.bf16.msra.mxu1 %v9120_v15  ;;  %v9218_v14 = vld [vmem:[%s15408_s1 + $0x120c] ss:$16 sps:$4 sm:$0xff]   ;;  %v9213_v15 = vld [vmem:[%s15408_s1 + $0x1200] ss:$16 sps:$4 sm:$0xff]  }
 0x184   :  { %3823 = vmatprep.subr.bf16.mxu0 %v9125_v16  ;;  %3909 = vmatprep.subr.bf16.mxu1 %v9128_v17  ;;  %v9216_v16 = vld [vmem:[%s15408_s1 + $0x1208] ss:$16 sps:$4 sm:$0xff]   ;;  %v9221_v17 = vld [vmem:[%s15408_s1 + $0x1224] ss:$16 sps:$4 sm:$0xff]  }
 0x185   :  { %3853 = vmatprep.mubr.bf16.mxu0 %v9699_v22  ;;  %3939 = vmatprep.mubr.bf16.mxu1 %v9699_v22  ;;  %v9227_v22 = vld [vmem:[%s15408_s1 + $0x1244] ss:$16 sps:$4 sm:$0xff]  }
 0x187   :  { %3824 = vmatpush1.bf16.msra.mxu0 %v9123_v18  ;;  %3910 = vmatpush1.bf16.msra.mxu1 %v9126_v19  ;;  %v9224_v18 = vld [vmem:[%s15408_s1 + $0x122c] ss:$16 sps:$4 sm:$0xff]   ;;  %v9700_v19 = vld [vmem:[%s15409_s0 + $0x20] ss:$16 sps:$4 sm:$0xff]  }
 0x188   :  { %3825 = vmatprep.subr.bf16.mxu0 %v9131_v20  ;;  %3911 = vmatprep.subr.bf16.mxu1 %v9134_v21  ;;  %v9219_v20 = vld [vmem:[%s15408_s1 + $0x1220] ss:$16 sps:$4 sm:$0xff]   ;;  %v9222_v21 = vld [vmem:[%s15408_s1 + $0x1228] ss:$16 sps:$4 sm:$0xff]  }
 0x18b   :  { %3826 = vmatpush1.bf16.msra.mxu0 %v9129_v23  ;;  %3912 = vmatpush1.bf16.msra.mxu1 %v9132_v24  ;;  %v9230_v23 = vld [vmem:[%s15408_s1 + $0x124c] ss:$16 sps:$4 sm:$0xff]  }
 0x18c   :  { %3827 = vmatprep.subr.bf16.mxu0 %v9137_v25  ;;  %3913 = vmatprep.subr.bf16.mxu1 %v9140_v26  ;;  %v9701_v24 = vld [vmem:[%s15409_s0 + $0x2c] ss:$16 sps:$4 sm:$0xff]   ;;  %v9225_v25 = vld [vmem:[%s15408_s1 + $0x1240] ss:$16 sps:$4 sm:$0xff]   ;;  %v9228_v26 = vld [vmem:[%s15408_s1 + $0x1248] ss:$16 sps:$4 sm:$0xff]  }
 0x18f   :  { %3828 = vmatpush1.bf16.msra.mxu0 %v9135_v27  ;;  %3914 = vmatpush1.bf16.msra.mxu1 %v9138_v28  ;;  %v9233_v27 = vld [vmem:[%s15408_s1 + $0x1264] ss:$16 sps:$4 sm:$0xff]   ;;  %v9236_v28 = vld [vmem:[%s15408_s1 + $0x126c] ss:$16 sps:$4 sm:$0xff]  }
 0x190   :  { %3829 = vmatprep.subr.bf16.mxu0 %v9143_v29  ;;  %3915 = vmatprep.subr.bf16.mxu1 %v9146_v30  ;;  %v9231_v29 = vld [vmem:[%s15408_s1 + $0x1260] ss:$16 sps:$4 sm:$0xff]   ;;  %v9234_v30 = vld [vmem:[%s15408_s1 + $0x1268] ss:$16 sps:$4 sm:$0xff]  }
 0x193   :  { %3830 = vmatpush1.bf16.msra.mxu0 %v9141_v31  ;;  %3916 = vmatpush1.bf16.msra.mxu1 %v9144_v32  ;;  %v9239_v31 = vld [vmem:[%s15408_s1 + $0x1284] ss:$16 sps:$4 sm:$0xff]   ;;  %v9242_v32 = vld [vmem:[%s15408_s1 + $0x128c] ss:$16 sps:$4 sm:$0xff]  }
 0x194   :  { %3831 = vmatprep.subr.bf16.mxu0 %v9149_v33  ;;  %3917 = vmatprep.subr.bf16.mxu1 %v9152_v34  ;;  %v9237_v33 = vld [vmem:[%s15408_s1 + $0x1280] ss:$16 sps:$4 sm:$0xff]   ;;  %v9240_v34 = vld [vmem:[%s15408_s1 + $0x1288] ss:$16 sps:$4 sm:$0xff]  }
 0x197   :  { %3832 = vmatpush1.bf16.msra.mxu0 %v9147_v35  ;;  %3918 = vmatpush1.bf16.msra.mxu1 %v9150_v36  ;;  %v9245_v35 = vld [vmem:[%s15408_s1 + $0x12a4] ss:$16 sps:$4 sm:$0xff]   ;;  %v9248_v36 = vld [vmem:[%s15408_s1 + $0x12ac] ss:$16 sps:$4 sm:$0xff]  }
 0x198   :  { %3833 = vmatprep.subr.bf16.mxu0 %v9155_v37  ;;  %3919 = vmatprep.subr.bf16.mxu1 %v9158_v38  ;;  %v9243_v37 = vld [vmem:[%s15408_s1 + $0x12a0] ss:$16 sps:$4 sm:$0xff]   ;;  %v9246_v38 = vld [vmem:[%s15408_s1 + $0x12a8] ss:$16 sps:$4 sm:$0xff]  }
 0x19b   :  { %3834 = vmatpush1.bf16.msra.mxu0 %v9153_v39  ;;  %3920 = vmatpush1.bf16.msra.mxu1 %v9156_v40  ;;  %v9251_v39 = vld [vmem:[%s15408_s1 + $0x12c4] ss:$16 sps:$4 sm:$0xff]   ;;  %v9254_v40 = vld [vmem:[%s15408_s1 + $0x12cc] ss:$16 sps:$4 sm:$0xff]  }
 0x19c   :  { %3835 = vmatprep.subr.bf16.mxu0 %v9161_v41  ;;  %3921 = vmatprep.subr.bf16.mxu1 %v9164_v42  ;;  %v9249_v41 = vld [vmem:[%s15408_s1 + $0x12c0] ss:$16 sps:$4 sm:$0xff]   ;;  %v9252_v42 = vld [vmem:[%s15408_s1 + $0x12c8] ss:$16 sps:$4 sm:$0xff]  }
 0x19f   :  { %3836 = vmatpush1.bf16.msra.mxu0 %v9159_v43  ;;  %3922 = vmatpush1.bf16.msra.mxu1 %v9162_v44  ;;  %v9257_v43 = vld [vmem:[%s15408_s1 + $0x12e4] ss:$16 sps:$4 sm:$0xff]   ;;  %v9260_v44 = vld [vmem:[%s15408_s1 + $0x12ec] ss:$16 sps:$4 sm:$0xff]  }
 0x1a0   :  { %3837 = vmatprep.subr.bf16.mxu0 %v9167_v45  ;;  %3923 = vmatprep.subr.bf16.mxu1 %v9170_v46  ;;  %v9255_v45 = vld [vmem:[%s15408_s1 + $0x12e0] ss:$16 sps:$4 sm:$0xff]   ;;  %v9258_v46 = vld [vmem:[%s15408_s1 + $0x12e8] ss:$16 sps:$4 sm:$0xff]  }
 0x1a3   :  { %3838 = vmatpush1.bf16.msra.mxu0 %v9165_v47  ;;  %3924 = vmatpush1.bf16.msra.mxu1 %v9168_v48  ;;  %v9263_v47 = vld [vmem:[%s15408_s1 + $0x1304] ss:$16 sps:$4 sm:$0xff]   ;;  %v9266_v48 = vld [vmem:[%s15408_s1 + $0x130c] ss:$16 sps:$4 sm:$0xff]  }
 0x1a4   :  { %3839 = vmatprep.subr.bf16.mxu0 %v9173_v49  ;;  %3925 = vmatprep.subr.bf16.mxu1 %v9176_v50  ;;  %v9261_v49 = vld [vmem:[%s15408_s1 + $0x1300] ss:$16 sps:$4 sm:$0xff]   ;;  %v9264_v50 = vld [vmem:[%s15408_s1 + $0x1308] ss:$16 sps:$4 sm:$0xff]  }
 0x1a7   :  { %3840 = vmatpush1.bf16.msra.mxu0 %v9171_v51  ;;  %3926 = vmatpush1.bf16.msra.mxu1 %v9174_v52  ;;  %v9269_v51 = vld [vmem:[%s15408_s1 + $0x1324] ss:$16 sps:$4 sm:$0xff]   ;;  %v9272_v52 = vld [vmem:[%s15408_s1 + $0x132c] ss:$16 sps:$4 sm:$0xff]  }
 0x1a8   :  { %3841 = vmatprep.subr.bf16.mxu0 %v9179_v53  ;;  %3927 = vmatprep.subr.bf16.mxu1 %v9182_v54  ;;  %v9267_v53 = vld [vmem:[%s15408_s1 + $0x1320] ss:$16 sps:$4 sm:$0xff]   ;;  %v9270_v54 = vld [vmem:[%s15408_s1 + $0x1328] ss:$16 sps:$4 sm:$0xff]  }
 0x1ab   :  { %3842 = vmatpush1.bf16.msra.mxu0 %v9177_v55  ;;  %3928 = vmatpush1.bf16.msra.mxu1 %v9180_v56  ;;  %v9275_v55 = vld [vmem:[%s15408_s1 + $0x1344] ss:$16 sps:$4 sm:$0xff]   ;;  %v9278_v56 = vld [vmem:[%s15408_s1 + $0x134c] ss:$16 sps:$4 sm:$0xff]  }
 0x1ac   :  { %3843 = vmatprep.subr.bf16.mxu0 %v9185_v57  ;;  %3929 = vmatprep.subr.bf16.mxu1 %v9188_v58  ;;  %v9273_v57 = vld [vmem:[%s15408_s1 + $0x1340] ss:$16 sps:$4 sm:$0xff]   ;;  %v9276_v58 = vld [vmem:[%s15408_s1 + $0x1348] ss:$16 sps:$4 sm:$0xff]  }
 0x1af   :  { %3844 = vmatpush1.bf16.msra.mxu0 %v9183_v59  ;;  %3930 = vmatpush1.bf16.msra.mxu1 %v9186_v60  ;;  %v9281_v59 = vld [vmem:[%s15408_s1 + $0x1364] ss:$16 sps:$4 sm:$0xff]   ;;  %v9284_v60 = vld [vmem:[%s15408_s1 + $0x136c] ss:$16 sps:$4 sm:$0xff]  }
 0x1b0   :  { %3845 = vmatprep.subr.bf16.mxu0 %v9191_v61  ;;  %3931 = vmatprep.subr.bf16.mxu1 %v9194_v62  ;;  %v9279_v61 = vld [vmem:[%s15408_s1 + $0x1360] ss:$16 sps:$4 sm:$0xff]   ;;  %v9282_v62 = vld [vmem:[%s15408_s1 + $0x1368] ss:$16 sps:$4 sm:$0xff]  }
 0x1b3   :  { %3846 = vmatpush1.bf16.msra.mxu0 %v9189_v63  ;;  %3932 = vmatpush1.bf16.msra.mxu1 %v9192_v0  ;;  %v9287_v63 = vld [vmem:[%s15408_s1 + $0x1384] ss:$16 sps:$4 sm:$0xff]   ;;  %v9290_v0 = vld [vmem:[%s15408_s1 + $0x138c] ss:$16 sps:$4 sm:$0xff]  }
 0x1b4   :  { %3847 = vmatprep.subr.bf16.mxu0 %v9197_v1  ;;  %3933 = vmatprep.subr.bf16.mxu1 %v9200_v2  ;;  %v9285_v1 = vld [vmem:[%s15408_s1 + $0x1380] ss:$16 sps:$4 sm:$0xff]   ;;  %v9288_v2 = vld [vmem:[%s15408_s1 + $0x1388] ss:$16 sps:$4 sm:$0xff]  }
 0x1b7   :  { %3848 = vmatpush1.bf16.msra.mxu0 %v9195_v3  ;;  %3934 = vmatpush1.bf16.msra.mxu1 %v9198_v4  ;;  %v9293_v3 = vld [vmem:[%s15408_s1 + $0x13a4] ss:$16 sps:$4 sm:$0xff]   ;;  %v9296_v4 = vld [vmem:[%s15408_s1 + $0x13ac] ss:$16 sps:$4 sm:$0xff]  }
 0x1b8   :  { %3849 = vmatprep.subr.bf16.mxu0 %v9203_v5  ;;  %3935 = vmatprep.subr.bf16.mxu1 %v9206_v6  ;;  %v9291_v5 = vld [vmem:[%s15408_s1 + $0x13a0] ss:$16 sps:$4 sm:$0xff]   ;;  %v9294_v6 = vld [vmem:[%s15408_s1 + $0x13a8] ss:$16 sps:$4 sm:$0xff]  }
 0x1bb   :  { %3850 = vmatpush1.bf16.msra.mxu0 %v9201_v7  ;;  %3936 = vmatpush1.bf16.msra.mxu1 %v9204_v8  ;;  %v9299_v7 = vld [vmem:[%s15408_s1 + $0x13c4] ss:$16 sps:$4 sm:$0xff]   ;;  %v9302_v8 = vld [vmem:[%s15408_s1 + $0x13cc] ss:$16 sps:$4 sm:$0xff]  }
 0x1bc   :  { %3851 = vmatprep.subr.bf16.mxu0 %v9209_v9  ;;  %3937 = vmatprep.subr.bf16.mxu1 %v9212_v10  ;;  %v9297_v9 = vld [vmem:[%s15408_s1 + $0x13c0] ss:$16 sps:$4 sm:$0xff]   ;;  %v9300_v10 = vld [vmem:[%s15408_s1 + $0x13c8] ss:$16 sps:$4 sm:$0xff]  }
 0x1bf   :  { %3852 = vmatpush1.bf16.msra.mxu0 %v9207_v11  ;;  %3938 = vmatpush1.bf16.msra.mxu1 %v9210_v12  ;;  %v9305_v11 = vld [vmem:[%s15408_s1 + $0x13e4] ss:$16 sps:$4 sm:$0xff]   ;;  %v9308_v12 = vld [vmem:[%s15408_s1 + $0x13ec] ss:$16 sps:$4 sm:$0xff]  }
 0x1c0   :  { %3864 = vmatprep.subr.bf16.mxu0 %v9215_v13  ;;  %3950 = vmatprep.subr.bf16.mxu1 %v9218_v14  ;;  %v9303_v13 = vld [vmem:[%s15408_s1 + $0x13e0] ss:$16 sps:$4 sm:$0xff]   ;;  %v9306_v14 = vld [vmem:[%s15408_s1 + $0x13e8] ss:$16 sps:$4 sm:$0xff]  }
 0x1c2   :  { %3854 = vmatmul.mubr.bf16.vlgmr.msra.gmra.mrb[4].mxu0 %v9700_v19  ;;  %3940 = vmatmul.mubr.bf16.vlgmr.msra.gmra.mrb[4].mxu1 %v9700_v19  ;;  %v9317_v19 = vld [vmem:[%s15408_s1 + $0xc24] ss:$16 sps:$4 sm:$0xff]  }
 0x1c3   :  { %3865 = vmatpush1.bf16.msra.mxu0 %v9213_v15  ;;  %3951 = vmatpush1.bf16.msra.mxu1 %v9216_v16  ;;  %v9311_v15 = vld [vmem:[%s15408_s1 + $0xc04] ss:$16 sps:$4 sm:$0xff]   ;;  %v9314_v16 = vld [vmem:[%s15408_s1 + $0xc0c] ss:$16 sps:$4 sm:$0xff]  }
 0x1c4   :  { %3866 = vmatprep.subr.bf16.mxu0 %v9221_v17  ;;  %3952 = vmatprep.subr.bf16.mxu1 %v9224_v18  ;;  %v9309_v17 = vld [vmem:[%s15408_s1 + $0xc00] ss:$16 sps:$4 sm:$0xff]   ;;  %v9312_v18 = vld [vmem:[%s15408_s1 + $0xc08] ss:$16 sps:$4 sm:$0xff]  }
 0x1c5   :  { %3896 = vmatprep.mubr.bf16.mxu0 %v9701_v24  ;;  %3982 = vmatprep.mubr.bf16.mxu1 %v9701_v24  ;;  %v9323_v24 = vld [vmem:[%s15408_s1 + $0xc44] ss:$16 sps:$4 sm:$0xff]  }
 0x1c7   :  { %3867 = vmatpush1.bf16.msra.mxu0 %v9219_v20  ;;  %3953 = vmatpush1.bf16.msra.mxu1 %v9222_v21  ;;  %v9320_v20 = vld [vmem:[%s15408_s1 + $0xc2c] ss:$16 sps:$4 sm:$0xff]   ;;  %v9702_v21 = vld [vmem:[%s15409_s0 + $0x28] ss:$16 sps:$4 sm:$0xff]  }
 0x1c8   :  { %3868 = vmatprep.subr.bf16.mxu0 %v9227_v22  ;;  %3954 = vmatprep.subr.bf16.mxu1 %v9230_v23  ;;  %v9315_v22 = vld [vmem:[%s15408_s1 + $0xc20] ss:$16 sps:$4 sm:$0xff]   ;;  %v9318_v23 = vld [vmem:[%s15408_s1 + $0xc28] ss:$16 sps:$4 sm:$0xff]  }
 0x1cb   :  { %3869 = vmatpush1.bf16.msra.mxu0 %v9225_v25  ;;  %3955 = vmatpush1.bf16.msra.mxu1 %v9228_v26  ;;  %v9326_v25 = vld [vmem:[%s15408_s1 + $0xc4c] ss:$16 sps:$4 sm:$0xff]   ;;  %v9703_v26 = vld [vmem:[%s15409_s0 + $0x4] ss:$16 sps:$4 sm:$0xff]  }
 0x1cc   :  { %3870 = vmatprep.subr.bf16.mxu0 %v9233_v27  ;;  %3956 = vmatprep.subr.bf16.mxu1 %v9236_v28  ;;  %v9321_v27 = vld [vmem:[%s15408_s1 + $0xc40] ss:$16 sps:$4 sm:$0xff]   ;;  %v9324_v28 = vld [vmem:[%s15408_s1 + $0xc48] ss:$16 sps:$4 sm:$0xff]  }
 0x1cf   :  { %3871 = vmatpush1.bf16.msra.mxu0 %v9231_v29  ;;  %3957 = vmatpush1.bf16.msra.mxu1 %v9234_v30  ;;  %v9329_v29 = vld [vmem:[%s15408_s1 + $0xc64] ss:$16 sps:$4 sm:$0xff]   ;;  %v9332_v30 = vld [vmem:[%s15408_s1 + $0xc6c] ss:$16 sps:$4 sm:$0xff]  }
 0x1d0   :  { %3872 = vmatprep.subr.bf16.mxu0 %v9239_v31  ;;  %3958 = vmatprep.subr.bf16.mxu1 %v9242_v32  ;;  %v9327_v31 = vld [vmem:[%s15408_s1 + $0xc60] ss:$16 sps:$4 sm:$0xff]   ;;  %v9330_v32 = vld [vmem:[%s15408_s1 + $0xc68] ss:$16 sps:$4 sm:$0xff]  }
 0x1d3   :  { %3873 = vmatpush1.bf16.msra.mxu0 %v9237_v33  ;;  %3959 = vmatpush1.bf16.msra.mxu1 %v9240_v34  ;;  %v9335_v33 = vld [vmem:[%s15408_s1 + $0xc84] ss:$16 sps:$4 sm:$0xff]   ;;  %v9338_v34 = vld [vmem:[%s15408_s1 + $0xc8c] ss:$16 sps:$4 sm:$0xff]  }
 0x1d4   :  { %3874 = vmatprep.subr.bf16.mxu0 %v9245_v35  ;;  %3960 = vmatprep.subr.bf16.mxu1 %v9248_v36  ;;  %v9333_v35 = vld [vmem:[%s15408_s1 + $0xc80] ss:$16 sps:$4 sm:$0xff]   ;;  %v9336_v36 = vld [vmem:[%s15408_s1 + $0xc88] ss:$16 sps:$4 sm:$0xff]  }
 0x1d7   :  { %3875 = vmatpush1.bf16.msra.mxu0 %v9243_v37  ;;  %3961 = vmatpush1.bf16.msra.mxu1 %v9246_v38  ;;  %v9341_v37 = vld [vmem:[%s15408_s1 + $0xca4] ss:$16 sps:$4 sm:$0xff]   ;;  %v9344_v38 = vld [vmem:[%s15408_s1 + $0xcac] ss:$16 sps:$4 sm:$0xff]  }
 0x1d8   :  { %3876 = vmatprep.subr.bf16.mxu0 %v9251_v39  ;;  %3962 = vmatprep.subr.bf16.mxu1 %v9254_v40  ;;  %v9339_v39 = vld [vmem:[%s15408_s1 + $0xca0] ss:$16 sps:$4 sm:$0xff]   ;;  %v9342_v40 = vld [vmem:[%s15408_s1 + $0xca8] ss:$16 sps:$4 sm:$0xff]  }
 0x1db   :  { %3877 = vmatpush1.bf16.msra.mxu0 %v9249_v41  ;;  %3963 = vmatpush1.bf16.msra.mxu1 %v9252_v42  ;;  %v9347_v41 = vld [vmem:[%s15408_s1 + $0xcc4] ss:$16 sps:$4 sm:$0xff]   ;;  %v9350_v42 = vld [vmem:[%s15408_s1 + $0xccc] ss:$16 sps:$4 sm:$0xff]  }
 0x1dc   :  { %3878 = vmatprep.subr.bf16.mxu0 %v9257_v43  ;;  %3964 = vmatprep.subr.bf16.mxu1 %v9260_v44  ;;  %v9345_v43 = vld [vmem:[%s15408_s1 + $0xcc0] ss:$16 sps:$4 sm:$0xff]   ;;  %v9348_v44 = vld [vmem:[%s15408_s1 + $0xcc8] ss:$16 sps:$4 sm:$0xff]  }
 0x1df   :  { %3879 = vmatpush1.bf16.msra.mxu0 %v9255_v45  ;;  %3965 = vmatpush1.bf16.msra.mxu1 %v9258_v46  ;;  %v9353_v45 = vld [vmem:[%s15408_s1 + $0xce4] ss:$16 sps:$4 sm:$0xff]   ;;  %v9356_v46 = vld [vmem:[%s15408_s1 + $0xcec] ss:$16 sps:$4 sm:$0xff]  }
 0x1e0   :  { %3880 = vmatprep.subr.bf16.mxu0 %v9263_v47  ;;  %3966 = vmatprep.subr.bf16.mxu1 %v9266_v48  ;;  %v9351_v47 = vld [vmem:[%s15408_s1 + $0xce0] ss:$16 sps:$4 sm:$0xff]   ;;  %v9354_v48 = vld [vmem:[%s15408_s1 + $0xce8] ss:$16 sps:$4 sm:$0xff]  }
 0x1e3   :  { %3881 = vmatpush1.bf16.msra.mxu0 %v9261_v49  ;;  %3967 = vmatpush1.bf16.msra.mxu1 %v9264_v50  ;;  %v9359_v49 = vld [vmem:[%s15408_s1 + $0xd04] ss:$16 sps:$4 sm:$0xff]   ;;  %v9362_v50 = vld [vmem:[%s15408_s1 + $0xd0c] ss:$16 sps:$4 sm:$0xff]  }
 0x1e4   :  { %3882 = vmatprep.subr.bf16.mxu0 %v9269_v51  ;;  %3968 = vmatprep.subr.bf16.mxu1 %v9272_v52  ;;  %v9357_v51 = vld [vmem:[%s15408_s1 + $0xd00] ss:$16 sps:$4 sm:$0xff]   ;;  %v9360_v52 = vld [vmem:[%s15408_s1 + $0xd08] ss:$16 sps:$4 sm:$0xff]  }
 0x1e7   :  { %3883 = vmatpush1.bf16.msra.mxu0 %v9267_v53  ;;  %3969 = vmatpush1.bf16.msra.mxu1 %v9270_v54  ;;  %v9365_v53 = vld [vmem:[%s15408_s1 + $0xd24] ss:$16 sps:$4 sm:$0xff]   ;;  %v9368_v54 = vld [vmem:[%s15408_s1 + $0xd2c] ss:$16 sps:$4 sm:$0xff]  }
 0x1e8   :  { %3884 = vmatprep.subr.bf16.mxu0 %v9275_v55  ;;  %3970 = vmatprep.subr.bf16.mxu1 %v9278_v56  ;;  %v9363_v55 = vld [vmem:[%s15408_s1 + $0xd20] ss:$16 sps:$4 sm:$0xff]   ;;  %v9366_v56 = vld [vmem:[%s15408_s1 + $0xd28] ss:$16 sps:$4 sm:$0xff]  }
 0x1eb   :  { %3885 = vmatpush1.bf16.msra.mxu0 %v9273_v57  ;;  %3971 = vmatpush1.bf16.msra.mxu1 %v9276_v58  ;;  %v9371_v57 = vld [vmem:[%s15408_s1 + $0xd44] ss:$16 sps:$4 sm:$0xff]   ;;  %v9374_v58 = vld [vmem:[%s15408_s1 + $0xd4c] ss:$16 sps:$4 sm:$0xff]  }
 0x1ec   :  { %3886 = vmatprep.subr.bf16.mxu0 %v9281_v59  ;;  %3972 = vmatprep.subr.bf16.mxu1 %v9284_v60  ;;  %v9369_v59 = vld [vmem:[%s15408_s1 + $0xd40] ss:$16 sps:$4 sm:$0xff]   ;;  %v9372_v60 = vld [vmem:[%s15408_s1 + $0xd48] ss:$16 sps:$4 sm:$0xff]  }
 0x1ef   :  { %3887 = vmatpush1.bf16.msra.mxu0 %v9279_v61  ;;  %3973 = vmatpush1.bf16.msra.mxu1 %v9282_v62  ;;  %v9377_v61 = vld [vmem:[%s15408_s1 + $0xd64] ss:$16 sps:$4 sm:$0xff]   ;;  %v9380_v62 = vld [vmem:[%s15408_s1 + $0xd6c] ss:$16 sps:$4 sm:$0xff]  }
 0x1f0   :  { %3888 = vmatprep.subr.bf16.mxu0 %v9287_v63  ;;  %3974 = vmatprep.subr.bf16.mxu1 %v9290_v0  ;;  %v9375_v63 = vld [vmem:[%s15408_s1 + $0xd60] ss:$16 sps:$4 sm:$0xff]   ;;  %v9378_v0 = vld [vmem:[%s15408_s1 + $0xd68] ss:$16 sps:$4 sm:$0xff]  }
 0x1f3   :  { %3889 = vmatpush1.bf16.msra.mxu0 %v9285_v1  ;;  %3975 = vmatpush1.bf16.msra.mxu1 %v9288_v2  ;;  %v9383_v1 = vld [vmem:[%s15408_s1 + $0xd84] ss:$16 sps:$4 sm:$0xff]   ;;  %v9386_v2 = vld [vmem:[%s15408_s1 + $0xd8c] ss:$16 sps:$4 sm:$0xff]  }
 0x1f4   :  { %3890 = vmatprep.subr.bf16.mxu0 %v9293_v3  ;;  %3976 = vmatprep.subr.bf16.mxu1 %v9296_v4  ;;  %v9381_v3 = vld [vmem:[%s15408_s1 + $0xd80] ss:$16 sps:$4 sm:$0xff]   ;;  %v9384_v4 = vld [vmem:[%s15408_s1 + $0xd88] ss:$16 sps:$4 sm:$0xff]  }
 0x1f7   :  { %3891 = vmatpush1.bf16.msra.mxu0 %v9291_v5  ;;  %3977 = vmatpush1.bf16.msra.mxu1 %v9294_v6  ;;  %v9389_v5 = vld [vmem:[%s15408_s1 + $0xda4] ss:$16 sps:$4 sm:$0xff]   ;;  %v9392_v6 = vld [vmem:[%s15408_s1 + $0xdac] ss:$16 sps:$4 sm:$0xff]  }
 0x1f8   :  { %3892 = vmatprep.subr.bf16.mxu0 %v9299_v7  ;;  %3978 = vmatprep.subr.bf16.mxu1 %v9302_v8  ;;  %v9387_v7 = vld [vmem:[%s15408_s1 + $0xda0] ss:$16 sps:$4 sm:$0xff]   ;;  %v9390_v8 = vld [vmem:[%s15408_s1 + $0xda8] ss:$16 sps:$4 sm:$0xff]  }
 0x1fb   :  { %3893 = vmatpush1.bf16.msra.mxu0 %v9297_v9  ;;  %3979 = vmatpush1.bf16.msra.mxu1 %v9300_v10  ;;  %v9395_v9 = vld [vmem:[%s15408_s1 + $0xdc4] ss:$16 sps:$4 sm:$0xff]   ;;  %v9398_v10 = vld [vmem:[%s15408_s1 + $0xdcc] ss:$16 sps:$4 sm:$0xff]  }
 0x1fc   :  { %3894 = vmatprep.subr.bf16.mxu0 %v9305_v11  ;;  %3980 = vmatprep.subr.bf16.mxu1 %v9308_v12  ;;  %v9393_v11 = vld [vmem:[%s15408_s1 + $0xdc0] ss:$16 sps:$4 sm:$0xff]   ;;  %v9396_v12 = vld [vmem:[%s15408_s1 + $0xdc8] ss:$16 sps:$4 sm:$0xff]  }
 0x1ff   :  { %3895 = vmatpush1.bf16.msra.mxu0 %v9303_v13  ;;  %3981 = vmatpush1.bf16.msra.mxu1 %v9306_v14  ;;  %v9401_v13 = vld [vmem:[%s15408_s1 + $0xde4] ss:$16 sps:$4 sm:$0xff]   ;;  %v9404_v14 = vld [vmem:[%s15408_s1 + $0xdec] ss:$16 sps:$4 sm:$0xff]  }
 0x200   :  { %4633 = vmatprep.subr.bf16.mxu0 %v9311_v15  ;;  %4719 = vmatprep.subr.bf16.mxu1 %v9314_v16  ;;  %v9399_v15 = vld [vmem:[%s15408_s1 + $0xde0] ss:$16 sps:$4 sm:$0xff]   ;;  %v9402_v16 = vld [vmem:[%s15408_s1 + $0xde8] ss:$16 sps:$4 sm:$0xff]  }
 0x202   :  { %3897 = vmatmul.mubr.bf16.vlgmr.msra.gmra.mrb[4].mxu0 %v9702_v21  ;;  %3983 = vmatmul.mubr.bf16.vlgmr.msra.gmra.mrb[4].mxu1 %v9702_v21  ;;  %v9413_v21 = vld [vmem:[%s15408_s1 + $0xe24] ss:$16 sps:$4 sm:$0xff]  }
 0x203   :  { %4634 = vmatpush1.bf16.msra.mxu0 %v9309_v17  ;;  %4720 = vmatpush1.bf16.msra.mxu1 %v9312_v18  ;;  %v9407_v17 = vld [vmem:[%s15408_s1 + $0xe04] ss:$16 sps:$4 sm:$0xff]   ;;  %v9410_v18 = vld [vmem:[%s15408_s1 + $0xe0c] ss:$16 sps:$4 sm:$0xff]  }
 0x204   :  { %4635 = vmatprep.subr.bf16.mxu0 %v9317_v19  ;;  %4721 = vmatprep.subr.bf16.mxu1 %v9320_v20  ;;  %v9405_v19 = vld [vmem:[%s15408_s1 + $0xe00] ss:$16 sps:$4 sm:$0xff]   ;;  %v9408_v20 = vld [vmem:[%s15408_s1 + $0xe08] ss:$16 sps:$4 sm:$0xff]  }
 0x205   :  { %4665 = vmatprep.mubr.bf16.mxu0 %v9703_v26  ;;  %4751 = vmatprep.mubr.bf16.mxu1 %v9703_v26  ;;  %v9419_v26 = vld [vmem:[%s15408_s1 + $0xe44] ss:$16 sps:$4 sm:$0xff]  }
 0x207   :  { %4636 = vmatpush1.bf16.msra.mxu0 %v9315_v22  ;;  %4722 = vmatpush1.bf16.msra.mxu1 %v9318_v23  ;;  %v9416_v22 = vld [vmem:[%s15408_s1 + $0xe2c] ss:$16 sps:$4 sm:$0xff]   ;;  %v9704_v23 = vld [vmem:[%s15409_s0] ss:$16 sps:$4 sm:$0xff]  }
 0x208   :  { %4637 = vmatprep.subr.bf16.mxu0 %v9323_v24  ;;  %4723 = vmatprep.subr.bf16.mxu1 %v9326_v25  ;;  %v9411_v24 = vld [vmem:[%s15408_s1 + $0xe20] ss:$16 sps:$4 sm:$0xff]   ;;  %v9414_v25 = vld [vmem:[%s15408_s1 + $0xe28] ss:$16 sps:$4 sm:$0xff]  }
 0x20b   :  { %4638 = vmatpush1.bf16.msra.mxu0 %v9321_v27  ;;  %4724 = vmatpush1.bf16.msra.mxu1 %v9324_v28  ;;  %v9422_v27 = vld [vmem:[%s15408_s1 + $0xe4c] ss:$16 sps:$4 sm:$0xff]  }
 0x20c   :  { %4639 = vmatprep.subr.bf16.mxu0 %v9329_v29  ;;  %4725 = vmatprep.subr.bf16.mxu1 %v9332_v30  ;;  %v9705_v28 = vld [vmem:[%s15409_s0 + $0xc] ss:$16 sps:$4 sm:$0xff]   ;;  %v9417_v29 = vld [vmem:[%s15408_s1 + $0xe40] ss:$16 sps:$4 sm:$0xff]   ;;  %v9420_v30 = vld [vmem:[%s15408_s1 + $0xe48] ss:$16 sps:$4 sm:$0xff]  }
 0x20f   :  { %4640 = vmatpush1.bf16.msra.mxu0 %v9327_v31  ;;  %4726 = vmatpush1.bf16.msra.mxu1 %v9330_v32  ;;  %v9425_v31 = vld [vmem:[%s15408_s1 + $0xe64] ss:$16 sps:$4 sm:$0xff]   ;;  %v9428_v32 = vld [vmem:[%s15408_s1 + $0xe6c] ss:$16 sps:$4 sm:$0xff]  }
 0x210   :  { %4641 = vmatprep.subr.bf16.mxu0 %v9335_v33  ;;  %4727 = vmatprep.subr.bf16.mxu1 %v9338_v34  ;;  %v9423_v33 = vld [vmem:[%s15408_s1 + $0xe60] ss:$16 sps:$4 sm:$0xff]   ;;  %v9426_v34 = vld [vmem:[%s15408_s1 + $0xe68] ss:$16 sps:$4 sm:$0xff]  }
 0x213   :  { %4642 = vmatpush1.bf16.msra.mxu0 %v9333_v35  ;;  %4728 = vmatpush1.bf16.msra.mxu1 %v9336_v36  ;;  %v9431_v35 = vld [vmem:[%s15408_s1 + $0xe84] ss:$16 sps:$4 sm:$0xff]   ;;  %v9434_v36 = vld [vmem:[%s15408_s1 + $0xe8c] ss:$16 sps:$4 sm:$0xff]  }
 0x214   :  { %4643 = vmatprep.subr.bf16.mxu0 %v9341_v37  ;;  %4729 = vmatprep.subr.bf16.mxu1 %v9344_v38  ;;  %v9429_v37 = vld [vmem:[%s15408_s1 + $0xe80] ss:$16 sps:$4 sm:$0xff]   ;;  %v9432_v38 = vld [vmem:[%s15408_s1 + $0xe88] ss:$16 sps:$4 sm:$0xff]  }
 0x217   :  { %4644 = vmatpush1.bf16.msra.mxu0 %v9339_v39  ;;  %4730 = vmatpush1.bf16.msra.mxu1 %v9342_v40  ;;  %v9437_v39 = vld [vmem:[%s15408_s1 + $0xea4] ss:$16 sps:$4 sm:$0xff]   ;;  %v9440_v40 = vld [vmem:[%s15408_s1 + $0xeac] ss:$16 sps:$4 sm:$0xff]  }
 0x218   :  { %4645 = vmatprep.subr.bf16.mxu0 %v9347_v41  ;;  %4731 = vmatprep.subr.bf16.mxu1 %v9350_v42  ;;  %v9435_v41 = vld [vmem:[%s15408_s1 + $0xea0] ss:$16 sps:$4 sm:$0xff]   ;;  %v9438_v42 = vld [vmem:[%s15408_s1 + $0xea8] ss:$16 sps:$4 sm:$0xff]  }
 0x21b   :  { %4646 = vmatpush1.bf16.msra.mxu0 %v9345_v43  ;;  %4732 = vmatpush1.bf16.msra.mxu1 %v9348_v44  ;;  %v9443_v43 = vld [vmem:[%s15408_s1 + $0xec4] ss:$16 sps:$4 sm:$0xff]   ;;  %v9446_v44 = vld [vmem:[%s15408_s1 + $0xecc] ss:$16 sps:$4 sm:$0xff]  }
 0x21c   :  { %4647 = vmatprep.subr.bf16.mxu0 %v9353_v45  ;;  %4733 = vmatprep.subr.bf16.mxu1 %v9356_v46 }
 0x21f   :  { %4648 = vmatpush1.bf16.msra.mxu0 %v9351_v47  ;;  %4734 = vmatpush1.bf16.msra.mxu1 %v9354_v48 }
 0x220   :  { %4649 = vmatprep.subr.bf16.mxu0 %v9359_v49  ;;  %4735 = vmatprep.subr.bf16.mxu1 %v9362_v50 }
 0x223   :  { %4650 = vmatpush1.bf16.msra.mxu0 %v9357_v51  ;;  %4736 = vmatpush1.bf16.msra.mxu1 %v9360_v52  ;;  %v9441_v51 = vld [vmem:[%s15408_s1 + $0xec0] ss:$16 sps:$4 sm:$0xff]   ;;  %v9444_v52 = vld [vmem:[%s15408_s1 + $0xec8] ss:$16 sps:$4 sm:$0xff]  }
 0x224   :  { %4651 = vmatprep.subr.bf16.mxu0 %v9365_v53  ;;  %4737 = vmatprep.subr.bf16.mxu1 %v9368_v54 }
 0x227   :  { %4652 = vmatpush1.bf16.msra.mxu0 %v9363_v55  ;;  %4738 = vmatpush1.bf16.msra.mxu1 %v9366_v56  ;;  %v9449_v55 = vld [vmem:[%s15408_s1 + $0xee4] ss:$16 sps:$4 sm:$0xff]   ;;  %v9452_v56 = vld [vmem:[%s15408_s1 + $0xeec] ss:$16 sps:$4 sm:$0xff]  }
 0x228   :  { %4653 = vmatprep.subr.bf16.mxu0 %v9371_v57  ;;  %4739 = vmatprep.subr.bf16.mxu1 %v9374_v58  ;;  %v9447_v57 = vld [vmem:[%s15408_s1 + $0xee0] ss:$16 sps:$4 sm:$0xff]   ;;  %v9450_v58 = vld [vmem:[%s15408_s1 + $0xee8] ss:$16 sps:$4 sm:$0xff]  }
 0x22b   :  { %4654 = vmatpush1.bf16.msra.mxu0 %v9369_v59  ;;  %4740 = vmatpush1.bf16.msra.mxu1 %v9372_v60  ;;  %v9455_v59 = vld [vmem:[%s15408_s1 + $0xf04] ss:$16 sps:$4 sm:$0xff]   ;;  %v9458_v60 = vld [vmem:[%s15408_s1 + $0xf0c] ss:$16 sps:$4 sm:$0xff]  }
 0x22c   :  { %4655 = vmatprep.subr.bf16.mxu0 %v9377_v61  ;;  %4741 = vmatprep.subr.bf16.mxu1 %v9380_v62  ;;  %v9453_v61 = vld [vmem:[%s15408_s1 + $0xf00] ss:$16 sps:$4 sm:$0xff]   ;;  %v9456_v62 = vld [vmem:[%s15408_s1 + $0xf08] ss:$16 sps:$4 sm:$0xff]  }
 0x22f   :  { %4656 = vmatpush1.bf16.msra.mxu0 %v9375_v63  ;;  %4742 = vmatpush1.bf16.msra.mxu1 %v9378_v0  ;;  %v9461_v63 = vld [vmem:[%s15408_s1 + $0xf24] ss:$16 sps:$4 sm:$0xff]   ;;  %v9464_v0 = vld [vmem:[%s15408_s1 + $0xf2c] ss:$16 sps:$4 sm:$0xff]  }
 0x230   :  { %4657 = vmatprep.subr.bf16.mxu0 %v9383_v1  ;;  %4743 = vmatprep.subr.bf16.mxu1 %v9386_v2  ;;  %v9459_v1 = vld [vmem:[%s15408_s1 + $0xf20] ss:$16 sps:$4 sm:$0xff]   ;;  %v9462_v2 = vld [vmem:[%s15408_s1 + $0xf28] ss:$16 sps:$4 sm:$0xff]  }
 0x233   :  { %4658 = vmatpush1.bf16.msra.mxu0 %v9381_v3  ;;  %4744 = vmatpush1.bf16.msra.mxu1 %v9384_v4  ;;  %v9467_v3 = vld [vmem:[%s15408_s1 + $0xf44] ss:$16 sps:$4 sm:$0xff]   ;;  %v9470_v4 = vld [vmem:[%s15408_s1 + $0xf4c] ss:$16 sps:$4 sm:$0xff]  }
 0x234   :  { %4659 = vmatprep.subr.bf16.mxu0 %v9389_v5  ;;  %4745 = vmatprep.subr.bf16.mxu1 %v9392_v6  ;;  %v9465_v5 = vld [vmem:[%s15408_s1 + $0xf40] ss:$16 sps:$4 sm:$0xff]   ;;  %v9468_v6 = vld [vmem:[%s15408_s1 + $0xf48] ss:$16 sps:$4 sm:$0xff]  }
 0x237   :  { %4660 = vmatpush1.bf16.msra.mxu0 %v9387_v7  ;;  %4746 = vmatpush1.bf16.msra.mxu1 %v9390_v8  ;;  %v9473_v7 = vld [vmem:[%s15408_s1 + $0xf64] ss:$16 sps:$4 sm:$0xff]   ;;  %v9476_v8 = vld [vmem:[%s15408_s1 + $0xf6c] ss:$16 sps:$4 sm:$0xff]  }
 0x238   :  { %4661 = vmatprep.subr.bf16.mxu0 %v9395_v9  ;;  %4747 = vmatprep.subr.bf16.mxu1 %v9398_v10  ;;  %v9471_v9 = vld [vmem:[%s15408_s1 + $0xf60] ss:$16 sps:$4 sm:$0xff]   ;;  %v9474_v10 = vld [vmem:[%s15408_s1 + $0xf68] ss:$16 sps:$4 sm:$0xff]  }
 0x23b   :  { %4662 = vmatpush1.bf16.msra.mxu0 %v9393_v11  ;;  %4748 = vmatpush1.bf16.msra.mxu1 %v9396_v12  ;;  %v9479_v11 = vld [vmem:[%s15408_s1 + $0xf84] ss:$16 sps:$4 sm:$0xff]   ;;  %v9482_v12 = vld [vmem:[%s15408_s1 + $0xf8c] ss:$16 sps:$4 sm:$0xff]  }
 0x23c   :  { %4663 = vmatprep.subr.bf16.mxu0 %v9401_v13  ;;  %4749 = vmatprep.subr.bf16.mxu1 %v9404_v14  ;;  %v9477_v13 = vld [vmem:[%s15408_s1 + $0xf80] ss:$16 sps:$4 sm:$0xff]   ;;  %v9480_v14 = vld [vmem:[%s15408_s1 + $0xf88] ss:$16 sps:$4 sm:$0xff]  }
 0x23f   :  { %4664 = vmatpush1.bf16.msra.mxu0 %v9399_v15  ;;  %4750 = vmatpush1.bf16.msra.mxu1 %v9402_v16  ;;  %v9485_v15 = vld [vmem:[%s15408_s1 + $0xfa4] ss:$16 sps:$4 sm:$0xff]   ;;  %v9488_v16 = vld [vmem:[%s15408_s1 + $0xfac] ss:$16 sps:$4 sm:$0xff]  }
 0x240   :  { %4676 = vmatprep.subr.bf16.mxu0 %v9407_v17  ;;  %4762 = vmatprep.subr.bf16.mxu1 %v9410_v18  ;;  %v9483_v17 = vld [vmem:[%s15408_s1 + $0xfa0] ss:$16 sps:$4 sm:$0xff]   ;;  %v9486_v18 = vld [vmem:[%s15408_s1 + $0xfa8] ss:$16 sps:$4 sm:$0xff]  }
 0x242   :  { %4666 = vmatmul.mubr.bf16.vlgmr.msra.gmra.mrb[4].mxu0 %v9704_v23  ;;  %4752 = vmatmul.mubr.bf16.vlgmr.msra.gmra.mrb[4].mxu1 %v9704_v23  ;;  %v9497_v23 = vld [vmem:[%s15408_s1 + $0xfe4] ss:$16 sps:$4 sm:$0xff]  }
 0x243   :  { %4677 = vmatpush1.bf16.msra.mxu0 %v9405_v19  ;;  %4763 = vmatpush1.bf16.msra.mxu1 %v9408_v20  ;;  %v9491_v19 = vld [vmem:[%s15408_s1 + $0xfc4] ss:$16 sps:$4 sm:$0xff]   ;;  %v9494_v20 = vld [vmem:[%s15408_s1 + $0xfcc] ss:$16 sps:$4 sm:$0xff]  }
 0x244   :  { %4678 = vmatprep.subr.bf16.mxu0 %v9413_v21  ;;  %4764 = vmatprep.subr.bf16.mxu1 %v9416_v22  ;;  %v9489_v21 = vld [vmem:[%s15408_s1 + $0xfc0] ss:$16 sps:$4 sm:$0xff]   ;;  %v9492_v22 = vld [vmem:[%s15408_s1 + $0xfc8] ss:$16 sps:$4 sm:$0xff]  }
 0x245   :  { %4708 = vmatprep.mubr.bf16.mxu0 %v9705_v28  ;;  %4794 = vmatprep.mubr.bf16.mxu1 %v9705_v28  ;;  %v9506_v28 = vld [vmem:[%s15408_s1 + $0x140c] ss:$16 sps:$4 sm:$0xff]  }
 0x247   :  { %4679 = vmatpush1.bf16.msra.mxu0 %v9411_v24  ;;  %4765 = vmatpush1.bf16.msra.mxu1 %v9414_v25  ;;  %v9500_v24 = vld [vmem:[%s15408_s1 + $0xfec] ss:$16 sps:$4 sm:$0xff]   ;;  %v9495_v25 = vld [vmem:[%s15408_s1 + $0xfe0] ss:$16 sps:$4 sm:$0xff]  }
 0x248   :  { %4680 = vmatprep.subr.bf16.mxu0 %v9419_v26  ;;  %4766 = vmatprep.subr.bf16.mxu1 %v9422_v27  ;;  %v9498_v26 = vld [vmem:[%s15408_s1 + $0xfe8] ss:$16 sps:$4 sm:$0xff]   ;;  %v9503_v27 = vld [vmem:[%s15408_s1 + $0x1404] ss:$16 sps:$4 sm:$0xff]  }
 0x24b   :  { %4681 = vmatpush1.bf16.msra.mxu0 %v9417_v29  ;;  %4767 = vmatpush1.bf16.msra.mxu1 %v9420_v30  ;;  %v9501_v29 = vld [vmem:[%s15408_s1 + $0x1400] ss:$16 sps:$4 sm:$0xff]   ;;  %v9504_v30 = vld [vmem:[%s15408_s1 + $0x1408] ss:$16 sps:$4 sm:$0xff]  }
 0x24c   :  { %4682 = vmatprep.subr.bf16.mxu0 %v9425_v31  ;;  %4768 = vmatprep.subr.bf16.mxu1 %v9428_v32  ;;  %v9509_v31 = vld [vmem:[%s15408_s1 + $0x1424] ss:$16 sps:$4 sm:$0xff]   ;;  %v9512_v32 = vld [vmem:[%s15408_s1 + $0x142c] ss:$16 sps:$4 sm:$0xff]  }
 0x24f   :  { %4683 = vmatpush1.bf16.msra.mxu0 %v9423_v33  ;;  %4769 = vmatpush1.bf16.msra.mxu1 %v9426_v34  ;;  %v9706_v33 = vld [vmem:[%s15409_s0 + $0x8] ss:$16 sps:$4 sm:$0xff]   ;;  %v9507_v34 = vld [vmem:[%s15408_s1 + $0x1420] ss:$16 sps:$4 sm:$0xff]  }
 0x250   :  { %4684 = vmatprep.subr.bf16.mxu0 %v9431_v35  ;;  %4770 = vmatprep.subr.bf16.mxu1 %v9434_v36  ;;  %v9510_v35 = vld [vmem:[%s15408_s1 + $0x1428] ss:$16 sps:$4 sm:$0xff]   ;;  %v9515_v36 = vld [vmem:[%s15408_s1 + $0x1444] ss:$16 sps:$4 sm:$0xff]  }
 0x253   :  { %4685 = vmatpush1.bf16.msra.mxu0 %v9429_v37  ;;  %4771 = vmatpush1.bf16.msra.mxu1 %v9432_v38  ;;  %v9518_v37 = vld [vmem:[%s15408_s1 + $0x144c] ss:$16 sps:$4 sm:$0xff]   ;;  %v12536_v38 = vld [vmem:[%s15409_s0 + $0x44] ss:$16 sps:$4 sm:$0xff]  }
 0x254   :  { %4686 = vmatprep.subr.bf16.mxu0 %v9437_v39  ;;  %4772 = vmatprep.subr.bf16.mxu1 %v9440_v40  ;;  %v9513_v39 = vld [vmem:[%s15408_s1 + $0x1440] ss:$16 sps:$4 sm:$0xff]   ;;  %v9516_v40 = vld [vmem:[%s15408_s1 + $0x1448] ss:$16 sps:$4 sm:$0xff]  }
 0x255   :  { %v12370_v45 = vpop.f32.mrb[0].mxu0  ;;  %v12372_v46 = vpop.f32.mrb[0].mxu1 }
 0x256   :  { %v12374_v47 = vpop.f32.mrb[1].mxu0  ;;  %v12376_v48 = vpop.f32.mrb[1].mxu1 }
 0x257   :  { %v12378_v49 = vpop.f32.mrb[2].mxu0  ;;  %v12380_v50 = vpop.f32.mrb[2].mxu1  ;;  %4687 = vmatpush1.bf16.msra.mxu0 %v9435_v41  ;;  %4773 = vmatpush1.bf16.msra.mxu1 %v9438_v42  ;;  %v9521_v41 = vld [vmem:[%s15408_s1 + $0x1464] ss:$16 sps:$4 sm:$0xff]   ;;  %v9524_v42 = vld [vmem:[%s15408_s1 + $0x146c] ss:$16 sps:$4 sm:$0xff]  }
 0x258   :  { %v12388_v53 = vpop.f32.mrb[3].mxu0  ;;  %v12390_v54 = vpop.f32.mrb[3].mxu1  ;;  %4688 = vmatprep.subr.bf16.mxu0 %v9443_v43  ;;  %4774 = vmatprep.subr.bf16.mxu1 %v9446_v44  ;;  %v9519_v43 = vld [vmem:[%s15408_s1 + $0x1460] ss:$16 sps:$4 sm:$0xff]   ;;  %v9522_v44 = vld [vmem:[%s15408_s1 + $0x1468] ss:$16 sps:$4 sm:$0xff]  }
 0x25b   :  { %4689 = vmatpush1.bf16.msra.mxu0 %v9441_v51  ;;  %4775 = vmatpush1.bf16.msra.mxu1 %v9444_v52  ;;  %v9527_v51 = vld [vmem:[%s15408_s1 + $0x1484] ss:$16 sps:$4 sm:$0xff]   ;;  %v9530_v52 = vld [vmem:[%s15408_s1 + $0x148c] ss:$16 sps:$4 sm:$0xff]  }
 0x25c   :  { %4690 = vmatprep.subr.bf16.mxu0 %v9449_v55  ;;  %4776 = vmatprep.subr.bf16.mxu1 %v9452_v56  ;;  %v9525_v55 = vld [vmem:[%s15408_s1 + $0x1480] ss:$16 sps:$4 sm:$0xff]   ;;  %v9528_v56 = vld [vmem:[%s15408_s1 + $0x1488] ss:$16 sps:$4 sm:$0xff]  }
 0x25f   :  { %4691 = vmatpush1.bf16.msra.mxu0 %v9447_v57  ;;  %4777 = vmatpush1.bf16.msra.mxu1 %v9450_v58  ;;  %v9533_v57 = vld [vmem:[%s15408_s1 + $0x14a4] ss:$16 sps:$4 sm:$0xff]   ;;  %v9536_v58 = vld [vmem:[%s15408_s1 + $0x14ac] ss:$16 sps:$4 sm:$0xff]  }
 0x260   :  { %4692 = vmatprep.subr.bf16.mxu0 %v9455_v59  ;;  %4778 = vmatprep.subr.bf16.mxu1 %v9458_v60  ;;  %v9531_v59 = vld [vmem:[%s15408_s1 + $0x14a0] ss:$16 sps:$4 sm:$0xff]   ;;  %v9534_v60 = vld [vmem:[%s15408_s1 + $0x14a8] ss:$16 sps:$4 sm:$0xff]  }
 0x263   :  { %4693 = vmatpush1.bf16.msra.mxu0 %v9453_v61  ;;  %4779 = vmatpush1.bf16.msra.mxu1 %v9456_v62  ;;  %v9539_v61 = vld [vmem:[%s15408_s1 + $0x14c4] ss:$16 sps:$4 sm:$0xff]   ;;  %v9542_v62 = vld [vmem:[%s15408_s1 + $0x14cc] ss:$16 sps:$4 sm:$0xff]  }
 0x264   :  { %4694 = vmatprep.subr.bf16.mxu0 %v9461_v63  ;;  %4780 = vmatprep.subr.bf16.mxu1 %v9464_v0  ;;  %v9537_v63 = vld [vmem:[%s15408_s1 + $0x14c0] ss:$16 sps:$4 sm:$0xff]   ;;  %v9540_v0 = vld [vmem:[%s15408_s1 + $0x14c8] ss:$16 sps:$4 sm:$0xff]  }
 0x267   :  { %4695 = vmatpush1.bf16.msra.mxu0 %v9459_v1  ;;  %4781 = vmatpush1.bf16.msra.mxu1 %v9462_v2  ;;  %v9545_v1 = vld [vmem:[%s15408_s1 + $0x14e4] ss:$16 sps:$4 sm:$0xff]   ;;  %v9548_v2 = vld [vmem:[%s15408_s1 + $0x14ec] ss:$16 sps:$4 sm:$0xff]  }
 0x268   :  { %4696 = vmatprep.subr.bf16.mxu0 %v9467_v3  ;;  %4782 = vmatprep.subr.bf16.mxu1 %v9470_v4  ;;  %v9543_v3 = vld [vmem:[%s15408_s1 + $0x14e0] ss:$16 sps:$4 sm:$0xff]   ;;  %v9546_v4 = vld [vmem:[%s15408_s1 + $0x14e8] ss:$16 sps:$4 sm:$0xff]  }
 0x26b   :  { %4697 = vmatpush1.bf16.msra.mxu0 %v9465_v5  ;;  %4783 = vmatpush1.bf16.msra.mxu1 %v9468_v6  ;;  %v9551_v5 = vld [vmem:[%s15408_s1 + $0x1504] ss:$16 sps:$4 sm:$0xff]   ;;  %v9554_v6 = vld [vmem:[%s15408_s1 + $0x150c] ss:$16 sps:$4 sm:$0xff]  }
 0x26c   :  { %4698 = vmatprep.subr.bf16.mxu0 %v9473_v7  ;;  %4784 = vmatprep.subr.bf16.mxu1 %v9476_v8  ;;  %v9549_v7 = vld [vmem:[%s15408_s1 + $0x1500] ss:$16 sps:$4 sm:$0xff]   ;;  %v9552_v8 = vld [vmem:[%s15408_s1 + $0x1508] ss:$16 sps:$4 sm:$0xff]  }
 0x26f   :  { %4699 = vmatpush1.bf16.msra.mxu0 %v9471_v9  ;;  %4785 = vmatpush1.bf16.msra.mxu1 %v9474_v10  ;;  %v9557_v9 = vld [vmem:[%s15408_s1 + $0x1524] ss:$16 sps:$4 sm:$0xff]   ;;  %v9560_v10 = vld [vmem:[%s15408_s1 + $0x152c] ss:$16 sps:$4 sm:$0xff]  }
 0x270   :  { %4700 = vmatprep.subr.bf16.mxu0 %v9479_v11  ;;  %4786 = vmatprep.subr.bf16.mxu1 %v9482_v12  ;;  %v9555_v11 = vld [vmem:[%s15408_s1 + $0x1520] ss:$16 sps:$4 sm:$0xff]   ;;  %v9558_v12 = vld [vmem:[%s15408_s1 + $0x1528] ss:$16 sps:$4 sm:$0xff]  }
 0x273   :  { %4701 = vmatpush1.bf16.msra.mxu0 %v9477_v13  ;;  %4787 = vmatpush1.bf16.msra.mxu1 %v9480_v14  ;;  %v9563_v13 = vld [vmem:[%s15408_s1 + $0x1544] ss:$16 sps:$4 sm:$0xff]   ;;  %v9566_v14 = vld [vmem:[%s15408_s1 + $0x154c] ss:$16 sps:$4 sm:$0xff]  }
 0x274   :  { %4702 = vmatprep.subr.bf16.mxu0 %v9485_v15  ;;  %4788 = vmatprep.subr.bf16.mxu1 %v9488_v16  ;;  %v9561_v15 = vld [vmem:[%s15408_s1 + $0x1540] ss:$16 sps:$4 sm:$0xff]   ;;  %v9564_v16 = vld [vmem:[%s15408_s1 + $0x1548] ss:$16 sps:$4 sm:$0xff]  }
 0x277   :  { %4703 = vmatpush1.bf16.msra.mxu0 %v9483_v17  ;;  %4789 = vmatpush1.bf16.msra.mxu1 %v9486_v18  ;;  %v9569_v17 = vld [vmem:[%s15408_s1 + $0x1564] ss:$16 sps:$4 sm:$0xff]   ;;  %v9572_v18 = vld [vmem:[%s15408_s1 + $0x156c] ss:$16 sps:$4 sm:$0xff]  }
 0x278   :  { %4704 = vmatprep.subr.bf16.mxu0 %v9491_v19  ;;  %4790 = vmatprep.subr.bf16.mxu1 %v9494_v20  ;;  %v9567_v19 = vld [vmem:[%s15408_s1 + $0x1560] ss:$16 sps:$4 sm:$0xff]   ;;  %v9570_v20 = vld [vmem:[%s15408_s1 + $0x1568] ss:$16 sps:$4 sm:$0xff]  }
 0x27b   :  { %4705 = vmatpush1.bf16.msra.mxu0 %v9489_v21  ;;  %4791 = vmatpush1.bf16.msra.mxu1 %v9492_v22  ;;  %v9575_v21 = vld [vmem:[%s15408_s1 + $0x1584] ss:$16 sps:$4 sm:$0xff]   ;;  %v9578_v22 = vld [vmem:[%s15408_s1 + $0x158c] ss:$16 sps:$4 sm:$0xff]  }
 0x27c   :  { %4706 = vmatprep.subr.bf16.mxu0 %v9497_v23  ;;  %4792 = vmatprep.subr.bf16.mxu1 %v9500_v24  ;;  %v9573_v23 = vld [vmem:[%s15408_s1 + $0x1580] ss:$16 sps:$4 sm:$0xff]   ;;  %v9576_v24 = vld [vmem:[%s15408_s1 + $0x1588] ss:$16 sps:$4 sm:$0xff]  }
 0x27f   :  { %4707 = vmatpush1.bf16.msra.mxu0 %v9495_v25  ;;  %4793 = vmatpush1.bf16.msra.mxu1 %v9498_v26  ;;  %v9581_v25 = vld [vmem:[%s15408_s1 + $0x15a4] ss:$16 sps:$4 sm:$0xff]   ;;  %v9584_v26 = vld [vmem:[%s15408_s1 + $0x15ac] ss:$16 sps:$4 sm:$0xff]  }
 0x280   :  { %5574 = vmatprep.subr.bf16.mxu0 %v9503_v27  ;;  %5660 = vmatprep.subr.bf16.mxu1 %v9506_v28  ;;  %v9579_v27 = vld [vmem:[%s15408_s1 + $0x15a0] ss:$16 sps:$4 sm:$0xff]   ;;  %v9582_v28 = vld [vmem:[%s15408_s1 + $0x15a8] ss:$16 sps:$4 sm:$0xff]  }
 0x282   :  { %4709 = vmatmul.mubr.bf16.vlgmr.msra.gmra.mrb[4].mxu0 %v9706_v33  ;;  %4795 = vmatmul.mubr.bf16.vlgmr.msra.gmra.mrb[4].mxu1 %v9706_v33  ;;  %v9593_v33 = vld [vmem:[%s15408_s1 + $0x15e4] ss:$16 sps:$4 sm:$0xff]  }
 0x283   :  { %5575 = vmatpush1.bf16.msra.mxu0 %v9501_v29  ;;  %5661 = vmatpush1.bf16.msra.mxu1 %v9504_v30  ;;  %v9587_v29 = vld [vmem:[%s15408_s1 + $0x15c4] ss:$16 sps:$4 sm:$0xff]   ;;  %v9590_v30 = vld [vmem:[%s15408_s1 + $0x15cc] ss:$16 sps:$4 sm:$0xff]  }
 0x284   :  { %5576 = vmatprep.subr.bf16.mxu0 %v9509_v31  ;;  %5662 = vmatprep.subr.bf16.mxu1 %v9512_v32  ;;  %v9585_v31 = vld [vmem:[%s15408_s1 + $0x15c0] ss:$16 sps:$4 sm:$0xff]   ;;  %v9588_v32 = vld [vmem:[%s15408_s1 + $0x15c8] ss:$16 sps:$4 sm:$0xff]  }
 0x285   :  { %5606 = vmatprep.mubr.bf16.mxu0 %v12536_v38  ;;  %5692 = vmatprep.mubr.bf16.mxu1 %v12536_v38 }
 0x287   :  { %5577 = vmatpush1.bf16.msra.mxu0 %v9507_v34  ;;  %5663 = vmatpush1.bf16.msra.mxu1 %v9510_v35  ;;  %v9596_v34 = vld [vmem:[%s15408_s1 + $0x15ec] ss:$16 sps:$4 sm:$0xff]   ;;  %v9591_v35 = vld [vmem:[%s15408_s1 + $0x15e0] ss:$16 sps:$4 sm:$0xff]  }
 0x288   :  { %5578 = vmatprep.subr.bf16.mxu0 %v9515_v36  ;;  %5664 = vmatprep.subr.bf16.mxu1 %v9518_v37  ;;  %v9594_v36 = vld [vmem:[%s15408_s1 + $0x15e8] ss:$16 sps:$4 sm:$0xff]   ;;  %v9599_v37 = vld [vmem:[%s15408_s1 + $0x1604] ss:$16 sps:$4 sm:$0xff]  }
 0x28b   :  { %5579 = vmatpush1.bf16.msra.mxu0 %v9513_v39  ;;  %5665 = vmatpush1.bf16.msra.mxu1 %v9516_v40  ;;  %v9602_v39 = vld [vmem:[%s15408_s1 + $0x160c] ss:$16 sps:$4 sm:$0xff]   ;;  %v9597_v40 = vld [vmem:[%s15408_s1 + $0x1600] ss:$16 sps:$4 sm:$0xff]  }
 0x28c   :  { %5580 = vmatprep.subr.bf16.mxu0 %v9521_v41  ;;  %5666 = vmatprep.subr.bf16.mxu1 %v9524_v42  ;;  %v9600_v41 = vld [vmem:[%s15408_s1 + $0x1608] ss:$16 sps:$4 sm:$0xff]   ;;  %v9605_v42 = vld [vmem:[%s15408_s1 + $0x1624] ss:$16 sps:$4 sm:$0xff]  }
 0x28f   :  { %5581 = vmatpush1.bf16.msra.mxu0 %v9519_v43  ;;  %5667 = vmatpush1.bf16.msra.mxu1 %v9522_v44  ;;  %v9608_v43 = vld [vmem:[%s15408_s1 + $0x162c] ss:$16 sps:$4 sm:$0xff]   ;;  %v12723_v44 = vld [vmem:[%s15409_s0 + $0x40] ss:$16 sps:$4 sm:$0xff]  }
 0x290   :  { %5582 = vmatprep.subr.bf16.mxu0 %v9527_v51  ;;  %5668 = vmatprep.subr.bf16.mxu1 %v9530_v52  ;;  %v9603_v51 = vld [vmem:[%s15408_s1 + $0x1620] ss:$16 sps:$4 sm:$0xff]   ;;  %v9606_v52 = vld [vmem:[%s15408_s1 + $0x1628] ss:$16 sps:$4 sm:$0xff]  }
 0x293   :  { %5583 = vmatpush1.bf16.msra.mxu0 %v9525_v55  ;;  %5669 = vmatpush1.bf16.msra.mxu1 %v9528_v56  ;;  %v9611_v55 = vld [vmem:[%s15408_s1 + $0x1644] ss:$16 sps:$4 sm:$0xff]   ;;  %v9614_v56 = vld [vmem:[%s15408_s1 + $0x164c] ss:$16 sps:$4 sm:$0xff]  }
 0x294   :  { %5584 = vmatprep.subr.bf16.mxu0 %v9533_v57  ;;  %5670 = vmatprep.subr.bf16.mxu1 %v9536_v58  ;;  %v12742_v57 = vld [vmem:[%s15409_s0 + $0x4c] ss:$16 sps:$4 sm:$0xff]   ;;  %v9609_v58 = vld [vmem:[%s15408_s1 + $0x1640] ss:$16 sps:$4 sm:$0xff]  }
 0x297   :  { %5585 = vmatpush1.bf16.msra.mxu0 %v9531_v59  ;;  %5671 = vmatpush1.bf16.msra.mxu1 %v9534_v60  ;;  %v9612_v59 = vld [vmem:[%s15408_s1 + $0x1648] ss:$16 sps:$4 sm:$0xff]   ;;  %v9617_v60 = vld [vmem:[%s15408_s1 + $0x1664] ss:$16 sps:$4 sm:$0xff]  }
 0x298   :  { %5586 = vmatprep.subr.bf16.mxu0 %v9539_v61  ;;  %5672 = vmatprep.subr.bf16.mxu1 %v9542_v62  ;;  %v9620_v61 = vld [vmem:[%s15408_s1 + $0x166c] ss:$16 sps:$4 sm:$0xff]   ;;  %v9615_v62 = vld [vmem:[%s15408_s1 + $0x1660] ss:$16 sps:$4 sm:$0xff]  }
 0x29b   :  { %5587 = vmatpush1.bf16.msra.mxu0 %v9537_v63  ;;  %5673 = vmatpush1.bf16.msra.mxu1 %v9540_v0  ;;  %v9618_v63 = vld [vmem:[%s15408_s1 + $0x1668] ss:$16 sps:$4 sm:$0xff]   ;;  %v9623_v0 = vld [vmem:[%s15408_s1 + $0x1684] ss:$16 sps:$4 sm:$0xff]  }
 0x29c   :  { %5588 = vmatprep.subr.bf16.mxu0 %v9545_v1  ;;  %5674 = vmatprep.subr.bf16.mxu1 %v9548_v2  ;;  %v9626_v1 = vld [vmem:[%s15408_s1 + $0x168c] ss:$16 sps:$4 sm:$0xff]   ;;  %v9621_v2 = vld [vmem:[%s15408_s1 + $0x1680] ss:$16 sps:$4 sm:$0xff]  }
 0x29f   :  { %5589 = vmatpush1.bf16.msra.mxu0 %v9543_v3  ;;  %5675 = vmatpush1.bf16.msra.mxu1 %v9546_v4  ;;  %v9624_v3 = vld [vmem:[%s15408_s1 + $0x1688] ss:$16 sps:$4 sm:$0xff]   ;;  %v9629_v4 = vld [vmem:[%s15408_s1 + $0x16a4] ss:$16 sps:$4 sm:$0xff]  }
 0x2a0   :  { %5590 = vmatprep.subr.bf16.mxu0 %v9551_v5  ;;  %5676 = vmatprep.subr.bf16.mxu1 %v9554_v6  ;;  %v9632_v5 = vld [vmem:[%s15408_s1 + $0x16ac] ss:$16 sps:$4 sm:$0xff]   ;;  %v9627_v6 = vld [vmem:[%s15408_s1 + $0x16a0] ss:$16 sps:$4 sm:$0xff]  }
 0x2a3   :  { %5591 = vmatpush1.bf16.msra.mxu0 %v9549_v7  ;;  %5677 = vmatpush1.bf16.msra.mxu1 %v9552_v8  ;;  %v9630_v7 = vld [vmem:[%s15408_s1 + $0x16a8] ss:$16 sps:$4 sm:$0xff]   ;;  %v9635_v8 = vld [vmem:[%s15408_s1 + $0x16c4] ss:$16 sps:$4 sm:$0xff]  }
 0x2a4   :  { %5592 = vmatprep.subr.bf16.mxu0 %v9557_v9  ;;  %5678 = vmatprep.subr.bf16.mxu1 %v9560_v10  ;;  %v9638_v9 = vld [vmem:[%s15408_s1 + $0x16cc] ss:$16 sps:$4 sm:$0xff]   ;;  %v9633_v10 = vld [vmem:[%s15408_s1 + $0x16c0] ss:$16 sps:$4 sm:$0xff]  }
 0x2a7   :  { %5593 = vmatpush1.bf16.msra.mxu0 %v9555_v11  ;;  %5679 = vmatpush1.bf16.msra.mxu1 %v9558_v12  ;;  %v9636_v11 = vld [vmem:[%s15408_s1 + $0x16c8] ss:$16 sps:$4 sm:$0xff]   ;;  %v9641_v12 = vld [vmem:[%s15408_s1 + $0x16e4] ss:$16 sps:$4 sm:$0xff]  }
 0x2a8   :  { %5594 = vmatprep.subr.bf16.mxu0 %v9563_v13  ;;  %5680 = vmatprep.subr.bf16.mxu1 %v9566_v14  ;;  %v9644_v13 = vld [vmem:[%s15408_s1 + $0x16ec] ss:$16 sps:$4 sm:$0xff]   ;;  %v9639_v14 = vld [vmem:[%s15408_s1 + $0x16e0] ss:$16 sps:$4 sm:$0xff]  }
 0x2ab   :  { %5595 = vmatpush1.bf16.msra.mxu0 %v9561_v15  ;;  %5681 = vmatpush1.bf16.msra.mxu1 %v9564_v16  ;;  %v9642_v15 = vld [vmem:[%s15408_s1 + $0x16e8] ss:$16 sps:$4 sm:$0xff]   ;;  %v9647_v16 = vld [vmem:[%s15408_s1 + $0x1704] ss:$16 sps:$4 sm:$0xff]  }
 0x2ac   :  { %5596 = vmatprep.subr.bf16.mxu0 %v9569_v17  ;;  %5682 = vmatprep.subr.bf16.mxu1 %v9572_v18  ;;  %v9650_v17 = vld [vmem:[%s15408_s1 + $0x170c] ss:$16 sps:$4 sm:$0xff]   ;;  %v9645_v18 = vld [vmem:[%s15408_s1 + $0x1700] ss:$16 sps:$4 sm:$0xff]  }
 0x2af   :  { %5597 = vmatpush1.bf16.msra.mxu0 %v9567_v19  ;;  %5683 = vmatpush1.bf16.msra.mxu1 %v9570_v20  ;;  %v9648_v19 = vld [vmem:[%s15408_s1 + $0x1708] ss:$16 sps:$4 sm:$0xff]   ;;  %v9653_v20 = vld [vmem:[%s15408_s1 + $0x1724] ss:$16 sps:$4 sm:$0xff]  }
 0x2b0   :  { %5598 = vmatprep.subr.bf16.mxu0 %v9575_v21  ;;  %5684 = vmatprep.subr.bf16.mxu1 %v9578_v22  ;;  %v9656_v21 = vld [vmem:[%s15408_s1 + $0x172c] ss:$16 sps:$4 sm:$0xff]   ;;  %v9651_v22 = vld [vmem:[%s15408_s1 + $0x1720] ss:$16 sps:$4 sm:$0xff]  }
 0x2b3   :  { %5599 = vmatpush1.bf16.msra.mxu0 %v9573_v23  ;;  %5685 = vmatpush1.bf16.msra.mxu1 %v9576_v24  ;;  %v9654_v23 = vld [vmem:[%s15408_s1 + $0x1728] ss:$16 sps:$4 sm:$0xff]   ;;  %v9659_v24 = vld [vmem:[%s15408_s1 + $0x1744] ss:$16 sps:$4 sm:$0xff]  }
 0x2b4   :  { %5600 = vmatprep.subr.bf16.mxu0 %v9581_v25  ;;  %5686 = vmatprep.subr.bf16.mxu1 %v9584_v26  ;;  %v9662_v25 = vld [vmem:[%s15408_s1 + $0x174c] ss:$16 sps:$4 sm:$0xff]   ;;  %v9657_v26 = vld [vmem:[%s15408_s1 + $0x1740] ss:$16 sps:$4 sm:$0xff]  }
 0x2b7   :  { %5601 = vmatpush1.bf16.msra.mxu0 %v9579_v27  ;;  %5687 = vmatpush1.bf16.msra.mxu1 %v9582_v28  ;;  %v9660_v27 = vld [vmem:[%s15408_s1 + $0x1748] ss:$16 sps:$4 sm:$0xff]   ;;  %v9665_v28 = vld [vmem:[%s15408_s1 + $0x1764] ss:$16 sps:$4 sm:$0xff]  }
 0x2b8   :  { %5602 = vmatprep.subr.bf16.mxu0 %v9587_v29  ;;  %5688 = vmatprep.subr.bf16.mxu1 %v9590_v30  ;;  %v9668_v29 = vld [vmem:[%s15408_s1 + $0x176c] ss:$16 sps:$4 sm:$0xff]   ;;  %v9663_v30 = vld [vmem:[%s15408_s1 + $0x1760] ss:$16 sps:$4 sm:$0xff]  }
 0x2bb   :  { %5603 = vmatpush1.bf16.msra.mxu0 %v9585_v31  ;;  %5689 = vmatpush1.bf16.msra.mxu1 %v9588_v32  ;;  %v9666_v31 = vld [vmem:[%s15408_s1 + $0x1768] ss:$16 sps:$4 sm:$0xff]   ;;  %v9671_v32 = vld [vmem:[%s15408_s1 + $0x1784] ss:$16 sps:$4 sm:$0xff]  }
 0x2bc   :  { %5604 = vmatprep.subr.bf16.mxu0 %v9593_v33  ;;  %5690 = vmatprep.subr.bf16.mxu1 %v9596_v34  ;;  %v9674_v33 = vld [vmem:[%s15408_s1 + $0x178c] ss:$16 sps:$4 sm:$0xff]   ;;  %v9669_v34 = vld [vmem:[%s15408_s1 + $0x1780] ss:$16 sps:$4 sm:$0xff]  }
 0x2bf   :  { %5605 = vmatpush1.bf16.msra.mxu0 %v9591_v35  ;;  %5691 = vmatpush1.bf16.msra.mxu1 %v9594_v36  ;;  %v9672_v35 = vld [vmem:[%s15408_s1 + $0x1788] ss:$16 sps:$4 sm:$0xff]   ;;  %v9677_v36 = vld [vmem:[%s15408_s1 + $0x17a4] ss:$16 sps:$4 sm:$0xff]  }
 0x2c0   :  { %5617 = vmatprep.subr.bf16.mxu0 %v9599_v37  ;;  %5703 = vmatprep.subr.bf16.mxu1 %v9602_v39  ;;  %v9680_v37 = vld [vmem:[%s15408_s1 + $0x17ac] ss:$16 sps:$4 sm:$0xff]   ;;  %v9675_v39 = vld [vmem:[%s15408_s1 + $0x17a0] ss:$16 sps:$4 sm:$0xff]  }
 0x2c2   :  { %5607 = vmatmul.mubr.bf16.vlgmr.msra.gmra.mrb[4].mxu0 %v12723_v44  ;;  %5693 = vmatmul.mubr.bf16.vlgmr.msra.gmra.mrb[4].mxu1 %v12723_v44 }
 0x2c3   :  { %5618 = vmatpush1.bf16.msra.mxu0 %v9597_v40  ;;  %5704 = vmatpush1.bf16.msra.mxu1 %v9600_v41  ;;  %v9678_v40 = vld [vmem:[%s15408_s1 + $0x17a8] ss:$16 sps:$4 sm:$0xff]   ;;  %v9683_v41 = vld [vmem:[%s15408_s1 + $0x17c4] ss:$16 sps:$4 sm:$0xff]  }
 0x2c4   :  { %5619 = vmatprep.subr.bf16.mxu0 %v9605_v42  ;;  %5705 = vmatprep.subr.bf16.mxu1 %v9608_v43  ;;  %v9686_v42 = vld [vmem:[%s15408_s1 + $0x17cc] ss:$16 sps:$4 sm:$0xff]   ;;  %v9681_v43 = vld [vmem:[%s15408_s1 + $0x17c0] ss:$16 sps:$4 sm:$0xff]  }
 0x2c5   :  { %5649 = vmatprep.mubr.bf16.mxu0 %v12742_v57  ;;  %5735 = vmatprep.mubr.bf16.mxu1 %v12742_v57 }
 0x2c7   :  { %5620 = vmatpush1.bf16.msra.mxu0 %v9603_v51  ;;  %5706 = vmatpush1.bf16.msra.mxu1 %v9606_v52  ;;  %v9684_v51 = vld [vmem:[%s15408_s1 + $0x17c8] ss:$16 sps:$4 sm:$0xff]   ;;  %v9689_v52 = vld [vmem:[%s15408_s1 + $0x17e4] ss:$16 sps:$4 sm:$0xff]  }
 0x2c8   :  { %5621 = vmatprep.subr.bf16.mxu0 %v9611_v55  ;;  %5707 = vmatprep.subr.bf16.mxu1 %v9614_v56  ;;  %v9692_v55 = vld [vmem:[%s15408_s1 + $0x17ec] ss:$16 sps:$4 sm:$0xff]   ;;  %v9687_v56 = vld [vmem:[%s15408_s1 + $0x17e0] ss:$16 sps:$4 sm:$0xff]  }
 0x2cb   :  { %5622 = vmatpush1.bf16.msra.mxu0 %v9609_v58  ;;  %5708 = vmatpush1.bf16.msra.mxu1 %v9612_v59  ;;  %v9690_v58 = vld [vmem:[%s15408_s1 + $0x17e8] ss:$16 sps:$4 sm:$0xff]   ;;  %v9710_v59 = vld [vmem:[%s15408_s1 + $0x404] ss:$16 sps:$4 sm:$0xff]  }
 0x2cc   :  { %5623 = vmatprep.subr.bf16.mxu0 %v9617_v60  ;;  %5709 = vmatprep.subr.bf16.mxu1 %v9620_v61  ;;  %v9711_v60 = vld [vmem:[%s15408_s1 + $0x40c] ss:$16 sps:$4 sm:$0xff]   ;;  %v12917_v61 = vld [vmem:[%s15409_s0 + $0x48] ss:$16 sps:$4 sm:$0xff]  }
 0x2cf   :  { %5624 = vmatpush1.bf16.msra.mxu0 %v9615_v62  ;;  %5710 = vmatpush1.bf16.msra.mxu1 %v9618_v63  ;;  %v9713_v62 = vld [vmem:[%s15408_s1 + $0x400] ss:$16 sps:$4 sm:$0xff]   ;;  %v9714_v63 = vld [vmem:[%s15408_s1 + $0x408] ss:$16 sps:$4 sm:$0xff]  }
 0x2d0   :  { %5625 = vmatprep.subr.bf16.mxu0 %v9623_v0  ;;  %5711 = vmatprep.subr.bf16.mxu1 %v9626_v1  ;;  %v9715_v0 = vld [vmem:[%s15408_s1 + $0x424] ss:$16 sps:$4 sm:$0xff]   ;;  %v9716_v1 = vld [vmem:[%s15408_s1 + $0x42c] ss:$16 sps:$4 sm:$0xff]  }
 0x2d3   :  { %5626 = vmatpush1.bf16.msra.mxu0 %v9621_v2  ;;  %5712 = vmatpush1.bf16.msra.mxu1 %v9624_v3  ;;  %v9717_v2 = vld [vmem:[%s15408_s1 + $0x420] ss:$16 sps:$4 sm:$0xff]   ;;  %v9718_v3 = vld [vmem:[%s15408_s1 + $0x428] ss:$16 sps:$4 sm:$0xff]  }
 0x2d4   :  { %5627 = vmatprep.subr.bf16.mxu0 %v9629_v4  ;;  %5713 = vmatprep.subr.bf16.mxu1 %v9632_v5  ;;  %v9719_v4 = vld [vmem:[%s15408_s1 + $0x444] ss:$16 sps:$4 sm:$0xff]   ;;  %v9720_v5 = vld [vmem:[%s15408_s1 + $0x44c] ss:$16 sps:$4 sm:$0xff]  }
 0x2d7   :  { %5628 = vmatpush1.bf16.msra.mxu0 %v9627_v6  ;;  %5714 = vmatpush1.bf16.msra.mxu1 %v9630_v7  ;;  %v9722_v6 = vld [vmem:[%s15408_s1 + $0x448] ss:$16 sps:$4 sm:$0xff]   ;;  %v9723_v7 = vld [vmem:[%s15408_s1 + $0x464] ss:$16 sps:$4 sm:$0xff]  }
 0x2d8   :  { %5629 = vmatprep.subr.bf16.mxu0 %v9635_v8  ;;  %5715 = vmatprep.subr.bf16.mxu1 %v9638_v9  ;;  %v9724_v8 = vld [vmem:[%s15408_s1 + $0x46c] ss:$16 sps:$4 sm:$0xff]   ;;  %v9725_v9 = vld [vmem:[%s15408_s1 + $0x460] ss:$16 sps:$4 sm:$0xff]  }
 0x2db   :  { %5630 = vmatpush1.bf16.msra.mxu0 %v9633_v10  ;;  %5716 = vmatpush1.bf16.msra.mxu1 %v9636_v11  ;;  %v9726_v10 = vld [vmem:[%s15408_s1 + $0x468] ss:$16 sps:$4 sm:$0xff]   ;;  %v9727_v11 = vld [vmem:[%s15408_s1 + $0x484] ss:$16 sps:$4 sm:$0xff]  }
 0x2dc   :  { %5631 = vmatprep.subr.bf16.mxu0 %v9641_v12  ;;  %5717 = vmatprep.subr.bf16.mxu1 %v9644_v13  ;;  %v9728_v12 = vld [vmem:[%s15408_s1 + $0x48c] ss:$16 sps:$4 sm:$0xff]   ;;  %v9729_v13 = vld [vmem:[%s15408_s1 + $0x480] ss:$16 sps:$4 sm:$0xff]  }
 0x2df   :  { %5632 = vmatpush1.bf16.msra.mxu0 %v9639_v14  ;;  %5718 = vmatpush1.bf16.msra.mxu1 %v9642_v15  ;;  %v9730_v14 = vld [vmem:[%s15408_s1 + $0x488] ss:$16 sps:$4 sm:$0xff]   ;;  %v9731_v15 = vld [vmem:[%s15408_s1 + $0x4a4] ss:$16 sps:$4 sm:$0xff]  }
 0x2e0   :  { %5633 = vmatprep.subr.bf16.mxu0 %v9647_v16  ;;  %5719 = vmatprep.subr.bf16.mxu1 %v9650_v17  ;;  %v9732_v16 = vld [vmem:[%s15408_s1 + $0x4ac] ss:$16 sps:$4 sm:$0xff]   ;;  %v9733_v17 = vld [vmem:[%s15408_s1 + $0x4a0] ss:$16 sps:$4 sm:$0xff]  }
 0x2e3   :  { %5634 = vmatpush1.bf16.msra.mxu0 %v9645_v18  ;;  %5720 = vmatpush1.bf16.msra.mxu1 %v9648_v19  ;;  %v9734_v18 = vld [vmem:[%s15408_s1 + $0x4a8] ss:$16 sps:$4 sm:$0xff]   ;;  %v9735_v19 = vld [vmem:[%s15408_s1 + $0x4c4] ss:$16 sps:$4 sm:$0xff]  }
 0x2e4   :  { %5635 = vmatprep.subr.bf16.mxu0 %v9653_v20  ;;  %5721 = vmatprep.subr.bf16.mxu1 %v9656_v21  ;;  %v9736_v20 = vld [vmem:[%s15408_s1 + $0x4cc] ss:$16 sps:$4 sm:$0xff]   ;;  %v9737_v21 = vld [vmem:[%s15408_s1 + $0x4c0] ss:$16 sps:$4 sm:$0xff]  }
 0x2e7   :  { %5636 = vmatpush1.bf16.msra.mxu0 %v9651_v22  ;;  %5722 = vmatpush1.bf16.msra.mxu1 %v9654_v23  ;;  %v9738_v22 = vld [vmem:[%s15408_s1 + $0x4c8] ss:$16 sps:$4 sm:$0xff]   ;;  %v9739_v23 = vld [vmem:[%s15408_s1 + $0x4e4] ss:$16 sps:$4 sm:$0xff]  }
 0x2e8   :  { %5637 = vmatprep.subr.bf16.mxu0 %v9659_v24  ;;  %5723 = vmatprep.subr.bf16.mxu1 %v9662_v25  ;;  %v9740_v24 = vld [vmem:[%s15408_s1 + $0x4ec] ss:$16 sps:$4 sm:$0xff]   ;;  %v9741_v25 = vld [vmem:[%s15408_s1 + $0x4e0] ss:$16 sps:$4 sm:$0xff]  }
 0x2eb   :  { %5638 = vmatpush1.bf16.msra.mxu0 %v9657_v26  ;;  %5724 = vmatpush1.bf16.msra.mxu1 %v9660_v27  ;;  %v9742_v26 = vld [vmem:[%s15408_s1 + $0x4e8] ss:$16 sps:$4 sm:$0xff]   ;;  %v9743_v27 = vld [vmem:[%s15408_s1 + $0x504] ss:$16 sps:$4 sm:$0xff]  }
 0x2ec   :  { %5639 = vmatprep.subr.bf16.mxu0 %v9665_v28  ;;  %5725 = vmatprep.subr.bf16.mxu1 %v9668_v29  ;;  %v9744_v28 = vld [vmem:[%s15408_s1 + $0x50c] ss:$16 sps:$4 sm:$0xff]   ;;  %v9745_v29 = vld [vmem:[%s15408_s1 + $0x500] ss:$16 sps:$4 sm:$0xff]  }
 0x2ef   :  { %5640 = vmatpush1.bf16.msra.mxu0 %v9663_v30  ;;  %5726 = vmatpush1.bf16.msra.mxu1 %v9666_v31  ;;  %v9746_v30 = vld [vmem:[%s15408_s1 + $0x508] ss:$16 sps:$4 sm:$0xff]   ;;  %v9747_v31 = vld [vmem:[%s15408_s1 + $0x524] ss:$16 sps:$4 sm:$0xff]  }
 0x2f0   :  { %5641 = vmatprep.subr.bf16.mxu0 %v9671_v32  ;;  %5727 = vmatprep.subr.bf16.mxu1 %v9674_v33  ;;  %v9748_v32 = vld [vmem:[%s15408_s1 + $0x52c] ss:$16 sps:$4 sm:$0xff]   ;;  %v9749_v33 = vld [vmem:[%s15408_s1 + $0x520] ss:$16 sps:$4 sm:$0xff]  }
 0x2f3   :  { %5642 = vmatpush1.bf16.msra.mxu0 %v9669_v34  ;;  %5728 = vmatpush1.bf16.msra.mxu1 %v9672_v35  ;;  %v9750_v34 = vld [vmem:[%s15408_s1 + $0x528] ss:$16 sps:$4 sm:$0xff]   ;;  %v9751_v35 = vld [vmem:[%s15408_s1 + $0x544] ss:$16 sps:$4 sm:$0xff]  }
 0x2f4   :  { %5643 = vmatprep.subr.bf16.mxu0 %v9677_v36  ;;  %5729 = vmatprep.subr.bf16.mxu1 %v9680_v37  ;;  %v9752_v36 = vld [vmem:[%s15408_s1 + $0x54c] ss:$16 sps:$4 sm:$0xff]   ;;  %v9753_v37 = vld [vmem:[%s15408_s1 + $0x540] ss:$16 sps:$4 sm:$0xff]  }
 0x2f7   :  { %5644 = vmatpush1.bf16.msra.mxu0 %v9675_v39  ;;  %5730 = vmatpush1.bf16.msra.mxu1 %v9678_v40  ;;  %v9754_v39 = vld [vmem:[%s15408_s1 + $0x548] ss:$16 sps:$4 sm:$0xff]   ;;  %v9755_v40 = vld [vmem:[%s15408_s1 + $0x564] ss:$16 sps:$4 sm:$0xff]  }
 0x2f8   :  { %5645 = vmatprep.subr.bf16.mxu0 %v9683_v41  ;;  %5731 = vmatprep.subr.bf16.mxu1 %v9686_v42  ;;  %v9756_v41 = vld [vmem:[%s15408_s1 + $0x56c] ss:$16 sps:$4 sm:$0xff]   ;;  %v9757_v42 = vld [vmem:[%s15408_s1 + $0x560] ss:$16 sps:$4 sm:$0xff]  }
 0x2fb   :  { %5646 = vmatpush1.bf16.msra.mxu0 %v9681_v43  ;;  %5732 = vmatpush1.bf16.msra.mxu1 %v9684_v51  ;;  %v9758_v43 = vld [vmem:[%s15408_s1 + $0x568] ss:$16 sps:$4 sm:$0xff]   ;;  %v9759_v51 = vld [vmem:[%s15408_s1 + $0x584] ss:$16 sps:$4 sm:$0xff]  }
 0x2fc   :  { %5647 = vmatprep.subr.bf16.mxu0 %v9689_v52  ;;  %5733 = vmatprep.subr.bf16.mxu1 %v9692_v55  ;;  %v9760_v52 = vld [vmem:[%s15408_s1 + $0x58c] ss:$16 sps:$4 sm:$0xff]   ;;  %v9761_v55 = vld [vmem:[%s15408_s1 + $0x580] ss:$16 sps:$4 sm:$0xff]  }
 0x2ff   :  { %5648 = vmatpush1.bf16.msra.mxu0 %v9687_v56  ;;  %5734 = vmatpush1.bf16.msra.mxu1 %v9690_v58  ;;  %v9762_v56 = vld [vmem:[%s15408_s1 + $0x588] ss:$16 sps:$4 sm:$0xff]   ;;  %v9763_v58 = vld [vmem:[%s15408_s1 + $0x5a4] ss:$16 sps:$4 sm:$0xff]  }
 0x300   :  { %5762 = vmatprep.subr.bf16.mxu0 %v9710_v59  ;;  %5848 = vmatprep.subr.bf16.mxu1 %v9711_v60  ;;  %v9764_v59 = vld [vmem:[%s15408_s1 + $0x5ac] ss:$16 sps:$4 sm:$0xff]   ;;  %v9765_v60 = vld [vmem:[%s15408_s1 + $0x5a0] ss:$16 sps:$4 sm:$0xff]  }
 0x302   :  { %5650 = vmatmul.mubr.bf16.vlgmr.msra.gmra.mrb[4].mxu0 %v12917_v61  ;;  %5736 = vmatmul.mubr.bf16.vlgmr.msra.gmra.mrb[4].mxu1 %v12917_v61 }
 0x303   :  { %5763 = vmatpush1.bf16.msra.mxu0 %v9713_v62  ;;  %5849 = vmatpush1.bf16.msra.mxu1 %v9714_v63  ;;  %v9766_v62 = vld [vmem:[%s15408_s1 + $0x5a8] ss:$16 sps:$4 sm:$0xff]   ;;  %v9767_v63 = vld [vmem:[%s15408_s1 + $0x5c4] ss:$16 sps:$4 sm:$0xff]  }
 0x304   :  { %5764 = vmatprep.subr.bf16.mxu0 %v9715_v0  ;;  %5850 = vmatprep.subr.bf16.mxu1 %v9716_v1  ;;  %v9768_v0 = vld [vmem:[%s15408_s1 + $0x5cc] ss:$16 sps:$4 sm:$0xff]   ;;  %v9769_v1 = vld [vmem:[%s15408_s1 + $0x5c0] ss:$16 sps:$4 sm:$0xff]  }
 0x305   :  { %5794 = vmatprep.mubr.bf16.mxu0 %v12536_v38  ;;  %5880 = vmatprep.mubr.bf16.mxu1 %v12536_v38  ;;  %v9721_v38 = vld [vmem:[%s15408_s1 + $0x440] ss:$16 sps:$4 sm:$0xff]  }
 0x307   :  { %5765 = vmatpush1.bf16.msra.mxu0 %v9717_v2  ;;  %5851 = vmatpush1.bf16.msra.mxu1 %v9718_v3  ;;  %v9770_v2 = vld [vmem:[%s15408_s1 + $0x5c8] ss:$16 sps:$4 sm:$0xff]   ;;  %v9771_v3 = vld [vmem:[%s15408_s1 + $0x5e4] ss:$16 sps:$4 sm:$0xff]  }
 0x308   :  { %5766 = vmatprep.subr.bf16.mxu0 %v9719_v4  ;;  %5852 = vmatprep.subr.bf16.mxu1 %v9720_v5  ;;  %v9772_v4 = vld [vmem:[%s15408_s1 + $0x5ec] ss:$16 sps:$4 sm:$0xff]   ;;  %v9773_v5 = vld [vmem:[%s15408_s1 + $0x5e0] ss:$16 sps:$4 sm:$0xff]  }
 0x30b   :  { %5767 = vmatpush1.bf16.msra.mxu0 %v9721_v38  ;;  %5853 = vmatpush1.bf16.msra.mxu1 %v9722_v6  ;;  %v9774_v38 = vld [vmem:[%s15408_s1 + $0x5e8] ss:$16 sps:$4 sm:$0xff]   ;;  %v9775_v6 = vld [vmem:[%s15408_s1 + $0x604] ss:$16 sps:$4 sm:$0xff]  }
 0x30c   :  { %5768 = vmatprep.subr.bf16.mxu0 %v9723_v7  ;;  %5854 = vmatprep.subr.bf16.mxu1 %v9724_v8  ;;  %v9776_v7 = vld [vmem:[%s15408_s1 + $0x60c] ss:$16 sps:$4 sm:$0xff]   ;;  %v9777_v8 = vld [vmem:[%s15408_s1 + $0x600] ss:$16 sps:$4 sm:$0xff]  }
 0x30f   :  { %5769 = vmatpush1.bf16.msra.mxu0 %v9725_v9  ;;  %5855 = vmatpush1.bf16.msra.mxu1 %v9726_v10  ;;  %v9778_v9 = vld [vmem:[%s15408_s1 + $0x608] ss:$16 sps:$4 sm:$0xff]   ;;  %v9779_v10 = vld [vmem:[%s15408_s1 + $0x624] ss:$16 sps:$4 sm:$0xff]  }
 0x310   :  { %5770 = vmatprep.subr.bf16.mxu0 %v9727_v11  ;;  %5856 = vmatprep.subr.bf16.mxu1 %v9728_v12  ;;  %v9780_v11 = vld [vmem:[%s15408_s1 + $0x62c] ss:$16 sps:$4 sm:$0xff]   ;;  %v9782_v12 = vld [vmem:[%s15408_s1 + $0x628] ss:$16 sps:$4 sm:$0xff]  }
 0x313   :  { %5771 = vmatpush1.bf16.msra.mxu0 %v9729_v13  ;;  %5857 = vmatpush1.bf16.msra.mxu1 %v9730_v14  ;;  %v9783_v13 = vld [vmem:[%s15408_s1 + $0x644] ss:$16 sps:$4 sm:$0xff]   ;;  %v9784_v14 = vld [vmem:[%s15408_s1 + $0x64c] ss:$16 sps:$4 sm:$0xff]  }
 0x314   :  { %5772 = vmatprep.subr.bf16.mxu0 %v9731_v15  ;;  %5858 = vmatprep.subr.bf16.mxu1 %v9732_v16  ;;  %v9786_v15 = vld [vmem:[%s15408_s1 + $0x648] ss:$16 sps:$4 sm:$0xff]   ;;  %v9787_v16 = vld [vmem:[%s15408_s1 + $0x664] ss:$16 sps:$4 sm:$0xff]  }
 0x317   :  { %5773 = vmatpush1.bf16.msra.mxu0 %v9733_v17  ;;  %5859 = vmatpush1.bf16.msra.mxu1 %v9734_v18  ;;  %v9788_v17 = vld [vmem:[%s15408_s1 + $0x66c] ss:$16 sps:$4 sm:$0xff]   ;;  %v9789_v18 = vld [vmem:[%s15408_s1 + $0x660] ss:$16 sps:$4 sm:$0xff]  }
 0x318   :  { %5774 = vmatprep.subr.bf16.mxu0 %v9735_v19  ;;  %5860 = vmatprep.subr.bf16.mxu1 %v9736_v20  ;;  %v9790_v19 = vld [vmem:[%s15408_s1 + $0x668] ss:$16 sps:$4 sm:$0xff]   ;;  %v9791_v20 = vld [vmem:[%s15408_s1 + $0x684] ss:$16 sps:$4 sm:$0xff]  }
 0x31b   :  { %5775 = vmatpush1.bf16.msra.mxu0 %v9737_v21  ;;  %5861 = vmatpush1.bf16.msra.mxu1 %v9738_v22  ;;  %v9792_v21 = vld [vmem:[%s15408_s1 + $0x68c] ss:$16 sps:$4 sm:$0xff]   ;;  %v9793_v22 = vld [vmem:[%s15408_s1 + $0x680] ss:$16 sps:$4 sm:$0xff]  }
 0x31c   :  { %5776 = vmatprep.subr.bf16.mxu0 %v9739_v23  ;;  %5862 = vmatprep.subr.bf16.mxu1 %v9740_v24  ;;  %v9794_v23 = vld [vmem:[%s15408_s1 + $0x688] ss:$16 sps:$4 sm:$0xff]   ;;  %v9795_v24 = vld [vmem:[%s15408_s1 + $0x6a4] ss:$16 sps:$4 sm:$0xff]  }
 0x31f   :  { %5777 = vmatpush1.bf16.msra.mxu0 %v9741_v25  ;;  %5863 = vmatpush1.bf16.msra.mxu1 %v9742_v26  ;;  %v9796_v25 = vld [vmem:[%s15408_s1 + $0x6ac] ss:$16 sps:$4 sm:$0xff]   ;;  %v9797_v26 = vld [vmem:[%s15408_s1 + $0x6a0] ss:$16 sps:$4 sm:$0xff]  }
 0x320   :  { %5778 = vmatprep.subr.bf16.mxu0 %v9743_v27  ;;  %5864 = vmatprep.subr.bf16.mxu1 %v9744_v28  ;;  %v9798_v27 = vld [vmem:[%s15408_s1 + $0x6a8] ss:$16 sps:$4 sm:$0xff]   ;;  %v9799_v28 = vld [vmem:[%s15408_s1 + $0x6c4] ss:$16 sps:$4 sm:$0xff]  }
 0x323   :  { %5779 = vmatpush1.bf16.msra.mxu0 %v9745_v29  ;;  %5865 = vmatpush1.bf16.msra.mxu1 %v9746_v30  ;;  %v9800_v29 = vld [vmem:[%s15408_s1 + $0x6cc] ss:$16 sps:$4 sm:$0xff]   ;;  %v9801_v30 = vld [vmem:[%s15408_s1 + $0x6c0] ss:$16 sps:$4 sm:$0xff]  }
 0x324   :  { %5780 = vmatprep.subr.bf16.mxu0 %v9747_v31  ;;  %5866 = vmatprep.subr.bf16.mxu1 %v9748_v32  ;;  %v9802_v31 = vld [vmem:[%s15408_s1 + $0x6c8] ss:$16 sps:$4 sm:$0xff]   ;;  %v9803_v32 = vld [vmem:[%s15408_s1 + $0x6e4] ss:$16 sps:$4 sm:$0xff]  }
 0x327   :  { %5781 = vmatpush1.bf16.msra.mxu0 %v9749_v33  ;;  %5867 = vmatpush1.bf16.msra.mxu1 %v9750_v34  ;;  %v9804_v33 = vld [vmem:[%s15408_s1 + $0x6ec] ss:$16 sps:$4 sm:$0xff]   ;;  %v9805_v34 = vld [vmem:[%s15408_s1 + $0x6e0] ss:$16 sps:$4 sm:$0xff]  }
 0x328   :  { %5782 = vmatprep.subr.bf16.mxu0 %v9751_v35  ;;  %5868 = vmatprep.subr.bf16.mxu1 %v9752_v36  ;;  %v9806_v35 = vld [vmem:[%s15408_s1 + $0x6e8] ss:$16 sps:$4 sm:$0xff]   ;;  %v9807_v36 = vld [vmem:[%s15408_s1 + $0x704] ss:$16 sps:$4 sm:$0xff]  }
 0x32b   :  { %5783 = vmatpush1.bf16.msra.mxu0 %v9753_v37  ;;  %5869 = vmatpush1.bf16.msra.mxu1 %v9754_v39  ;;  %v9808_v37 = vld [vmem:[%s15408_s1 + $0x70c] ss:$16 sps:$4 sm:$0xff]   ;;  %v9809_v39 = vld [vmem:[%s15408_s1 + $0x700] ss:$16 sps:$4 sm:$0xff]  }
 0x32c   :  { %5784 = vmatprep.subr.bf16.mxu0 %v9755_v40  ;;  %5870 = vmatprep.subr.bf16.mxu1 %v9756_v41  ;;  %v9810_v40 = vld [vmem:[%s15408_s1 + $0x708] ss:$16 sps:$4 sm:$0xff]   ;;  %v9811_v41 = vld [vmem:[%s15408_s1 + $0x724] ss:$16 sps:$4 sm:$0xff]  }
 0x32f   :  { %5785 = vmatpush1.bf16.msra.mxu0 %v9757_v42  ;;  %5871 = vmatpush1.bf16.msra.mxu1 %v9758_v43  ;;  %v9812_v42 = vld [vmem:[%s15408_s1 + $0x72c] ss:$16 sps:$4 sm:$0xff]   ;;  %v9813_v43 = vld [vmem:[%s15408_s1 + $0x720] ss:$16 sps:$4 sm:$0xff]  }
 0x330   :  { %5786 = vmatprep.subr.bf16.mxu0 %v9759_v51  ;;  %5872 = vmatprep.subr.bf16.mxu1 %v9760_v52  ;;  %v9814_v51 = vld [vmem:[%s15408_s1 + $0x728] ss:$16 sps:$4 sm:$0xff]   ;;  %v9815_v52 = vld [vmem:[%s15408_s1 + $0x744] ss:$16 sps:$4 sm:$0xff]  }
 0x333   :  { %5787 = vmatpush1.bf16.msra.mxu0 %v9761_v55  ;;  %5873 = vmatpush1.bf16.msra.mxu1 %v9762_v56  ;;  %v9816_v55 = vld [vmem:[%s15408_s1 + $0x74c] ss:$16 sps:$4 sm:$0xff]   ;;  %v9817_v56 = vld [vmem:[%s15408_s1 + $0x740] ss:$16 sps:$4 sm:$0xff]  }
 0x334   :  { %5788 = vmatprep.subr.bf16.mxu0 %v9763_v58  ;;  %5874 = vmatprep.subr.bf16.mxu1 %v9764_v59  ;;  %v9818_v58 = vld [vmem:[%s15408_s1 + $0x748] ss:$16 sps:$4 sm:$0xff]   ;;  %v9819_v59 = vld [vmem:[%s15408_s1 + $0x764] ss:$16 sps:$4 sm:$0xff]  }
 0x337   :  { %5789 = vmatpush1.bf16.msra.mxu0 %v9765_v60  ;;  %5875 = vmatpush1.bf16.msra.mxu1 %v9766_v62  ;;  %v9820_v60 = vld [vmem:[%s15408_s1 + $0x76c] ss:$16 sps:$4 sm:$0xff]   ;;  %v9821_v62 = vld [vmem:[%s15408_s1 + $0x760] ss:$16 sps:$4 sm:$0xff]  }
 0x338   :  { %5790 = vmatprep.subr.bf16.mxu0 %v9767_v63  ;;  %5876 = vmatprep.subr.bf16.mxu1 %v9768_v0  ;;  %v9822_v63 = vld [vmem:[%s15408_s1 + $0x768] ss:$16 sps:$4 sm:$0xff]   ;;  %v9823_v0 = vld [vmem:[%s15408_s1 + $0x784] ss:$16 sps:$4 sm:$0xff]  }
 0x33b   :  { %5791 = vmatpush1.bf16.msra.mxu0 %v9769_v1  ;;  %5877 = vmatpush1.bf16.msra.mxu1 %v9770_v2  ;;  %v9824_v1 = vld [vmem:[%s15408_s1 + $0x78c] ss:$16 sps:$4 sm:$0xff]   ;;  %v9825_v2 = vld [vmem:[%s15408_s1 + $0x780] ss:$16 sps:$4 sm:$0xff]  }
 0x33c   :  { %5792 = vmatprep.subr.bf16.mxu0 %v9771_v3  ;;  %5878 = vmatprep.subr.bf16.mxu1 %v9772_v4  ;;  %v9826_v3 = vld [vmem:[%s15408_s1 + $0x788] ss:$16 sps:$4 sm:$0xff]   ;;  %v9827_v4 = vld [vmem:[%s15408_s1 + $0x7a4] ss:$16 sps:$4 sm:$0xff]  }
 0x33f   :  { %5793 = vmatpush1.bf16.msra.mxu0 %v9773_v5  ;;  %5879 = vmatpush1.bf16.msra.mxu1 %v9774_v38  ;;  %v9828_v5 = vld [vmem:[%s15408_s1 + $0x7ac] ss:$16 sps:$4 sm:$0xff]   ;;  %v9829_v38 = vld [vmem:[%s15408_s1 + $0x7a0] ss:$16 sps:$4 sm:$0xff]  }
 0x340   :  { %5805 = vmatprep.subr.bf16.mxu0 %v9775_v6  ;;  %5891 = vmatprep.subr.bf16.mxu1 %v9776_v7  ;;  %v9830_v6 = vld [vmem:[%s15408_s1 + $0x7a8] ss:$16 sps:$4 sm:$0xff]   ;;  %v9831_v7 = vld [vmem:[%s15408_s1 + $0x7c4] ss:$16 sps:$4 sm:$0xff]  }
 0x342   :  { %5795 = vmatmul.mubr.bf16.vlgmr.msra.gmra.mrb[8].mxu0 %v12723_v44  ;;  %5881 = vmatmul.mubr.bf16.vlgmr.msra.gmra.mrb[8].mxu1 %v12723_v44  ;;  %v9781_v44 = vld [vmem:[%s15408_s1 + $0x620] ss:$16 sps:$4 sm:$0xff]  }
 0x343   :  { %5806 = vmatpush1.bf16.msra.mxu0 %v9777_v8  ;;  %5892 = vmatpush1.bf16.msra.mxu1 %v9778_v9  ;;  %v9832_v8 = vld [vmem:[%s15408_s1 + $0x7cc] ss:$16 sps:$4 sm:$0xff]   ;;  %v9833_v9 = vld [vmem:[%s15408_s1 + $0x7c0] ss:$16 sps:$4 sm:$0xff]  }
 0x344   :  { %5807 = vmatprep.subr.bf16.mxu0 %v9779_v10  ;;  %5893 = vmatprep.subr.bf16.mxu1 %v9780_v11  ;;  %v9834_v10 = vld [vmem:[%s15408_s1 + $0x7c8] ss:$16 sps:$4 sm:$0xff]   ;;  %v9835_v11 = vld [vmem:[%s15408_s1 + $0x7e4] ss:$16 sps:$4 sm:$0xff]  }
 0x345   :  { %5837 = vmatprep.mubr.bf16.mxu0 %v12742_v57  ;;  %5923 = vmatprep.mubr.bf16.mxu1 %v12742_v57  ;;  %v9785_v57 = vld [vmem:[%s15408_s1 + $0x640] ss:$16 sps:$4 sm:$0xff]  }
 0x347   :  { %5808 = vmatpush1.bf16.msra.mxu0 %v9781_v44  ;;  %5894 = vmatpush1.bf16.msra.mxu1 %v9782_v12  ;;  %v9836_v44 = vld [vmem:[%s15408_s1 + $0x7ec] ss:$16 sps:$4 sm:$0xff]   ;;  %v9837_v12 = vld [vmem:[%s15408_s1 + $0x7e0] ss:$16 sps:$4 sm:$0xff]  }
 0x348   :  { %5809 = vmatprep.subr.bf16.mxu0 %v9783_v13  ;;  %5895 = vmatprep.subr.bf16.mxu1 %v9784_v14  ;;  %v9838_v13 = vld [vmem:[%s15408_s1 + $0x7e8] ss:$16 sps:$4 sm:$0xff]   ;;  %v9839_v14 = vld [vmem:[%s15408_s1 + $0x4] ss:$16 sps:$4 sm:$0xff]  }
 0x34b   :  { %5810 = vmatpush1.bf16.msra.mxu0 %v9785_v57  ;;  %5896 = vmatpush1.bf16.msra.mxu1 %v9786_v15  ;;  %v9840_v57 = vld [vmem:[%s15408_s1 + $0xc] ss:$16 sps:$4 sm:$0xff]   ;;  %v9841_v15 = vld [vmem:[%s15408_s1] ss:$16 sps:$4 sm:$0xff]  }
 0x34c   :  { %5811 = vmatprep.subr.bf16.mxu0 %v9787_v16  ;;  %5897 = vmatprep.subr.bf16.mxu1 %v9788_v17  ;;  %v9842_v16 = vld [vmem:[%s15408_s1 + $0x8] ss:$16 sps:$4 sm:$0xff]   ;;  %v9843_v17 = vld [vmem:[%s15408_s1 + $0x24] ss:$16 sps:$4 sm:$0xff]  }
 0x34f   :  { %5812 = vmatpush1.bf16.msra.mxu0 %v9789_v18  ;;  %5898 = vmatpush1.bf16.msra.mxu1 %v9790_v19  ;;  %v9844_v18 = vld [vmem:[%s15408_s1 + $0x2c] ss:$16 sps:$4 sm:$0xff]   ;;  %v9846_v19 = vld [vmem:[%s15408_s1 + $0x20] ss:$16 sps:$4 sm:$0xff]  }
 0x350   :  { %5813 = vmatprep.subr.bf16.mxu0 %v9791_v20  ;;  %5899 = vmatprep.subr.bf16.mxu1 %v9792_v21  ;;  %v9847_v20 = vld [vmem:[%s15408_s1 + $0x28] ss:$16 sps:$4 sm:$0xff]   ;;  %v9848_v21 = vld [vmem:[%s15408_s1 + $0x44] ss:$16 sps:$4 sm:$0xff]  }
 0x353   :  { %5814 = vmatpush1.bf16.msra.mxu0 %v9793_v22  ;;  %5900 = vmatpush1.bf16.msra.mxu1 %v9794_v23  ;;  %v9849_v22 = vld [vmem:[%s15408_s1 + $0x4c] ss:$16 sps:$4 sm:$0xff]   ;;  %v9850_v23 = vld [vmem:[%s15408_s1 + $0x40] ss:$16 sps:$4 sm:$0xff]  }
 0x354   :  { %5815 = vmatprep.subr.bf16.mxu0 %v9795_v24  ;;  %5901 = vmatprep.subr.bf16.mxu1 %v9796_v25  ;;  %v9851_v24 = vld [vmem:[%s15408_s1 + $0x48] ss:$16 sps:$4 sm:$0xff]   ;;  %v9852_v25 = vld [vmem:[%s15408_s1 + $0x64] ss:$16 sps:$4 sm:$0xff]  }
 0x357   :  { %5816 = vmatpush1.bf16.msra.mxu0 %v9797_v26  ;;  %5902 = vmatpush1.bf16.msra.mxu1 %v9798_v27  ;;  %v9853_v26 = vld [vmem:[%s15408_s1 + $0x6c] ss:$16 sps:$4 sm:$0xff]   ;;  %v9854_v27 = vld [vmem:[%s15408_s1 + $0x60] ss:$16 sps:$4 sm:$0xff]  }
 0x358   :  { %5817 = vmatprep.subr.bf16.mxu0 %v9799_v28  ;;  %5903 = vmatprep.subr.bf16.mxu1 %v9800_v29  ;;  %v9855_v28 = vld [vmem:[%s15408_s1 + $0x68] ss:$16 sps:$4 sm:$0xff]   ;;  %v9856_v29 = vld [vmem:[%s15408_s1 + $0x84] ss:$16 sps:$4 sm:$0xff]  }
 0x35b   :  { %5818 = vmatpush1.bf16.msra.mxu0 %v9801_v30  ;;  %5904 = vmatpush1.bf16.msra.mxu1 %v9802_v31  ;;  %v9857_v30 = vld [vmem:[%s15408_s1 + $0x8c] ss:$16 sps:$4 sm:$0xff]   ;;  %v9858_v31 = vld [vmem:[%s15408_s1 + $0x80] ss:$16 sps:$4 sm:$0xff]  }
 0x35c   :  { %5819 = vmatprep.subr.bf16.mxu0 %v9803_v32  ;;  %5905 = vmatprep.subr.bf16.mxu1 %v9804_v33  ;;  %v9859_v32 = vld [vmem:[%s15408_s1 + $0x88] ss:$16 sps:$4 sm:$0xff]   ;;  %v9860_v33 = vld [vmem:[%s15408_s1 + $0xa4] ss:$16 sps:$4 sm:$0xff]  }
 0x35f   :  { %5820 = vmatpush1.bf16.msra.mxu0 %v9805_v34  ;;  %5906 = vmatpush1.bf16.msra.mxu1 %v9806_v35  ;;  %v9861_v34 = vld [vmem:[%s15408_s1 + $0xac] ss:$16 sps:$4 sm:$0xff]   ;;  %v9862_v35 = vld [vmem:[%s15408_s1 + $0xa0] ss:$16 sps:$4 sm:$0xff]  }
 0x360   :  { %5821 = vmatprep.subr.bf16.mxu0 %v9807_v36  ;;  %5907 = vmatprep.subr.bf16.mxu1 %v9808_v37  ;;  %v9863_v36 = vld [vmem:[%s15408_s1 + $0xa8] ss:$16 sps:$4 sm:$0xff]   ;;  %v9864_v37 = vld [vmem:[%s15408_s1 + $0xc4] ss:$16 sps:$4 sm:$0xff]  }
 0x363   :  { %5822 = vmatpush1.bf16.msra.mxu0 %v9809_v39  ;;  %5908 = vmatpush1.bf16.msra.mxu1 %v9810_v40  ;;  %v9865_v39 = vld [vmem:[%s15408_s1 + $0xcc] ss:$16 sps:$4 sm:$0xff]   ;;  %v9866_v40 = vld [vmem:[%s15408_s1 + $0xc0] ss:$16 sps:$4 sm:$0xff]  }
 0x364   :  { %5823 = vmatprep.subr.bf16.mxu0 %v9811_v41  ;;  %5909 = vmatprep.subr.bf16.mxu1 %v9812_v42  ;;  %v9867_v41 = vld [vmem:[%s15408_s1 + $0xc8] ss:$16 sps:$4 sm:$0xff]   ;;  %v9868_v42 = vld [vmem:[%s15408_s1 + $0xe4] ss:$16 sps:$4 sm:$0xff]  }
 0x367   :  { %5824 = vmatpush1.bf16.msra.mxu0 %v9813_v43  ;;  %5910 = vmatpush1.bf16.msra.mxu1 %v9814_v51  ;;  %v9869_v43 = vld [vmem:[%s15408_s1 + $0xec] ss:$16 sps:$4 sm:$0xff]   ;;  %v9870_v51 = vld [vmem:[%s15408_s1 + $0xe0] ss:$16 sps:$4 sm:$0xff]  }
 0x368   :  { %5825 = vmatprep.subr.bf16.mxu0 %v9815_v52  ;;  %5911 = vmatprep.subr.bf16.mxu1 %v9816_v55  ;;  %v9871_v52 = vld [vmem:[%s15408_s1 + $0xe8] ss:$16 sps:$4 sm:$0xff]   ;;  %v9872_v55 = vld [vmem:[%s15408_s1 + $0x104] ss:$16 sps:$4 sm:$0xff]  }
 0x36b   :  { %5826 = vmatpush1.bf16.msra.mxu0 %v9817_v56  ;;  %5912 = vmatpush1.bf16.msra.mxu1 %v9818_v58  ;;  %v9873_v56 = vld [vmem:[%s15408_s1 + $0x10c] ss:$16 sps:$4 sm:$0xff]   ;;  %v9874_v58 = vld [vmem:[%s15408_s1 + $0x100] ss:$16 sps:$4 sm:$0xff]  }
 0x36c   :  { %5827 = vmatprep.subr.bf16.mxu0 %v9819_v59  ;;  %5913 = vmatprep.subr.bf16.mxu1 %v9820_v60  ;;  %v9875_v59 = vld [vmem:[%s15408_s1 + $0x108] ss:$16 sps:$4 sm:$0xff]   ;;  %v9876_v60 = vld [vmem:[%s15408_s1 + $0x124] ss:$16 sps:$4 sm:$0xff]  }
 0x36f   :  { %5828 = vmatpush1.bf16.msra.mxu0 %v9821_v62  ;;  %5914 = vmatpush1.bf16.msra.mxu1 %v9822_v63  ;;  %v9877_v62 = vld [vmem:[%s15408_s1 + $0x12c] ss:$16 sps:$4 sm:$0xff]   ;;  %v9878_v63 = vld [vmem:[%s15408_s1 + $0x120] ss:$16 sps:$4 sm:$0xff]  }
 0x370   :  { %5829 = vmatprep.subr.bf16.mxu0 %v9823_v0  ;;  %5915 = vmatprep.subr.bf16.mxu1 %v9824_v1  ;;  %v9879_v0 = vld [vmem:[%s15408_s1 + $0x128] ss:$16 sps:$4 sm:$0xff]   ;;  %v9880_v1 = vld [vmem:[%s15408_s1 + $0x144] ss:$16 sps:$4 sm:$0xff]  }
 0x373   :  { %5830 = vmatpush1.bf16.msra.mxu0 %v9825_v2  ;;  %5916 = vmatpush1.bf16.msra.mxu1 %v9826_v3  ;;  %v9881_v2 = vld [vmem:[%s15408_s1 + $0x14c] ss:$16 sps:$4 sm:$0xff]   ;;  %v9882_v3 = vld [vmem:[%s15408_s1 + $0x140] ss:$16 sps:$4 sm:$0xff]  }
 0x374   :  { %5831 = vmatprep.subr.bf16.mxu0 %v9827_v4  ;;  %5917 = vmatprep.subr.bf16.mxu1 %v9828_v5  ;;  %v9883_v4 = vld [vmem:[%s15408_s1 + $0x148] ss:$16 sps:$4 sm:$0xff]   ;;  %v9884_v5 = vld [vmem:[%s15408_s1 + $0x164] ss:$16 sps:$4 sm:$0xff]  }
 0x377   :  { %5832 = vmatpush1.bf16.msra.mxu0 %v9829_v38  ;;  %5918 = vmatpush1.bf16.msra.mxu1 %v9830_v6  ;;  %v9885_v38 = vld [vmem:[%s15408_s1 + $0x16c] ss:$16 sps:$4 sm:$0xff]   ;;  %v9886_v6 = vld [vmem:[%s15408_s1 + $0x160] ss:$16 sps:$4 sm:$0xff]  }
 0x378   :  { %5833 = vmatprep.subr.bf16.mxu0 %v9831_v7  ;;  %5919 = vmatprep.subr.bf16.mxu1 %v9832_v8  ;;  %v9887_v7 = vld [vmem:[%s15408_s1 + $0x168] ss:$16 sps:$4 sm:$0xff]   ;;  %v9888_v8 = vld [vmem:[%s15408_s1 + $0x184] ss:$16 sps:$4 sm:$0xff]  }
 0x37b   :  { %5834 = vmatpush1.bf16.msra.mxu0 %v9833_v9  ;;  %5920 = vmatpush1.bf16.msra.mxu1 %v9834_v10  ;;  %v9889_v9 = vld [vmem:[%s15408_s1 + $0x18c] ss:$16 sps:$4 sm:$0xff]   ;;  %v9890_v10 = vld [vmem:[%s15408_s1 + $0x180] ss:$16 sps:$4 sm:$0xff]  }
 0x37c   :  { %5835 = vmatprep.subr.bf16.mxu0 %v9835_v11  ;;  %5921 = vmatprep.subr.bf16.mxu1 %v9836_v44  ;;  %v9891_v11 = vld [vmem:[%s15408_s1 + $0x188] ss:$16 sps:$4 sm:$0xff]   ;;  %v9892_v44 = vld [vmem:[%s15408_s1 + $0x1a4] ss:$16 sps:$4 sm:$0xff]  }
 0x37f   :  { %5836 = vmatpush1.bf16.msra.mxu0 %v9837_v12  ;;  %5922 = vmatpush1.bf16.msra.mxu1 %v9838_v13  ;;  %v9893_v12 = vld [vmem:[%s15408_s1 + $0x1ac] ss:$16 sps:$4 sm:$0xff]   ;;  %v9894_v13 = vld [vmem:[%s15408_s1 + $0x1a0] ss:$16 sps:$4 sm:$0xff]  }
 0x380   :  { %5934 = vmatprep.subr.bf16.mxu0 %v9839_v14  ;;  %6020 = vmatprep.subr.bf16.mxu1 %v9840_v57  ;;  %v9895_v14 = vld [vmem:[%s15408_s1 + $0x1a8] ss:$16 sps:$4 sm:$0xff]   ;;  %v9896_v57 = vld [vmem:[%s15408_s1 + $0x1c4] ss:$16 sps:$4 sm:$0xff]  }
 0x382   :  { %5838 = vmatmul.mubr.bf16.vlgmr.msra.gmra.mrb[8].mxu0 %v12917_v61  ;;  %5924 = vmatmul.mubr.bf16.vlgmr.msra.gmra.mrb[8].mxu1 %v12917_v61  ;;  %v13328_v61 = vld [vmem:[%s15409_s0 + $0x24] ss:$16 sps:$4 sm:$0xff]  }
 0x383   :  { %5935 = vmatpush1.bf16.msra.mxu0 %v9841_v15  ;;  %6021 = vmatpush1.bf16.msra.mxu1 %v9842_v16  ;;  %v9897_v15 = vld [vmem:[%s15408_s1 + $0x1cc] ss:$16 sps:$4 sm:$0xff]   ;;  %v9898_v16 = vld [vmem:[%s15408_s1 + $0x1c0] ss:$16 sps:$4 sm:$0xff]  }
 0x384   :  { %5936 = vmatprep.subr.bf16.mxu0 %v9843_v17  ;;  %6022 = vmatprep.subr.bf16.mxu1 %v9844_v18  ;;  %v9899_v17 = vld [vmem:[%s15408_s1 + $0x1c8] ss:$16 sps:$4 sm:$0xff]   ;;  %v9900_v18 = vld [vmem:[%s15408_s1 + $0x1e4] ss:$16 sps:$4 sm:$0xff]  }
 0x385   :  { %5966 = vmatprep.mubr.bf16.mxu0 %v13328_v61  ;;  %6052 = vmatprep.mubr.bf16.mxu1 %v13328_v61 }
 0x387   :  { %5937 = vmatpush1.bf16.msra.mxu0 %v9846_v19  ;;  %6023 = vmatpush1.bf16.msra.mxu1 %v9847_v20  ;;  %v9901_v19 = vld [vmem:[%s15408_s1 + $0x1ec] ss:$16 sps:$4 sm:$0xff]   ;;  %v9902_v20 = vld [vmem:[%s15408_s1 + $0x1e0] ss:$16 sps:$4 sm:$0xff]  }
 0x388   :  { %5938 = vmatprep.subr.bf16.mxu0 %v9848_v21  ;;  %6024 = vmatprep.subr.bf16.mxu1 %v9849_v22  ;;  %v9903_v21 = vld [vmem:[%s15408_s1 + $0x1e8] ss:$16 sps:$4 sm:$0xff]   ;;  %v9904_v22 = vld [vmem:[%s15408_s1 + $0x204] ss:$16 sps:$4 sm:$0xff]  }
 0x38b   :  { %5939 = vmatpush1.bf16.msra.mxu0 %v9850_v23  ;;  %6025 = vmatpush1.bf16.msra.mxu1 %v9851_v24  ;;  %v9905_v23 = vld [vmem:[%s15408_s1 + $0x20c] ss:$16 sps:$4 sm:$0xff]   ;;  %v13515_v24 = vld [vmem:[%s15409_s0 + $0x20] ss:$16 sps:$4 sm:$0xff]  }
 0x38c   :  { %5940 = vmatprep.subr.bf16.mxu0 %v9852_v25  ;;  %6026 = vmatprep.subr.bf16.mxu1 %v9853_v26  ;;  %v9907_v25 = vld [vmem:[%s15408_s1 + $0x200] ss:$16 sps:$4 sm:$0xff]   ;;  %v9908_v26 = vld [vmem:[%s15408_s1 + $0x208] ss:$16 sps:$4 sm:$0xff]  }
 0x38f   :  { %5941 = vmatpush1.bf16.msra.mxu0 %v9854_v27  ;;  %6027 = vmatpush1.bf16.msra.mxu1 %v9855_v28  ;;  %v9909_v27 = vld [vmem:[%s15408_s1 + $0x224] ss:$16 sps:$4 sm:$0xff]   ;;  %v9910_v28 = vld [vmem:[%s15408_s1 + $0x22c] ss:$16 sps:$4 sm:$0xff]  }
 0x390   :  { %5942 = vmatprep.subr.bf16.mxu0 %v9856_v29  ;;  %6028 = vmatprep.subr.bf16.mxu1 %v9857_v30  ;;  %v13534_v29 = vld [vmem:[%s15409_s0 + $0x2c] ss:$16 sps:$4 sm:$0xff]   ;;  %v9912_v30 = vld [vmem:[%s15408_s1 + $0x220] ss:$16 sps:$4 sm:$0xff]  }
 0x393   :  { %5943 = vmatpush1.bf16.msra.mxu0 %v9858_v31  ;;  %6029 = vmatpush1.bf16.msra.mxu1 %v9859_v32  ;;  %v9913_v31 = vld [vmem:[%s15408_s1 + $0x228] ss:$16 sps:$4 sm:$0xff]   ;;  %v9914_v32 = vld [vmem:[%s15408_s1 + $0x244] ss:$16 sps:$4 sm:$0xff]  }
 0x394   :  { %5944 = vmatprep.subr.bf16.mxu0 %v9860_v33  ;;  %6030 = vmatprep.subr.bf16.mxu1 %v9861_v34  ;;  %v9915_v33 = vld [vmem:[%s15408_s1 + $0x24c] ss:$16 sps:$4 sm:$0xff]   ;;  %v9916_v34 = vld [vmem:[%s15408_s1 + $0x240] ss:$16 sps:$4 sm:$0xff]  }
 0x397   :  { %5945 = vmatpush1.bf16.msra.mxu0 %v9862_v35  ;;  %6031 = vmatpush1.bf16.msra.mxu1 %v9863_v36  ;;  %v9917_v35 = vld [vmem:[%s15408_s1 + $0x248] ss:$16 sps:$4 sm:$0xff]   ;;  %v9918_v36 = vld [vmem:[%s15408_s1 + $0x264] ss:$16 sps:$4 sm:$0xff]  }
 0x398   :  { %5946 = vmatprep.subr.bf16.mxu0 %v9864_v37  ;;  %6032 = vmatprep.subr.bf16.mxu1 %v9865_v39  ;;  %v9919_v37 = vld [vmem:[%s15408_s1 + $0x26c] ss:$16 sps:$4 sm:$0xff]   ;;  %v9920_v39 = vld [vmem:[%s15408_s1 + $0x260] ss:$16 sps:$4 sm:$0xff]  }
 0x39b   :  { %5947 = vmatpush1.bf16.msra.mxu0 %v9866_v40  ;;  %6033 = vmatpush1.bf16.msra.mxu1 %v9867_v41  ;;  %v9921_v40 = vld [vmem:[%s15408_s1 + $0x268] ss:$16 sps:$4 sm:$0xff]   ;;  %v9922_v41 = vld [vmem:[%s15408_s1 + $0x284] ss:$16 sps:$4 sm:$0xff]  }
 0x39c   :  { %5948 = vmatprep.subr.bf16.mxu0 %v9868_v42  ;;  %6034 = vmatprep.subr.bf16.mxu1 %v9869_v43  ;;  %v9923_v42 = vld [vmem:[%s15408_s1 + $0x28c] ss:$16 sps:$4 sm:$0xff]   ;;  %v9924_v43 = vld [vmem:[%s15408_s1 + $0x280] ss:$16 sps:$4 sm:$0xff]  }
 0x39f   :  { %5949 = vmatpush1.bf16.msra.mxu0 %v9870_v51  ;;  %6035 = vmatpush1.bf16.msra.mxu1 %v9871_v52  ;;  %v9925_v51 = vld [vmem:[%s15408_s1 + $0x288] ss:$16 sps:$4 sm:$0xff]   ;;  %v9926_v52 = vld [vmem:[%s15408_s1 + $0x2a4] ss:$16 sps:$4 sm:$0xff]  }
 0x3a0   :  { %5950 = vmatprep.subr.bf16.mxu0 %v9872_v55  ;;  %6036 = vmatprep.subr.bf16.mxu1 %v9873_v56  ;;  %v9927_v55 = vld [vmem:[%s15408_s1 + $0x2ac] ss:$16 sps:$4 sm:$0xff]  }
 0x3a3   :  { %5951 = vmatpush1.bf16.msra.mxu0 %v9874_v58  ;;  %6037 = vmatpush1.bf16.msra.mxu1 %v9875_v59 }
 0x3a4   :  { %5952 = vmatprep.subr.bf16.mxu0 %v9876_v60  ;;  %6038 = vmatprep.subr.bf16.mxu1 %v9877_v62 }
 0x3a7   :  { %5953 = vmatpush1.bf16.msra.mxu0 %v9878_v63  ;;  %6039 = vmatpush1.bf16.msra.mxu1 %v9879_v0 }
 0x3a8   :  { %5954 = vmatprep.subr.bf16.mxu0 %v9880_v1  ;;  %6040 = vmatprep.subr.bf16.mxu1 %v9881_v2 }
 0x3ab   :  { %5955 = vmatpush1.bf16.msra.mxu0 %v9882_v3  ;;  %6041 = vmatpush1.bf16.msra.mxu1 %v9883_v4  ;;  %v9928_v4 = vld [vmem:[%s15408_s1 + $0x2a0] ss:$16 sps:$4 sm:$0xff]  }
 0x3ac   :  { %5956 = vmatprep.subr.bf16.mxu0 %v9884_v5  ;;  %6042 = vmatprep.subr.bf16.mxu1 %v9885_v38  ;;  %v9929_v5 = vld [vmem:[%s15408_s1 + $0x2a8] ss:$16 sps:$4 sm:$0xff]  }
 0x3af   :  { %5957 = vmatpush1.bf16.msra.mxu0 %v9886_v6  ;;  %6043 = vmatpush1.bf16.msra.mxu1 %v9887_v7 }
 0x3b0   :  { %5958 = vmatprep.subr.bf16.mxu0 %v9888_v8  ;;  %6044 = vmatprep.subr.bf16.mxu1 %v9889_v9  ;;  %v9930_v9 = vld [vmem:[%s15408_s1 + $0x2c4] ss:$16 sps:$4 sm:$0xff]  }
 0x3b3   :  { %5959 = vmatpush1.bf16.msra.mxu0 %v9890_v10  ;;  %6045 = vmatpush1.bf16.msra.mxu1 %v9891_v11  ;;  %v9931_v10 = vld [vmem:[%s15408_s1 + $0x2cc] ss:$16 sps:$4 sm:$0xff]  }
 0x3b4   :  { %5960 = vmatprep.subr.bf16.mxu0 %v9892_v44  ;;  %6046 = vmatprep.subr.bf16.mxu1 %v9893_v12  ;;  %v9932_v12 = vld [vmem:[%s15408_s1 + $0x2c0] ss:$16 sps:$4 sm:$0xff]  }
 0x3b7   :  { %5961 = vmatpush1.bf16.msra.mxu0 %v9894_v13  ;;  %6047 = vmatpush1.bf16.msra.mxu1 %v9895_v14  ;;  %v9933_v13 = vld [vmem:[%s15408_s1 + $0x2c8] ss:$16 sps:$4 sm:$0xff]   ;;  %v9934_v14 = vld [vmem:[%s15408_s1 + $0x2e4] ss:$16 sps:$4 sm:$0xff]  }
 0x3b8   :  { %5962 = vmatprep.subr.bf16.mxu0 %v9896_v57  ;;  %6048 = vmatprep.subr.bf16.mxu1 %v9897_v15  ;;  %v9935_v57 = vld [vmem:[%s15408_s1 + $0x2ec] ss:$16 sps:$4 sm:$0xff]   ;;  %v9936_v15 = vld [vmem:[%s15408_s1 + $0x2e0] ss:$16 sps:$4 sm:$0xff]  }
 0x3bb   :  { %5963 = vmatpush1.bf16.msra.mxu0 %v9898_v16  ;;  %6049 = vmatpush1.bf16.msra.mxu1 %v9899_v17  ;;  %v9937_v16 = vld [vmem:[%s15408_s1 + $0x2e8] ss:$16 sps:$4 sm:$0xff]   ;;  %v9938_v17 = vld [vmem:[%s15408_s1 + $0x304] ss:$16 sps:$4 sm:$0xff]  }
 0x3bc   :  { %5964 = vmatprep.subr.bf16.mxu0 %v9900_v18  ;;  %6050 = vmatprep.subr.bf16.mxu1 %v9901_v19  ;;  %v9939_v18 = vld [vmem:[%s15408_s1 + $0x30c] ss:$16 sps:$4 sm:$0xff]   ;;  %v9940_v19 = vld [vmem:[%s15408_s1 + $0x300] ss:$16 sps:$4 sm:$0xff]  }
 0x3bf   :  { %5965 = vmatpush1.bf16.msra.mxu0 %v9902_v20  ;;  %6051 = vmatpush1.bf16.msra.mxu1 %v9903_v21  ;;  %v9941_v20 = vld [vmem:[%s15408_s1 + $0x308] ss:$16 sps:$4 sm:$0xff]   ;;  %v9942_v21 = vld [vmem:[%s15408_s1 + $0x324] ss:$16 sps:$4 sm:$0xff]  }
 0x3c0   :  { %5977 = vmatprep.subr.bf16.mxu0 %v9904_v22  ;;  %6063 = vmatprep.subr.bf16.mxu1 %v9905_v23  ;;  %v9943_v22 = vld [vmem:[%s15408_s1 + $0x32c] ss:$16 sps:$4 sm:$0xff]   ;;  %v9944_v23 = vld [vmem:[%s15408_s1 + $0x320] ss:$16 sps:$4 sm:$0xff]  }
 0x3c2   :  { %5967 = vmatmul.mubr.bf16.vlgmr.msra.gmra.mrb[8].mxu0 %v13515_v24  ;;  %6053 = vmatmul.mubr.bf16.vlgmr.msra.gmra.mrb[8].mxu1 %v13515_v24 }
 0x3c3   :  { %5978 = vmatpush1.bf16.msra.mxu0 %v9907_v25  ;;  %6064 = vmatpush1.bf16.msra.mxu1 %v9908_v26  ;;  %v9945_v25 = vld [vmem:[%s15408_s1 + $0x328] ss:$16 sps:$4 sm:$0xff]   ;;  %v9946_v26 = vld [vmem:[%s15408_s1 + $0x344] ss:$16 sps:$4 sm:$0xff]  }
 0x3c4   :  { %5979 = vmatprep.subr.bf16.mxu0 %v9909_v27  ;;  %6065 = vmatprep.subr.bf16.mxu1 %v9910_v28  ;;  %v9947_v27 = vld [vmem:[%s15408_s1 + $0x34c] ss:$16 sps:$4 sm:$0xff]   ;;  %v9948_v28 = vld [vmem:[%s15408_s1 + $0x340] ss:$16 sps:$4 sm:$0xff]  }
 0x3c5   :  { %6009 = vmatprep.mubr.bf16.mxu0 %v13534_v29  ;;  %6095 = vmatprep.mubr.bf16.mxu1 %v13534_v29 }
 0x3c7   :  { %5980 = vmatpush1.bf16.msra.mxu0 %v9912_v30  ;;  %6066 = vmatpush1.bf16.msra.mxu1 %v9913_v31  ;;  %v9949_v30 = vld [vmem:[%s15408_s1 + $0x348] ss:$16 sps:$4 sm:$0xff]   ;;  %v9950_v31 = vld [vmem:[%s15408_s1 + $0x364] ss:$16 sps:$4 sm:$0xff]  }
 0x3c8   :  { %5981 = vmatprep.subr.bf16.mxu0 %v9914_v32  ;;  %6067 = vmatprep.subr.bf16.mxu1 %v9915_v33  ;;  %v9951_v32 = vld [vmem:[%s15408_s1 + $0x36c] ss:$16 sps:$4 sm:$0xff]   ;;  %v9952_v33 = vld [vmem:[%s15408_s1 + $0x360] ss:$16 sps:$4 sm:$0xff]  }
 0x3cb   :  { %5982 = vmatpush1.bf16.msra.mxu0 %v9916_v34  ;;  %6068 = vmatpush1.bf16.msra.mxu1 %v9917_v35  ;;  %v9953_v34 = vld [vmem:[%s15408_s1 + $0x368] ss:$16 sps:$4 sm:$0xff]   ;;  %v9954_v35 = vld [vmem:[%s15408_s1 + $0x384] ss:$16 sps:$4 sm:$0xff]  }
 0x3cc   :  { %5983 = vmatprep.subr.bf16.mxu0 %v9918_v36  ;;  %6069 = vmatprep.subr.bf16.mxu1 %v9919_v37  ;;  %v9955_v36 = vld [vmem:[%s15408_s1 + $0x38c] ss:$16 sps:$4 sm:$0xff]   ;;  %v9956_v37 = vld [vmem:[%s15408_s1 + $0x380] ss:$16 sps:$4 sm:$0xff]  }
 0x3cf   :  { %5984 = vmatpush1.bf16.msra.mxu0 %v9920_v39  ;;  %6070 = vmatpush1.bf16.msra.mxu1 %v9921_v40  ;;  %v9957_v39 = vld [vmem:[%s15408_s1 + $0x388] ss:$16 sps:$4 sm:$0xff]   ;;  %v9958_v40 = vld [vmem:[%s15408_s1 + $0x3a4] ss:$16 sps:$4 sm:$0xff]  }
 0x3d0   :  { %5985 = vmatprep.subr.bf16.mxu0 %v9922_v41  ;;  %6071 = vmatprep.subr.bf16.mxu1 %v9923_v42  ;;  %v9959_v41 = vld [vmem:[%s15408_s1 + $0x3ac] ss:$16 sps:$4 sm:$0xff]   ;;  %v9960_v42 = vld [vmem:[%s15408_s1 + $0x3a0] ss:$16 sps:$4 sm:$0xff]  }
 0x3d3   :  { %5986 = vmatpush1.bf16.msra.mxu0 %v9924_v43  ;;  %6072 = vmatpush1.bf16.msra.mxu1 %v9925_v51  ;;  %v9961_v43 = vld [vmem:[%s15408_s1 + $0x3a8] ss:$16 sps:$4 sm:$0xff]   ;;  %v9962_v51 = vld [vmem:[%s15408_s1 + $0x3c4] ss:$16 sps:$4 sm:$0xff]  }
 0x3d4   :  { %5987 = vmatprep.subr.bf16.mxu0 %v9926_v52  ;;  %6073 = vmatprep.subr.bf16.mxu1 %v9927_v55  ;;  %v9963_v52 = vld [vmem:[%s15408_s1 + $0x3cc] ss:$16 sps:$4 sm:$0xff]   ;;  %v9964_v55 = vld [vmem:[%s15408_s1 + $0x3c0] ss:$16 sps:$4 sm:$0xff]  }
 0x3d5   :  { %v13586_v56 = vpop.f32.mrb[4].mxu0  ;;  %v13588_v58 = vpop.f32.mrb[4].mxu1 }
 0x3d6   :  { %v5754_v59 = vmax.f32 %v12370_v45, %v13586_v56  ;;  %v5756_v60 = vmax.f32 %v12372_v46, %v13588_v58  ;;  %v13594_v62 = vpop.f32.mrb[5].mxu0  ;;  %v13596_v63 = vpop.f32.mrb[5].mxu1 }
 0x3d7   :  { %v5755_v0 = vmax.f32 %v12374_v47, %v13594_v62  ;;  %v5757_v1 = vmax.f32 %v12376_v48, %v13596_v63  ;;  %v13602_v2 = vpop.f32.mrb[6].mxu0  ;;  %v13604_v3 = vpop.f32.mrb[6].mxu1  ;;  %5988 = vmatpush1.bf16.msra.mxu0 %v9928_v4  ;;  %6074 = vmatpush1.bf16.msra.mxu1 %v9929_v5  ;;  %v9965_v4 = vld [vmem:[%s15408_s1 + $0x3c8] ss:$16 sps:$4 sm:$0xff]   ;;  %v9966_v5 = vld [vmem:[%s15408_s1 + $0x3e4] ss:$16 sps:$4 sm:$0xff]  }
 0x3d8   :  { %v5758_v38 = vmax.f32 %v12378_v49, %v13602_v2  ;;  %v5760_v6 = vmax.f32 %v12380_v50, %v13604_v3  ;;  %v13616_v7 = vpop.f32.mrb[7].mxu0  ;;  %v13618_v8 = vpop.f32.mrb[7].mxu1  ;;  %5989 = vmatprep.subr.bf16.mxu0 %v9930_v9  ;;  %6075 = vmatprep.subr.bf16.mxu1 %v9931_v10  ;;  %v9967_v9 = vld [vmem:[%s15408_s1 + $0x3ec] ss:$16 sps:$4 sm:$0xff]   ;;  %v9968_v10 = vld [vmem:[%s15408_s1 + $0x3e0] ss:$16 sps:$4 sm:$0xff]  }
 0x3d9   :  { %v5759_v11 = vmax.f32 %v12388_v53, %v13616_v7  ;;  %v5761_v44 = vmax.f32 %v12390_v54, %v13618_v8 }
 0x3db   :  { %5990 = vmatpush1.bf16.msra.mxu0 %v9932_v12  ;;  %6076 = vmatpush1.bf16.msra.mxu1 %v9933_v13  ;;  %v9969_v12 = vld [vmem:[%s15408_s1 + $0x3e8] ss:$16 sps:$4 sm:$0xff]   ;;  %v9970_v13 = vld [vmem:[%s15408_s1 + $0x804] ss:$16 sps:$4 sm:$0xff]  }
 0x3dc   :  { %5991 = vmatprep.subr.bf16.mxu0 %v9934_v14  ;;  %6077 = vmatprep.subr.bf16.mxu1 %v9935_v57  ;;  %v9971_v14 = vld [vmem:[%s15408_s1 + $0x80c] ss:$16 sps:$4 sm:$0xff]   ;;  %v13753_v57 = vld [vmem:[%s15409_s0 + $0x64] ss:$16 sps:$4 sm:$0xff]  }
 0x3df   :  { %5992 = vmatpush1.bf16.msra.mxu0 %v9936_v15  ;;  %6078 = vmatpush1.bf16.msra.mxu1 %v9937_v16  ;;  %v13758_v15 = vld [vmem:[%s15409_s0 + $0x28] ss:$16 sps:$4 sm:$0xff]   ;;  %v9973_v16 = vld [vmem:[%s15408_s1 + $0x800] ss:$16 sps:$4 sm:$0xff]  }
 0x3e0   :  { %5993 = vmatprep.subr.bf16.mxu0 %v9938_v17  ;;  %6079 = vmatprep.subr.bf16.mxu1 %v9939_v18  ;;  %v9974_v17 = vld [vmem:[%s15408_s1 + $0x808] ss:$16 sps:$4 sm:$0xff]   ;;  %v9975_v18 = vld [vmem:[%s15408_s1 + $0x824] ss:$16 sps:$4 sm:$0xff]  }
 0x3e3   :  { %5994 = vmatpush1.bf16.msra.mxu0 %v9940_v19  ;;  %6080 = vmatpush1.bf16.msra.mxu1 %v9941_v20  ;;  %v9976_v19 = vld [vmem:[%s15408_s1 + $0x82c] ss:$16 sps:$4 sm:$0xff]   ;;  %v9977_v20 = vld [vmem:[%s15408_s1 + $0x820] ss:$16 sps:$4 sm:$0xff]  }
 0x3e4   :  { %5995 = vmatprep.subr.bf16.mxu0 %v9942_v21  ;;  %6081 = vmatprep.subr.bf16.mxu1 %v9943_v22  ;;  %v9978_v21 = vld [vmem:[%s15408_s1 + $0x828] ss:$16 sps:$4 sm:$0xff]   ;;  %v9979_v22 = vld [vmem:[%s15408_s1 + $0x844] ss:$16 sps:$4 sm:$0xff]  }
 0x3e7   :  { %5996 = vmatpush1.bf16.msra.mxu0 %v9944_v23  ;;  %6082 = vmatpush1.bf16.msra.mxu1 %v9945_v25  ;;  %v9980_v23 = vld [vmem:[%s15408_s1 + $0x84c] ss:$16 sps:$4 sm:$0xff]   ;;  %v9981_v25 = vld [vmem:[%s15408_s1 + $0x840] ss:$16 sps:$4 sm:$0xff]  }
 0x3e8   :  { %5997 = vmatprep.subr.bf16.mxu0 %v9946_v26  ;;  %6083 = vmatprep.subr.bf16.mxu1 %v9947_v27  ;;  %v9982_v26 = vld [vmem:[%s15408_s1 + $0x848] ss:$16 sps:$4 sm:$0xff]   ;;  %v9983_v27 = vld [vmem:[%s15408_s1 + $0x864] ss:$16 sps:$4 sm:$0xff]  }
 0x3eb   :  { %5998 = vmatpush1.bf16.msra.mxu0 %v9948_v28  ;;  %6084 = vmatpush1.bf16.msra.mxu1 %v9949_v30  ;;  %v9984_v28 = vld [vmem:[%s15408_s1 + $0x86c] ss:$16 sps:$4 sm:$0xff]   ;;  %v9985_v30 = vld [vmem:[%s15408_s1 + $0x860] ss:$16 sps:$4 sm:$0xff]  }
 0x3ec   :  { %5999 = vmatprep.subr.bf16.mxu0 %v9950_v31  ;;  %6085 = vmatprep.subr.bf16.mxu1 %v9951_v32  ;;  %v9986_v31 = vld [vmem:[%s15408_s1 + $0x868] ss:$16 sps:$4 sm:$0xff]   ;;  %v9987_v32 = vld [vmem:[%s15408_s1 + $0x884] ss:$16 sps:$4 sm:$0xff]  }
 0x3ef   :  { %6000 = vmatpush1.bf16.msra.mxu0 %v9952_v33  ;;  %6086 = vmatpush1.bf16.msra.mxu1 %v9953_v34  ;;  %v9988_v33 = vld [vmem:[%s15408_s1 + $0x88c] ss:$16 sps:$4 sm:$0xff]   ;;  %v9989_v34 = vld [vmem:[%s15408_s1 + $0x880] ss:$16 sps:$4 sm:$0xff]  }
 0x3f0   :  { %6001 = vmatprep.subr.bf16.mxu0 %v9954_v35  ;;  %6087 = vmatprep.subr.bf16.mxu1 %v9955_v36  ;;  %v9990_v35 = vld [vmem:[%s15408_s1 + $0x888] ss:$16 sps:$4 sm:$0xff]   ;;  %v9991_v36 = vld [vmem:[%s15408_s1 + $0x8a4] ss:$16 sps:$4 sm:$0xff]  }
 0x3f3   :  { %6002 = vmatpush1.bf16.msra.mxu0 %v9956_v37  ;;  %6088 = vmatpush1.bf16.msra.mxu1 %v9957_v39  ;;  %v9992_v37 = vld [vmem:[%s15408_s1 + $0x8ac] ss:$16 sps:$4 sm:$0xff]   ;;  %v9993_v39 = vld [vmem:[%s15408_s1 + $0x8a0] ss:$16 sps:$4 sm:$0xff]  }
 0x3f4   :  { %6003 = vmatprep.subr.bf16.mxu0 %v9958_v40  ;;  %6089 = vmatprep.subr.bf16.mxu1 %v9959_v41  ;;  %v9994_v40 = vld [vmem:[%s15408_s1 + $0x8a8] ss:$16 sps:$4 sm:$0xff]   ;;  %v9995_v41 = vld [vmem:[%s15408_s1 + $0x8c4] ss:$16 sps:$4 sm:$0xff]  }
 0x3f7   :  { %6004 = vmatpush1.bf16.msra.mxu0 %v9960_v42  ;;  %6090 = vmatpush1.bf16.msra.mxu1 %v9961_v43  ;;  %v9996_v42 = vld [vmem:[%s15408_s1 + $0x8cc] ss:$16 sps:$4 sm:$0xff]   ;;  %v9997_v43 = vld [vmem:[%s15408_s1 + $0x8c0] ss:$16 sps:$4 sm:$0xff]  }
 0x3f8   :  { %6005 = vmatprep.subr.bf16.mxu0 %v9962_v51  ;;  %6091 = vmatprep.subr.bf16.mxu1 %v9963_v52  ;;  %v9998_v51 = vld [vmem:[%s15408_s1 + $0x8c8] ss:$16 sps:$4 sm:$0xff]   ;;  %v9999_v52 = vld [vmem:[%s15408_s1 + $0x8e4] ss:$16 sps:$4 sm:$0xff]  }
 0x3fb   :  { %6006 = vmatpush1.bf16.msra.mxu0 %v9964_v55  ;;  %6092 = vmatpush1.bf16.msra.mxu1 %v9965_v4  ;;  %v10000_v55 = vld [vmem:[%s15408_s1 + $0x8ec] ss:$16 sps:$4 sm:$0xff]   ;;  %v10001_v4 = vld [vmem:[%s15408_s1 + $0x8e0] ss:$16 sps:$4 sm:$0xff]  }
 0x3fc   :  { %6007 = vmatprep.subr.bf16.mxu0 %v9966_v5  ;;  %6093 = vmatprep.subr.bf16.mxu1 %v9967_v9  ;;  %v10002_v5 = vld [vmem:[%s15408_s1 + $0x8e8] ss:$16 sps:$4 sm:$0xff]   ;;  %v10003_v9 = vld [vmem:[%s15408_s1 + $0x904] ss:$16 sps:$4 sm:$0xff]  }
 0x3ff   :  { %6008 = vmatpush1.bf16.msra.mxu0 %v9968_v10  ;;  %6094 = vmatpush1.bf16.msra.mxu1 %v9969_v12  ;;  %v10004_v10 = vld [vmem:[%s15408_s1 + $0x90c] ss:$16 sps:$4 sm:$0xff]   ;;  %v10005_v12 = vld [vmem:[%s15408_s1 + $0x900] ss:$16 sps:$4 sm:$0xff]  }
 0x400   :  { %6126 = vmatprep.subr.bf16.mxu0 %v9970_v13  ;;  %6212 = vmatprep.subr.bf16.mxu1 %v9971_v14  ;;  %v10006_v13 = vld [vmem:[%s15408_s1 + $0x908] ss:$16 sps:$4 sm:$0xff]   ;;  %v10007_v14 = vld [vmem:[%s15408_s1 + $0x924] ss:$16 sps:$4 sm:$0xff]  }
 0x402   :  { %6010 = vmatmul.mubr.bf16.vlgmr.msra.gmra.mrb[8].mxu0 %v13758_v15  ;;  %6096 = vmatmul.mubr.bf16.vlgmr.msra.gmra.mrb[8].mxu1 %v13758_v15 }
 0x403   :  { %6127 = vmatpush1.bf16.msra.mxu0 %v9973_v16  ;;  %6213 = vmatpush1.bf16.msra.mxu1 %v9974_v17  ;;  %v10008_v16 = vld [vmem:[%s15408_s1 + $0x92c] ss:$16 sps:$4 sm:$0xff]   ;;  %v10009_v17 = vld [vmem:[%s15408_s1 + $0x920] ss:$16 sps:$4 sm:$0xff]  }
 0x404   :  { %6128 = vmatprep.subr.bf16.mxu0 %v9975_v18  ;;  %6214 = vmatprep.subr.bf16.mxu1 %v9976_v19  ;;  %v10010_v18 = vld [vmem:[%s15408_s1 + $0x928] ss:$16 sps:$4 sm:$0xff]   ;;  %v10011_v19 = vld [vmem:[%s15408_s1 + $0x944] ss:$16 sps:$4 sm:$0xff]  }
 0x405   :  { %6158 = vmatprep.mubr.bf16.mxu0 %v13753_v57  ;;  %6244 = vmatprep.mubr.bf16.mxu1 %v13753_v57 }
 0x407   :  { %6129 = vmatpush1.bf16.msra.mxu0 %v9977_v20  ;;  %6215 = vmatpush1.bf16.msra.mxu1 %v9978_v21  ;;  %v10012_v20 = vld [vmem:[%s15408_s1 + $0x94c] ss:$16 sps:$4 sm:$0xff]   ;;  %v10013_v21 = vld [vmem:[%s15408_s1 + $0x940] ss:$16 sps:$4 sm:$0xff]  }
 0x408   :  { %6130 = vmatprep.subr.bf16.mxu0 %v9979_v22  ;;  %6216 = vmatprep.subr.bf16.mxu1 %v9980_v23  ;;  %v10014_v22 = vld [vmem:[%s15408_s1 + $0x948] ss:$16 sps:$4 sm:$0xff]   ;;  %v10015_v23 = vld [vmem:[%s15408_s1 + $0x964] ss:$16 sps:$4 sm:$0xff]  }
 0x40b   :  { %6131 = vmatpush1.bf16.msra.mxu0 %v9981_v25  ;;  %6217 = vmatpush1.bf16.msra.mxu1 %v9982_v26  ;;  %v10016_v25 = vld [vmem:[%s15408_s1 + $0x96c] ss:$16 sps:$4 sm:$0xff]   ;;  %v10017_v26 = vld [vmem:[%s15408_s1 + $0x960] ss:$16 sps:$4 sm:$0xff]  }
 0x40c   :  { %6132 = vmatprep.subr.bf16.mxu0 %v9983_v27  ;;  %6218 = vmatprep.subr.bf16.mxu1 %v9984_v28  ;;  %v10018_v27 = vld [vmem:[%s15408_s1 + $0x968] ss:$16 sps:$4 sm:$0xff]   ;;  %v10019_v28 = vld [vmem:[%s15408_s1 + $0x984] ss:$16 sps:$4 sm:$0xff]  }
 0x40f   :  { %6133 = vmatpush1.bf16.msra.mxu0 %v9985_v30  ;;  %6219 = vmatpush1.bf16.msra.mxu1 %v9986_v31  ;;  %v10020_v30 = vld [vmem:[%s15408_s1 + $0x98c] ss:$16 sps:$4 sm:$0xff]   ;;  %v10021_v31 = vld [vmem:[%s15408_s1 + $0x980] ss:$16 sps:$4 sm:$0xff]  }
 0x410   :  { %6134 = vmatprep.subr.bf16.mxu0 %v9987_v32  ;;  %6220 = vmatprep.subr.bf16.mxu1 %v9988_v33  ;;  %v10022_v32 = vld [vmem:[%s15408_s1 + $0x988] ss:$16 sps:$4 sm:$0xff]   ;;  %v10023_v33 = vld [vmem:[%s15408_s1 + $0x9a4] ss:$16 sps:$4 sm:$0xff]  }
 0x413   :  { %6135 = vmatpush1.bf16.msra.mxu0 %v9989_v34  ;;  %6221 = vmatpush1.bf16.msra.mxu1 %v9990_v35  ;;  %v10024_v34 = vld [vmem:[%s15408_s1 + $0x9ac] ss:$16 sps:$4 sm:$0xff]   ;;  %v10025_v35 = vld [vmem:[%s15408_s1 + $0x9a0] ss:$16 sps:$4 sm:$0xff]  }
 0x414   :  { %6136 = vmatprep.subr.bf16.mxu0 %v9991_v36  ;;  %6222 = vmatprep.subr.bf16.mxu1 %v9992_v37  ;;  %v10026_v36 = vld [vmem:[%s15408_s1 + $0x9a8] ss:$16 sps:$4 sm:$0xff]   ;;  %v10027_v37 = vld [vmem:[%s15408_s1 + $0x9c4] ss:$16 sps:$4 sm:$0xff]  }
 0x417   :  { %6137 = vmatpush1.bf16.msra.mxu0 %v9993_v39  ;;  %6223 = vmatpush1.bf16.msra.mxu1 %v9994_v40  ;;  %v10028_v39 = vld [vmem:[%s15408_s1 + $0x9cc] ss:$16 sps:$4 sm:$0xff]   ;;  %v10029_v40 = vld [vmem:[%s15408_s1 + $0x9c0] ss:$16 sps:$4 sm:$0xff]  }
 0x418   :  { %6138 = vmatprep.subr.bf16.mxu0 %v9995_v41  ;;  %6224 = vmatprep.subr.bf16.mxu1 %v9996_v42  ;;  %v10030_v41 = vld [vmem:[%s15408_s1 + $0x9c8] ss:$16 sps:$4 sm:$0xff]   ;;  %v10031_v42 = vld [vmem:[%s15408_s1 + $0x9e4] ss:$16 sps:$4 sm:$0xff]  }
 0x41b   :  { %6139 = vmatpush1.bf16.msra.mxu0 %v9997_v43  ;;  %6225 = vmatpush1.bf16.msra.mxu1 %v9998_v51  ;;  %v10032_v43 = vld [vmem:[%s15408_s1 + $0x9ec] ss:$16 sps:$4 sm:$0xff]   ;;  %v13947_v51 = vld [vmem:[%s15409_s0 + $0x60] ss:$16 sps:$4 sm:$0xff]  }
 0x41c   :  { %6140 = vmatprep.subr.bf16.mxu0 %v9999_v52  ;;  %6226 = vmatprep.subr.bf16.mxu1 %v10000_v55  ;;  %v10033_v52 = vld [vmem:[%s15408_s1 + $0x9e0] ss:$16 sps:$4 sm:$0xff]   ;;  %v10034_v55 = vld [vmem:[%s15408_s1 + $0x9e8] ss:$16 sps:$4 sm:$0xff]  }
 0x41f   :  { %6141 = vmatpush1.bf16.msra.mxu0 %v10001_v4  ;;  %6227 = vmatpush1.bf16.msra.mxu1 %v10002_v5  ;;  %v10035_v4 = vld [vmem:[%s15408_s1 + $0xa04] ss:$16 sps:$4 sm:$0xff]   ;;  %v10036_v5 = vld [vmem:[%s15408_s1 + $0xa0c] ss:$16 sps:$4 sm:$0xff]  }
 0x420   :  { %6142 = vmatprep.subr.bf16.mxu0 %v10003_v9  ;;  %6228 = vmatprep.subr.bf16.mxu1 %v10004_v10  ;;  %v13964_v9 = vld [vmem:[%s15409_s0 + $0x6c] ss:$16 sps:$4 sm:$0xff]   ;;  %v10037_v10 = vld [vmem:[%s15408_s1 + $0xa00] ss:$16 sps:$4 sm:$0xff]  }
 0x423   :  { %6143 = vmatpush1.bf16.msra.mxu0 %v10005_v12  ;;  %6229 = vmatpush1.bf16.msra.mxu1 %v10006_v13  ;;  %v10038_v12 = vld [vmem:[%s15408_s1 + $0xa08] ss:$16 sps:$4 sm:$0xff]   ;;  %v10039_v13 = vld [vmem:[%s15408_s1 + $0xa24] ss:$16 sps:$4 sm:$0xff]  }
 0x424   :  { %6144 = vmatprep.subr.bf16.mxu0 %v10007_v14  ;;  %6230 = vmatprep.subr.bf16.mxu1 %v10008_v16  ;;  %v10040_v14 = vld [vmem:[%s15408_s1 + $0xa2c] ss:$16 sps:$4 sm:$0xff]   ;;  %v10041_v16 = vld [vmem:[%s15408_s1 + $0xa20] ss:$16 sps:$4 sm:$0xff]  }
 0x427   :  { %6145 = vmatpush1.bf16.msra.mxu0 %v10009_v17  ;;  %6231 = vmatpush1.bf16.msra.mxu1 %v10010_v18  ;;  %v10042_v17 = vld [vmem:[%s15408_s1 + $0xa28] ss:$16 sps:$4 sm:$0xff]   ;;  %v10043_v18 = vld [vmem:[%s15408_s1 + $0xa44] ss:$16 sps:$4 sm:$0xff]  }
 0x428   :  { %6146 = vmatprep.subr.bf16.mxu0 %v10011_v19  ;;  %6232 = vmatprep.subr.bf16.mxu1 %v10012_v20  ;;  %v10044_v19 = vld [vmem:[%s15408_s1 + $0xa4c] ss:$16 sps:$4 sm:$0xff]   ;;  %v10045_v20 = vld [vmem:[%s15408_s1 + $0xa40] ss:$16 sps:$4 sm:$0xff]  }
 0x42b   :  { %6147 = vmatpush1.bf16.msra.mxu0 %v10013_v21  ;;  %6233 = vmatpush1.bf16.msra.mxu1 %v10014_v22  ;;  %v10046_v21 = vld [vmem:[%s15408_s1 + $0xa48] ss:$16 sps:$4 sm:$0xff]   ;;  %v10047_v22 = vld [vmem:[%s15408_s1 + $0xa64] ss:$16 sps:$4 sm:$0xff]  }
 0x42c   :  { %6148 = vmatprep.subr.bf16.mxu0 %v10015_v23  ;;  %6234 = vmatprep.subr.bf16.mxu1 %v10016_v25  ;;  %v10048_v23 = vld [vmem:[%s15408_s1 + $0xa6c] ss:$16 sps:$4 sm:$0xff]   ;;  %v10049_v25 = vld [vmem:[%s15408_s1 + $0xa60] ss:$16 sps:$4 sm:$0xff]  }
 0x42f   :  { %6149 = vmatpush1.bf16.msra.mxu0 %v10017_v26  ;;  %6235 = vmatpush1.bf16.msra.mxu1 %v10018_v27  ;;  %v10050_v26 = vld [vmem:[%s15408_s1 + $0xa68] ss:$16 sps:$4 sm:$0xff]   ;;  %v10051_v27 = vld [vmem:[%s15408_s1 + $0xa84] ss:$16 sps:$4 sm:$0xff]  }
 0x430   :  { %6150 = vmatprep.subr.bf16.mxu0 %v10019_v28  ;;  %6236 = vmatprep.subr.bf16.mxu1 %v10020_v30  ;;  %v10052_v28 = vld [vmem:[%s15408_s1 + $0xa8c] ss:$16 sps:$4 sm:$0xff]   ;;  %v10053_v30 = vld [vmem:[%s15408_s1 + $0xa80] ss:$16 sps:$4 sm:$0xff]  }
 0x433   :  { %6151 = vmatpush1.bf16.msra.mxu0 %v10021_v31  ;;  %6237 = vmatpush1.bf16.msra.mxu1 %v10022_v32  ;;  %v10054_v31 = vld [vmem:[%s15408_s1 + $0xa88] ss:$16 sps:$4 sm:$0xff]   ;;  %v10055_v32 = vld [vmem:[%s15408_s1 + $0xaa4] ss:$16 sps:$4 sm:$0xff]  }
 0x434   :  { %6152 = vmatprep.subr.bf16.mxu0 %v10023_v33  ;;  %6238 = vmatprep.subr.bf16.mxu1 %v10024_v34  ;;  %v10056_v33 = vld [vmem:[%s15408_s1 + $0xaac] ss:$16 sps:$4 sm:$0xff]   ;;  %v10057_v34 = vld [vmem:[%s15408_s1 + $0xaa0] ss:$16 sps:$4 sm:$0xff]  }
 0x437   :  { %6153 = vmatpush1.bf16.msra.mxu0 %v10025_v35  ;;  %6239 = vmatpush1.bf16.msra.mxu1 %v10026_v36  ;;  %v10058_v35 = vld [vmem:[%s15408_s1 + $0xaa8] ss:$16 sps:$4 sm:$0xff]   ;;  %v10059_v36 = vld [vmem:[%s15408_s1 + $0xac4] ss:$16 sps:$4 sm:$0xff]  }
 0x438   :  { %6154 = vmatprep.subr.bf16.mxu0 %v10027_v37  ;;  %6240 = vmatprep.subr.bf16.mxu1 %v10028_v39  ;;  %v10060_v37 = vld [vmem:[%s15408_s1 + $0xacc] ss:$16 sps:$4 sm:$0xff]   ;;  %v10061_v39 = vld [vmem:[%s15408_s1 + $0xac0] ss:$16 sps:$4 sm:$0xff]  }
 0x43b   :  { %6155 = vmatpush1.bf16.msra.mxu0 %v10029_v40  ;;  %6241 = vmatpush1.bf16.msra.mxu1 %v10030_v41  ;;  %v10062_v40 = vld [vmem:[%s15408_s1 + $0xac8] ss:$16 sps:$4 sm:$0xff]   ;;  %v10063_v41 = vld [vmem:[%s15408_s1 + $0xae4] ss:$16 sps:$4 sm:$0xff]  }
 0x43c   :  { %6156 = vmatprep.subr.bf16.mxu0 %v10031_v42  ;;  %6242 = vmatprep.subr.bf16.mxu1 %v10032_v43  ;;  %v10064_v42 = vld [vmem:[%s15408_s1 + $0xaec] ss:$16 sps:$4 sm:$0xff]   ;;  %v10065_v43 = vld [vmem:[%s15408_s1 + $0xae0] ss:$16 sps:$4 sm:$0xff]  }
 0x43f   :  { %6157 = vmatpush1.bf16.msra.mxu0 %v10033_v52  ;;  %6243 = vmatpush1.bf16.msra.mxu1 %v10034_v55  ;;  %v10066_v52 = vld [vmem:[%s15408_s1 + $0xae8] ss:$16 sps:$4 sm:$0xff]   ;;  %v10067_v55 = vld [vmem:[%s15408_s1 + $0xb04] ss:$16 sps:$4 sm:$0xff]  }
 0x440   :  { %6169 = vmatprep.subr.bf16.mxu0 %v10035_v4  ;;  %6255 = vmatprep.subr.bf16.mxu1 %v10036_v5  ;;  %v10068_v4 = vld [vmem:[%s15408_s1 + $0xb0c] ss:$16 sps:$4 sm:$0xff]   ;;  %v10069_v5 = vld [vmem:[%s15408_s1 + $0xb00] ss:$16 sps:$4 sm:$0xff]  }
 0x442   :  { %6159 = vmatmul.mubr.bf16.vlgmr.msra.gmra.mrb[8].mxu0 %v13947_v51  ;;  %6245 = vmatmul.mubr.bf16.vlgmr.msra.gmra.mrb[8].mxu1 %v13947_v51 }
 0x443   :  { %6170 = vmatpush1.bf16.msra.mxu0 %v10037_v10  ;;  %6256 = vmatpush1.bf16.msra.mxu1 %v10038_v12  ;;  %v10070_v10 = vld [vmem:[%s15408_s1 + $0xb08] ss:$16 sps:$4 sm:$0xff]   ;;  %v10071_v12 = vld [vmem:[%s15408_s1 + $0xb24] ss:$16 sps:$4 sm:$0xff]  }
 0x444   :  { %6171 = vmatprep.subr.bf16.mxu0 %v10039_v13  ;;  %6257 = vmatprep.subr.bf16.mxu1 %v10040_v14  ;;  %v10072_v13 = vld [vmem:[%s15408_s1 + $0xb2c] ss:$16 sps:$4 sm:$0xff]   ;;  %v10073_v14 = vld [vmem:[%s15408_s1 + $0xb20] ss:$16 sps:$4 sm:$0xff]  }
 0x445   :  { %6201 = vmatprep.mubr.bf16.mxu0 %v13964_v9  ;;  %6287 = vmatprep.mubr.bf16.mxu1 %v13964_v9 }
 0x447   :  { %6172 = vmatpush1.bf16.msra.mxu0 %v10041_v16  ;;  %6258 = vmatpush1.bf16.msra.mxu1 %v10042_v17  ;;  %v10074_v16 = vld [vmem:[%s15408_s1 + $0xb28] ss:$16 sps:$4 sm:$0xff]   ;;  %v10075_v17 = vld [vmem:[%s15408_s1 + $0xb44] ss:$16 sps:$4 sm:$0xff]  }
 0x448   :  { %6173 = vmatprep.subr.bf16.mxu0 %v10043_v18  ;;  %6259 = vmatprep.subr.bf16.mxu1 %v10044_v19  ;;  %v10076_v18 = vld [vmem:[%s15408_s1 + $0xb4c] ss:$16 sps:$4 sm:$0xff]   ;;  %v10077_v19 = vld [vmem:[%s15408_s1 + $0xb40] ss:$16 sps:$4 sm:$0xff]  }
 0x44b   :  { %6174 = vmatpush1.bf16.msra.mxu0 %v10045_v20  ;;  %6260 = vmatpush1.bf16.msra.mxu1 %v10046_v21  ;;  %v10078_v20 = vld [vmem:[%s15408_s1 + $0xb48] ss:$16 sps:$4 sm:$0xff]   ;;  %v10079_v21 = vld [vmem:[%s15408_s1 + $0xb64] ss:$16 sps:$4 sm:$0xff]  }
 0x44c   :  { %6175 = vmatprep.subr.bf16.mxu0 %v10047_v22  ;;  %6261 = vmatprep.subr.bf16.mxu1 %v10048_v23  ;;  %v10080_v22 = vld [vmem:[%s15408_s1 + $0xb6c] ss:$16 sps:$4 sm:$0xff]   ;;  %v10081_v23 = vld [vmem:[%s15408_s1 + $0xb60] ss:$16 sps:$4 sm:$0xff]  }
 0x44f   :  { %6176 = vmatpush1.bf16.msra.mxu0 %v10049_v25  ;;  %6262 = vmatpush1.bf16.msra.mxu1 %v10050_v26  ;;  %v10082_v25 = vld [vmem:[%s15408_s1 + $0xb68] ss:$16 sps:$4 sm:$0xff]   ;;  %v10083_v26 = vld [vmem:[%s15408_s1 + $0xb84] ss:$16 sps:$4 sm:$0xff]  }
 0x450   :  { %6177 = vmatprep.subr.bf16.mxu0 %v10051_v27  ;;  %6263 = vmatprep.subr.bf16.mxu1 %v10052_v28  ;;  %v10084_v27 = vld [vmem:[%s15408_s1 + $0xb8c] ss:$16 sps:$4 sm:$0xff]   ;;  %v10085_v28 = vld [vmem:[%s15408_s1 + $0xb80] ss:$16 sps:$4 sm:$0xff]  }
 0x453   :  { %6178 = vmatpush1.bf16.msra.mxu0 %v10053_v30  ;;  %6264 = vmatpush1.bf16.msra.mxu1 %v10054_v31  ;;  %v10086_v30 = vld [vmem:[%s15408_s1 + $0xb88] ss:$16 sps:$4 sm:$0xff]   ;;  %v10087_v31 = vld [vmem:[%s15408_s1 + $0xba4] ss:$16 sps:$4 sm:$0xff]  }
 0x454   :  { %6179 = vmatprep.subr.bf16.mxu0 %v10055_v32  ;;  %6265 = vmatprep.subr.bf16.mxu1 %v10056_v33  ;;  %v10088_v32 = vld [vmem:[%s15408_s1 + $0xbac] ss:$16 sps:$4 sm:$0xff]   ;;  %v10089_v33 = vld [vmem:[%s15408_s1 + $0xba0] ss:$16 sps:$4 sm:$0xff]  }
 0x457   :  { %6180 = vmatpush1.bf16.msra.mxu0 %v10057_v34  ;;  %6266 = vmatpush1.bf16.msra.mxu1 %v10058_v35  ;;  %v10090_v34 = vld [vmem:[%s15408_s1 + $0xba8] ss:$16 sps:$4 sm:$0xff]   ;;  %v10091_v35 = vld [vmem:[%s15408_s1 + $0xbc4] ss:$16 sps:$4 sm:$0xff]  }
 0x458   :  { %6181 = vmatprep.subr.bf16.mxu0 %v10059_v36  ;;  %6267 = vmatprep.subr.bf16.mxu1 %v10060_v37  ;;  %v10092_v36 = vld [vmem:[%s15408_s1 + $0xbcc] ss:$16 sps:$4 sm:$0xff]   ;;  %v10093_v37 = vld [vmem:[%s15408_s1 + $0xbc0] ss:$16 sps:$4 sm:$0xff]  }
 0x45b   :  { %6182 = vmatpush1.bf16.msra.mxu0 %v10061_v39  ;;  %6268 = vmatpush1.bf16.msra.mxu1 %v10062_v40  ;;  %v10094_v39 = vld [vmem:[%s15408_s1 + $0xbc8] ss:$16 sps:$4 sm:$0xff]   ;;  %v10095_v40 = vld [vmem:[%s15408_s1 + $0xbe4] ss:$16 sps:$4 sm:$0xff]  }
 0x45c   :  { %6183 = vmatprep.subr.bf16.mxu0 %v10063_v41  ;;  %6269 = vmatprep.subr.bf16.mxu1 %v10064_v42  ;;  %v10096_v41 = vld [vmem:[%s15408_s1 + $0xbec] ss:$16 sps:$4 sm:$0xff]   ;;  %v14153_v42 = vld [vmem:[%s15409_s0 + $0x68] ss:$16 sps:$4 sm:$0xff]  }
 0x45f   :  { %6184 = vmatpush1.bf16.msra.mxu0 %v10065_v43  ;;  %6270 = vmatpush1.bf16.msra.mxu1 %v10066_v52  ;;  %v10097_v43 = vld [vmem:[%s15408_s1 + $0xbe0] ss:$16 sps:$4 sm:$0xff]   ;;  %v10098_v52 = vld [vmem:[%s15408_s1 + $0xbe8] ss:$16 sps:$4 sm:$0xff]  }
 0x460   :  { %6185 = vmatprep.subr.bf16.mxu0 %v10067_v55  ;;  %6271 = vmatprep.subr.bf16.mxu1 %v10068_v4  ;;  %v10099_v55 = vld [vmem:[%s15408_s1 + $0x1004] ss:$16 sps:$4 sm:$0xff]   ;;  %v10100_v4 = vld [vmem:[%s15408_s1 + $0x100c] ss:$16 sps:$4 sm:$0xff]  }
 0x463   :  { %6186 = vmatpush1.bf16.msra.mxu0 %v10069_v5  ;;  %6272 = vmatpush1.bf16.msra.mxu1 %v10070_v10  ;;  %v10101_v5 = vld [vmem:[%s15408_s1 + $0x1000] ss:$16 sps:$4 sm:$0xff]   ;;  %v10102_v10 = vld [vmem:[%s15408_s1 + $0x1008] ss:$16 sps:$4 sm:$0xff]  }
 0x464   :  { %6187 = vmatprep.subr.bf16.mxu0 %v10071_v12  ;;  %6273 = vmatprep.subr.bf16.mxu1 %v10072_v13  ;;  %v10103_v12 = vld [vmem:[%s15408_s1 + $0x1024] ss:$16 sps:$4 sm:$0xff]   ;;  %v10104_v13 = vld [vmem:[%s15408_s1 + $0x102c] ss:$16 sps:$4 sm:$0xff]  }
 0x467   :  { %6188 = vmatpush1.bf16.msra.mxu0 %v10073_v14  ;;  %6274 = vmatpush1.bf16.msra.mxu1 %v10074_v16  ;;  %v10105_v14 = vld [vmem:[%s15409_s0 + $0x44] ss:$16 sps:$4 sm:$0xff]   ;;  %v10106_v16 = vld [vmem:[%s15408_s1 + $0x1020] ss:$16 sps:$4 sm:$0xff]  }
 0x468   :  { %6189 = vmatprep.subr.bf16.mxu0 %v10075_v17  ;;  %6275 = vmatprep.subr.bf16.mxu1 %v10076_v18  ;;  %v10107_v17 = vld [vmem:[%s15408_s1 + $0x1028] ss:$16 sps:$4 sm:$0xff]   ;;  %v10108_v18 = vld [vmem:[%s15408_s1 + $0x1044] ss:$16 sps:$4 sm:$0xff]  }
 0x46b   :  { %6190 = vmatpush1.bf16.msra.mxu0 %v10077_v19  ;;  %6276 = vmatpush1.bf16.msra.mxu1 %v10078_v20  ;;  %v10109_v19 = vld [vmem:[%s15408_s1 + $0x104c] ss:$16 sps:$4 sm:$0xff]   ;;  %v10110_v20 = vld [vmem:[%s15408_s1 + $0x1040] ss:$16 sps:$4 sm:$0xff]  }
 0x46c   :  { %6191 = vmatprep.subr.bf16.mxu0 %v10079_v21  ;;  %6277 = vmatprep.subr.bf16.mxu1 %v10080_v22  ;;  %v10111_v21 = vld [vmem:[%s15408_s1 + $0x1048] ss:$16 sps:$4 sm:$0xff]   ;;  %v10112_v22 = vld [vmem:[%s15408_s1 + $0x1064] ss:$16 sps:$4 sm:$0xff]  }
 0x46f   :  { %6192 = vmatpush1.bf16.msra.mxu0 %v10081_v23  ;;  %6278 = vmatpush1.bf16.msra.mxu1 %v10082_v25  ;;  %v10113_v23 = vld [vmem:[%s15408_s1 + $0x106c] ss:$16 sps:$4 sm:$0xff]   ;;  %v10114_v25 = vld [vmem:[%s15408_s1 + $0x1060] ss:$16 sps:$4 sm:$0xff]  }
 0x470   :  { %6193 = vmatprep.subr.bf16.mxu0 %v10083_v26  ;;  %6279 = vmatprep.subr.bf16.mxu1 %v10084_v27  ;;  %v10115_v26 = vld [vmem:[%s15408_s1 + $0x1068] ss:$16 sps:$4 sm:$0xff]   ;;  %v10116_v27 = vld [vmem:[%s15408_s1 + $0x1084] ss:$16 sps:$4 sm:$0xff]  }
 0x473   :  { %6194 = vmatpush1.bf16.msra.mxu0 %v10085_v28  ;;  %6280 = vmatpush1.bf16.msra.mxu1 %v10086_v30  ;;  %v10117_v28 = vld [vmem:[%s15408_s1 + $0x108c] ss:$16 sps:$4 sm:$0xff]   ;;  %v10118_v30 = vld [vmem:[%s15408_s1 + $0x1080] ss:$16 sps:$4 sm:$0xff]  }
 0x474   :  { %6195 = vmatprep.subr.bf16.mxu0 %v10087_v31  ;;  %6281 = vmatprep.subr.bf16.mxu1 %v10088_v32  ;;  %v10119_v31 = vld [vmem:[%s15408_s1 + $0x1088] ss:$16 sps:$4 sm:$0xff]   ;;  %v10120_v32 = vld [vmem:[%s15408_s1 + $0x10a4] ss:$16 sps:$4 sm:$0xff]  }
 0x477   :  { %6196 = vmatpush1.bf16.msra.mxu0 %v10089_v33  ;;  %6282 = vmatpush1.bf16.msra.mxu1 %v10090_v34  ;;  %v10121_v33 = vld [vmem:[%s15408_s1 + $0x10ac] ss:$16 sps:$4 sm:$0xff]   ;;  %v10122_v34 = vld [vmem:[%s15408_s1 + $0x10a0] ss:$16 sps:$4 sm:$0xff]  }
 0x478   :  { %6197 = vmatprep.subr.bf16.mxu0 %v10091_v35  ;;  %6283 = vmatprep.subr.bf16.mxu1 %v10092_v36  ;;  %v10123_v35 = vld [vmem:[%s15408_s1 + $0x10a8] ss:$16 sps:$4 sm:$0xff]   ;;  %v10124_v36 = vld [vmem:[%s15408_s1 + $0x10c4] ss:$16 sps:$4 sm:$0xff]  }
 0x47b   :  { %6198 = vmatpush1.bf16.msra.mxu0 %v10093_v37  ;;  %6284 = vmatpush1.bf16.msra.mxu1 %v10094_v39  ;;  %v10125_v37 = vld [vmem:[%s15408_s1 + $0x10cc] ss:$16 sps:$4 sm:$0xff]   ;;  %v10126_v39 = vld [vmem:[%s15408_s1 + $0x10c0] ss:$16 sps:$4 sm:$0xff]  }
 0x47c   :  { %6199 = vmatprep.subr.bf16.mxu0 %v10095_v40  ;;  %6285 = vmatprep.subr.bf16.mxu1 %v10096_v41  ;;  %v10127_v40 = vld [vmem:[%s15408_s1 + $0x10c8] ss:$16 sps:$4 sm:$0xff]   ;;  %v10128_v41 = vld [vmem:[%s15408_s1 + $0x10e4] ss:$16 sps:$4 sm:$0xff]  }
 0x47f   :  { %6200 = vmatpush1.bf16.msra.mxu0 %v10097_v43  ;;  %6286 = vmatpush1.bf16.msra.mxu1 %v10098_v52  ;;  %v10129_v43 = vld [vmem:[%s15408_s1 + $0x10ec] ss:$16 sps:$4 sm:$0xff]   ;;  %v10130_v52 = vld [vmem:[%s15408_s1 + $0x10e0] ss:$16 sps:$4 sm:$0xff]  }
 0x480   :  { %6306 = vmatprep.subr.bf16.mxu0 %v10099_v55  ;;  %6392 = vmatprep.subr.bf16.mxu1 %v10100_v4  ;;  %v10131_v55 = vld [vmem:[%s15408_s1 + $0x10e8] ss:$16 sps:$4 sm:$0xff]   ;;  %v10132_v4 = vld [vmem:[%s15408_s1 + $0x1104] ss:$16 sps:$4 sm:$0xff]  }
 0x482   :  { %6202 = vmatmul.mubr.bf16.vlgmr.msra.gmra.mrb[8].mxu0 %v14153_v42  ;;  %6288 = vmatmul.mubr.bf16.vlgmr.msra.gmra.mrb[8].mxu1 %v14153_v42 }
 0x483   :  { %6307 = vmatpush1.bf16.msra.mxu0 %v10101_v5  ;;  %6393 = vmatpush1.bf16.msra.mxu1 %v10102_v10  ;;  %v10133_v5 = vld [vmem:[%s15408_s1 + $0x110c] ss:$16 sps:$4 sm:$0xff]   ;;  %v10134_v10 = vld [vmem:[%s15408_s1 + $0x1100] ss:$16 sps:$4 sm:$0xff]  }
 0x484   :  { %6308 = vmatprep.subr.bf16.mxu0 %v10103_v12  ;;  %6394 = vmatprep.subr.bf16.mxu1 %v10104_v13  ;;  %v10135_v12 = vld [vmem:[%s15408_s1 + $0x1108] ss:$16 sps:$4 sm:$0xff]   ;;  %v10136_v13 = vld [vmem:[%s15408_s1 + $0x1124] ss:$16 sps:$4 sm:$0xff]  }
 0x485   :  { %6338 = vmatprep.mubr.bf16.mxu0 %v10105_v14  ;;  %6424 = vmatprep.mubr.bf16.mxu1 %v10105_v14  ;;  %v10137_v14 = vld [vmem:[%s15408_s1 + $0x112c] ss:$16 sps:$4 sm:$0xff]  }
 0x487   :  { %6309 = vmatpush1.bf16.msra.mxu0 %v10106_v16  ;;  %6395 = vmatpush1.bf16.msra.mxu1 %v10107_v17  ;;  %v10138_v16 = vld [vmem:[%s15408_s1 + $0x1120] ss:$16 sps:$4 sm:$0xff]   ;;  %v10139_v17 = vld [vmem:[%s15408_s1 + $0x1128] ss:$16 sps:$4 sm:$0xff]  }
 0x488   :  { %6310 = vmatprep.subr.bf16.mxu0 %v10108_v18  ;;  %6396 = vmatprep.subr.bf16.mxu1 %v10109_v19  ;;  %v10140_v18 = vld [vmem:[%s15408_s1 + $0x1144] ss:$16 sps:$4 sm:$0xff]   ;;  %v10141_v19 = vld [vmem:[%s15408_s1 + $0x114c] ss:$16 sps:$4 sm:$0xff]  }
 0x48b   :  { %6311 = vmatpush1.bf16.msra.mxu0 %v10110_v20  ;;  %6397 = vmatpush1.bf16.msra.mxu1 %v10111_v21  ;;  %v10142_v20 = vld [vmem:[%s15408_s1 + $0x1140] ss:$16 sps:$4 sm:$0xff]   ;;  %v10143_v21 = vld [vmem:[%s15408_s1 + $0x1148] ss:$16 sps:$4 sm:$0xff]  }
 0x48c   :  { %6312 = vmatprep.subr.bf16.mxu0 %v10112_v22  ;;  %6398 = vmatprep.subr.bf16.mxu1 %v10113_v23  ;;  %v10144_v22 = vld [vmem:[%s15408_s1 + $0x1164] ss:$16 sps:$4 sm:$0xff]   ;;  %v10145_v23 = vld [vmem:[%s15408_s1 + $0x116c] ss:$16 sps:$4 sm:$0xff]  }
 0x48f   :  { %6313 = vmatpush1.bf16.msra.mxu0 %v10114_v25  ;;  %6399 = vmatpush1.bf16.msra.mxu1 %v10115_v26  ;;  %v10146_v25 = vld [vmem:[%s15408_s1 + $0x1160] ss:$16 sps:$4 sm:$0xff]   ;;  %v10147_v26 = vld [vmem:[%s15408_s1 + $0x1168] ss:$16 sps:$4 sm:$0xff]  }
 0x490   :  { %6314 = vmatprep.subr.bf16.mxu0 %v10116_v27  ;;  %6400 = vmatprep.subr.bf16.mxu1 %v10117_v28  ;;  %v10148_v27 = vld [vmem:[%s15408_s1 + $0x1184] ss:$16 sps:$4 sm:$0xff]   ;;  %v10149_v28 = vld [vmem:[%s15408_s1 + $0x118c] ss:$16 sps:$4 sm:$0xff]  }
 0x493   :  { %6315 = vmatpush1.bf16.msra.mxu0 %v10118_v30  ;;  %6401 = vmatpush1.bf16.msra.mxu1 %v10119_v31  ;;  %v10150_v30 = vld [vmem:[%s15408_s1 + $0x1180] ss:$16 sps:$4 sm:$0xff]   ;;  %v10151_v31 = vld [vmem:[%s15408_s1 + $0x1188] ss:$16 sps:$4 sm:$0xff]  }
 0x494   :  { %6316 = vmatprep.subr.bf16.mxu0 %v10120_v32  ;;  %6402 = vmatprep.subr.bf16.mxu1 %v10121_v33  ;;  %v10152_v32 = vld [vmem:[%s15408_s1 + $0x11a4] ss:$16 sps:$4 sm:$0xff]   ;;  %v10153_v33 = vld [vmem:[%s15408_s1 + $0x11ac] ss:$16 sps:$4 sm:$0xff]  }
 0x497   :  { %6317 = vmatpush1.bf16.msra.mxu0 %v10122_v34  ;;  %6403 = vmatpush1.bf16.msra.mxu1 %v10123_v35  ;;  %v10154_v34 = vld [vmem:[%s15408_s1 + $0x11a0] ss:$16 sps:$4 sm:$0xff]   ;;  %v10155_v35 = vld [vmem:[%s15408_s1 + $0x11a8] ss:$16 sps:$4 sm:$0xff]  }
 0x498   :  { %6318 = vmatprep.subr.bf16.mxu0 %v10124_v36  ;;  %6404 = vmatprep.subr.bf16.mxu1 %v10125_v37  ;;  %v10156_v36 = vld [vmem:[%s15408_s1 + $0x11c4] ss:$16 sps:$4 sm:$0xff]   ;;  %v10157_v37 = vld [vmem:[%s15408_s1 + $0x11cc] ss:$16 sps:$4 sm:$0xff]  }
 0x49b   :  { %6319 = vmatpush1.bf16.msra.mxu0 %v10126_v39  ;;  %6405 = vmatpush1.bf16.msra.mxu1 %v10127_v40  ;;  %v10158_v39 = vld [vmem:[%s15408_s1 + $0x11c0] ss:$16 sps:$4 sm:$0xff]   ;;  %v10159_v40 = vld [vmem:[%s15408_s1 + $0x11c8] ss:$16 sps:$4 sm:$0xff]  }
 0x49c   :  { %6320 = vmatprep.subr.bf16.mxu0 %v10128_v41  ;;  %6406 = vmatprep.subr.bf16.mxu1 %v10129_v43  ;;  %v10160_v41 = vld [vmem:[%s15408_s1 + $0x11e4] ss:$16 sps:$4 sm:$0xff]   ;;  %v10161_v43 = vld [vmem:[%s15408_s1 + $0x11ec] ss:$16 sps:$4 sm:$0xff]  }
 0x49f   :  { %6321 = vmatpush1.bf16.msra.mxu0 %v10130_v52  ;;  %6407 = vmatpush1.bf16.msra.mxu1 %v10131_v55  ;;  %v10162_v52 = vld [vmem:[%s15408_s1 + $0x11e0] ss:$16 sps:$4 sm:$0xff]   ;;  %v10163_v55 = vld [vmem:[%s15408_s1 + $0x11e8] ss:$16 sps:$4 sm:$0xff]  }
 0x4a0   :  { %6322 = vmatprep.subr.bf16.mxu0 %v10132_v4  ;;  %6408 = vmatprep.subr.bf16.mxu1 %v10133_v5  ;;  %v10164_v4 = vld [vmem:[%s15408_s1 + $0x1204] ss:$16 sps:$4 sm:$0xff]   ;;  %v10165_v5 = vld [vmem:[%s15408_s1 + $0x120c] ss:$16 sps:$4 sm:$0xff]  }
 0x4a3   :  { %6323 = vmatpush1.bf16.msra.mxu0 %v10134_v10  ;;  %6409 = vmatpush1.bf16.msra.mxu1 %v10135_v12  ;;  %v10166_v10 = vld [vmem:[%s15409_s0 + $0x40] ss:$16 sps:$4 sm:$0xff]  }
 0x4a4   :  { %6324 = vmatprep.subr.bf16.mxu0 %v10136_v13  ;;  %6410 = vmatprep.subr.bf16.mxu1 %v10137_v14  ;;  %v10167_v12 = vld [vmem:[%s15408_s1 + $0x1200] ss:$16 sps:$4 sm:$0xff]   ;;  %v10168_v13 = vld [vmem:[%s15408_s1 + $0x1208] ss:$16 sps:$4 sm:$0xff]   ;;  %v10169_v14 = vld [vmem:[%s15408_s1 + $0x1224] ss:$16 sps:$4 sm:$0xff]  }
 0x4a7   :  { %6325 = vmatpush1.bf16.msra.mxu0 %v10138_v16  ;;  %6411 = vmatpush1.bf16.msra.mxu1 %v10139_v17  ;;  %v10170_v16 = vld [vmem:[%s15408_s1 + $0x122c] ss:$16 sps:$4 sm:$0xff]  }
 0x4a8   :  { %6326 = vmatprep.subr.bf16.mxu0 %v10140_v18  ;;  %6412 = vmatprep.subr.bf16.mxu1 %v10141_v19  ;;  %v10171_v17 = vld [vmem:[%s15409_s0 + $0x4c] ss:$16 sps:$4 sm:$0xff]   ;;  %v10172_v18 = vld [vmem:[%s15408_s1 + $0x1220] ss:$16 sps:$4 sm:$0xff]   ;;  %v10173_v19 = vld [vmem:[%s15408_s1 + $0x1228] ss:$16 sps:$4 sm:$0xff]  }
 0x4ab   :  { %6327 = vmatpush1.bf16.msra.mxu0 %v10142_v20  ;;  %6413 = vmatpush1.bf16.msra.mxu1 %v10143_v21  ;;  %v10174_v20 = vld [vmem:[%s15408_s1 + $0x1244] ss:$16 sps:$4 sm:$0xff]   ;;  %v10175_v21 = vld [vmem:[%s15408_s1 + $0x124c] ss:$16 sps:$4 sm:$0xff]  }
 0x4ac   :  { %6328 = vmatprep.subr.bf16.mxu0 %v10144_v22  ;;  %6414 = vmatprep.subr.bf16.mxu1 %v10145_v23  ;;  %v10176_v22 = vld [vmem:[%s15408_s1 + $0x1240] ss:$16 sps:$4 sm:$0xff]   ;;  %v10177_v23 = vld [vmem:[%s15408_s1 + $0x1248] ss:$16 sps:$4 sm:$0xff]  }
 0x4af   :  { %6329 = vmatpush1.bf16.msra.mxu0 %v10146_v25  ;;  %6415 = vmatpush1.bf16.msra.mxu1 %v10147_v26  ;;  %v10178_v25 = vld [vmem:[%s15408_s1 + $0x1264] ss:$16 sps:$4 sm:$0xff]   ;;  %v10179_v26 = vld [vmem:[%s15408_s1 + $0x126c] ss:$16 sps:$4 sm:$0xff]  }
 0x4b0   :  { %6330 = vmatprep.subr.bf16.mxu0 %v10148_v27  ;;  %6416 = vmatprep.subr.bf16.mxu1 %v10149_v28  ;;  %v10180_v27 = vld [vmem:[%s15408_s1 + $0x1260] ss:$16 sps:$4 sm:$0xff]   ;;  %v10181_v28 = vld [vmem:[%s15408_s1 + $0x1268] ss:$16 sps:$4 sm:$0xff]  }
 0x4b3   :  { %6331 = vmatpush1.bf16.msra.mxu0 %v10150_v30  ;;  %6417 = vmatpush1.bf16.msra.mxu1 %v10151_v31  ;;  %v10182_v30 = vld [vmem:[%s15408_s1 + $0x1284] ss:$16 sps:$4 sm:$0xff]   ;;  %v10183_v31 = vld [vmem:[%s15408_s1 + $0x128c] ss:$16 sps:$4 sm:$0xff]  }
 0x4b4   :  { %6332 = vmatprep.subr.bf16.mxu0 %v10152_v32  ;;  %6418 = vmatprep.subr.bf16.mxu1 %v10153_v33  ;;  %v10184_v32 = vld [vmem:[%s15408_s1 + $0x1280] ss:$16 sps:$4 sm:$0xff]   ;;  %v10185_v33 = vld [vmem:[%s15408_s1 + $0x1288] ss:$16 sps:$4 sm:$0xff]  }
 0x4b7   :  { %6333 = vmatpush1.bf16.msra.mxu0 %v10154_v34  ;;  %6419 = vmatpush1.bf16.msra.mxu1 %v10155_v35  ;;  %v10186_v34 = vld [vmem:[%s15408_s1 + $0x12a4] ss:$16 sps:$4 sm:$0xff]   ;;  %v10187_v35 = vld [vmem:[%s15408_s1 + $0x12ac] ss:$16 sps:$4 sm:$0xff]  }
 0x4b8   :  { %6334 = vmatprep.subr.bf16.mxu0 %v10156_v36  ;;  %6420 = vmatprep.subr.bf16.mxu1 %v10157_v37  ;;  %v10188_v36 = vld [vmem:[%s15408_s1 + $0x12a0] ss:$16 sps:$4 sm:$0xff]   ;;  %v10189_v37 = vld [vmem:[%s15408_s1 + $0x12a8] ss:$16 sps:$4 sm:$0xff]  }
 0x4bb   :  { %6335 = vmatpush1.bf16.msra.mxu0 %v10158_v39  ;;  %6421 = vmatpush1.bf16.msra.mxu1 %v10159_v40  ;;  %v10190_v39 = vld [vmem:[%s15408_s1 + $0x12c4] ss:$16 sps:$4 sm:$0xff]   ;;  %v10191_v40 = vld [vmem:[%s15408_s1 + $0x12cc] ss:$16 sps:$4 sm:$0xff]  }
 0x4bc   :  { %6336 = vmatprep.subr.bf16.mxu0 %v10160_v41  ;;  %6422 = vmatprep.subr.bf16.mxu1 %v10161_v43  ;;  %v10192_v41 = vld [vmem:[%s15408_s1 + $0x12c0] ss:$16 sps:$4 sm:$0xff]   ;;  %v10193_v43 = vld [vmem:[%s15408_s1 + $0x12c8] ss:$16 sps:$4 sm:$0xff]  }
 0x4bf   :  { %6337 = vmatpush1.bf16.msra.mxu0 %v10162_v52  ;;  %6423 = vmatpush1.bf16.msra.mxu1 %v10163_v55  ;;  %v10194_v52 = vld [vmem:[%s15408_s1 + $0x12e4] ss:$16 sps:$4 sm:$0xff]   ;;  %v10195_v55 = vld [vmem:[%s15408_s1 + $0x12ec] ss:$16 sps:$4 sm:$0xff]  }
 0x4c0   :  { %6349 = vmatprep.subr.bf16.mxu0 %v10164_v4  ;;  %6435 = vmatprep.subr.bf16.mxu1 %v10165_v5  ;;  %v10196_v4 = vld [vmem:[%s15408_s1 + $0x12e0] ss:$16 sps:$4 sm:$0xff]   ;;  %v10197_v5 = vld [vmem:[%s15408_s1 + $0x12e8] ss:$16 sps:$4 sm:$0xff]  }
 0x4c2   :  { %6339 = vmatmul.mubr.bf16.vlgmr.msra.gmra.mrb[12].mxu0 %v10166_v10  ;;  %6425 = vmatmul.mubr.bf16.vlgmr.msra.gmra.mrb[12].mxu1 %v10166_v10  ;;  %v10198_v10 = vld [vmem:[%s15408_s1 + $0x1304] ss:$16 sps:$4 sm:$0xff]  }
 0x4c3   :  { %6350 = vmatpush1.bf16.msra.mxu0 %v10167_v12  ;;  %6436 = vmatpush1.bf16.msra.mxu1 %v10168_v13  ;;  %v10199_v12 = vld [vmem:[%s15408_s1 + $0x130c] ss:$16 sps:$4 sm:$0xff]   ;;  %v10200_v13 = vld [vmem:[%s15408_s1 + $0x1300] ss:$16 sps:$4 sm:$0xff]  }
 0x4c4   :  { %6351 = vmatprep.subr.bf16.mxu0 %v10169_v14  ;;  %6437 = vmatprep.subr.bf16.mxu1 %v10170_v16  ;;  %v10201_v14 = vld [vmem:[%s15408_s1 + $0x1308] ss:$16 sps:$4 sm:$0xff]   ;;  %v10202_v16 = vld [vmem:[%s15408_s1 + $0x1324] ss:$16 sps:$4 sm:$0xff]  }
 0x4c5   :  { %6381 = vmatprep.mubr.bf16.mxu0 %v10171_v17  ;;  %6467 = vmatprep.mubr.bf16.mxu1 %v10171_v17  ;;  %v10203_v17 = vld [vmem:[%s15408_s1 + $0x132c] ss:$16 sps:$4 sm:$0xff]  }
 0x4c7   :  { %6352 = vmatpush1.bf16.msra.mxu0 %v10172_v18  ;;  %6438 = vmatpush1.bf16.msra.mxu1 %v10173_v19  ;;  %v10204_v18 = vld [vmem:[%s15408_s1 + $0x1320] ss:$16 sps:$4 sm:$0xff]   ;;  %v10205_v19 = vld [vmem:[%s15408_s1 + $0x1328] ss:$16 sps:$4 sm:$0xff]  }
 0x4c8   :  { %6353 = vmatprep.subr.bf16.mxu0 %v10174_v20  ;;  %6439 = vmatprep.subr.bf16.mxu1 %v10175_v21  ;;  %v10206_v20 = vld [vmem:[%s15408_s1 + $0x1344] ss:$16 sps:$4 sm:$0xff]   ;;  %v10207_v21 = vld [vmem:[%s15408_s1 + $0x134c] ss:$16 sps:$4 sm:$0xff]  }
 0x4cb   :  { %6354 = vmatpush1.bf16.msra.mxu0 %v10176_v22  ;;  %6440 = vmatpush1.bf16.msra.mxu1 %v10177_v23  ;;  %v10208_v22 = vld [vmem:[%s15408_s1 + $0x1340] ss:$16 sps:$4 sm:$0xff]   ;;  %v10209_v23 = vld [vmem:[%s15408_s1 + $0x1348] ss:$16 sps:$4 sm:$0xff]  }
 0x4cc   :  { %6355 = vmatprep.subr.bf16.mxu0 %v10178_v25  ;;  %6441 = vmatprep.subr.bf16.mxu1 %v10179_v26  ;;  %v10210_v25 = vld [vmem:[%s15408_s1 + $0x1364] ss:$16 sps:$4 sm:$0xff]   ;;  %v10211_v26 = vld [vmem:[%s15408_s1 + $0x136c] ss:$16 sps:$4 sm:$0xff]  }
 0x4cf   :  { %6356 = vmatpush1.bf16.msra.mxu0 %v10180_v27  ;;  %6442 = vmatpush1.bf16.msra.mxu1 %v10181_v28  ;;  %v10212_v27 = vld [vmem:[%s15408_s1 + $0x1360] ss:$16 sps:$4 sm:$0xff]   ;;  %v10213_v28 = vld [vmem:[%s15408_s1 + $0x1368] ss:$16 sps:$4 sm:$0xff]  }
 0x4d0   :  { %6357 = vmatprep.subr.bf16.mxu0 %v10182_v30  ;;  %6443 = vmatprep.subr.bf16.mxu1 %v10183_v31  ;;  %v10214_v30 = vld [vmem:[%s15408_s1 + $0x1384] ss:$16 sps:$4 sm:$0xff]   ;;  %v10215_v31 = vld [vmem:[%s15408_s1 + $0x138c] ss:$16 sps:$4 sm:$0xff]  }
 0x4d3   :  { %6358 = vmatpush1.bf16.msra.mxu0 %v10184_v32  ;;  %6444 = vmatpush1.bf16.msra.mxu1 %v10185_v33  ;;  %v10216_v32 = vld [vmem:[%s15408_s1 + $0x1380] ss:$16 sps:$4 sm:$0xff]   ;;  %v10217_v33 = vld [vmem:[%s15408_s1 + $0x1388] ss:$16 sps:$4 sm:$0xff]  }
 0x4d4   :  { %6359 = vmatprep.subr.bf16.mxu0 %v10186_v34  ;;  %6445 = vmatprep.subr.bf16.mxu1 %v10187_v35  ;;  %v10218_v34 = vld [vmem:[%s15408_s1 + $0x13a4] ss:$16 sps:$4 sm:$0xff]   ;;  %v10219_v35 = vld [vmem:[%s15408_s1 + $0x13ac] ss:$16 sps:$4 sm:$0xff]  }
 0x4d7   :  { %6360 = vmatpush1.bf16.msra.mxu0 %v10188_v36  ;;  %6446 = vmatpush1.bf16.msra.mxu1 %v10189_v37  ;;  %v10220_v36 = vld [vmem:[%s15408_s1 + $0x13a0] ss:$16 sps:$4 sm:$0xff]   ;;  %v10221_v37 = vld [vmem:[%s15408_s1 + $0x13a8] ss:$16 sps:$4 sm:$0xff]  }
 0x4d8   :  { %6361 = vmatprep.subr.bf16.mxu0 %v10190_v39  ;;  %6447 = vmatprep.subr.bf16.mxu1 %v10191_v40  ;;  %v10222_v39 = vld [vmem:[%s15408_s1 + $0x13c4] ss:$16 sps:$4 sm:$0xff]   ;;  %v10223_v40 = vld [vmem:[%s15408_s1 + $0x13cc] ss:$16 sps:$4 sm:$0xff]  }
 0x4db   :  { %6362 = vmatpush1.bf16.msra.mxu0 %v10192_v41  ;;  %6448 = vmatpush1.bf16.msra.mxu1 %v10193_v43  ;;  %v10224_v41 = vld [vmem:[%s15408_s1 + $0x13c0] ss:$16 sps:$4 sm:$0xff]   ;;  %v10225_v43 = vld [vmem:[%s15408_s1 + $0x13c8] ss:$16 sps:$4 sm:$0xff]  }
 0x4dc   :  { %6363 = vmatprep.subr.bf16.mxu0 %v10194_v52  ;;  %6449 = vmatprep.subr.bf16.mxu1 %v10195_v55  ;;  %v10226_v52 = vld [vmem:[%s15408_s1 + $0x13e4] ss:$16 sps:$4 sm:$0xff]   ;;  %v10227_v55 = vld [vmem:[%s15408_s1 + $0x13ec] ss:$16 sps:$4 sm:$0xff]  }
 0x4df   :  { %6364 = vmatpush1.bf16.msra.mxu0 %v10196_v4  ;;  %6450 = vmatpush1.bf16.msra.mxu1 %v10197_v5  ;;  %v10228_v4 = vld [vmem:[%s15408_s1 + $0x13e0] ss:$16 sps:$4 sm:$0xff]   ;;  %v10229_v5 = vld [vmem:[%s15408_s1 + $0x13e8] ss:$16 sps:$4 sm:$0xff]  }
 0x4e0   :  { %6365 = vmatprep.subr.bf16.mxu0 %v10198_v10  ;;  %6451 = vmatprep.subr.bf16.mxu1 %v10199_v12  ;;  %v10230_v10 = vld [vmem:[%s15408_s1 + $0xc04] ss:$16 sps:$4 sm:$0xff]   ;;  %v10231_v12 = vld [vmem:[%s15408_s1 + $0xc0c] ss:$16 sps:$4 sm:$0xff]  }
 0x4e3   :  { %6366 = vmatpush1.bf16.msra.mxu0 %v10200_v13  ;;  %6452 = vmatpush1.bf16.msra.mxu1 %v10201_v14  ;;  %v10232_v13 = vld [vmem:[%s15409_s0 + $0x48] ss:$16 sps:$4 sm:$0xff]   ;;  %v10233_v14 = vld [vmem:[%s15408_s1 + $0xc00] ss:$16 sps:$4 sm:$0xff]  }
 0x4e4   :  { %6367 = vmatprep.subr.bf16.mxu0 %v10202_v16  ;;  %6453 = vmatprep.subr.bf16.mxu1 %v10203_v17  ;;  %v10234_v16 = vld [vmem:[%s15408_s1 + $0xc08] ss:$16 sps:$4 sm:$0xff]   ;;  %v10235_v17 = vld [vmem:[%s15408_s1 + $0xc24] ss:$16 sps:$4 sm:$0xff]  }
 0x4e7   :  { %6368 = vmatpush1.bf16.msra.mxu0 %v10204_v18  ;;  %6454 = vmatpush1.bf16.msra.mxu1 %v10205_v19  ;;  %v10236_v18 = vld [vmem:[%s15408_s1 + $0xc2c] ss:$16 sps:$4 sm:$0xff]   ;;  %v10237_v19 = vld [vmem:[%s15408_s1 + $0xc20] ss:$16 sps:$4 sm:$0xff]  }
 0x4e8   :  { %6369 = vmatprep.subr.bf16.mxu0 %v10206_v20  ;;  %6455 = vmatprep.subr.bf16.mxu1 %v10207_v21  ;;  %v10238_v20 = vld [vmem:[%s15408_s1 + $0xc28] ss:$16 sps:$4 sm:$0xff]   ;;  %v10239_v21 = vld [vmem:[%s15408_s1 + $0xc44] ss:$16 sps:$4 sm:$0xff]  }
 0x4eb   :  { %6370 = vmatpush1.bf16.msra.mxu0 %v10208_v22  ;;  %6456 = vmatpush1.bf16.msra.mxu1 %v10209_v23  ;;  %v10240_v22 = vld [vmem:[%s15408_s1 + $0xc4c] ss:$16 sps:$4 sm:$0xff]   ;;  %v10242_v23 = vld [vmem:[%s15408_s1 + $0xc48] ss:$16 sps:$4 sm:$0xff]  }
 0x4ec   :  { %6371 = vmatprep.subr.bf16.mxu0 %v10210_v25  ;;  %6457 = vmatprep.subr.bf16.mxu1 %v10211_v26  ;;  %v10243_v25 = vld [vmem:[%s15408_s1 + $0xc64] ss:$16 sps:$4 sm:$0xff]   ;;  %v10244_v26 = vld [vmem:[%s15408_s1 + $0xc6c] ss:$16 sps:$4 sm:$0xff]  }
 0x4ef   :  { %6372 = vmatpush1.bf16.msra.mxu0 %v10212_v27  ;;  %6458 = vmatpush1.bf16.msra.mxu1 %v10213_v28  ;;  %v10245_v27 = vld [vmem:[%s15408_s1 + $0xc60] ss:$16 sps:$4 sm:$0xff]   ;;  %v10246_v28 = vld [vmem:[%s15408_s1 + $0xc68] ss:$16 sps:$4 sm:$0xff]  }
 0x4f0   :  { %6373 = vmatprep.subr.bf16.mxu0 %v10214_v30  ;;  %6459 = vmatprep.subr.bf16.mxu1 %v10215_v31  ;;  %v10247_v30 = vld [vmem:[%s15408_s1 + $0xc84] ss:$16 sps:$4 sm:$0xff]   ;;  %v10248_v31 = vld [vmem:[%s15408_s1 + $0xc8c] ss:$16 sps:$4 sm:$0xff]  }
 0x4f3   :  { %6374 = vmatpush1.bf16.msra.mxu0 %v10216_v32  ;;  %6460 = vmatpush1.bf16.msra.mxu1 %v10217_v33  ;;  %v10249_v32 = vld [vmem:[%s15408_s1 + $0xc80] ss:$16 sps:$4 sm:$0xff]   ;;  %v10250_v33 = vld [vmem:[%s15408_s1 + $0xc88] ss:$16 sps:$4 sm:$0xff]  }
 0x4f4   :  { %6375 = vmatprep.subr.bf16.mxu0 %v10218_v34  ;;  %6461 = vmatprep.subr.bf16.mxu1 %v10219_v35  ;;  %v10251_v34 = vld [vmem:[%s15408_s1 + $0xca4] ss:$16 sps:$4 sm:$0xff]   ;;  %v10252_v35 = vld [vmem:[%s15408_s1 + $0xcac] ss:$16 sps:$4 sm:$0xff]  }
 0x4f7   :  { %6376 = vmatpush1.bf16.msra.mxu0 %v10220_v36  ;;  %6462 = vmatpush1.bf16.msra.mxu1 %v10221_v37  ;;  %v10253_v36 = vld [vmem:[%s15408_s1 + $0xca0] ss:$16 sps:$4 sm:$0xff]   ;;  %v10254_v37 = vld [vmem:[%s15408_s1 + $0xca8] ss:$16 sps:$4 sm:$0xff]  }
 0x4f8   :  { %6377 = vmatprep.subr.bf16.mxu0 %v10222_v39  ;;  %6463 = vmatprep.subr.bf16.mxu1 %v10223_v40  ;;  %v10255_v39 = vld [vmem:[%s15408_s1 + $0xcc4] ss:$16 sps:$4 sm:$0xff]   ;;  %v10256_v40 = vld [vmem:[%s15408_s1 + $0xccc] ss:$16 sps:$4 sm:$0xff]  }
 0x4fb   :  { %6378 = vmatpush1.bf16.msra.mxu0 %v10224_v41  ;;  %6464 = vmatpush1.bf16.msra.mxu1 %v10225_v43  ;;  %v10257_v41 = vld [vmem:[%s15408_s1 + $0xcc0] ss:$16 sps:$4 sm:$0xff]   ;;  %v10258_v43 = vld [vmem:[%s15408_s1 + $0xcc8] ss:$16 sps:$4 sm:$0xff]  }
 0x4fc   :  { %6379 = vmatprep.subr.bf16.mxu0 %v10226_v52  ;;  %6465 = vmatprep.subr.bf16.mxu1 %v10227_v55  ;;  %v10259_v52 = vld [vmem:[%s15408_s1 + $0xce4] ss:$16 sps:$4 sm:$0xff]   ;;  %v10260_v55 = vld [vmem:[%s15408_s1 + $0xcec] ss:$16 sps:$4 sm:$0xff]  }
 0x4ff   :  { %6380 = vmatpush1.bf16.msra.mxu0 %v10228_v4  ;;  %6466 = vmatpush1.bf16.msra.mxu1 %v10229_v5  ;;  %v10261_v4 = vld [vmem:[%s15408_s1 + $0xce0] ss:$16 sps:$4 sm:$0xff]   ;;  %v10262_v5 = vld [vmem:[%s15408_s1 + $0xce8] ss:$16 sps:$4 sm:$0xff]  }
 0x500   :  { %6478 = vmatprep.subr.bf16.mxu0 %v10230_v10  ;;  %6564 = vmatprep.subr.bf16.mxu1 %v10231_v12  ;;  %v10263_v10 = vld [vmem:[%s15408_s1 + $0xd04] ss:$16 sps:$4 sm:$0xff]   ;;  %v10264_v12 = vld [vmem:[%s15408_s1 + $0xd0c] ss:$16 sps:$4 sm:$0xff]  }
 0x502   :  { %6382 = vmatmul.mubr.bf16.vlgmr.msra.gmra.mrb[12].mxu0 %v10232_v13  ;;  %6468 = vmatmul.mubr.bf16.vlgmr.msra.gmra.mrb[12].mxu1 %v10232_v13  ;;  %v10265_v13 = vld [vmem:[%s15408_s1 + $0xd00] ss:$16 sps:$4 sm:$0xff]  }
 0x503   :  { %6479 = vmatpush1.bf16.msra.mxu0 %v10233_v14  ;;  %6565 = vmatpush1.bf16.msra.mxu1 %v10234_v16  ;;  %v10266_v14 = vld [vmem:[%s15408_s1 + $0xd08] ss:$16 sps:$4 sm:$0xff]   ;;  %v10267_v16 = vld [vmem:[%s15408_s1 + $0xd24] ss:$16 sps:$4 sm:$0xff]  }
 0x504   :  { %6480 = vmatprep.subr.bf16.mxu0 %v10235_v17  ;;  %6566 = vmatprep.subr.bf16.mxu1 %v10236_v18  ;;  %v10268_v17 = vld [vmem:[%s15408_s1 + $0xd2c] ss:$16 sps:$4 sm:$0xff]   ;;  %v10269_v18 = vld [vmem:[%s15408_s1 + $0xd20] ss:$16 sps:$4 sm:$0xff]  }
 0x505   :  { %6510 = vmatprep.mubr.bf16.mxu0 %v13328_v61  ;;  %6596 = vmatprep.mubr.bf16.mxu1 %v13328_v61  ;;  %v10241_v61 = vld [vmem:[%s15408_s1 + $0xc40] ss:$16 sps:$4 sm:$0xff]  }
 0x507   :  { %6481 = vmatpush1.bf16.msra.mxu0 %v10237_v19  ;;  %6567 = vmatpush1.bf16.msra.mxu1 %v10238_v20  ;;  %v10270_v19 = vld [vmem:[%s15408_s1 + $0xd28] ss:$16 sps:$4 sm:$0xff]   ;;  %v10271_v20 = vld [vmem:[%s15408_s1 + $0xd44] ss:$16 sps:$4 sm:$0xff]  }
 0x508   :  { %6482 = vmatprep.subr.bf16.mxu0 %v10239_v21  ;;  %6568 = vmatprep.subr.bf16.mxu1 %v10240_v22  ;;  %v10272_v21 = vld [vmem:[%s15408_s1 + $0xd4c] ss:$16 sps:$4 sm:$0xff]   ;;  %v10273_v22 = vld [vmem:[%s15408_s1 + $0xd40] ss:$16 sps:$4 sm:$0xff]  }
 0x50b   :  { %6483 = vmatpush1.bf16.msra.mxu0 %v10241_v61  ;;  %6569 = vmatpush1.bf16.msra.mxu1 %v10242_v23  ;;  %v10274_v61 = vld [vmem:[%s15408_s1 + $0xd48] ss:$16 sps:$4 sm:$0xff]   ;;  %v10275_v23 = vld [vmem:[%s15408_s1 + $0xd64] ss:$16 sps:$4 sm:$0xff]  }
 0x50c   :  { %6484 = vmatprep.subr.bf16.mxu0 %v10243_v25  ;;  %6570 = vmatprep.subr.bf16.mxu1 %v10244_v26  ;;  %v10276_v25 = vld [vmem:[%s15408_s1 + $0xd6c] ss:$16 sps:$4 sm:$0xff]   ;;  %v10277_v26 = vld [vmem:[%s15408_s1 + $0xd60] ss:$16 sps:$4 sm:$0xff]  }
 0x50f   :  { %6485 = vmatpush1.bf16.msra.mxu0 %v10245_v27  ;;  %6571 = vmatpush1.bf16.msra.mxu1 %v10246_v28  ;;  %v10278_v27 = vld [vmem:[%s15408_s1 + $0xd68] ss:$16 sps:$4 sm:$0xff]   ;;  %v10279_v28 = vld [vmem:[%s15408_s1 + $0xd84] ss:$16 sps:$4 sm:$0xff]  }
 0x510   :  { %6486 = vmatprep.subr.bf16.mxu0 %v10247_v30  ;;  %6572 = vmatprep.subr.bf16.mxu1 %v10248_v31  ;;  %v10280_v30 = vld [vmem:[%s15408_s1 + $0xd8c] ss:$16 sps:$4 sm:$0xff]   ;;  %v10281_v31 = vld [vmem:[%s15408_s1 + $0xd80] ss:$16 sps:$4 sm:$0xff]  }
 0x513   :  { %6487 = vmatpush1.bf16.msra.mxu0 %v10249_v32  ;;  %6573 = vmatpush1.bf16.msra.mxu1 %v10250_v33  ;;  %v10282_v32 = vld [vmem:[%s15408_s1 + $0xd88] ss:$16 sps:$4 sm:$0xff]   ;;  %v10283_v33 = vld [vmem:[%s15408_s1 + $0xda4] ss:$16 sps:$4 sm:$0xff]  }
 0x514   :  { %6488 = vmatprep.subr.bf16.mxu0 %v10251_v34  ;;  %6574 = vmatprep.subr.bf16.mxu1 %v10252_v35  ;;  %v10284_v34 = vld [vmem:[%s15408_s1 + $0xdac] ss:$16 sps:$4 sm:$0xff]   ;;  %v10285_v35 = vld [vmem:[%s15408_s1 + $0xda0] ss:$16 sps:$4 sm:$0xff]  }
 0x517   :  { %6489 = vmatpush1.bf16.msra.mxu0 %v10253_v36  ;;  %6575 = vmatpush1.bf16.msra.mxu1 %v10254_v37  ;;  %v10286_v36 = vld [vmem:[%s15408_s1 + $0xda8] ss:$16 sps:$4 sm:$0xff]   ;;  %v10287_v37 = vld [vmem:[%s15408_s1 + $0xdc4] ss:$16 sps:$4 sm:$0xff]  }
 0x518   :  { %6490 = vmatprep.subr.bf16.mxu0 %v10255_v39  ;;  %6576 = vmatprep.subr.bf16.mxu1 %v10256_v40  ;;  %v10288_v39 = vld [vmem:[%s15408_s1 + $0xdcc] ss:$16 sps:$4 sm:$0xff]   ;;  %v10289_v40 = vld [vmem:[%s15408_s1 + $0xdc0] ss:$16 sps:$4 sm:$0xff]  }
 0x51b   :  { %6491 = vmatpush1.bf16.msra.mxu0 %v10257_v41  ;;  %6577 = vmatpush1.bf16.msra.mxu1 %v10258_v43  ;;  %v10290_v41 = vld [vmem:[%s15408_s1 + $0xdc8] ss:$16 sps:$4 sm:$0xff]   ;;  %v10291_v43 = vld [vmem:[%s15408_s1 + $0xde4] ss:$16 sps:$4 sm:$0xff]  }
 0x51c   :  { %6492 = vmatprep.subr.bf16.mxu0 %v10259_v52  ;;  %6578 = vmatprep.subr.bf16.mxu1 %v10260_v55  ;;  %v10292_v52 = vld [vmem:[%s15408_s1 + $0xdec] ss:$16 sps:$4 sm:$0xff]   ;;  %v10293_v55 = vld [vmem:[%s15408_s1 + $0xde0] ss:$16 sps:$4 sm:$0xff]  }
 0x51f   :  { %6493 = vmatpush1.bf16.msra.mxu0 %v10261_v4  ;;  %6579 = vmatpush1.bf16.msra.mxu1 %v10262_v5  ;;  %v10294_v4 = vld [vmem:[%s15408_s1 + $0xde8] ss:$16 sps:$4 sm:$0xff]   ;;  %v10295_v5 = vld [vmem:[%s15408_s1 + $0xe04] ss:$16 sps:$4 sm:$0xff]  }
 0x520   :  { %6494 = vmatprep.subr.bf16.mxu0 %v10263_v10  ;;  %6580 = vmatprep.subr.bf16.mxu1 %v10264_v12  ;;  %v10296_v10 = vld [vmem:[%s15408_s1 + $0xe0c] ss:$16 sps:$4 sm:$0xff]   ;;  %v10297_v12 = vld [vmem:[%s15408_s1 + $0xe00] ss:$16 sps:$4 sm:$0xff]  }
 0x523   :  { %6495 = vmatpush1.bf16.msra.mxu0 %v10265_v13  ;;  %6581 = vmatpush1.bf16.msra.mxu1 %v10266_v14  ;;  %v10298_v13 = vld [vmem:[%s15408_s1 + $0xe08] ss:$16 sps:$4 sm:$0xff]   ;;  %v10299_v14 = vld [vmem:[%s15408_s1 + $0xe24] ss:$16 sps:$4 sm:$0xff]  }
 0x524   :  { %6496 = vmatprep.subr.bf16.mxu0 %v10267_v16  ;;  %6582 = vmatprep.subr.bf16.mxu1 %v10268_v17  ;;  %v10300_v16 = vld [vmem:[%s15408_s1 + $0xe2c] ss:$16 sps:$4 sm:$0xff]   ;;  %v10302_v17 = vld [vmem:[%s15408_s1 + $0xe28] ss:$16 sps:$4 sm:$0xff]  }
 0x527   :  { %6497 = vmatpush1.bf16.msra.mxu0 %v10269_v18  ;;  %6583 = vmatpush1.bf16.msra.mxu1 %v10270_v19  ;;  %v10303_v18 = vld [vmem:[%s15408_s1 + $0xe44] ss:$16 sps:$4 sm:$0xff]   ;;  %v10304_v19 = vld [vmem:[%s15408_s1 + $0xe4c] ss:$16 sps:$4 sm:$0xff]  }
 0x528   :  { %6498 = vmatprep.subr.bf16.mxu0 %v10271_v20  ;;  %6584 = vmatprep.subr.bf16.mxu1 %v10272_v21  ;;  %v10306_v20 = vld [vmem:[%s15408_s1 + $0xe48] ss:$16 sps:$4 sm:$0xff]   ;;  %v10307_v21 = vld [vmem:[%s15408_s1 + $0xe64] ss:$16 sps:$4 sm:$0xff]  }
 0x52b   :  { %6499 = vmatpush1.bf16.msra.mxu0 %v10273_v22  ;;  %6585 = vmatpush1.bf16.msra.mxu1 %v10274_v61  ;;  %v10308_v22 = vld [vmem:[%s15408_s1 + $0xe6c] ss:$16 sps:$4 sm:$0xff]   ;;  %v10309_v61 = vld [vmem:[%s15408_s1 + $0xe60] ss:$16 sps:$4 sm:$0xff]  }
 0x52c   :  { %6500 = vmatprep.subr.bf16.mxu0 %v10275_v23  ;;  %6586 = vmatprep.subr.bf16.mxu1 %v10276_v25  ;;  %v10310_v23 = vld [vmem:[%s15408_s1 + $0xe68] ss:$16 sps:$4 sm:$0xff]   ;;  %v10311_v25 = vld [vmem:[%s15408_s1 + $0xe84] ss:$16 sps:$4 sm:$0xff]  }
 0x52f   :  { %6501 = vmatpush1.bf16.msra.mxu0 %v10277_v26  ;;  %6587 = vmatpush1.bf16.msra.mxu1 %v10278_v27  ;;  %v10312_v26 = vld [vmem:[%s15408_s1 + $0xe8c] ss:$16 sps:$4 sm:$0xff]   ;;  %v10313_v27 = vld [vmem:[%s15408_s1 + $0xe80] ss:$16 sps:$4 sm:$0xff]  }
 0x530   :  { %6502 = vmatprep.subr.bf16.mxu0 %v10279_v28  ;;  %6588 = vmatprep.subr.bf16.mxu1 %v10280_v30  ;;  %v10314_v28 = vld [vmem:[%s15408_s1 + $0xe88] ss:$16 sps:$4 sm:$0xff]   ;;  %v10315_v30 = vld [vmem:[%s15408_s1 + $0xea4] ss:$16 sps:$4 sm:$0xff]  }
 0x533   :  { %6503 = vmatpush1.bf16.msra.mxu0 %v10281_v31  ;;  %6589 = vmatpush1.bf16.msra.mxu1 %v10282_v32  ;;  %v10316_v31 = vld [vmem:[%s15408_s1 + $0xeac] ss:$16 sps:$4 sm:$0xff]  }
 0x534   :  { %6504 = vmatprep.subr.bf16.mxu0 %v10283_v33  ;;  %6590 = vmatprep.subr.bf16.mxu1 %v10284_v34 }
 0x537   :  { %6505 = vmatpush1.bf16.msra.mxu0 %v10285_v35  ;;  %6591 = vmatpush1.bf16.msra.mxu1 %v10286_v36 }
 0x538   :  { %6506 = vmatprep.subr.bf16.mxu0 %v10287_v37  ;;  %6592 = vmatprep.subr.bf16.mxu1 %v10288_v39  ;;  %v10317_v39 = vld [vmem:[%s15408_s1 + $0xea0] ss:$16 sps:$4 sm:$0xff]  }
 0x53b   :  { %6507 = vmatpush1.bf16.msra.mxu0 %v10289_v40  ;;  %6593 = vmatpush1.bf16.msra.mxu1 %v10290_v41  ;;  %v10318_v40 = vld [vmem:[%s15408_s1 + $0xea8] ss:$16 sps:$4 sm:$0xff]  }
 0x53c   :  { %6508 = vmatprep.subr.bf16.mxu0 %v10291_v43  ;;  %6594 = vmatprep.subr.bf16.mxu1 %v10292_v52  ;;  %v10319_v52 = vld [vmem:[%s15408_s1 + $0xec4] ss:$16 sps:$4 sm:$0xff]  }
 0x53f   :  { %6509 = vmatpush1.bf16.msra.mxu0 %v10293_v55  ;;  %6595 = vmatpush1.bf16.msra.mxu1 %v10294_v4  ;;  %v10320_v55 = vld [vmem:[%s15408_s1 + $0xecc] ss:$16 sps:$4 sm:$0xff]   ;;  %v10321_v4 = vld [vmem:[%s15408_s1 + $0xec0] ss:$16 sps:$4 sm:$0xff]  }
 0x540   :  { %6521 = vmatprep.subr.bf16.mxu0 %v10295_v5  ;;  %6607 = vmatprep.subr.bf16.mxu1 %v10296_v10  ;;  %v10322_v5 = vld [vmem:[%s15408_s1 + $0xec8] ss:$16 sps:$4 sm:$0xff]   ;;  %v10323_v10 = vld [vmem:[%s15408_s1 + $0xee4] ss:$16 sps:$4 sm:$0xff]  }
 0x542   :  { %6511 = vmatmul.mubr.bf16.vlgmr.msra.gmra.mrb[12].mxu0 %v13515_v24  ;;  %6597 = vmatmul.mubr.bf16.vlgmr.msra.gmra.mrb[12].mxu1 %v13515_v24  ;;  %v10301_v24 = vld [vmem:[%s15408_s1 + $0xe20] ss:$16 sps:$4 sm:$0xff]  }
 0x543   :  { %6522 = vmatpush1.bf16.msra.mxu0 %v10297_v12  ;;  %6608 = vmatpush1.bf16.msra.mxu1 %v10298_v13  ;;  %v10324_v12 = vld [vmem:[%s15408_s1 + $0xeec] ss:$16 sps:$4 sm:$0xff]   ;;  %v10325_v13 = vld [vmem:[%s15408_s1 + $0xee0] ss:$16 sps:$4 sm:$0xff]  }
 0x544   :  { %6523 = vmatprep.subr.bf16.mxu0 %v10299_v14  ;;  %6609 = vmatprep.subr.bf16.mxu1 %v10300_v16  ;;  %v10326_v14 = vld [vmem:[%s15408_s1 + $0xee8] ss:$16 sps:$4 sm:$0xff]   ;;  %v10327_v16 = vld [vmem:[%s15408_s1 + $0xf04] ss:$16 sps:$4 sm:$0xff]  }
 0x545   :  { %6553 = vmatprep.mubr.bf16.mxu0 %v13534_v29  ;;  %6639 = vmatprep.mubr.bf16.mxu1 %v13534_v29  ;;  %v10305_v29 = vld [vmem:[%s15408_s1 + $0xe40] ss:$16 sps:$4 sm:$0xff]  }
 0x547   :  { %6524 = vmatpush1.bf16.msra.mxu0 %v10301_v24  ;;  %6610 = vmatpush1.bf16.msra.mxu1 %v10302_v17  ;;  %v10328_v24 = vld [vmem:[%s15408_s1 + $0xf0c] ss:$16 sps:$4 sm:$0xff]   ;;  %v10329_v17 = vld [vmem:[%s15408_s1 + $0xf00] ss:$16 sps:$4 sm:$0xff]  }
 0x548   :  { %6525 = vmatprep.subr.bf16.mxu0 %v10303_v18  ;;  %6611 = vmatprep.subr.bf16.mxu1 %v10304_v19  ;;  %v10330_v18 = vld [vmem:[%s15408_s1 + $0xf08] ss:$16 sps:$4 sm:$0xff]   ;;  %v10331_v19 = vld [vmem:[%s15408_s1 + $0xf24] ss:$16 sps:$4 sm:$0xff]  }
 0x54b   :  { %6526 = vmatpush1.bf16.msra.mxu0 %v10305_v29  ;;  %6612 = vmatpush1.bf16.msra.mxu1 %v10306_v20  ;;  %v10332_v29 = vld [vmem:[%s15408_s1 + $0xf2c] ss:$16 sps:$4 sm:$0xff]   ;;  %v10333_v20 = vld [vmem:[%s15408_s1 + $0xf20] ss:$16 sps:$4 sm:$0xff]  }
 0x54c   :  { %6527 = vmatprep.subr.bf16.mxu0 %v10307_v21  ;;  %6613 = vmatprep.subr.bf16.mxu1 %v10308_v22  ;;  %v10334_v21 = vld [vmem:[%s15408_s1 + $0xf28] ss:$16 sps:$4 sm:$0xff]   ;;  %v10335_v22 = vld [vmem:[%s15408_s1 + $0xf44] ss:$16 sps:$4 sm:$0xff]  }
 0x54f   :  { %6528 = vmatpush1.bf16.msra.mxu0 %v10309_v61  ;;  %6614 = vmatpush1.bf16.msra.mxu1 %v10310_v23  ;;  %v10336_v61 = vld [vmem:[%s15408_s1 + $0xf4c] ss:$16 sps:$4 sm:$0xff]   ;;  %v10337_v23 = vld [vmem:[%s15408_s1 + $0xf40] ss:$16 sps:$4 sm:$0xff]  }
 0x550   :  { %6529 = vmatprep.subr.bf16.mxu0 %v10311_v25  ;;  %6615 = vmatprep.subr.bf16.mxu1 %v10312_v26  ;;  %v10338_v25 = vld [vmem:[%s15408_s1 + $0xf48] ss:$16 sps:$4 sm:$0xff]   ;;  %v10339_v26 = vld [vmem:[%s15408_s1 + $0xf64] ss:$16 sps:$4 sm:$0xff]  }
 0x553   :  { %6530 = vmatpush1.bf16.msra.mxu0 %v10313_v27  ;;  %6616 = vmatpush1.bf16.msra.mxu1 %v10314_v28  ;;  %v10340_v27 = vld [vmem:[%s15408_s1 + $0xf6c] ss:$16 sps:$4 sm:$0xff]   ;;  %v10341_v28 = vld [vmem:[%s15408_s1 + $0xf60] ss:$16 sps:$4 sm:$0xff]  }
 0x554   :  { %6531 = vmatprep.subr.bf16.mxu0 %v10315_v30  ;;  %6617 = vmatprep.subr.bf16.mxu1 %v10316_v31  ;;  %v10342_v30 = vld [vmem:[%s15408_s1 + $0xf68] ss:$16 sps:$4 sm:$0xff]   ;;  %v10343_v31 = vld [vmem:[%s15408_s1 + $0xf84] ss:$16 sps:$4 sm:$0xff]  }
 0x555   :  { %v14823_v32 = vpop.f32.mrb[8].mxu0  ;;  %v14825_v33 = vpop.f32.mrb[8].mxu1 }
 0x556   :  { %v14827_v34 = vpop.f32.mrb[9].mxu0  ;;  %v14829_v35 = vpop.f32.mrb[9].mxu1 }
 0x557   :  { %v14831_v36 = vpop.f32.mrb[10].mxu0  ;;  %v14833_v37 = vpop.f32.mrb[10].mxu1  ;;  %6532 = vmatpush1.bf16.msra.mxu0 %v10317_v39  ;;  %6618 = vmatpush1.bf16.msra.mxu1 %v10318_v40  ;;  %v10344_v39 = vld [vmem:[%s15408_s1 + $0xf8c] ss:$16 sps:$4 sm:$0xff]   ;;  %v10345_v40 = vld [vmem:[%s15408_s1 + $0xf80] ss:$16 sps:$4 sm:$0xff]  }
 0x558   :  { %v14841_v41 = vpop.f32.mrb[11].mxu0  ;;  %v14843_v43 = vpop.f32.mrb[11].mxu1  ;;  %6533 = vmatprep.subr.bf16.mxu0 %v10319_v52  ;;  %6619 = vmatprep.subr.bf16.mxu1 %v10320_v55  ;;  %v10346_v52 = vld [vmem:[%s15408_s1 + $0xf88] ss:$16 sps:$4 sm:$0xff]   ;;  %v10347_v55 = vld [vmem:[%s15408_s1 + $0xfa4] ss:$16 sps:$4 sm:$0xff]  }
 0x55b   :  { %6534 = vmatpush1.bf16.msra.mxu0 %v10321_v4  ;;  %6620 = vmatpush1.bf16.msra.mxu1 %v10322_v5  ;;  %v10348_v4 = vld [vmem:[%s15408_s1 + $0xfac] ss:$16 sps:$4 sm:$0xff]   ;;  %v10349_v5 = vld [vmem:[%s15408_s1 + $0xfa0] ss:$16 sps:$4 sm:$0xff]  }
 0x55c   :  { %6535 = vmatprep.subr.bf16.mxu0 %v10323_v10  ;;  %6621 = vmatprep.subr.bf16.mxu1 %v10324_v12  ;;  %v10350_v10 = vld [vmem:[%s15408_s1 + $0xfa8] ss:$16 sps:$4 sm:$0xff]   ;;  %v10351_v12 = vld [vmem:[%s15408_s1 + $0xfc4] ss:$16 sps:$4 sm:$0xff]  }
 0x55f   :  { %6536 = vmatpush1.bf16.msra.mxu0 %v10325_v13  ;;  %6622 = vmatpush1.bf16.msra.mxu1 %v10326_v14  ;;  %v10352_v13 = vld [vmem:[%s15408_s1 + $0xfcc] ss:$16 sps:$4 sm:$0xff]   ;;  %v10353_v14 = vld [vmem:[%s15408_s1 + $0xfc0] ss:$16 sps:$4 sm:$0xff]  }
 0x560   :  { %6537 = vmatprep.subr.bf16.mxu0 %v10327_v16  ;;  %6623 = vmatprep.subr.bf16.mxu1 %v10328_v24  ;;  %v10354_v16 = vld [vmem:[%s15408_s1 + $0xfc8] ss:$16 sps:$4 sm:$0xff]   ;;  %v10355_v24 = vld [vmem:[%s15408_s1 + $0xfe4] ss:$16 sps:$4 sm:$0xff]  }
 0x563   :  { %6538 = vmatpush1.bf16.msra.mxu0 %v10329_v17  ;;  %6624 = vmatpush1.bf16.msra.mxu1 %v10330_v18  ;;  %v10356_v17 = vld [vmem:[%s15408_s1 + $0xfec] ss:$16 sps:$4 sm:$0xff]   ;;  %v10357_v18 = vld [vmem:[%s15408_s1 + $0xfe0] ss:$16 sps:$4 sm:$0xff]  }
 0x564   :  { %6539 = vmatprep.subr.bf16.mxu0 %v10331_v19  ;;  %6625 = vmatprep.subr.bf16.mxu1 %v10332_v29  ;;  %v10358_v19 = vld [vmem:[%s15408_s1 + $0xfe8] ss:$16 sps:$4 sm:$0xff]   ;;  %v10359_v29 = vld [vmem:[%s15408_s1 + $0x1404] ss:$16 sps:$4 sm:$0xff]  }
 0x567   :  { %6540 = vmatpush1.bf16.msra.mxu0 %v10333_v20  ;;  %6626 = vmatpush1.bf16.msra.mxu1 %v10334_v21  ;;  %v10360_v20 = vld [vmem:[%s15408_s1 + $0x140c] ss:$16 sps:$4 sm:$0xff]   ;;  %v10361_v21 = vld [vmem:[%s15408_s1 + $0x1400] ss:$16 sps:$4 sm:$0xff]  }
 0x568   :  { %6541 = vmatprep.subr.bf16.mxu0 %v10335_v22  ;;  %6627 = vmatprep.subr.bf16.mxu1 %v10336_v61  ;;  %v10362_v22 = vld [vmem:[%s15408_s1 + $0x1408] ss:$16 sps:$4 sm:$0xff]   ;;  %v10363_v61 = vld [vmem:[%s15408_s1 + $0x1424] ss:$16 sps:$4 sm:$0xff]  }
 0x56b   :  { %6542 = vmatpush1.bf16.msra.mxu0 %v10337_v23  ;;  %6628 = vmatpush1.bf16.msra.mxu1 %v10338_v25  ;;  %v10364_v23 = vld [vmem:[%s15408_s1 + $0x142c] ss:$16 sps:$4 sm:$0xff]   ;;  %v10366_v25 = vld [vmem:[%s15408_s1 + $0x1428] ss:$16 sps:$4 sm:$0xff]  }
 0x56c   :  { %6543 = vmatprep.subr.bf16.mxu0 %v10339_v26  ;;  %6629 = vmatprep.subr.bf16.mxu1 %v10340_v27  ;;  %v10367_v26 = vld [vmem:[%s15408_s1 + $0x1444] ss:$16 sps:$4 sm:$0xff]   ;;  %v10368_v27 = vld [vmem:[%s15408_s1 + $0x144c] ss:$16 sps:$4 sm:$0xff]  }
 0x56f   :  { %6544 = vmatpush1.bf16.msra.mxu0 %v10341_v28  ;;  %6630 = vmatpush1.bf16.msra.mxu1 %v10342_v30  ;;  %v10370_v28 = vld [vmem:[%s15408_s1 + $0x1448] ss:$16 sps:$4 sm:$0xff]   ;;  %v10371_v30 = vld [vmem:[%s15408_s1 + $0x1464] ss:$16 sps:$4 sm:$0xff]  }
 0x570   :  { %6545 = vmatprep.subr.bf16.mxu0 %v10343_v31  ;;  %6631 = vmatprep.subr.bf16.mxu1 %v10344_v39  ;;  %v10372_v31 = vld [vmem:[%s15408_s1 + $0x146c] ss:$16 sps:$4 sm:$0xff]   ;;  %v10373_v39 = vld [vmem:[%s15408_s1 + $0x1460] ss:$16 sps:$4 sm:$0xff]  }
 0x573   :  { %6546 = vmatpush1.bf16.msra.mxu0 %v10345_v40  ;;  %6632 = vmatpush1.bf16.msra.mxu1 %v10346_v52  ;;  %v10374_v40 = vld [vmem:[%s15408_s1 + $0x1468] ss:$16 sps:$4 sm:$0xff]   ;;  %v10375_v52 = vld [vmem:[%s15408_s1 + $0x1484] ss:$16 sps:$4 sm:$0xff]  }
 0x574   :  { %6547 = vmatprep.subr.bf16.mxu0 %v10347_v55  ;;  %6633 = vmatprep.subr.bf16.mxu1 %v10348_v4  ;;  %v10376_v55 = vld [vmem:[%s15408_s1 + $0x148c] ss:$16 sps:$4 sm:$0xff]   ;;  %v10377_v4 = vld [vmem:[%s15408_s1 + $0x1480] ss:$16 sps:$4 sm:$0xff]  }
 0x577   :  { %6548 = vmatpush1.bf16.msra.mxu0 %v10349_v5  ;;  %6634 = vmatpush1.bf16.msra.mxu1 %v10350_v10  ;;  %v10378_v5 = vld [vmem:[%s15408_s1 + $0x1488] ss:$16 sps:$4 sm:$0xff]   ;;  %v10379_v10 = vld [vmem:[%s15408_s1 + $0x14a4] ss:$16 sps:$4 sm:$0xff]  }
 0x578   :  { %6549 = vmatprep.subr.bf16.mxu0 %v10351_v12  ;;  %6635 = vmatprep.subr.bf16.mxu1 %v10352_v13  ;;  %v10380_v12 = vld [vmem:[%s15408_s1 + $0x14ac] ss:$16 sps:$4 sm:$0xff]   ;;  %v10381_v13 = vld [vmem:[%s15408_s1 + $0x14a0] ss:$16 sps:$4 sm:$0xff]  }
 0x57b   :  { %6550 = vmatpush1.bf16.msra.mxu0 %v10353_v14  ;;  %6636 = vmatpush1.bf16.msra.mxu1 %v10354_v16  ;;  %v10382_v14 = vld [vmem:[%s15408_s1 + $0x14a8] ss:$16 sps:$4 sm:$0xff]   ;;  %v10383_v16 = vld [vmem:[%s15408_s1 + $0x14c4] ss:$16 sps:$4 sm:$0xff]  }
 0x57c   :  { %6551 = vmatprep.subr.bf16.mxu0 %v10355_v24  ;;  %6637 = vmatprep.subr.bf16.mxu1 %v10356_v17  ;;  %v10384_v24 = vld [vmem:[%s15408_s1 + $0x14cc] ss:$16 sps:$4 sm:$0xff]   ;;  %v10385_v17 = vld [vmem:[%s15408_s1 + $0x14c0] ss:$16 sps:$4 sm:$0xff]  }
 0x57f   :  { %6552 = vmatpush1.bf16.msra.mxu0 %v10357_v18  ;;  %6638 = vmatpush1.bf16.msra.mxu1 %v10358_v19  ;;  %v10386_v18 = vld [vmem:[%s15408_s1 + $0x14c8] ss:$16 sps:$4 sm:$0xff]   ;;  %v10387_v19 = vld [vmem:[%s15408_s1 + $0x14e4] ss:$16 sps:$4 sm:$0xff]  }
 0x580   :  { %6650 = vmatprep.subr.bf16.mxu0 %v10359_v29  ;;  %6736 = vmatprep.subr.bf16.mxu1 %v10360_v20  ;;  %v10388_v29 = vld [vmem:[%s15408_s1 + $0x14ec] ss:$16 sps:$4 sm:$0xff]   ;;  %v10389_v20 = vld [vmem:[%s15408_s1 + $0x14e0] ss:$16 sps:$4 sm:$0xff]  }
 0x582   :  { %6554 = vmatmul.mubr.bf16.vlgmr.msra.gmra.mrb[12].mxu0 %v13758_v15  ;;  %6640 = vmatmul.mubr.bf16.vlgmr.msra.gmra.mrb[12].mxu1 %v13758_v15  ;;  %v10365_v15 = vld [vmem:[%s15408_s1 + $0x1420] ss:$16 sps:$4 sm:$0xff]  }
 0x583   :  { %6651 = vmatpush1.bf16.msra.mxu0 %v10361_v21  ;;  %6737 = vmatpush1.bf16.msra.mxu1 %v10362_v22  ;;  %v10390_v21 = vld [vmem:[%s15408_s1 + $0x14e8] ss:$16 sps:$4 sm:$0xff]   ;;  %v10391_v22 = vld [vmem:[%s15408_s1 + $0x1504] ss:$16 sps:$4 sm:$0xff]  }
 0x584   :  { %6652 = vmatprep.subr.bf16.mxu0 %v10363_v61  ;;  %6738 = vmatprep.subr.bf16.mxu1 %v10364_v23  ;;  %v10392_v61 = vld [vmem:[%s15408_s1 + $0x150c] ss:$16 sps:$4 sm:$0xff]   ;;  %v10393_v23 = vld [vmem:[%s15408_s1 + $0x1500] ss:$16 sps:$4 sm:$0xff]  }
 0x585   :  { %6682 = vmatprep.mubr.bf16.mxu0 %v13753_v57  ;;  %6768 = vmatprep.mubr.bf16.mxu1 %v13753_v57  ;;  %v10369_v57 = vld [vmem:[%s15408_s1 + $0x1440] ss:$16 sps:$4 sm:$0xff]  }
 0x587   :  { %6653 = vmatpush1.bf16.msra.mxu0 %v10365_v15  ;;  %6739 = vmatpush1.bf16.msra.mxu1 %v10366_v25  ;;  %v10394_v15 = vld [vmem:[%s15408_s1 + $0x1508] ss:$16 sps:$4 sm:$0xff]   ;;  %v10395_v25 = vld [vmem:[%s15408_s1 + $0x1524] ss:$16 sps:$4 sm:$0xff]  }
 0x588   :  { %6654 = vmatprep.subr.bf16.mxu0 %v10367_v26  ;;  %6740 = vmatprep.subr.bf16.mxu1 %v10368_v27  ;;  %v10396_v26 = vld [vmem:[%s15408_s1 + $0x152c] ss:$16 sps:$4 sm:$0xff]   ;;  %v10397_v27 = vld [vmem:[%s15408_s1 + $0x1520] ss:$16 sps:$4 sm:$0xff]  }
 0x58b   :  { %6655 = vmatpush1.bf16.msra.mxu0 %v10369_v57  ;;  %6741 = vmatpush1.bf16.msra.mxu1 %v10370_v28  ;;  %v10398_v57 = vld [vmem:[%s15408_s1 + $0x1528] ss:$16 sps:$4 sm:$0xff]   ;;  %v10399_v28 = vld [vmem:[%s15408_s1 + $0x1544] ss:$16 sps:$4 sm:$0xff]  }
 0x58c   :  { %6656 = vmatprep.subr.bf16.mxu0 %v10371_v30  ;;  %6742 = vmatprep.subr.bf16.mxu1 %v10372_v31  ;;  %v10400_v30 = vld [vmem:[%s15408_s1 + $0x154c] ss:$16 sps:$4 sm:$0xff]   ;;  %v10401_v31 = vld [vmem:[%s15408_s1 + $0x1540] ss:$16 sps:$4 sm:$0xff]  }
 0x58f   :  { %6657 = vmatpush1.bf16.msra.mxu0 %v10373_v39  ;;  %6743 = vmatpush1.bf16.msra.mxu1 %v10374_v40  ;;  %v10402_v39 = vld [vmem:[%s15408_s1 + $0x1548] ss:$16 sps:$4 sm:$0xff]   ;;  %v10403_v40 = vld [vmem:[%s15408_s1 + $0x1564] ss:$16 sps:$4 sm:$0xff]  }
 0x590   :  { %6658 = vmatprep.subr.bf16.mxu0 %v10375_v52  ;;  %6744 = vmatprep.subr.bf16.mxu1 %v10376_v55  ;;  %v10404_v52 = vld [vmem:[%s15408_s1 + $0x156c] ss:$16 sps:$4 sm:$0xff]   ;;  %v10405_v55 = vld [vmem:[%s15408_s1 + $0x1560] ss:$16 sps:$4 sm:$0xff]  }
 0x593   :  { %6659 = vmatpush1.bf16.msra.mxu0 %v10377_v4  ;;  %6745 = vmatpush1.bf16.msra.mxu1 %v10378_v5  ;;  %v10406_v4 = vld [vmem:[%s15408_s1 + $0x1568] ss:$16 sps:$4 sm:$0xff]   ;;  %v10407_v5 = vld [vmem:[%s15408_s1 + $0x1584] ss:$16 sps:$4 sm:$0xff]  }
 0x594   :  { %6660 = vmatprep.subr.bf16.mxu0 %v10379_v10  ;;  %6746 = vmatprep.subr.bf16.mxu1 %v10380_v12  ;;  %v10408_v10 = vld [vmem:[%s15408_s1 + $0x158c] ss:$16 sps:$4 sm:$0xff]   ;;  %v10409_v12 = vld [vmem:[%s15408_s1 + $0x1580] ss:$16 sps:$4 sm:$0xff]  }
 0x597   :  { %6661 = vmatpush1.bf16.msra.mxu0 %v10381_v13  ;;  %6747 = vmatpush1.bf16.msra.mxu1 %v10382_v14  ;;  %v10410_v13 = vld [vmem:[%s15408_s1 + $0x1588] ss:$16 sps:$4 sm:$0xff]   ;;  %v10411_v14 = vld [vmem:[%s15408_s1 + $0x15a4] ss:$16 sps:$4 sm:$0xff]  }
 0x598   :  { %6662 = vmatprep.subr.bf16.mxu0 %v10383_v16  ;;  %6748 = vmatprep.subr.bf16.mxu1 %v10384_v24  ;;  %v10412_v16 = vld [vmem:[%s15408_s1 + $0x15ac] ss:$16 sps:$4 sm:$0xff]   ;;  %v10413_v24 = vld [vmem:[%s15408_s1 + $0x15a0] ss:$16 sps:$4 sm:$0xff]  }
 0x59b   :  { %6663 = vmatpush1.bf16.msra.mxu0 %v10385_v17  ;;  %6749 = vmatpush1.bf16.msra.mxu1 %v10386_v18  ;;  %v10414_v17 = vld [vmem:[%s15408_s1 + $0x15a8] ss:$16 sps:$4 sm:$0xff]   ;;  %v10415_v18 = vld [vmem:[%s15408_s1 + $0x15c4] ss:$16 sps:$4 sm:$0xff]  }
 0x59c   :  { %6664 = vmatprep.subr.bf16.mxu0 %v10387_v19  ;;  %6750 = vmatprep.subr.bf16.mxu1 %v10388_v29  ;;  %v10416_v19 = vld [vmem:[%s15408_s1 + $0x15cc] ss:$16 sps:$4 sm:$0xff]   ;;  %v10417_v29 = vld [vmem:[%s15408_s1 + $0x15c0] ss:$16 sps:$4 sm:$0xff]  }
 0x59f   :  { %6665 = vmatpush1.bf16.msra.mxu0 %v10389_v20  ;;  %6751 = vmatpush1.bf16.msra.mxu1 %v10390_v21  ;;  %v10418_v20 = vld [vmem:[%s15408_s1 + $0x15c8] ss:$16 sps:$4 sm:$0xff]   ;;  %v10419_v21 = vld [vmem:[%s15408_s1 + $0x15e4] ss:$16 sps:$4 sm:$0xff]  }
 0x5a0   :  { %6666 = vmatprep.subr.bf16.mxu0 %v10391_v22  ;;  %6752 = vmatprep.subr.bf16.mxu1 %v10392_v61  ;;  %v10420_v22 = vld [vmem:[%s15408_s1 + $0x15ec] ss:$16 sps:$4 sm:$0xff]   ;;  %v10421_v61 = vld [vmem:[%s15408_s1 + $0x15e0] ss:$16 sps:$4 sm:$0xff]  }
 0x5a3   :  { %6667 = vmatpush1.bf16.msra.mxu0 %v10393_v23  ;;  %6753 = vmatpush1.bf16.msra.mxu1 %v10394_v15  ;;  %v10422_v23 = vld [vmem:[%s15408_s1 + $0x15e8] ss:$16 sps:$4 sm:$0xff]   ;;  %v10423_v15 = vld [vmem:[%s15408_s1 + $0x1604] ss:$16 sps:$4 sm:$0xff]  }
 0x5a4   :  { %6668 = vmatprep.subr.bf16.mxu0 %v10395_v25  ;;  %6754 = vmatprep.subr.bf16.mxu1 %v10396_v26  ;;  %v10424_v25 = vld [vmem:[%s15408_s1 + $0x160c] ss:$16 sps:$4 sm:$0xff]   ;;  %v10425_v26 = vld [vmem:[%s15408_s1 + $0x1600] ss:$16 sps:$4 sm:$0xff]  }
 0x5a7   :  { %6669 = vmatpush1.bf16.msra.mxu0 %v10397_v27  ;;  %6755 = vmatpush1.bf16.msra.mxu1 %v10398_v57  ;;  %v10426_v27 = vld [vmem:[%s15408_s1 + $0x1608] ss:$16 sps:$4 sm:$0xff]   ;;  %v10427_v57 = vld [vmem:[%s15408_s1 + $0x1624] ss:$16 sps:$4 sm:$0xff]  }
 0x5a8   :  { %6670 = vmatprep.subr.bf16.mxu0 %v10399_v28  ;;  %6756 = vmatprep.subr.bf16.mxu1 %v10400_v30  ;;  %v10428_v28 = vld [vmem:[%s15408_s1 + $0x162c] ss:$16 sps:$4 sm:$0xff]   ;;  %v10430_v30 = vld [vmem:[%s15408_s1 + $0x1628] ss:$16 sps:$4 sm:$0xff]  }
 0x5ab   :  { %6671 = vmatpush1.bf16.msra.mxu0 %v10401_v31  ;;  %6757 = vmatpush1.bf16.msra.mxu1 %v10402_v39  ;;  %v10431_v31 = vld [vmem:[%s15408_s1 + $0x1644] ss:$16 sps:$4 sm:$0xff]   ;;  %v10432_v39 = vld [vmem:[%s15408_s1 + $0x164c] ss:$16 sps:$4 sm:$0xff]  }
 0x5ac   :  { %6672 = vmatprep.subr.bf16.mxu0 %v10403_v40  ;;  %6758 = vmatprep.subr.bf16.mxu1 %v10404_v52  ;;  %v10434_v40 = vld [vmem:[%s15408_s1 + $0x1648] ss:$16 sps:$4 sm:$0xff]   ;;  %v10435_v52 = vld [vmem:[%s15408_s1 + $0x1664] ss:$16 sps:$4 sm:$0xff]  }
 0x5af   :  { %6673 = vmatpush1.bf16.msra.mxu0 %v10405_v55  ;;  %6759 = vmatpush1.bf16.msra.mxu1 %v10406_v4  ;;  %v10436_v55 = vld [vmem:[%s15408_s1 + $0x166c] ss:$16 sps:$4 sm:$0xff]   ;;  %v10437_v4 = vld [vmem:[%s15408_s1 + $0x1660] ss:$16 sps:$4 sm:$0xff]  }
 0x5b0   :  { %6674 = vmatprep.subr.bf16.mxu0 %v10407_v5  ;;  %6760 = vmatprep.subr.bf16.mxu1 %v10408_v10  ;;  %v10438_v5 = vld [vmem:[%s15408_s1 + $0x1668] ss:$16 sps:$4 sm:$0xff]   ;;  %v10439_v10 = vld [vmem:[%s15408_s1 + $0x1684] ss:$16 sps:$4 sm:$0xff]  }
 0x5b3   :  { %6675 = vmatpush1.bf16.msra.mxu0 %v10409_v12  ;;  %6761 = vmatpush1.bf16.msra.mxu1 %v10410_v13  ;;  %v10440_v12 = vld [vmem:[%s15408_s1 + $0x168c] ss:$16 sps:$4 sm:$0xff]   ;;  %v10441_v13 = vld [vmem:[%s15408_s1 + $0x1680] ss:$16 sps:$4 sm:$0xff]  }
 0x5b4   :  { %6676 = vmatprep.subr.bf16.mxu0 %v10411_v14  ;;  %6762 = vmatprep.subr.bf16.mxu1 %v10412_v16  ;;  %v10442_v14 = vld [vmem:[%s15408_s1 + $0x1688] ss:$16 sps:$4 sm:$0xff]   ;;  %v10443_v16 = vld [vmem:[%s15408_s1 + $0x16a4] ss:$16 sps:$4 sm:$0xff]  }
 0x5b7   :  { %6677 = vmatpush1.bf16.msra.mxu0 %v10413_v24  ;;  %6763 = vmatpush1.bf16.msra.mxu1 %v10414_v17  ;;  %v10444_v24 = vld [vmem:[%s15408_s1 + $0x16ac] ss:$16 sps:$4 sm:$0xff]   ;;  %v10445_v17 = vld [vmem:[%s15408_s1 + $0x16a0] ss:$16 sps:$4 sm:$0xff]  }
 0x5b8   :  { %6678 = vmatprep.subr.bf16.mxu0 %v10415_v18  ;;  %6764 = vmatprep.subr.bf16.mxu1 %v10416_v19  ;;  %v10446_v18 = vld [vmem:[%s15408_s1 + $0x16a8] ss:$16 sps:$4 sm:$0xff]   ;;  %v10447_v19 = vld [vmem:[%s15408_s1 + $0x16c4] ss:$16 sps:$4 sm:$0xff]  }
 0x5bb   :  { %6679 = vmatpush1.bf16.msra.mxu0 %v10417_v29  ;;  %6765 = vmatpush1.bf16.msra.mxu1 %v10418_v20  ;;  %v10448_v29 = vld [vmem:[%s15408_s1 + $0x16cc] ss:$16 sps:$4 sm:$0xff]   ;;  %v10449_v20 = vld [vmem:[%s15408_s1 + $0x16c0] ss:$16 sps:$4 sm:$0xff]  }
 0x5bc   :  { %6680 = vmatprep.subr.bf16.mxu0 %v10419_v21  ;;  %6766 = vmatprep.subr.bf16.mxu1 %v10420_v22  ;;  %v10450_v21 = vld [vmem:[%s15408_s1 + $0x16c8] ss:$16 sps:$4 sm:$0xff]   ;;  %v10451_v22 = vld [vmem:[%s15408_s1 + $0x16e4] ss:$16 sps:$4 sm:$0xff]  }
 0x5bf   :  { %6681 = vmatpush1.bf16.msra.mxu0 %v10421_v61  ;;  %6767 = vmatpush1.bf16.msra.mxu1 %v10422_v23  ;;  %v10452_v61 = vld [vmem:[%s15408_s1 + $0x16ec] ss:$16 sps:$4 sm:$0xff]   ;;  %v10453_v23 = vld [vmem:[%s15408_s1 + $0x16e0] ss:$16 sps:$4 sm:$0xff]  }
 0x5c0   :  { %6693 = vmatprep.subr.bf16.mxu0 %v10423_v15  ;;  %6779 = vmatprep.subr.bf16.mxu1 %v10424_v25  ;;  %v10454_v15 = vld [vmem:[%s15408_s1 + $0x16e8] ss:$16 sps:$4 sm:$0xff]   ;;  %v10455_v25 = vld [vmem:[%s15408_s1 + $0x1704] ss:$16 sps:$4 sm:$0xff]  }
 0x5c2   :  { %6683 = vmatmul.mubr.bf16.vlgmr.msra.gmra.mrb[12].mxu0 %v13947_v51  ;;  %6769 = vmatmul.mubr.bf16.vlgmr.msra.gmra.mrb[12].mxu1 %v13947_v51  ;;  %v10429_v51 = vld [vmem:[%s15408_s1 + $0x1620] ss:$16 sps:$4 sm:$0xff]  }
 0x5c3   :  { %6694 = vmatpush1.bf16.msra.mxu0 %v10425_v26  ;;  %6780 = vmatpush1.bf16.msra.mxu1 %v10426_v27  ;;  %v10456_v26 = vld [vmem:[%s15408_s1 + $0x170c] ss:$16 sps:$4 sm:$0xff]   ;;  %v10457_v27 = vld [vmem:[%s15408_s1 + $0x1700] ss:$16 sps:$4 sm:$0xff]  }
 0x5c4   :  { %6695 = vmatprep.subr.bf16.mxu0 %v10427_v57  ;;  %6781 = vmatprep.subr.bf16.mxu1 %v10428_v28  ;;  %v10458_v57 = vld [vmem:[%s15408_s1 + $0x1708] ss:$16 sps:$4 sm:$0xff]   ;;  %v10459_v28 = vld [vmem:[%s15408_s1 + $0x1724] ss:$16 sps:$4 sm:$0xff]  }
 0x5c5   :  { %6725 = vmatprep.mubr.bf16.mxu0 %v13964_v9  ;;  %6811 = vmatprep.mubr.bf16.mxu1 %v13964_v9  ;;  %v10433_v9 = vld [vmem:[%s15408_s1 + $0x1640] ss:$16 sps:$4 sm:$0xff]  }
 0x5c7   :  { %6696 = vmatpush1.bf16.msra.mxu0 %v10429_v51  ;;  %6782 = vmatpush1.bf16.msra.mxu1 %v10430_v30  ;;  %v10460_v51 = vld [vmem:[%s15408_s1 + $0x172c] ss:$16 sps:$4 sm:$0xff]   ;;  %v10461_v30 = vld [vmem:[%s15408_s1 + $0x1720] ss:$16 sps:$4 sm:$0xff]  }
 0x5c8   :  { %6697 = vmatprep.subr.bf16.mxu0 %v10431_v31  ;;  %6783 = vmatprep.subr.bf16.mxu1 %v10432_v39  ;;  %v10462_v31 = vld [vmem:[%s15408_s1 + $0x1728] ss:$16 sps:$4 sm:$0xff]   ;;  %v10463_v39 = vld [vmem:[%s15408_s1 + $0x1744] ss:$16 sps:$4 sm:$0xff]  }
 0x5cb   :  { %6698 = vmatpush1.bf16.msra.mxu0 %v10433_v9  ;;  %6784 = vmatpush1.bf16.msra.mxu1 %v10434_v40  ;;  %v10464_v9 = vld [vmem:[%s15408_s1 + $0x174c] ss:$16 sps:$4 sm:$0xff]   ;;  %v10465_v40 = vld [vmem:[%s15408_s1 + $0x1740] ss:$16 sps:$4 sm:$0xff]  }
 0x5cc   :  { %6699 = vmatprep.subr.bf16.mxu0 %v10435_v52  ;;  %6785 = vmatprep.subr.bf16.mxu1 %v10436_v55  ;;  %v10466_v52 = vld [vmem:[%s15408_s1 + $0x1748] ss:$16 sps:$4 sm:$0xff]   ;;  %v10467_v55 = vld [vmem:[%s15408_s1 + $0x1764] ss:$16 sps:$4 sm:$0xff]  }
 0x5cf   :  { %6700 = vmatpush1.bf16.msra.mxu0 %v10437_v4  ;;  %6786 = vmatpush1.bf16.msra.mxu1 %v10438_v5  ;;  %v10468_v4 = vld [vmem:[%s15408_s1 + $0x176c] ss:$16 sps:$4 sm:$0xff]   ;;  %v10469_v5 = vld [vmem:[%s15408_s1 + $0x1760] ss:$16 sps:$4 sm:$0xff]  }
 0x5d0   :  { %6701 = vmatprep.subr.bf16.mxu0 %v10439_v10  ;;  %6787 = vmatprep.subr.bf16.mxu1 %v10440_v12  ;;  %v10470_v10 = vld [vmem:[%s15408_s1 + $0x1768] ss:$16 sps:$4 sm:$0xff]   ;;  %v10471_v12 = vld [vmem:[%s15408_s1 + $0x1784] ss:$16 sps:$4 sm:$0xff]  }
 0x5d3   :  { %6702 = vmatpush1.bf16.msra.mxu0 %v10441_v13  ;;  %6788 = vmatpush1.bf16.msra.mxu1 %v10442_v14  ;;  %v10472_v13 = vld [vmem:[%s15408_s1 + $0x178c] ss:$16 sps:$4 sm:$0xff]   ;;  %v10473_v14 = vld [vmem:[%s15408_s1 + $0x1780] ss:$16 sps:$4 sm:$0xff]  }
 0x5d4   :  { %6703 = vmatprep.subr.bf16.mxu0 %v10443_v16  ;;  %6789 = vmatprep.subr.bf16.mxu1 %v10444_v24  ;;  %v10474_v16 = vld [vmem:[%s15408_s1 + $0x1788] ss:$16 sps:$4 sm:$0xff]   ;;  %v10475_v24 = vld [vmem:[%s15408_s1 + $0x17a4] ss:$16 sps:$4 sm:$0xff]  }
 0x5d7   :  { %6704 = vmatpush1.bf16.msra.mxu0 %v10445_v17  ;;  %6790 = vmatpush1.bf16.msra.mxu1 %v10446_v18  ;;  %v10476_v17 = vld [vmem:[%s15408_s1 + $0x17ac] ss:$16 sps:$4 sm:$0xff]   ;;  %v10477_v18 = vld [vmem:[%s15408_s1 + $0x17a0] ss:$16 sps:$4 sm:$0xff]  }
 0x5d8   :  { %6705 = vmatprep.subr.bf16.mxu0 %v10447_v19  ;;  %6791 = vmatprep.subr.bf16.mxu1 %v10448_v29  ;;  %v10478_v19 = vld [vmem:[%s15408_s1 + $0x17a8] ss:$16 sps:$4 sm:$0xff]   ;;  %v10479_v29 = vld [vmem:[%s15408_s1 + $0x17c4] ss:$16 sps:$4 sm:$0xff]  }
 0x5db   :  { %6706 = vmatpush1.bf16.msra.mxu0 %v10449_v20  ;;  %6792 = vmatpush1.bf16.msra.mxu1 %v10450_v21  ;;  %v10480_v20 = vld [vmem:[%s15408_s1 + $0x17cc] ss:$16 sps:$4 sm:$0xff]   ;;  %v10481_v21 = vld [vmem:[%s15408_s1 + $0x17c0] ss:$16 sps:$4 sm:$0xff]  }
 0x5dc   :  { %6707 = vmatprep.subr.bf16.mxu0 %v10451_v22  ;;  %6793 = vmatprep.subr.bf16.mxu1 %v10452_v61  ;;  %v10482_v22 = vld [vmem:[%s15408_s1 + $0x17c8] ss:$16 sps:$4 sm:$0xff]   ;;  %v10483_v61 = vld [vmem:[%s15408_s1 + $0x17e4] ss:$16 sps:$4 sm:$0xff]  }
 0x5df   :  { %6708 = vmatpush1.bf16.msra.mxu0 %v10453_v23  ;;  %6794 = vmatpush1.bf16.msra.mxu1 %v10454_v15  ;;  %v10484_v23 = vld [vmem:[%s15408_s1 + $0x17ec] ss:$16 sps:$4 sm:$0xff]   ;;  %v10485_v15 = vld [vmem:[%s15408_s1 + $0x17e0] ss:$16 sps:$4 sm:$0xff]  }
 0x5e0   :  { %6709 = vmatprep.subr.bf16.mxu0 %v10455_v25  ;;  %6795 = vmatprep.subr.bf16.mxu1 %v10456_v26  ;;  %v10486_v25 = vld [vmem:[%s15408_s1 + $0x17e8] ss:$16 sps:$4 sm:$0xff]   ;;  %v6848_v26 = vlaneseq }
 0x5e3   :  { %6710 = vmatpush1.bf16.msra.mxu0 %v10457_v27  ;;  %6796 = vmatpush1.bf16.msra.mxu1 %v10458_v57  ;;  %v6849_v27 = vshrl.u32 %v6848_v26, 7 }
 0x5e4   :  { %6711 = vmatprep.subr.bf16.mxu0 %v10459_v28  ;;  %6797 = vmatprep.subr.bf16.mxu1 %v10460_v51  ;;  %v6846_v51 = vld [vmem:[%s15410_s2] sm:$0xf] }
 0x5e5   :  { %v6850_v57 = vsub.s32 0, %v6849_v27  ;;  %v6858_v28 = vsub.s32 2, %v6849_v27 }
 0x5e7   :  { %6712 = vmatpush1.bf16.msra.mxu0 %v10461_v30  ;;  %6798 = vmatpush1.bf16.msra.mxu1 %v10462_v31  ;;  %v6854_v30 = vsub.s32 1, %v6849_v27  ;;  %v6862_v31 = vsub.s32 3, %v6849_v27 }
 0x5e8   :  { %6713 = vmatprep.subr.bf16.mxu0 %v10463_v39  ;;  %6799 = vmatprep.subr.bf16.mxu1 %v10464_v9  ;;  %v6851_v9 = vrot.slane %v6846_v51, %v6850_v57 }
 0x5eb   :  { %6714 = vmatpush1.bf16.msra.mxu0 %v10465_v40  ;;  %6800 = vmatpush1.bf16.msra.mxu1 %v10466_v52  ;;  %v6859_v52 = vrot.slane %v6846_v51, %v6858_v28 }
 0x5ec   :  { %6715 = vmatprep.subr.bf16.mxu0 %v10467_v55  ;;  %6801 = vmatprep.subr.bf16.mxu1 %v10468_v4 }
 0x5ef   :  { %6716 = vmatpush1.bf16.msra.mxu0 %v10469_v5  ;;  %6802 = vmatpush1.bf16.msra.mxu1 %v10470_v10 }
 0x5f0   :  { %6717 = vmatprep.subr.bf16.mxu0 %v10471_v12  ;;  %6803 = vmatprep.subr.bf16.mxu1 %v10472_v13  ;;  %v6863_v12 = vrot.slane %v6846_v51, %v6862_v31 }
 0x5f3   :  { %6718 = vmatpush1.bf16.msra.mxu0 %v10473_v14  ;;  %6804 = vmatpush1.bf16.msra.mxu1 %v10474_v16 }
 0x5f4   :  { %6719 = vmatprep.subr.bf16.mxu0 %v10475_v24  ;;  %6805 = vmatprep.subr.bf16.mxu1 %v10476_v17 }
 0x5f7   :  { %6720 = vmatpush1.bf16.msra.mxu0 %v10477_v18  ;;  %6806 = vmatpush1.bf16.msra.mxu1 %v10478_v19 }
 0x5f8   :  { %6721 = vmatprep.subr.bf16.mxu0 %v10479_v29  ;;  %6807 = vmatprep.subr.bf16.mxu1 %v10480_v20 }
 0x5fb   :  { %6722 = vmatpush1.bf16.msra.mxu0 %v10481_v21  ;;  %6808 = vmatpush1.bf16.msra.mxu1 %v10482_v22 }
 0x5fc   :  { %6723 = vmatprep.subr.bf16.mxu0 %v10483_v61  ;;  %6809 = vmatprep.subr.bf16.mxu1 %v10484_v23 }
 0x5ff   :  { %6724 = vmatpush1.bf16.msra.mxu0 %v10485_v15  ;;  %6810 = vmatpush1.bf16.msra.mxu1 %v10486_v25 }
 0x602   :  { %6726 = vmatmul.mubr.bf16.vlgmr.msra.gmra.mrb[12].mxu0 %v14153_v42  ;;  %6812 = vmatmul.mubr.bf16.vlgmr.msra.gmra.mrb[12].mxu1 %v14153_v42  ;;  %v6855_v42 = vrot.slane %v6846_v51, %v6854_v30 }
 0x6d5   :  { %v6727_v39 = vpop.f32.mrb[12].mxu0  ;;  %v6813_v40 = vpop.f32.mrb[12].mxu1 }
 0x6d6   :  { %v6830_v55 = vmax.f32 %v14823_v32, %v6727_v39  ;;  %v6832_v4 = vmax.f32 %v14825_v33, %v6813_v40  ;;  %v6729_v5 = vpop.f32.mrb[13].mxu0  ;;  %v6815_v10 = vpop.f32.mrb[13].mxu1 }
 0x6d7   :  { %v6831_v13 = vmax.f32 %v14827_v34, %v6729_v5  ;;  %v6833_v14 = vmax.f32 %v14829_v35, %v6815_v10  ;;  %v6731_v16 = vpop.f32.mrb[14].mxu0  ;;  %v6817_v24 = vpop.f32.mrb[14].mxu1 }
 0x6d8   :  { %v6838_v17 = vmax.f32 %v5754_v59, %v6830_v55  ;;  %v6840_v32 = vmax.f32 %v5756_v60, %v6832_v4  ;;  %v6834_v33 = vmax.f32 %v14831_v36, %v6731_v16  ;;  %v6836_v18 = vmax.f32 %v14833_v37, %v6817_v24  ;;  %v6733_v19 = vpop.f32.mrb[15].mxu0  ;;  %v6819_v34 = vpop.f32.mrb[15].mxu1 }
 0x6d9   :  { %v6839_v35 = vmax.f32 %v5755_v0, %v6831_v13  ;;  %v6841_v29 = vmax.f32 %v5757_v1, %v6833_v14  ;;  %v6835_v45 = vmax.f32 %v14841_v41, %v6733_v19  ;;  %v6837_v56 = vmax.f32 %v14843_v43, %v6819_v34 }
 0x6da   :  { %v6868_v46 = vadd.f32 %v6851_v9, %v6838_v17  ;;  %v6870_v58 = vadd.f32 %v6859_v52, %v6840_v32  ;;  %v6842_v59 = vmax.f32 %v5758_v38, %v6834_v33  ;;  %v6844_v60 = vmax.f32 %v5760_v6, %v6836_v18 }
 0x6db   :  { %v6869_v47 = vadd.f32 %v6855_v42, %v6839_v35  ;;  %v6871_v62 = vadd.f32 %v6863_v12, %v6841_v29  ;;  %v6843_v48 = vmax.f32 %v5759_v11, %v6835_v45  ;;  %v6845_v63 = vmax.f32 %v5761_v44, %v6837_v56 }
 0x6dc   :  { %v6876_v0 = vmax.f32 %v6868_v46, 0.0  ;;  %v6878_v1 = vmax.f32 %v6870_v58, 0.0  ;;  %v6872_v36 = vadd.f32 %v6851_v9, %v6842_v59  ;;  %v6874_v37 = vadd.f32 %v6859_v52, %v6844_v60 }
 0x6dd   :  { %v6877_v49 = vmax.f32 %v6869_v47, 0.0  ;;  %v6879_v2 = vmax.f32 %v6871_v62, 0.0  ;;  %v6873_v38 = vadd.f32 %v6855_v42, %v6843_v48  ;;  %v6875_v41 = vadd.f32 %v6863_v12, %v6845_v63 }
 0x6de   :  { %v6880_v50 = vmax.f32 %v6872_v36, 0.0  ;;  %v6882_v3 = vmax.f32 %v6874_v37, 0.0 }
 0x6df   :  { %v8359_v6 = vpack.c.bf16 %v6877_v49, %v6876_v0  ;;  %v8360_v53 = vpack.c.bf16 %v6879_v2, %v6878_v1  ;;  %v6881_v7 = vmax.f32 %v6873_v38, 0.0  ;;  %v6883_v11 = vmax.f32 %v6875_v41, 0.0 }
 0x6e1   :  { %6908 = vst [vmem:[%s15411_s3] sm:$0xff] %v8359_v6  ;;  %6912 = vst.msk [vmem:[%s15411_s3 + $0x8] sm:$0xff] %vm6911_vm2, %v8360_v53  ;;  %v8361_v54 = vpack.c.bf16 %v6881_v7, %v6880_v50  ;;  %v8362_v8 = vpack.c.bf16 %v6883_v11, %v6882_v3 }
 0x6e3   :  { %6913 = vst [vmem:[%s15411_s3 + $0x10] sm:$0xff] %v8361_v54  ;;  %6914 = vst.msk [vmem:[%s15411_s3 + $0x18] sm:$0xff] %vm6911_vm2, %v8362_v8 }

</bundles_post_ra>
